<compile_context>
chip_gen: v7x
topology: tpu7x:2x2x1
jax: 0.10.0
libtpu: 0.0.40
codegen_flags: <defaults>
</compile_context>

<pallas_src>
import jax
import jax.numpy as jnp
from jax import lax
from jax.experimental import pallas as pl
from jax.experimental.pallas import tpu as pltpu

_OFF = 8  # interior column offset inside the padded scratch (sublane-aligned)


# ----------------------------------------------------------------------------
# Kernel helpers
# ----------------------------------------------------------------------------
def _conv3x3_taps(pad_ref, w_ref, bias_row, H, W, C):
    """3x3 'SAME' conv of the padded bf16 image held in pad_ref.

    pad_ref : VMEM ref (H+2, W_PAD, C) bf16; interior at cols [_OFF, _OFF+W),
              halo (row 0, row H+1, col _OFF-1, col _OFF+W) already zeroed.
    w_ref   : (9, C, C) bf16 per-tap weights, tap index = kh*3 + kw (cin->cout).
    bias_row: (1, C) float32.
    Returns (H*W, C) float32.
    """
    acc = None
    for kh in range(3):
        for kw in range(3):
            tap = pad_ref[kh:kh + H, _OFF - 1 + kw:_OFF - 1 + kw + W, :]
            tap = tap.reshape(H * W, C)
            part = jnp.dot(tap, w_ref[kh * 3 + kw],
                           preferred_element_type=jnp.float32)
            acc = part if acc is None else acc + part
    return acc + bias_row


def residual_block_kernel(x_ref, w1_ref, b1_ref, w2_ref, b2_ref, o_ref,
                          pad_ref):
    # x_ref : (1, H, W, C) f32     input image (also the residual)
    # w1/w2 : (9, C, C)   bf16     per-tap conv weights
    # b1/b2 : (1, C)      f32      conv biases
    # o_ref : (1, H, W, C) f32     output
    # pad_ref: VMEM (H+2, W+2*_OFF, C) bf16, reused staging buffer for both convs
    H, W, C = x_ref.shape[1], x_ref.shape[2], x_ref.shape[3]
    W_PAD = pad_ref.shape[1]

    # Zero only the halo the taps actually read (interior is fully overwritten
    # below).  Re-done every step so correctness never depends on which core
    # ran step 0.
    zero_row = jnp.zeros((1, W_PAD, C), jnp.bfloat16)
    zero_col = jnp.zeros((H + 2, 1, C), jnp.bfloat16)
    pad_ref[0:1, :, :] = zero_row
    pad_ref[H + 1:H + 2, :, :] = zero_row
    pad_ref[:, _OFF - 1:_OFF, :] = zero_col
    pad_ref[:, _OFF + W:_OFF + W + 1, :] = zero_col

    x = x_ref[0]                                               # (H, W, C) f32

    # ---- conv1 + bias + ReLU -------------------------------------------------
    pad_ref[1:1 + H, _OFF:_OFF + W, :] = x.astype(jnp.bfloat16)
    out1 = jnp.maximum(
        _conv3x3_taps(pad_ref, w1_ref, b1_ref[...], H, W, C), 0.0)

    # ---- conv2 + bias (reuse scratch; halo is still zero) ---------------------
    pad_ref[1:1 + H, _OFF:_OFF + W, :] = out1.reshape(H, W, C).astype(
        jnp.bfloat16)
    out2 = _conv3x3_taps(pad_ref, w2_ref, b2_ref[...], H, W, C)

    # ---- residual add ---------------------------------------------------------
    o_ref[0] = out2.reshape(H, W, C) + x


# ----------------------------------------------------------------------------
# Wrapper
# ----------------------------------------------------------------------------
def residual_block_nobn(x_nhwc, w1_hwio, b1, w2_hwio, b2):
    """x_nhwc: (B, H, W, C) float32; convs are 3x3, stride 1, padding 1."""
    B, H, W, C = x_nhwc.shape
    assert w1_hwio.shape == (3, 3, C, C) and w2_hwio.shape == (3, 3, C, C)

    # HWIO (kh, kw, cin, cout) -> (9, cin, cout), bf16 for the MXU.
    w1_t = w1_hwio.reshape(9, C, C).astype(jnp.bfloat16)
    w2_t = w2_hwio.reshape(9, C, C).astype(jnp.bfloat16)

    W_PAD = W + 2 * _OFF

    # VMEM budget: double-buffered in/out image blocks + weights + pad scratch
    # + headroom for f32 accumulators / tap temporaries.
    fmap = H * W * C * 4
    est = (4 * fmap                               # in/out blocks (2x buffered)
           + 4 * (9 * C * C * 2 + C * 4)          # both weight sets, buffered
           + (H + 2) * W_PAD * C * 2              # bf16 pad scratch
           + 12 * fmap                            # accumulators / tap temps
           + (8 << 20))                           # headroom
    vmem_limit = int(max(32 << 20, min(est, 64 << 20)))
    # TODO(synk): for production feature maps (e.g. 128x128x64+) add an H
    # row-tile grid axis with a 1-row halo so the working set stays inside
    # v7x's 64 MiB VMEM and the pipeline has >B steps to hide DMAs.

    return pl.pallas_call(
        residual_block_kernel,
        out_shape=jax.ShapeDtypeStruct((B, H, W, C), jnp.float32),
        grid_spec=pltpu.PrefetchScalarGridSpec(
            num_scalar_prefetch=0,
            grid=(B,),
            in_specs=[
                pl.BlockSpec((1, H, W, C), lambda b: (b, 0, 0, 0)),   # x
                pl.BlockSpec((9, C, C), lambda b: (0, 0, 0)),         # w1 taps
                pl.BlockSpec((1, C), lambda b: (0, 0)),               # b1
                pl.BlockSpec((9, C, C), lambda b: (0, 0, 0)),         # w2 taps
                pl.BlockSpec((1, C), lambda b: (0, 0)),               # b2
            ],
            out_specs=pl.BlockSpec((1, H, W, C), lambda b: (b, 0, 0, 0)),
            scratch_shapes=[pltpu.VMEM((H + 2, W_PAD, C), jnp.bfloat16)],
        ),
        compiler_params=pltpu.CompilerParams(
            dimension_semantics=("parallel",),
            vmem_limit_bytes=vmem_limit,
        ),
    )(x_nhwc, w1_t, b1.reshape(1, C), w2_t, b2.reshape(1, C))


# ----------------------------------------------------------------------------
# Pure-JAX reference (for correctness check)
# ----------------------------------------------------------------------------
def residual_block_nobn_ref(x_nhwc, w1_hwio, b1, w2_hwio, b2):
    dn = ("NHWC", "HWIO", "NHWC")
    y = lax.conv_general_dilated(
        x_nhwc, w1_hwio, (1, 1), "SAME", dimension_numbers=dn,
        precision=lax.Precision.HIGHEST) + b1
    y = jnp.maximum(y, 0.0)
    y = lax.conv_general_dilated(
        y, w2_hwio, (1, 1), "SAME", dimension_numbers=dn,
        precision=lax.Precision.HIGHEST) + b2
    return x_nhwc + y


# ----------------------------------------------------------------------------
# Deterministic inputs + run
# ----------------------------------------------------------------------------
if __name__ == "__main__":
    # ResidualBlock_noBN(nf=64) — the module default — at a small 16x16 size.
    B, C, H, W = 2, 64, 16, 16

    key = jax.random.PRNGKey(0)
    kx, kw1, kw2, kb1, kb2 = jax.random.split(key, 5)

    x_nchw = jax.random.normal(kx, (B, C, H, W), jnp.float32)   # PyTorch layout
    x_nhwc = jnp.transpose(x_nchw, (0, 2, 3, 1))                # kernel layout

    # Kaiming-normal(fan_in) * 0.1, mirroring initialize_weights(..., 0.1);
    # weights generated directly in HWIO (math identical to OIHW).
    std = 0.1 * (2.0 / (9 * C)) ** 0.5
    w1_hwio = std * jax.random.normal(kw1, (3, 3, C, C), jnp.float32)
    w2_hwio = std * jax.random.normal(kw2, (3, 3, C, C), jnp.float32)
    # PyTorch init zeroes the biases; use small nonzero values so the bias
    # path of the kernel is actually exercised.
    b1 = 0.01 * jax.random.normal(kb1, (C,), jnp.float32)
    b2 = 0.01 * jax.random.normal(kb2, (C,), jnp.float32)

    out = residual_block_nobn(x_nhwc, w1_hwio, b1, w2_hwio, b2)
    out = jax.block_until_ready(out)

    ref = residual_block_nobn_ref(x_nhwc, w1_hwio, b1, w2_hwio, b2)
    assert out.shape == (B, H, W, C)
    max_err = jnp.max(jnp.abs(out - ref))
    # bf16 matmul operands (f32 accumulation) -> relaxed tolerance vs the
    # HIGHEST-precision f32 reference.
    assert jnp.allclose(out, ref, rtol=1e-2, atol=1e-2), \
        f"max abs err {max_err}"

    print("KERNEL_OK")
</pallas_src>

<mosaic_0001>
module attributes {stable_mosaic.version = 11 : i64} {
  func.func @residual_block_kernel(%arg0: i32, %arg1: memref<1x16x16x64xf32, #tpu.memory_space<vmem>>, %arg2: memref<9x64x64xbf16, #tpu.memory_space<vmem>>, %arg3: memref<1x64xf32, #tpu.memory_space<vmem>>, %arg4: memref<9x64x64xbf16, #tpu.memory_space<vmem>>, %arg5: memref<1x64xf32, #tpu.memory_space<vmem>>, %arg6: memref<1x16x16x64xf32, #tpu.memory_space<vmem>>, %arg7: memref<18x32x64xbf16, #tpu.memory_space<vmem>>) attributes {dimension_semantics = [#tpu.dimension_semantics<parallel>], iteration_bounds = array<i64: 2>, scalar_prefetch = 0 : i64, scratch_operands = 1 : i64, tpu.core_type = #tpu.core_type<tc>, window_params = [{transform_indices = @transform_0, window_bounds = array<i64: 1, 16, 16, 64>}, {pipeline_mode = #tpu.pipeline_mode<synchronous>, transform_indices = @transform_1, window_bounds = array<i64: 9, 64, 64>}, {pipeline_mode = #tpu.pipeline_mode<synchronous>, transform_indices = @transform_2, window_bounds = array<i64: 1, 64>}, {pipeline_mode = #tpu.pipeline_mode<synchronous>, transform_indices = @transform_3, window_bounds = array<i64: 9, 64, 64>}, {pipeline_mode = #tpu.pipeline_mode<synchronous>, transform_indices = @transform_4, window_bounds = array<i64: 1, 64>}, {transform_indices = @transform_5, window_bounds = array<i64: 1, 16, 16, 64>}]} {
    %cst = arith.constant 0.000000e+00 : bf16
    %0 = vector.broadcast %cst : bf16 to vector<1x32x64xbf16>
    %cst_0 = arith.constant 0.000000e+00 : bf16
    %1 = vector.broadcast %cst_0 : bf16 to vector<18x1x64xbf16>
    %c0 = arith.constant 0 : index
    %c0_1 = arith.constant 0 : index
    %c0_2 = arith.constant 0 : index
    %2 = vector.load %arg7[%c0, %c0_1, %c0_2] : memref<18x32x64xbf16, #tpu.memory_space<vmem>>, vector<1x32x64xbf16>
    tpu.vector_store %arg7[%c0, %c0_1, %c0_2], %0 {strides = array<i32>} : memref<18x32x64xbf16, #tpu.memory_space<vmem>>, vector<1x32x64xbf16>,
    %c17 = arith.constant 17 : index
    %c0_3 = arith.constant 0 : index
    %c0_4 = arith.constant 0 : index
    %3 = vector.load %arg7[%c17, %c0_3, %c0_4] : memref<18x32x64xbf16, #tpu.memory_space<vmem>>, vector<1x32x64xbf16>
    tpu.vector_store %arg7[%c17, %c0_3, %c0_4], %0 {strides = array<i32>} : memref<18x32x64xbf16, #tpu.memory_space<vmem>>, vector<1x32x64xbf16>,
    %c0_5 = arith.constant 0 : index
    %c7 = arith.constant 7 : index
    %c0_6 = arith.constant 0 : index
    %4 = vector.load %arg7[%c0_5, %c7, %c0_6] : memref<18x32x64xbf16, #tpu.memory_space<vmem>>, vector<18x1x64xbf16>
    tpu.vector_store %arg7[%c0_5, %c7, %c0_6], %1 {strides = array<i32>} : memref<18x32x64xbf16, #tpu.memory_space<vmem>>, vector<18x1x64xbf16>,
    %c0_7 = arith.constant 0 : index
    %c24 = arith.constant 24 : index
    %c0_8 = arith.constant 0 : index
    %5 = vector.load %arg7[%c0_7, %c24, %c0_8] : memref<18x32x64xbf16, #tpu.memory_space<vmem>>, vector<18x1x64xbf16>
    tpu.vector_store %arg7[%c0_7, %c24, %c0_8], %1 {strides = array<i32>} : memref<18x32x64xbf16, #tpu.memory_space<vmem>>, vector<18x1x64xbf16>,
    %c0_9 = arith.constant 0 : index
    %c0_10 = arith.constant 0 : index
    %c0_11 = arith.constant 0 : index
    %c0_12 = arith.constant 0 : index
    %6 = vector.load %arg1[%c0_9, %c0_10, %c0_11, %c0_12] : memref<1x16x16x64xf32, #tpu.memory_space<vmem>>, vector<1x16x16x64xf32>
    %7 = vector.shape_cast %6 : vector<1x16x16x64xf32> to vector<16x16x64xf32>
    %8 = arith.truncf %7 : vector<16x16x64xf32> to vector<16x16x64xbf16>
    %c1 = arith.constant 1 : index
    %c8 = arith.constant 8 : index
    %c0_13 = arith.constant 0 : index
    %9 = vector.load %arg7[%c1, %c8, %c0_13] : memref<18x32x64xbf16, #tpu.memory_space<vmem>>, vector<16x16x64xbf16>
    tpu.vector_store %arg7[%c1, %c8, %c0_13], %8 {strides = array<i32>} : memref<18x32x64xbf16, #tpu.memory_space<vmem>>, vector<16x16x64xbf16>,
    %c0_14 = arith.constant 0 : index
    %c0_15 = arith.constant 0 : index
    %10 = vector.load %arg3[%c0_14, %c0_15] : memref<1x64xf32, #tpu.memory_space<vmem>>, vector<1x64xf32>
    %c0_16 = arith.constant 0 : index
    %c7_17 = arith.constant 7 : index
    %c0_18 = arith.constant 0 : index
    %11 = vector.load %arg7[%c0_16, %c7_17, %c0_18] : memref<18x32x64xbf16, #tpu.memory_space<vmem>>, vector<16x16x64xbf16>
    %12 = vector.shape_cast %11 : vector<16x16x64xbf16> to vector<256x64xbf16>
    %c0_19 = arith.constant 0 : index
    %c0_20 = arith.constant 0 : index
    %c0_21 = arith.constant 0 : index
    %13 = vector.load %arg2[%c0_19, %c0_20, %c0_21] : memref<9x64x64xbf16, #tpu.memory_space<vmem>>, vector<1x64x64xbf16>
    %14 = vector.shape_cast %13 : vector<1x64x64xbf16> to vector<64x64xbf16>
    %cst_22 = arith.constant dense<0.000000e+00> : vector<256x64xf32>
    %15 = tpu.matmul %12, %14, %cst_22 {dimension_numbers = #tpu.dot_dimension_numbers<[1], [0], [0], [1], [0, 0, 1, 1], [], []>} : vector<256x64xbf16>, vector<64x64xbf16>, vector<256x64xf32> -> vector<256x64xf32>
    %c0_23 = arith.constant 0 : index
    %c8_24 = arith.constant 8 : index
    %c0_25 = arith.constant 0 : index
    %16 = vector.load %arg7[%c0_23, %c8_24, %c0_25] : memref<18x32x64xbf16, #tpu.memory_space<vmem>>, vector<16x16x64xbf16>
    %17 = vector.shape_cast %16 : vector<16x16x64xbf16> to vector<256x64xbf16>
    %c1_26 = arith.constant 1 : index
    %c0_27 = arith.constant 0 : index
    %c0_28 = arith.constant 0 : index
    %18 = vector.load %arg2[%c1_26, %c0_27, %c0_28] : memref<9x64x64xbf16, #tpu.memory_space<vmem>>, vector<1x64x64xbf16>
    %19 = vector.shape_cast %18 : vector<1x64x64xbf16> to vector<64x64xbf16>
    %cst_29 = arith.constant dense<0.000000e+00> : vector<256x64xf32>
    %20 = tpu.matmul %17, %19, %cst_29 {dimension_numbers = #tpu.dot_dimension_numbers<[1], [0], [0], [1], [0, 0, 1, 1], [], []>} : vector<256x64xbf16>, vector<64x64xbf16>, vector<256x64xf32> -> vector<256x64xf32>
    %21 = arith.addf %15, %20 : vector<256x64xf32>
    %c0_30 = arith.constant 0 : index
    %c9 = arith.constant 9 : index
    %c0_31 = arith.constant 0 : index
    %22 = vector.load %arg7[%c0_30, %c9, %c0_31] : memref<18x32x64xbf16, #tpu.memory_space<vmem>>, vector<16x16x64xbf16>
    %23 = vector.shape_cast %22 : vector<16x16x64xbf16> to vector<256x64xbf16>
    %c2 = arith.constant 2 : index
    %c0_32 = arith.constant 0 : index
    %c0_33 = arith.constant 0 : index
    %24 = vector.load %arg2[%c2, %c0_32, %c0_33] : memref<9x64x64xbf16, #tpu.memory_space<vmem>>, vector<1x64x64xbf16>
    %25 = vector.shape_cast %24 : vector<1x64x64xbf16> to vector<64x64xbf16>
    %cst_34 = arith.constant dense<0.000000e+00> : vector<256x64xf32>
    %26 = tpu.matmul %23, %25, %cst_34 {dimension_numbers = #tpu.dot_dimension_numbers<[1], [0], [0], [1], [0, 0, 1, 1], [], []>} : vector<256x64xbf16>, vector<64x64xbf16>, vector<256x64xf32> -> vector<256x64xf32>
    %27 = arith.addf %21, %26 : vector<256x64xf32>
    %c1_35 = arith.constant 1 : index
    %c7_36 = arith.constant 7 : index
    %c0_37 = arith.constant 0 : index
    %28 = vector.load %arg7[%c1_35, %c7_36, %c0_37] : memref<18x32x64xbf16, #tpu.memory_space<vmem>>, vector<16x16x64xbf16>
    %29 = vector.shape_cast %28 : vector<16x16x64xbf16> to vector<256x64xbf16>
    %c3 = arith.constant 3 : index
    %c0_38 = arith.constant 0 : index
    %c0_39 = arith.constant 0 : index
    %30 = vector.load %arg2[%c3, %c0_38, %c0_39] : memref<9x64x64xbf16, #tpu.memory_space<vmem>>, vector<1x64x64xbf16>
    %31 = vector.shape_cast %30 : vector<1x64x64xbf16> to vector<64x64xbf16>
    %cst_40 = arith.constant dense<0.000000e+00> : vector<256x64xf32>
    %32 = tpu.matmul %29, %31, %cst_40 {dimension_numbers = #tpu.dot_dimension_numbers<[1], [0], [0], [1], [0, 0, 1, 1], [], []>} : vector<256x64xbf16>, vector<64x64xbf16>, vector<256x64xf32> -> vector<256x64xf32>
    %33 = arith.addf %27, %32 : vector<256x64xf32>
    %c1_41 = arith.constant 1 : index
    %c8_42 = arith.constant 8 : index
    %c0_43 = arith.constant 0 : index
    %34 = vector.load %arg7[%c1_41, %c8_42, %c0_43] : memref<18x32x64xbf16, #tpu.memory_space<vmem>>, vector<16x16x64xbf16>
    %35 = vector.shape_cast %34 : vector<16x16x64xbf16> to vector<256x64xbf16>
    %c4 = arith.constant 4 : index
    %c0_44 = arith.constant 0 : index
    %c0_45 = arith.constant 0 : index
    %36 = vector.load %arg2[%c4, %c0_44, %c0_45] : memref<9x64x64xbf16, #tpu.memory_space<vmem>>, vector<1x64x64xbf16>
    %37 = vector.shape_cast %36 : vector<1x64x64xbf16> to vector<64x64xbf16>
    %cst_46 = arith.constant dense<0.000000e+00> : vector<256x64xf32>
    %38 = tpu.matmul %35, %37, %cst_46 {dimension_numbers = #tpu.dot_dimension_numbers<[1], [0], [0], [1], [0, 0, 1, 1], [], []>} : vector<256x64xbf16>, vector<64x64xbf16>, vector<256x64xf32> -> vector<256x64xf32>
    %39 = arith.addf %33, %38 : vector<256x64xf32>
    %c1_47 = arith.constant 1 : index
    %c9_48 = arith.constant 9 : index
    %c0_49 = arith.constant 0 : index
    %40 = vector.load %arg7[%c1_47, %c9_48, %c0_49] : memref<18x32x64xbf16, #tpu.memory_space<vmem>>, vector<16x16x64xbf16>
    %41 = vector.shape_cast %40 : vector<16x16x64xbf16> to vector<256x64xbf16>
    %c5 = arith.constant 5 : index
    %c0_50 = arith.constant 0 : index
    %c0_51 = arith.constant 0 : index
    %42 = vector.load %arg2[%c5, %c0_50, %c0_51] : memref<9x64x64xbf16, #tpu.memory_space<vmem>>, vector<1x64x64xbf16>
    %43 = vector.shape_cast %42 : vector<1x64x64xbf16> to vector<64x64xbf16>
    %cst_52 = arith.constant dense<0.000000e+00> : vector<256x64xf32>
    %44 = tpu.matmul %41, %43, %cst_52 {dimension_numbers = #tpu.dot_dimension_numbers<[1], [0], [0], [1], [0, 0, 1, 1], [], []>} : vector<256x64xbf16>, vector<64x64xbf16>, vector<256x64xf32> -> vector<256x64xf32>
    %45 = arith.addf %39, %44 : vector<256x64xf32>
    %c2_53 = arith.constant 2 : index
    %c7_54 = arith.constant 7 : index
    %c0_55 = arith.constant 0 : index
    %46 = vector.load %arg7[%c2_53, %c7_54, %c0_55] : memref<18x32x64xbf16, #tpu.memory_space<vmem>>, vector<16x16x64xbf16>
    %47 = vector.shape_cast %46 : vector<16x16x64xbf16> to vector<256x64xbf16>
    %c6 = arith.constant 6 : index
    %c0_56 = arith.constant 0 : index
    %c0_57 = arith.constant 0 : index
    %48 = vector.load %arg2[%c6, %c0_56, %c0_57] : memref<9x64x64xbf16, #tpu.memory_space<vmem>>, vector<1x64x64xbf16>
    %49 = vector.shape_cast %48 : vector<1x64x64xbf16> to vector<64x64xbf16>
    %cst_58 = arith.constant dense<0.000000e+00> : vector<256x64xf32>
    %50 = tpu.matmul %47, %49, %cst_58 {dimension_numbers = #tpu.dot_dimension_numbers<[1], [0], [0], [1], [0, 0, 1, 1], [], []>} : vector<256x64xbf16>, vector<64x64xbf16>, vector<256x64xf32> -> vector<256x64xf32>
    %51 = arith.addf %45, %50 : vector<256x64xf32>
    %c2_59 = arith.constant 2 : index
    %c8_60 = arith.constant 8 : index
    %c0_61 = arith.constant 0 : index
    %52 = vector.load %arg7[%c2_59, %c8_60, %c0_61] : memref<18x32x64xbf16, #tpu.memory_space<vmem>>, vector<16x16x64xbf16>
    %53 = vector.shape_cast %52 : vector<16x16x64xbf16> to vector<256x64xbf16>
    %c7_62 = arith.constant 7 : index
    %c0_63 = arith.constant 0 : index
    %c0_64 = arith.constant 0 : index
    %54 = vector.load %arg2[%c7_62, %c0_63, %c0_64] : memref<9x64x64xbf16, #tpu.memory_space<vmem>>, vector<1x64x64xbf16>
    %55 = vector.shape_cast %54 : vector<1x64x64xbf16> to vector<64x64xbf16>
    %cst_65 = arith.constant dense<0.000000e+00> : vector<256x64xf32>
    %56 = tpu.matmul %53, %55, %cst_65 {dimension_numbers = #tpu.dot_dimension_numbers<[1], [0], [0], [1], [0, 0, 1, 1], [], []>} : vector<256x64xbf16>, vector<64x64xbf16>, vector<256x64xf32> -> vector<256x64xf32>
    %57 = arith.addf %51, %56 : vector<256x64xf32>
    %c2_66 = arith.constant 2 : index
    %c9_67 = arith.constant 9 : index
    %c0_68 = arith.constant 0 : index
    %58 = vector.load %arg7[%c2_66, %c9_67, %c0_68] : memref<18x32x64xbf16, #tpu.memory_space<vmem>>, vector<16x16x64xbf16>
    %59 = vector.shape_cast %58 : vector<16x16x64xbf16> to vector<256x64xbf16>
    %c8_69 = arith.constant 8 : index
    %c0_70 = arith.constant 0 : index
    %c0_71 = arith.constant 0 : index
    %60 = vector.load %arg2[%c8_69, %c0_70, %c0_71] : memref<9x64x64xbf16, #tpu.memory_space<vmem>>, vector<1x64x64xbf16>
    %61 = vector.shape_cast %60 : vector<1x64x64xbf16> to vector<64x64xbf16>
    %cst_72 = arith.constant dense<0.000000e+00> : vector<256x64xf32>
    %62 = tpu.matmul %59, %61, %cst_72 {dimension_numbers = #tpu.dot_dimension_numbers<[1], [0], [0], [1], [0, 0, 1, 1], [], []>} : vector<256x64xbf16>, vector<64x64xbf16>, vector<256x64xf32> -> vector<256x64xf32>
    %63 = arith.addf %57, %62 : vector<256x64xf32>
    %64 = vector.broadcast %10 : vector<1x64xf32> to vector<256x64xf32>
    %65 = arith.addf %63, %64 : vector<256x64xf32>
    %cst_73 = arith.constant 0.000000e+00 : f32
    %66 = vector.broadcast %cst_73 : f32 to vector<256x64xf32>
    %67 = arith.maximumf %65, %66 : vector<256x64xf32>
    %68 = vector.shape_cast %67 : vector<256x64xf32> to vector<16x16x64xf32>
    %69 = arith.truncf %68 : vector<16x16x64xf32> to vector<16x16x64xbf16>
    %c1_74 = arith.constant 1 : index
    %c8_75 = arith.constant 8 : index
    %c0_76 = arith.constant 0 : index
    %70 = vector.load %arg7[%c1_74, %c8_75, %c0_76] : memref<18x32x64xbf16, #tpu.memory_space<vmem>>, vector<16x16x64xbf16>
    tpu.vector_store %arg7[%c1_74, %c8_75, %c0_76], %69 {strides = array<i32>} : memref<18x32x64xbf16, #tpu.memory_space<vmem>>, vector<16x16x64xbf16>,
    %c0_77 = arith.constant 0 : index
    %c0_78 = arith.constant 0 : index
    %71 = vector.load %arg5[%c0_77, %c0_78] : memref<1x64xf32, #tpu.memory_space<vmem>>, vector<1x64xf32>
    %c0_79 = arith.constant 0 : index
    %c7_80 = arith.constant 7 : index
    %c0_81 = arith.constant 0 : index
    %72 = vector.load %arg7[%c0_79, %c7_80, %c0_81] : memref<18x32x64xbf16, #tpu.memory_space<vmem>>, vector<16x16x64xbf16>
    %73 = vector.shape_cast %72 : vector<16x16x64xbf16> to vector<256x64xbf16>
    %c0_82 = arith.constant 0 : index
    %c0_83 = arith.constant 0 : index
    %c0_84 = arith.constant 0 : index
    %74 = vector.load %arg4[%c0_82, %c0_83, %c0_84] : memref<9x64x64xbf16, #tpu.memory_space<vmem>>, vector<1x64x64xbf16>
    %75 = vector.shape_cast %74 : vector<1x64x64xbf16> to vector<64x64xbf16>
    %cst_85 = arith.constant dense<0.000000e+00> : vector<256x64xf32>
    %76 = tpu.matmul %73, %75, %cst_85 {dimension_numbers = #tpu.dot_dimension_numbers<[1], [0], [0], [1], [0, 0, 1, 1], [], []>} : vector<256x64xbf16>, vector<64x64xbf16>, vector<256x64xf32> -> vector<256x64xf32>
    %c0_86 = arith.constant 0 : index
    %c8_87 = arith.constant 8 : index
    %c0_88 = arith.constant 0 : index
    %77 = vector.load %arg7[%c0_86, %c8_87, %c0_88] : memref<18x32x64xbf16, #tpu.memory_space<vmem>>, vector<16x16x64xbf16>
    %78 = vector.shape_cast %77 : vector<16x16x64xbf16> to vector<256x64xbf16>
    %c1_89 = arith.constant 1 : index
    %c0_90 = arith.constant 0 : index
    %c0_91 = arith.constant 0 : index
    %79 = vector.load %arg4[%c1_89, %c0_90, %c0_91] : memref<9x64x64xbf16, #tpu.memory_space<vmem>>, vector<1x64x64xbf16>
    %80 = vector.shape_cast %79 : vector<1x64x64xbf16> to vector<64x64xbf16>
    %cst_92 = arith.constant dense<0.000000e+00> : vector<256x64xf32>
    %81 = tpu.matmul %78, %80, %cst_92 {dimension_numbers = #tpu.dot_dimension_numbers<[1], [0], [0], [1], [0, 0, 1, 1], [], []>} : vector<256x64xbf16>, vector<64x64xbf16>, vector<256x64xf32> -> vector<256x64xf32>
    %82 = arith.addf %76, %81 : vector<256x64xf32>
    %c0_93 = arith.constant 0 : index
    %c9_94 = arith.constant 9 : index
    %c0_95 = arith.constant 0 : index
    %83 = vector.load %arg7[%c0_93, %c9_94, %c0_95] : memref<18x32x64xbf16, #tpu.memory_space<vmem>>, vector<16x16x64xbf16>
    %84 = vector.shape_cast %83 : vector<16x16x64xbf16> to vector<256x64xbf16>
    %c2_96 = arith.constant 2 : index
    %c0_97 = arith.constant 0 : index
    %c0_98 = arith.constant 0 : index
    %85 = vector.load %arg4[%c2_96, %c0_97, %c0_98] : memref<9x64x64xbf16, #tpu.memory_space<vmem>>, vector<1x64x64xbf16>
    %86 = vector.shape_cast %85 : vector<1x64x64xbf16> to vector<64x64xbf16>
    %cst_99 = arith.constant dense<0.000000e+00> : vector<256x64xf32>
    %87 = tpu.matmul %84, %86, %cst_99 {dimension_numbers = #tpu.dot_dimension_numbers<[1], [0], [0], [1], [0, 0, 1, 1], [], []>} : vector<256x64xbf16>, vector<64x64xbf16>, vector<256x64xf32> -> vector<256x64xf32>
    %88 = arith.addf %82, %87 : vector<256x64xf32>
    %c1_100 = arith.constant 1 : index
    %c7_101 = arith.constant 7 : index
    %c0_102 = arith.constant 0 : index
    %89 = vector.load %arg7[%c1_100, %c7_101, %c0_102] : memref<18x32x64xbf16, #tpu.memory_space<vmem>>, vector<16x16x64xbf16>
    %90 = vector.shape_cast %89 : vector<16x16x64xbf16> to vector<256x64xbf16>
    %c3_103 = arith.constant 3 : index
    %c0_104 = arith.constant 0 : index
    %c0_105 = arith.constant 0 : index
    %91 = vector.load %arg4[%c3_103, %c0_104, %c0_105] : memref<9x64x64xbf16, #tpu.memory_space<vmem>>, vector<1x64x64xbf16>
    %92 = vector.shape_cast %91 : vector<1x64x64xbf16> to vector<64x64xbf16>
    %cst_106 = arith.constant dense<0.000000e+00> : vector<256x64xf32>
    %93 = tpu.matmul %90, %92, %cst_106 {dimension_numbers = #tpu.dot_dimension_numbers<[1], [0], [0], [1], [0, 0, 1, 1], [], []>} : vector<256x64xbf16>, vector<64x64xbf16>, vector<256x64xf32> -> vector<256x64xf32>
    %94 = arith.addf %88, %93 : vector<256x64xf32>
    %c1_107 = arith.constant 1 : index
    %c8_108 = arith.constant 8 : index
    %c0_109 = arith.constant 0 : index
    %95 = vector.load %arg7[%c1_107, %c8_108, %c0_109] : memref<18x32x64xbf16, #tpu.memory_space<vmem>>, vector<16x16x64xbf16>
    %96 = vector.shape_cast %95 : vector<16x16x64xbf16> to vector<256x64xbf16>
    %c4_110 = arith.constant 4 : index
    %c0_111 = arith.constant 0 : index
    %c0_112 = arith.constant 0 : index
    %97 = vector.load %arg4[%c4_110, %c0_111, %c0_112] : memref<9x64x64xbf16, #tpu.memory_space<vmem>>, vector<1x64x64xbf16>
    %98 = vector.shape_cast %97 : vector<1x64x64xbf16> to vector<64x64xbf16>
    %cst_113 = arith.constant dense<0.000000e+00> : vector<256x64xf32>
    %99 = tpu.matmul %96, %98, %cst_113 {dimension_numbers = #tpu.dot_dimension_numbers<[1], [0], [0], [1], [0, 0, 1, 1], [], []>} : vector<256x64xbf16>, vector<64x64xbf16>, vector<256x64xf32> -> vector<256x64xf32>
    %100 = arith.addf %94, %99 : vector<256x64xf32>
    %c1_114 = arith.constant 1 : index
    %c9_115 = arith.constant 9 : index
    %c0_116 = arith.constant 0 : index
    %101 = vector.load %arg7[%c1_114, %c9_115, %c0_116] : memref<18x32x64xbf16, #tpu.memory_space<vmem>>, vector<16x16x64xbf16>
    %102 = vector.shape_cast %101 : vector<16x16x64xbf16> to vector<256x64xbf16>
    %c5_117 = arith.constant 5 : index
    %c0_118 = arith.constant 0 : index
    %c0_119 = arith.constant 0 : index
    %103 = vector.load %arg4[%c5_117, %c0_118, %c0_119] : memref<9x64x64xbf16, #tpu.memory_space<vmem>>, vector<1x64x64xbf16>
    %104 = vector.shape_cast %103 : vector<1x64x64xbf16> to vector<64x64xbf16>
    %cst_120 = arith.constant dense<0.000000e+00> : vector<256x64xf32>
    %105 = tpu.matmul %102, %104, %cst_120 {dimension_numbers = #tpu.dot_dimension_numbers<[1], [0], [0], [1], [0, 0, 1, 1], [], []>} : vector<256x64xbf16>, vector<64x64xbf16>, vector<256x64xf32> -> vector<256x64xf32>
    %106 = arith.addf %100, %105 : vector<256x64xf32>
    %c2_121 = arith.constant 2 : index
    %c7_122 = arith.constant 7 : index
    %c0_123 = arith.constant 0 : index
    %107 = vector.load %arg7[%c2_121, %c7_122, %c0_123] : memref<18x32x64xbf16, #tpu.memory_space<vmem>>, vector<16x16x64xbf16>
    %108 = vector.shape_cast %107 : vector<16x16x64xbf16> to vector<256x64xbf16>
    %c6_124 = arith.constant 6 : index
    %c0_125 = arith.constant 0 : index
    %c0_126 = arith.constant 0 : index
    %109 = vector.load %arg4[%c6_124, %c0_125, %c0_126] : memref<9x64x64xbf16, #tpu.memory_space<vmem>>, vector<1x64x64xbf16>
    %110 = vector.shape_cast %109 : vector<1x64x64xbf16> to vector<64x64xbf16>
    %cst_127 = arith.constant dense<0.000000e+00> : vector<256x64xf32>
    %111 = tpu.matmul %108, %110, %cst_127 {dimension_numbers = #tpu.dot_dimension_numbers<[1], [0], [0], [1], [0, 0, 1, 1], [], []>} : vector<256x64xbf16>, vector<64x64xbf16>, vector<256x64xf32> -> vector<256x64xf32>
    %112 = arith.addf %106, %111 : vector<256x64xf32>
    %c2_128 = arith.constant 2 : index
    %c8_129 = arith.constant 8 : index
    %c0_130 = arith.constant 0 : index
    %113 = vector.load %arg7[%c2_128, %c8_129, %c0_130] : memref<18x32x64xbf16, #tpu.memory_space<vmem>>, vector<16x16x64xbf16>
    %114 = vector.shape_cast %113 : vector<16x16x64xbf16> to vector<256x64xbf16>
    %c7_131 = arith.constant 7 : index
    %c0_132 = arith.constant 0 : index
    %c0_133 = arith.constant 0 : index
    %115 = vector.load %arg4[%c7_131, %c0_132, %c0_133] : memref<9x64x64xbf16, #tpu.memory_space<vmem>>, vector<1x64x64xbf16>
    %116 = vector.shape_cast %115 : vector<1x64x64xbf16> to vector<64x64xbf16>
    %cst_134 = arith.constant dense<0.000000e+00> : vector<256x64xf32>
    %117 = tpu.matmul %114, %116, %cst_134 {dimension_numbers = #tpu.dot_dimension_numbers<[1], [0], [0], [1], [0, 0, 1, 1], [], []>} : vector<256x64xbf16>, vector<64x64xbf16>, vector<256x64xf32> -> vector<256x64xf32>
    %118 = arith.addf %112, %117 : vector<256x64xf32>
    %c2_135 = arith.constant 2 : index
    %c9_136 = arith.constant 9 : index
    %c0_137 = arith.constant 0 : index
    %119 = vector.load %arg7[%c2_135, %c9_136, %c0_137] : memref<18x32x64xbf16, #tpu.memory_space<vmem>>, vector<16x16x64xbf16>
    %120 = vector.shape_cast %119 : vector<16x16x64xbf16> to vector<256x64xbf16>
    %c8_138 = arith.constant 8 : index
    %c0_139 = arith.constant 0 : index
    %c0_140 = arith.constant 0 : index
    %121 = vector.load %arg4[%c8_138, %c0_139, %c0_140] : memref<9x64x64xbf16, #tpu.memory_space<vmem>>, vector<1x64x64xbf16>
    %122 = vector.shape_cast %121 : vector<1x64x64xbf16> to vector<64x64xbf16>
    %cst_141 = arith.constant dense<0.000000e+00> : vector<256x64xf32>
    %123 = tpu.matmul %120, %122, %cst_141 {dimension_numbers = #tpu.dot_dimension_numbers<[1], [0], [0], [1], [0, 0, 1, 1], [], []>} : vector<256x64xbf16>, vector<64x64xbf16>, vector<256x64xf32> -> vector<256x64xf32>
    %124 = arith.addf %118, %123 : vector<256x64xf32>
    %125 = vector.broadcast %71 : vector<1x64xf32> to vector<256x64xf32>
    %126 = arith.addf %124, %125 : vector<256x64xf32>
    %127 = vector.shape_cast %126 : vector<256x64xf32> to vector<16x16x64xf32>
    %128 = arith.addf %127, %7 : vector<16x16x64xf32>
    %c0_142 = arith.constant 0 : index
    %c0_143 = arith.constant 0 : index
    %c0_144 = arith.constant 0 : index
    %c0_145 = arith.constant 0 : index
    %129 = vector.load %arg6[%c0_142, %c0_143, %c0_144, %c0_145] : memref<1x16x16x64xf32, #tpu.memory_space<vmem>>, vector<1x16x16x64xf32>
    %130 = vector.shape_cast %129 : vector<1x16x16x64xf32> to vector<16x16x64xf32>
    %131 = vector.shape_cast %128 : vector<16x16x64xf32> to vector<1x16x16x64xf32>
    tpu.vector_store %arg6[%c0_142, %c0_143, %c0_144, %c0_145], %131 {strides = array<i32>} : memref<1x16x16x64xf32, #tpu.memory_space<vmem>>, vector<1x16x16x64xf32>,
    return
  }
  func.func @transform_0(%arg0: i32) -> (i32, i32, i32, i32) {
    %c0_i32 = arith.constant 0 : i32
    %c0_i32_0 = arith.constant 0 : i32
    %c0_i32_1 = arith.constant 0 : i32
    %c0_i32_2 = arith.constant 0 : i32
    return %arg0, %c0_i32, %c0_i32_0, %c0_i32_1 : i32, i32, i32, i32
  }
  func.func @transform_1(%arg0: i32) -> (i32, i32, i32) {
    %c0_i32 = arith.constant 0 : i32
    %c0_i32_0 = arith.constant 0 : i32
    %c0_i32_1 = arith.constant 0 : i32
    %c0_i32_2 = arith.constant 0 : i32
    return %c0_i32, %c0_i32_0, %c0_i32_1 : i32, i32, i32
  }
  func.func @transform_2(%arg0: i32) -> (i32, i32) {
    %c0_i32 = arith.constant 0 : i32
    %c0_i32_0 = arith.constant 0 : i32
    %c0_i32_1 = arith.constant 0 : i32
    return %c0_i32, %c0_i32_0 : i32, i32
  }
  func.func @transform_3(%arg0: i32) -> (i32, i32, i32) {
    %c0_i32 = arith.constant 0 : i32
    %c0_i32_0 = arith.constant 0 : i32
    %c0_i32_1 = arith.constant 0 : i32
    %c0_i32_2 = arith.constant 0 : i32
    return %c0_i32, %c0_i32_0, %c0_i32_1 : i32, i32, i32
  }
  func.func @transform_4(%arg0: i32) -> (i32, i32) {
    %c0_i32 = arith.constant 0 : i32
    %c0_i32_0 = arith.constant 0 : i32
    %c0_i32_1 = arith.constant 0 : i32
    return %c0_i32, %c0_i32_0 : i32, i32
  }
  func.func @transform_5(%arg0: i32) -> (i32, i32, i32, i32) {
    %c0_i32 = arith.constant 0 : i32
    %c0_i32_0 = arith.constant 0 : i32
    %c0_i32_1 = arith.constant 0 : i32
    %c0_i32_2 = arith.constant 0 : i32
    return %arg0, %c0_i32, %c0_i32_0, %c0_i32_1 : i32, i32, i32, i32
  }
}

</mosaic_0001>

<bundles_post_ra>
// kernel: tpu_custom_call.1
= control target key start
LH: loop header
LB: loop body
LE: loop exit
PB: predicated region body
PF: predicated region fallthrough
CT: control target
= control target key end

     0   :  { %10 = vsyncpa [#allocation4], 0  ;;  %s14390_s0 = inlined_call_operand.hbm [shape: f32[2,16,16,64], index: 0, kind: input, shape index: {}]   ;;  %s14391_s1 = inlined_call_operand.hbm [shape: bf16[9,64,64], index: 1, kind: input, shape index: {}]   ;;  %s14392_s2 = inlined_call_operand.vmem [shape: f32[1,64], index: 2, kind: input, shape index: {}]   ;;  %s14393_s3 = inlined_call_operand.hbm [shape: bf16[9,64,64], index: 3, kind: input, shape index: {}]   ;;  %s14394_s4 = inlined_call_operand.vmem [shape: f32[1,64], index: 4, kind: input, shape index: {}]   ;;  %s14395_s5 = inlined_call_operand.hbm [shape: f32[2,16,16,64], index: 5, kind: output, shape index: {}]  }
   0x1   :  { %12 = vsyncpa [#allocation4 + $0x1], 0 }
   0x2   :  { %13 = vsyncpa [#allocation7], 0 }
   0x3   :  { %14 = vsyncpa [#allocation5], 0 }
   0x4   :  { %16 = vsyncpa [#allocation5 + $0x1], 0  ;;  %s12191_s18 = smov 0   ;;  %s12193_s19 = smov 0  }
   0x5   :  { %s12195_s20 = smov 0   ;;  %s12197_s21 = smov 0  }
   0x6 LB: > { %s12212_s22 = sadd.s32 4294967295, %s12148_s21   ;;  %s9833_s23 = sadd.s32 4294967294, %s12148_s21   ;;  %s12148_s21 = sphi %s12197_s21, %s14419_s21   ;;  %s12144_s20 = sphi %s12195_s20, %s14418_s20   ;;  %s12140_s19 = sphi %s12193_s19, %s14417_s19   ;;  %s12136_s18 = sphi %s12191_s18, %s14416_s18  }
   0x7   : > { %p42_p0 = scmp.ne.s32.totalorder %s12140_s19, %s12136_s18  ;;  %p14396_p1 = scmp.eq.s32.totalorder %s12212_s22, 0 }
   0x8   : > { %p156_p3 = scmp.eq.s32.totalorder %s9833_s23, 1  ;;  %p9834_p5 = scmp.ge.s32.totalorder %s12148_s21, 1 }
   0x9   : > { %p12221_p4 = por %p14396_p1, %p42_p0  ;;  %p163_p7 = scmp.lt.s32.totalorder %s12148_s21, 3 }
   0xa   : > { %p12226_p6 = por %p156_p3, %p42_p0  ;;  %s12150_s27 = smov [#allocation6]  }
   0xb   : > { %s14399_s24 = scalar_select %p12221_p4, 1, 0 }
   0xc   : > { %s14400_s25 = scalar_select %p12226_p6, 1, 0 }
   0xd   : > { %p12231_p8 = pnand %p9834_p5, %p163_p7  ;;  %s175_s28 = sshll.u32 %s12150_s27, 4  ;;  %s12235_s28 = int_to_ptr.vmem [resolvable:$true] %s175_s28 }
   0xe   : > { %s12151_s30 = smov [#allocation8]   ;;  %s11992_s9 = scalar_lea.hbm %s14391_s1, 4608 }
   0xf   : > { %p11819_p9 = pneg %p12231_p8  ;;  %s191_s6 = sshll.u32 %s12151_s30, 4  ;;  %s12246_s6 = int_to_ptr.vmem [resolvable:$true] %s191_s6 }
  0x10   : > { %p11993_p12 = scmp.ne.s32.totalorder %s14391_s1, %s11992_s9  ;;  %p11999_p5 = scmp.lt.u32.totalorder %s11992_s9, %s14391_s1 }
  0x11   : > { %p12242_p11 = pnand %p11819_p9, %p14396_p1 }
  0x13   : > { %p11994_p13 = pneg %p12242_p11 }
  0x15   : > { %p11995_p0 = pnand %p11994_p13, %p11993_p12 }
  0x17   : > { %p11996_p3 = pneg %p11995_p0 }
  0x19   : > { %p12001_p7 = pnand %p11999_p5, %p11996_p3 }
  0x1b   : > { %12004 = shalt.err (!%p12001_p7)
}
  0x1c   : > { %s12005_s14 = scalar_lea.vmem %s12235_s28, 4608  ;;  %p12013_p2 = scmp.lt.s32.totalorder %s12235_s28, %s12235_s28 }
  0x1d   : > { %p12006_p9 = scmp.ne.s32.totalorder %s12235_s28, %s12005_s14  ;;  %p12014_p12 = scmp.lt.s32.totalorder %s12005_s14, %s12005_s14 }
  0x1f   : > { %p12008_p10 = pnand %p12006_p9, %p11994_p13  ;;  %p12015_p0 = por %p12014_p12, %p12013_p2 }
  0x21   : > { %p12009_p1 = pneg %p12008_p10 }
  0x23   : > { %p12016_p6 = pnand %p12015_p0, %p12009_p1 }
  0x25   : > { %12019 = shalt.err (!%p12016_p6)
}
  0x26   : > { %s12152_s15 = smov 64   ;;  %s12153_s16 = smov 4  }
  0x27   : > { %11822 = dma.hbm_to_vmem [thread:$0]  (!%p12242_p11), %s14391_s1, 4608, %s12235_s28, [#allocation7], %s12152_s15, %s12152_s15, %s12153_s16  }
  0x28   : > { %s12020_s7 = scalar_lea.hbm %s14393_s3, 4608 }
  0x29   : > { %p12021_p2 = scmp.ne.s32.totalorder %s14393_s3, %s12020_s7  ;;  %p12027_p10 = scmp.lt.u32.totalorder %s12020_s7, %s14393_s3 }
  0x2b   : > { %p12023_p1 = pnand %p12021_p2, %p11994_p13 }
  0x2d   : > { %p12024_p6 = pneg %p12023_p1 }
  0x2f   : > { %p12029_p3 = pnand %p12027_p10, %p12024_p6 }
  0x31   : > { %12032 = shalt.err (!%p12029_p3)
}
  0x32   : > { %s12033_s28 = scalar_lea.vmem %s12246_s6, 4608  ;;  %p12041_p12 = scmp.lt.s32.totalorder %s12246_s6, %s12246_s6 }
  0x33   : > { %p12034_p5 = scmp.ne.s32.totalorder %s12246_s6, %s12033_s28  ;;  %p12042_p0 = scmp.lt.s32.totalorder %s12033_s28, %s12033_s28 }
  0x35   : > { %p12036_p7 = pnand %p12034_p5, %p11994_p13  ;;  %p12043_p2 = por %p12042_p0, %p12041_p12 }
  0x37   : > { %p12037_p9 = pneg %p12036_p7 }
  0x39   : > { %p12044_p1 = pnand %p12043_p2, %p12037_p9 }
  0x3b   : > { %12047 = shalt.err (!%p12044_p1)
}
  0x3c   : > { %11825 = dma.hbm_to_vmem [thread:$0]  (!%p12242_p11), %s14393_s3, 4608, %s12246_s6, [#allocation7], %s12152_s15, %s12152_s15, %s12153_s16  }
  0x3d   : > { %s12301_s14 = sadd.s32 1, %s12148_s21   ;;  %s29_s29 = sadd.s32 1, %s12144_s20 }
  0x3e   : > { %s26_s17 = ssub.s32 %s12148_s21, %s12301_s14  ;;  %p36_p13 = scmp.ne.s32.totalorder %s12144_s20, %s12140_s19 }
  0x3f   : > { %p27_p6 = scmp.eq.s32.totalorder %s26_s17, 0  ;;  %p37_p10 = scmp.eq.s32.totalorder %s12148_s21, 0 }
  0x40   : > { %p14403_p3 = scmp.eq.s32.totalorder %s12212_s22, 1  ;;  %p11836_p7 = scmp.lt.s32.totalorder %s12148_s21, 2 }
  0x41   : > { %s12317_s27 = scalar_select %p27_p6, %s12144_s20, %s29_s29  }
  0x42   : > { %p12311_p5 = por %p14403_p3, %p36_p13  ;;  %p38_p9 = por %p37_p10, %p36_p13 }
  0x43   : > { %s208_s30 = sand.u32 1, %s12144_s20   ;;  %s10213_s6 = sshll.u32 %s12148_s21, 12 }
  0x44   : > { %s14404_s23 = scalar_select %p12311_p5, 1, 0 }
  0x45   : > { %s9838_s7 = sshll.u32 %s208_s30, 8  ;;  %s12324_s8 = scalar_lea.hbm %s14390_s0, %s10213_s6 }
  0x46   : > { %s212_s9 = scalar_lea.vmem [#allocation3], %s9838_s7  ;;  %p12328_p11 = pnand %p11836_p7, %p38_p9 }
  0x47   : > { %s219_s10 = sshll.u32 %s212_s9, 4  ;;  %s12332_s28 = scalar_lea.sflag [#allocation4], %s208_s30  ;;  %s12326_s10 = int_to_ptr.vmem [resolvable:$true] %s219_s10 }
  0x48   : > { %s12048_s12 = scalar_lea.hbm %s12324_s8, 4096  ;;  %p12050_p0 = pneg %p12328_p11 }
  0x49   : > { %p12049_p12 = scmp.ne.s32.totalorder %s12324_s8, %s12048_s12  ;;  %s12053_s17 = scalar_lea.hbm %s14390_s0, 8192 }
  0x4a   : > { %p12054_p13 = scmp.lt.u32.totalorder %s12324_s8, %s14390_s0  ;;  %p12055_p6 = scmp.lt.u32.totalorder %s12053_s17, %s12048_s12 }
  0x4b   : > { %p12051_p2 = pnand %p12050_p0, %p12049_p12  ;;  %p12057_p3 = scmp.lt.u32.totalorder %s12048_s12, %s12324_s8 }
  0x4c   : > { %p12056_p10 = por %p12055_p6, %p12054_p13 }
  0x4d   : > { %p12052_p1 = pneg %p12051_p2 }
  0x4e   : > { %p12058_p7 = por %p12057_p3, %p12056_p10 }
  0x50   : > { %p12059_p9 = pnand %p12058_p7, %p12052_p1 }
  0x52   : > { %12062 = shalt.err (!%p12059_p9)
}
  0x53   : > { %s12063_s30 = scalar_lea.vmem %s12326_s10, 4096  ;;  %s12154_s15 = smov [#allocation3]  }
  0x54   : > { %p12064_p12 = scmp.ne.s32.totalorder %s12326_s10, %s12063_s30  ;;  %s12068_s16 = sshll.u32 %s12154_s15, 4  ;;  %s12069_s16 = int_to_ptr.vmem [resolvable:$false] %s12068_s16 }
  0x55   : > { %s12070_s9 = scalar_lea.vmem %s12069_s16, 8192  ;;  %p12071_p4 = scmp.lt.s32.totalorder %s12326_s10, %s12069_s16 }
  0x56   : > { %p12066_p2 = pnand %p12064_p12, %p12050_p0  ;;  %p12072_p13 = scmp.lt.s32.totalorder %s12070_s9, %s12063_s30 }
  0x58   : > { %p12067_p5 = pneg %p12066_p2  ;;  %p12073_p6 = por %p12072_p13, %p12071_p4 }
  0x5a   : > { %p12074_p10 = pnand %p12073_p6, %p12067_p5 }
  0x5c   : > { %12077 = shalt.err (!%p12074_p10)
}
  0x5d   : > { %s12155_s12 = smov 128   ;;  %s12156_s13 = smov 8  }
  0x5e   : > { %11829 = dma.hbm_to_vmem [thread:$0]  (!%p12328_p11), %s12324_s8, 4096, %s12326_s10, %s12332_s28, %s12155_s12, %s12155_s12, %s12156_s13  }
  0x5f   : > { %231 = sbr.rel (%p12231_p8) target bundleno = 1676 (0x68c), region = 40  ;;  %s12363_s29 = sand.u32 (!%p12231_p8), 1, %s12140_s19  }
  0x60   : > { %s9842_s17 = sshll.u32 (!%p12231_p8), %s12363_s29, 8  ;;  %s234_s7 = scalar_lea.sflag (!%p12231_p8), [#allocation4], %s12363_s29 }
  0x61   : > { %s12369_s6 = scalar_lea.vmem (!%p12231_p8), [#allocation3], %s9842_s17  ;;  %p14406_p4 = scmp.ne.s32.totalorder (!%p12231_p8), %s14399_s24, 0 }
  0x66   : > { %12123 = dma.done.wait (%p14406_p4), %s234_s7, 4096  }
  0x67   : > { %12125 = vsyncadd (%p14406_p4), %s234_s7, 4294963200  ;;  %p14407_p5 = scmp.eq.s32.totalorder %s12212_s22, 0 }
  0x69   : > { %12127 = dma.done.wait (%p14407_p5), [#allocation7], 9216   ;;  %p14408_p8 = pmov %p14407_p5 }
  0x6a   : > { %vm273_vm0 = vcmask 523264   ;;  %v12157_v0 = vmov 0   ;;  %v11881_v1 = vld [vmem:[#allocation6 + $0x20] sm:$0xff]   ;;  %v11882_v2 = vld [vmem:[#allocation6 + $0x28] sm:$0xff]   ;;  %v11883_v3 = vld [vmem:[#allocation6 + $0x30] sm:$0xff]   ;;  %vm885_vm1 = vcmask 1043456  }
  0x6b   : > { %12129 = vsyncadd (%p14408_p8), [#allocation7], 4294958080  ;;  %274 = vst.msk [vmem:[#allocation2] sm:$0xff] %vm273_vm0, %v12157_v0  ;;  %10575 = vmatprep.subr.bf16.mxu0 %v11881_v1  ;;  %v393_v6 = vld [vmem:[%s12369_s6] sm:$0xff]  ;;  %v394_v9 = vld [vmem:[%s12369_s6 + $0x8] sm:$0xff]  ;;  %vm490_vm2 = vcmask 523268  }
  0x6c   : > { %275 = vst.msk [vmem:[#allocation2 + $0x8] sm:$0xff] %vm273_vm0, %v12157_v0  ;;  %277 = vst.msk [vmem:[#allocation2 + $0x110] sm:$0xff] %vm273_vm0, %v12157_v0  ;;  %10576 = vmatpush3.bf16.msra.mxu0 %v11881_v1  ;;  %v11884_v10 = vld [vmem:[#allocation6 + $0x38] sm:$0xff]   ;;  %v425_v11 = vpack.c.bf16 %v394_v9, %v393_v6  ;;  %vm492_vm3 = vcmask 519168   ;;  %v395_v13 = vld [vmem:[%s12369_s6 + $0x10] sm:$0xff]  ;;  %vm279_vm5 = vcmask 519171  }
  0x6d   : > { %278 = vst.msk [vmem:[#allocation2 + $0x118] sm:$0xff] %vm273_vm0, %v12157_v0  ;;  %10577 = vmatprep.subr.bf16.mxu0 %v11882_v2  ;;  %v396_v14 = vld [vmem:[%s12369_s6 + $0x18] sm:$0xff]  ;;  %v397_v15 = vld [vmem:[%s12369_s6 + $0x20] sm:$0xff]  ;;  %v398_v18 = vld [vmem:[%s12369_s6 + $0x28] sm:$0xff]  ;;  %vm280_vm4 = vsmask.f32 7950 }
  0x6e   : > { %v457_v16 = vrot.slane %v425_v11, 4  ;;  %v426_v17 = vpack.c.bf16 %v396_v14, %v395_v13  ;;  %v399_v19 = vld [vmem:[%s12369_s6 + $0x30] sm:$0xff]  ;;  %v400_v20 = vld [vmem:[%s12369_s6 + $0x38] sm:$0xff]  ;;  %v427_v21 = vpack.c.bf16 %v398_v18, %v397_v15  ;;  %v401_v23 = vld [vmem:[%s12369_s6 + $0x40] sm:$0xff]  ;;  %vm337_vm7 = vsmask.f32 4352 }
  0x6f   : > { %v428_v22 = vpack.c.bf16 %v400_v20, %v399_v19  ;;  %v402_v24 = vld [vmem:[%s12369_s6 + $0x48] sm:$0xff]  ;;  %v12400_v25 = vld [vmem:[#allocation6] sm:$0xff]   ;;  %v403_v28 = vld [vmem:[%s12369_s6 + $0x50] sm:$0xff]  ;;  %vm336_vm8 = vcmask 520196   ;;  %vm1425_vm10 = vsmask.f32 3328 }
  0x70   : > { %10578 = vmatpush3.bf16.msra.mxu0 %v11882_v2  ;;  %491 = vst.msk [vmem:[#allocation2 + $0x10] sm:$0xf0] %vm490_vm2, %v457_v16  ;;  %v458_v26 = vrot.slane %v426_v17, 4  ;;  %v429_v27 = vpack.c.bf16 %v402_v24, %v401_v23  ;;  %v459_v29 = vrot.slane %v427_v21, 4  ;;  %v404_v31 = vld [vmem:[%s12369_s6 + $0x58] sm:$0xff]  ;;  %v405_v32 = vld [vmem:[%s12369_s6 + $0x60] sm:$0xff]  ;;  %vm12488_vm6 = vmand %vm279_vm5, %vm280_vm4 }
  0x71   : > { %10579 = vmatprep.subr.bf16.mxu0 %v11883_v3  ;;  %493 = vst.msk [vmem:[#allocation2 + $0x18] sm:$0xf] %vm492_vm3, %v457_v16  ;;  %v460_v30 = vrot.slane %v428_v22, 4  ;;  %v406_v33 = vld [vmem:[%s12369_s6 + $0x68] sm:$0xff]  ;;  %v430_v35 = vpack.c.bf16 %v404_v31, %v403_v28  ;;  %v407_v37 = vld [vmem:[%s12369_s6 + $0x70] sm:$0xff]  ;;  %v408_v38 = vld [vmem:[%s12369_s6 + $0x78] sm:$0xff] }
  0x72   : > { %v837_v5 = vld [vmem:[#allocation2] sm:$0xf0]  ;;  %494 = vst.msk [vmem:[#allocation2 + $0x20] sm:$0xf0] %vm490_vm2, %v458_v26  ;;  %v461_v34 = vrot.slane %v429_v27, 4  ;;  %v431_v36 = vpack.c.bf16 %v406_v33, %v405_v32  ;;  %v432_v40 = vpack.c.bf16 %v408_v38, %v407_v37  ;;  %v410_v41 = vld [vmem:[%s12369_s6 + $0x88] sm:$0xff]  ;;  %vm12610_vm9 = vmand %vm336_vm8, %vm337_vm7 }
  0x73   : > { %v12383_v4 = vld [vmem:[#allocation2 + $0x8] sm:$0xf]  ;;  %v886_v7 = vrot.slane %v837_v5, 4  ;;  %495 = vst.msk [vmem:[#allocation2 + $0x28] sm:$0xf] %vm492_vm3, %v458_v26  ;;  %v409_v39 = vld [vmem:[%s12369_s6 + $0x80] sm:$0xff] }
  0x74   : > { %v887_v8 = vrot.slane %v12383_v4, 4  ;;  %10580 = vmatpush3.bf16.msra.mxu0 %v11883_v3  ;;  %496 = vst.msk [vmem:[#allocation2 + $0x30] sm:$0xf0] %vm490_vm2, %v459_v29  ;;  %498 = vst.msk [vmem:[#allocation2 + $0x40] sm:$0xf0] %vm490_vm2, %v460_v30  ;;  %v462_v42 = vrot.slane %v430_v35, 4  ;;  %v433_v44 = vpack.c.bf16 %v410_v41, %v409_v39 }
  0x75   : > { %10581 = vmatprep.subr.bf16.mxu0 %v11884_v10  ;;  %497 = vst.msk [vmem:[#allocation2 + $0x38] sm:$0xf] %vm492_vm3, %v459_v29  ;;  %499 = vst.msk [vmem:[#allocation2 + $0x48] sm:$0xf] %vm492_vm3, %v460_v30  ;;  %v463_v43 = vrot.slane %v431_v36, 4  ;;  %v411_v45 = vld [vmem:[%s12369_s6 + $0x90] sm:$0xff] }
  0x76   : > { %v888_v12 = vsel %vm885_vm1, %v886_v7, %v887_v8  ;;  %500 = vst.msk [vmem:[#allocation2 + $0x50] sm:$0xf0] %vm490_vm2, %v461_v34  ;;  %v412_v46 = vld [vmem:[%s12369_s6 + $0x98] sm:$0xff]  ;;  %v464_v47 = vrot.slane %v432_v40, 4  ;;  %v413_v49 = vld [vmem:[%s12369_s6 + $0xa0] sm:$0xff]  ;;  %v414_v50 = vld [vmem:[%s12369_s6 + $0xa8] sm:$0xff] }
  0x77   : > { %10583 = vmatprep.mubr.msk.bf16.mxu0 %vm273_vm0, %v888_v12  ;;  %501 = vst.msk [vmem:[#allocation2 + $0x58] sm:$0xf] %vm492_vm3, %v461_v34  ;;  %v434_v48 = vpack.c.bf16 %v412_v46, %v411_v45  ;;  %v415_v51 = vld [vmem:[%s12369_s6 + $0xb0] sm:$0xff]  ;;  %503 = vst.msk [vmem:[#allocation2 + $0x68] sm:$0xf] %vm492_vm3, %v462_v42  ;;  %v465_v52 = vrot.slane %v433_v44, 4  ;;  %v435_v53 = vpack.c.bf16 %v414_v50, %v413_v49 }
  0x78   : > { %10582 = vmatpush3.bf16.msra.mxu0 %v11884_v10  ;;  %502 = vst.msk [vmem:[#allocation2 + $0x60] sm:$0xf0] %vm490_vm2, %v462_v42  ;;  %504 = vst.msk [vmem:[#allocation2 + $0x70] sm:$0xf0] %vm490_vm2, %v463_v43  ;;  %v416_v54 = vld [vmem:[%s12369_s6 + $0xb8] sm:$0xff]  ;;  %v417_v55 = vld [vmem:[%s12369_s6 + $0xc0] sm:$0xff] }
  0x79   : > { %10615 = vmatprep.subr.bf16.mxu0 %v12400_v25  ;;  %505 = vst.msk [vmem:[#allocation2 + $0x78] sm:$0xf] %vm492_vm3, %v463_v43  ;;  %v418_v56 = vld [vmem:[%s12369_s6 + $0xc8] sm:$0xff]  ;;  %v12431_v57 = vld [vmem:[#allocation2 + $0x18] sm:$0xf]  ;;  %v466_v59 = vrot.slane %v434_v48, 4  ;;  %v436_v60 = vpack.c.bf16 %v416_v54, %v415_v51 }
  0x7a   : > { %v12433_v58 = vld [vmem:[#allocation2 + $0x10] sm:$0xf0]  ;;  %506 = vst.msk [vmem:[#allocation2 + $0x80] sm:$0xf0] %vm490_vm2, %v464_v47  ;;  %v437_v61 = vpack.c.bf16 %v418_v56, %v417_v55  ;;  %v890_v63 = vrot.slane %v12431_v57, 4  ;;  %v11886_v0 = vld [vmem:[#allocation6 + $0x8] sm:$0xff]  }
  0x7b   : > { %507 = vst.msk [vmem:[#allocation2 + $0x88] sm:$0xf] %vm492_vm3, %v464_v47  ;;  %v889_v62 = vrot.slane %v12433_v58, 4  ;;  %509 = vst.msk [vmem:[#allocation2 + $0x98] sm:$0xf] %vm492_vm3, %v465_v52  ;;  %v467_v1 = vrot.slane %v435_v53, 4 }
  0x7c   : > { %508 = vst.msk [vmem:[#allocation2 + $0x90] sm:$0xf0] %vm490_vm2, %v465_v52  ;;  %v12441_v2 = vld [vmem:[#allocation2 + $0x28] sm:$0xf]  ;;  %v12443_v3 = vld [vmem:[#allocation2 + $0x20] sm:$0xf0] }
  0x7d   : > { %510 = vst.msk [vmem:[#allocation2 + $0xa0] sm:$0xf0] %vm490_vm2, %v466_v59  ;;  %v468_v5 = vrot.slane %v436_v60, 4  ;;  %v469_v6 = vrot.slane %v437_v61, 4  ;;  %v891_v7 = vsel %vm885_vm1, %v889_v62, %v890_v63  ;;  %v892_v8 = vrot.slane %v12443_v3, 4  ;;  %v11887_v19 = vld [vmem:[#allocation6 + $0x10] sm:$0xff]  }
  0x7e   : > { %511 = vst.msk [vmem:[#allocation2 + $0xa8] sm:$0xf] %vm492_vm3, %v466_v59  ;;  %v893_v9 = vrot.slane %v12441_v2, 4  ;;  %v12450_v10 = vld [vmem:[#allocation2 + $0x38] sm:$0xf]  ;;  %10584 = vmatmul.mubr.msk.bf16.vlgmr.msra.gmra.mrb[0].mxu0 %vm273_vm0, %v891_v7  ;;  %v419_v27 = vld [vmem:[%s12369_s6 + $0xd0] sm:$0xff] }
  0x7f   : > { %v12452_v11 = vld [vmem:[#allocation2 + $0x30] sm:$0xf0]  ;;  %512 = vst.msk [vmem:[#allocation2 + $0xb0] sm:$0xf0] %vm490_vm2, %v467_v1  ;;  %v12457_v12 = vld [vmem:[#allocation2 + $0x48] sm:$0xf]  ;;  %10616 = vmatpush3.bf16.msra.mxu0 %v12400_v25 }
  0x80   : > { %513 = vst.msk [vmem:[#allocation2 + $0xb8] sm:$0xf] %vm492_vm3, %v467_v1  ;;  %v12459_v13 = vld [vmem:[#allocation2 + $0x40] sm:$0xf0]  ;;  %515 = vst.msk [vmem:[#allocation2 + $0xc8] sm:$0xf] %vm492_vm3, %v468_v5  ;;  %v894_v14 = vsel %vm885_vm1, %v892_v8, %v893_v9  ;;  %10617 = vmatprep.subr.bf16.mxu0 %v11886_v0 }
  0x81   : > { %514 = vst.msk [vmem:[#allocation2 + $0xc0] sm:$0xf0] %vm490_vm2, %v468_v5  ;;  %516 = vst.msk [vmem:[#allocation2 + $0xd0] sm:$0xf0] %vm490_vm2, %v469_v6  ;;  %v895_v15 = vrot.slane %v12452_v11, 4  ;;  %v896_v16 = vrot.slane %v12450_v10, 4  ;;  %10587 = vmatprep.mubr.msk.bf16.mxu0 %vm273_vm0, %v894_v14 }
  0x82   : > { %517 = vst.msk [vmem:[#allocation2 + $0xd8] sm:$0xf] %vm492_vm3, %v469_v6  ;;  %v898_v17 = vrot.slane %v12459_v13, 4  ;;  %v899_v18 = vrot.slane %v12457_v12, 4  ;;  %v12474_v22 = vld [vmem:[#allocation2 + $0x58] sm:$0xf] }
  0x83   : > { %v897_v20 = vsel %vm885_vm1, %v895_v15, %v896_v16  ;;  %10618 = vmatpush3.bf16.msra.mxu0 %v11886_v0  ;;  %v12476_v23 = vld [vmem:[#allocation2 + $0x50] sm:$0xf0]  ;;  %v11888_v24 = vld [vmem:[#allocation6 + $0x18] sm:$0xff]   ;;  %v12478_v25 = vld [vmem:[#allocation2 + $0x68] sm:$0xf]  ;;  %v902_v29 = vrot.slane %v12474_v22, 4 }
  0x84   : > { %v900_v21 = vsel %vm885_vm1, %v898_v17, %v899_v18  ;;  %10619 = vmatprep.subr.bf16.mxu0 %v11887_v19  ;;  %v12480_v26 = vld [vmem:[#allocation2 + $0x60] sm:$0xf0]  ;;  %v901_v28 = vrot.slane %v12476_v23, 4  ;;  %v905_v32 = vrot.slane %v12478_v25, 4  ;;  %v420_v33 = vld [vmem:[%s12369_s6 + $0xd8] sm:$0xff]  ;;  %v422_v36 = vld [vmem:[%s12369_s6 + $0xe8] sm:$0xff] }
  0x85   : > { %v904_v31 = vrot.slane %v12480_v26, 4  ;;  %v421_v34 = vld [vmem:[%s12369_s6 + $0xe0] sm:$0xff]  ;;  %v438_v35 = vpack.c.bf16 %v420_v33, %v419_v27  ;;  %v285_v38 = vld [vmem:[#allocation2 + $0x10] sm:$0x8]  ;;  %v12497_v39 = vld [vmem:[#allocation2 + $0x78] sm:$0xf] }
  0x86   : > { %10588 = vmatmul.mubr.msk.bf16.gmra.mrb[4].mxu0 %vm273_vm0, %v897_v20  ;;  %v282_v37 = vld [vmem:[#allocation2] sm:$0x8]  ;;  %v439_v40 = vpack.c.bf16 %v422_v36, %v421_v34  ;;  %v286_v42 = vsel %vm12488_vm6, 0, %v285_v38  ;;  %v903_v43 = vsel %vm885_vm1, %v901_v28, %v902_v29  ;;  %v12504_v44 = vld [vmem:[#allocation2 + $0x70] sm:$0xf0]  ;;  %v908_v61 = vrot.slane %v12497_v39, 4 }
  0x87   : > { %10591 = vmatprep.mubr.msk.bf16.mxu0 %vm273_vm0, %v900_v21  ;;  %10620 = vmatpush3.bf16.msra.mxu0 %v11887_v19  ;;  %v283_v41 = vsel %vm12488_vm6, 0, %v282_v37  ;;  %v470_v45 = vrot.slane %v438_v35, 4  ;;  %287 = vst [vmem:[#allocation2 + $0x10] sm:$0x8] %v286_v42  ;;  %v12506_v46 = vld [vmem:[#allocation6 + $0x40] sm:$0xff]   ;;  %v906_v48 = vsel %vm885_vm1, %v904_v31, %v905_v32  ;;  %v907_v60 = vrot.slane %v12504_v44, 4 }
  0x88   : > { %10621 = vmatprep.subr.bf16.mxu0 %v11888_v24  ;;  %284 = vst [vmem:[#allocation2] sm:$0x8] %v283_v41  ;;  %v288_v47 = vld [vmem:[#allocation2 + $0x20] sm:$0x8]  ;;  %v12509_v49 = vld [vmem:[#allocation2 + $0x88] sm:$0xf] }
  0x89   : > { %v471_v50 = vrot.slane %v439_v40, 4  ;;  %v289_v51 = vsel %vm12488_vm6, 0, %v288_v47  ;;  %v291_v52 = vld [vmem:[#allocation2 + $0x30] sm:$0x8]  ;;  %v12513_v53 = vld [vmem:[#allocation2 + $0x80] sm:$0xf0]  ;;  %v909_v6 = vsel %vm885_vm1, %v907_v60, %v908_v61 }
  0x8a   : > { %518 = vst.msk [vmem:[#allocation2 + $0xe0] sm:$0xf0] %vm490_vm2, %v470_v45  ;;  %290 = vst [vmem:[#allocation2 + $0x20] sm:$0x8] %v289_v51  ;;  %v292_v54 = vsel %vm12488_vm6, 0, %v291_v52  ;;  %v910_v62 = vrot.slane %v12513_v53, 4 }
  0x8b   : > { %10622 = vmatpush3.bf16.msra.mxu0 %v11888_v24  ;;  %519 = vst.msk [vmem:[#allocation2 + $0xe8] sm:$0xf] %vm492_vm3, %v470_v45  ;;  %v294_v55 = vld [vmem:[#allocation2 + $0x40] sm:$0x8]  ;;  %521 = vst.msk [vmem:[#allocation2 + $0xf8] sm:$0xf] %vm492_vm3, %v471_v50 }
  0x8c   : > { %10655 = vmatprep.subr.bf16.mxu0 %v12506_v46  ;;  %520 = vst.msk [vmem:[#allocation2 + $0xf0] sm:$0xf0] %vm490_vm2, %v471_v50  ;;  %293 = vst [vmem:[#allocation2 + $0x30] sm:$0x8] %v292_v54  ;;  %v295_v56 = vsel %vm12488_vm6, 0, %v294_v55  ;;  %v911_v63 = vrot.slane %v12509_v49, 4 }
  0x8d   : > { %v297_v59 = vld [vmem:[#allocation2 + $0x50] sm:$0x8]  ;;  %296 = vst [vmem:[#allocation2 + $0x40] sm:$0x8] %v295_v56  ;;  %v300_v1 = vld [vmem:[#allocation2 + $0x60] sm:$0x8] }
  0x8e   : > { %10592 = vmatmul.mubr.msk.bf16.gmra.mrb[8].mxu0 %vm273_vm0, %v903_v43  ;;  %v298_v0 = vsel %vm12488_vm6, 0, %v297_v59  ;;  %v301_v5 = vsel %vm12488_vm6, 0, %v300_v1  ;;  %v912_v7 = vsel %vm885_vm1, %v910_v62, %v911_v63  ;;  %v12536_v8 = vld [vmem:[#allocation2 + $0x98] sm:$0xf]  ;;  %v12538_v9 = vld [vmem:[#allocation2 + $0x90] sm:$0xf0] }
  0x8f   : > { %10595 = vmatprep.mubr.msk.bf16.mxu0 %vm273_vm0, %v906_v48  ;;  %299 = vst [vmem:[#allocation2 + $0x50] sm:$0x8] %v298_v0  ;;  %302 = vst [vmem:[#allocation2 + $0x60] sm:$0x8] %v301_v5  ;;  %v12540_v14 = vld [vmem:[#allocation2 + $0xa8] sm:$0xf] }
  0x90   : > { %v12542_v15 = vld [vmem:[#allocation2 + $0xa0] sm:$0xf0]  ;;  %v913_v16 = vrot.slane %v12538_v9, 4  ;;  %v914_v17 = vrot.slane %v12536_v8, 4  ;;  %v917_v19 = vrot.slane %v12540_v14, 4  ;;  %v566_v59 = vshrl.u32 %v12383_v4, 16 }
  0x91   : > { %v916_v18 = vrot.slane %v12542_v15, 4  ;;  %v12551_v21 = vld [vmem:[#allocation2 + $0xb8] sm:$0xf]  ;;  %v12554_v27 = vld [vmem:[#allocation2 + $0xb0] sm:$0xf0]  ;;  %v569_v60 = vshll.u32 %v12383_v4, 16 }
  0x92   : > { %v915_v20 = vsel %vm885_vm1, %v913_v16, %v914_v17  ;;  %v849_v28 = vld [vmem:[#allocation2 + $0xc0] sm:$0xf0]  ;;  %v12556_v29 = vld [vmem:[#allocation2 + $0xc8] sm:$0xf]  ;;  %v303_v31 = vld [vmem:[#allocation2 + $0x70] sm:$0x8] }
  0x93   : > { %v918_v24 = vsel %vm885_vm1, %v916_v18, %v917_v19  ;;  %v306_v32 = vld [vmem:[#allocation2 + $0x80] sm:$0x8]  ;;  %v919_v33 = vrot.slane %v12554_v27, 4  ;;  %v920_v34 = vrot.slane %v12551_v21, 4  ;;  %v922_v35 = vrot.slane %v849_v28, 4  ;;  %s14215_s11 = scalar_lea.vmem [#allocation9], %s9842_s17 }
  0x94   : > { %v309_v36 = vld [vmem:[#allocation2 + $0x90] sm:$0x8]  ;;  %v923_v37 = vrot.slane %v12556_v29, 4  ;;  %v304_v38 = vsel %vm12488_vm6, 0, %v303_v31  ;;  %v307_v40 = vsel %vm12488_vm6, 0, %v306_v32  ;;  %v568_v17 = vrot.slane %v566_v59, 3 }
  0x95   : > { %305 = vst [vmem:[#allocation2 + $0x70] sm:$0x8] %v304_v38  ;;  %v12567_v41 = vld [vmem:[#allocation2 + $0xd8] sm:$0xf]  ;;  %308 = vst [vmem:[#allocation2 + $0x80] sm:$0x8] %v307_v40  ;;  %v921_v43 = vsel %vm885_vm1, %v919_v33, %v920_v34 }
  0x96   : > { %10596 = vmatmul.mubr.msk.bf16.gmra.mrb[12].mxu0 %vm273_vm0, %v909_v6  ;;  %v312_v42 = vld [vmem:[#allocation2 + $0xa0] sm:$0x8]  ;;  %v850_v45 = vld [vmem:[#allocation2 + $0xd0] sm:$0xf0]  ;;  %v310_v48 = vsel %vm12488_vm6, 0, %v309_v36  ;;  %v924_v50 = vsel %vm885_vm1, %v922_v35, %v923_v37  ;;  %v926_v62 = vrot.slane %v12567_v41, 4 }
  0x97   : > { %10599 = vmatprep.mubr.msk.bf16.mxu0 %vm273_vm0, %v912_v7  ;;  %v525_v47 = vld [vmem:[#allocation2] sm:$0xf8]  ;;  %v12573_v51 = vld [vmem:[#allocation2 + $0xe8] sm:$0xf]  ;;  %311 = vst [vmem:[#allocation2 + $0x90] sm:$0x8] %v310_v48 }
  0x98   : > { %v851_v52 = vld [vmem:[#allocation2 + $0xe0] sm:$0xf0]  ;;  %v315_v54 = vld [vmem:[#allocation2 + $0xb0] sm:$0x8]  ;;  %v313_v55 = vsel %vm12488_vm6, 0, %v312_v42  ;;  %v925_v61 = vrot.slane %v850_v45, 4 }
  0x99   : > { %v318_v56 = vld [vmem:[#allocation2 + $0xc0] sm:$0x8]  ;;  %314 = vst [vmem:[#allocation2 + $0xa0] sm:$0x8] %v313_v55  ;;  %v558_v63 = vshrl.u32 %v525_v47, 16  ;;  %v316_v0 = vsel %vm12488_vm6, 0, %v315_v54 }
  0x9a   : > { %v928_v1 = vrot.slane %v851_v52, 4  ;;  %v929_v5 = vrot.slane %v12573_v51, 4  ;;  %v561_v6 = vshll.u32 %v525_v47, 16  ;;  %317 = vst [vmem:[#allocation2 + $0xb0] sm:$0x8] %v316_v0  ;;  %v319_v4 = vsel %vm12488_vm6, 0, %v318_v56 }
  0x9b   : > { %320 = vst [vmem:[#allocation2 + $0xc0] sm:$0x8] %v319_v4  ;;  %v321_v7 = vld [vmem:[#allocation2 + $0xd0] sm:$0x8]  ;;  %v927_v16 = vsel %vm885_vm1, %v925_v61, %v926_v62  ;;  %v571_v18 = vrot.slane %v569_v60, 4  ;;  %v560_v31 = vrot.slane %v558_v63, 3 }
  0x9c   : > { %v527_v19 = vld [vmem:[#allocation2 + $0x10] sm:$0xf8]  ;;  %v563_v32 = vrot.slane %v561_v6, 4  ;;  %v583_v33 = vshrl.u32 %v12431_v57, 16  ;;  %v586_v34 = vshll.u32 %v12431_v57, 16  ;;  %v322_v36 = vsel %vm12488_vm6, 0, %v321_v7 }
  0x9d   : > { %v852_v28 = vld [vmem:[#allocation2 + $0xf0] sm:$0xf0]  ;;  %v529_v35 = vld [vmem:[#allocation2 + $0x20] sm:$0xf8]  ;;  %v575_v37 = vshrl.u32 %v527_v19, 16  ;;  %v578_v38 = vshll.u32 %v527_v19, 16  ;;  %v572_v48 = vor.u32 %v571_v18, %v568_v17 }
  0x9e   : > { %10600 = vmatmul.mubr.msk.bf16.gmra.mrb[16].mxu0 %vm273_vm0, %v915_v20  ;;  %v930_v20 = vsel %vm885_vm1, %v928_v1, %v929_v5  ;;  %v600_v40 = vshrl.u32 %v12441_v2, 16  ;;  %v603_v42 = vshll.u32 %v12441_v2, 16  ;;  %323 = vst [vmem:[#allocation2 + $0xd0] sm:$0x8] %v322_v36  ;;  %v324_v47 = vld [vmem:[#allocation2 + $0xe0] sm:$0x8]  ;;  %v564_v57 = vor.u32 %v563_v32, %v560_v31 }
  0x9f   : > { %10603 = vmatprep.mubr.msk.bf16.mxu0 %vm273_vm0, %v918_v24  ;;  %v12589_v24 = vld [vmem:[#allocation2 + $0xf8] sm:$0xf]  ;;  %v595_v52 = vshll.u32 %v529_v35, 16  ;;  %v585_v54 = vrot.slane %v583_v33, 3  ;;  %v588_v55 = vrot.slane %v586_v34, 4  ;;  %v617_v60 = vshrl.u32 %v12450_v10, 16 }
  0xa0   : > { %v932_v45 = vrot.slane %v12589_v24, 4  ;;  %v327_v56 = vld [vmem:[#allocation2 + $0xf0] sm:$0x8]  ;;  %v602_v59 = vrot.slane %v600_v40, 3  ;;  %v620_v2 = vshll.u32 %v12450_v10, 16  ;;  %v325_v61 = vsel %vm12488_vm6, 0, %v324_v47 }
  0xa1   : > { %v577_v63 = vrot.slane %v575_v37, 3  ;;  %v580_v0 = vrot.slane %v578_v38, 4  ;;  %v605_v1 = vrot.slane %v603_v42, 4  ;;  %v531_v5 = vld [vmem:[#allocation2 + $0x30] sm:$0xf8]  ;;  %v573_v6 = vsel %vm337_vm7, %v564_v57, %v572_v48  ;;  %s10214_s28 = sshll.u32 %s12212_s22, 12 }
  0xa2   : > { %326 = vst [vmem:[#allocation2 + $0xe0] sm:$0x8] %v325_v61  ;;  %v597_v7 = vrot.slane %v595_v52, 4  ;;  %v533_v17 = vld [vmem:[#allocation2 + $0x40] sm:$0xf8]  ;;  %v589_v19 = vor.u32 %v588_v55, %v585_v54  ;;  %v609_v34 = vshrl.u32 %v531_v5, 16  ;;  %s14337_s16 = scalar_lea.hbm %s14395_s5, %s10214_s28 }
  0xa3   : > { %v339_v18 = vld [vmem:[#allocation2 + $0x8] sm:$0x10]  ;;  %v342_v31 = vld [vmem:[#allocation2 + $0x18] sm:$0x10]  ;;  %v581_v32 = vor.u32 %v580_v0, %v577_v63  ;;  %v606_v33 = vor.u32 %v605_v1, %v602_v59  ;;  %v626_v38 = vshrl.u32 %v533_v17, 16  ;;  %v629_v40 = vshll.u32 %v533_v17, 16 }
  0xa4   : > { %v345_v36 = vld [vmem:[#allocation2 + $0x28] sm:$0x10]  ;;  %v340_v42 = vsel %vm12610_vm9, 0, %v339_v18  ;;  %v535_v57 = vld [vmem:[#allocation2 + $0x50] sm:$0xf8]  ;;  %v611_v52 = vrot.slane %v609_v34, 3 }
  0xa5   : > { %341 = vst [vmem:[#allocation2 + $0x8] sm:$0x10] %v340_v42  ;;  %v346_v48 = vsel %vm12610_vm9, 0, %v345_v36  ;;  %v348_v55 = vld [vmem:[#allocation2 + $0x38] sm:$0x10]  ;;  %v628_v59 = vrot.slane %v626_v38, 3 }
  0xa6   : > { %10604 = vmatmul.mubr.msk.bf16.gmra.mrb[20].mxu0 %vm273_vm0, %v921_v43  ;;  %v931_v43 = vrot.slane %v852_v28, 4  ;;  %v637_v28 = vshll.u32 %v12457_v12, 16  ;;  %347 = vst [vmem:[#allocation2 + $0x28] sm:$0x10] %v346_v48  ;;  %v11890_v61 = vld [vmem:[#allocation6 + $0x48] sm:$0xff]   ;;  %v651_v0 = vshrl.u32 %v12474_v22, 16 }
  0xa7   : > { %10607 = vmatprep.mubr.msk.bf16.mxu0 %vm273_vm0, %v924_v50  ;;  %v592_v50 = vshrl.u32 %v529_v35, 16  ;;  %v612_v35 = vshll.u32 %v531_v5, 16  ;;  %v351_v1 = vld [vmem:[#allocation2 + $0x48] sm:$0x10]  ;;  %v643_v5 = vshrl.u32 %v535_v57, 16  ;;  %v11892_v42 = vld [vmem:[#allocation6 + $0x58] sm:$0xff]  }
  0xa8   : > { %v933_v62 = vsel %vm885_vm1, %v931_v43, %v932_v45  ;;  %v619_v43 = vrot.slane %v617_v60, 3  ;;  %v622_v45 = vrot.slane %v620_v2, 4  ;;  %v631_v60 = vrot.slane %v629_v40, 4  ;;  %v354_v36 = vld [vmem:[#allocation2 + $0x58] sm:$0x10]  ;;  %s9741_s30 = sshll.u32 %s14215_s11, 4  ;;  %s14339_s30 = int_to_ptr.vmem [resolvable:$true] %s9741_s30 }
  0xa9   : > { %v594_v4 = vrot.slane %v592_v50, 3  ;;  %v590_v50 = vsel %vm337_vm7, %v581_v32, %v589_v19  ;;  %v614_v54 = vrot.slane %v612_v35, 4  ;;  %v639_v2 = vrot.slane %v637_v28, 4  ;;  %v11891_v32 = vld [vmem:[#allocation6 + $0x50] sm:$0xff]   ;;  %s9728_s9 = scalar_lea.sflag [#allocation5], %s12363_s29  ;;  %s12078_s12 = scalar_lea.vmem %s14339_s30, 4096 }
  0xaa   : > { %v623_v63 = vor.u32 %v622_v45, %v619_v43  ;;  %v668_v19 = vshrl.u32 %v12478_v25, 16  ;;  %v653_v34 = vrot.slane %v651_v0, 3  ;;  %p12079_p11 = scmp.ne.s32.totalorder %s14339_s30, %s12078_s12  ;;  %p14413_p0 = scmp.ne.s32.totalorder %s14404_s23, 0 }
  0xab   : > { %v598_v37 = vor.u32 %v597_v7, %v594_v4  ;;  %v654_v4 = vshll.u32 %v12474_v22, 16  ;;  %v349_v7 = vsel %vm12610_vm9, 0, %v348_v55  ;;  %v352_v22 = vsel %vm12610_vm9, 0, %v351_v1  ;;  %v12647_v1 = vld [vmem:[#allocation6 + $0x60] sm:$0xff]   ;;  %s12158_s13 = smov [#allocation9]  }
  0xac   : > { %350 = vst [vmem:[#allocation2 + $0x38] sm:$0x10] %v349_v7  ;;  %353 = vst [vmem:[#allocation2 + $0x48] sm:$0x10] %v352_v22  ;;  %v670_v45 = vrot.slane %v668_v19, 3  ;;  %p12080_p1 = pnand %p12079_p11, %p14413_p0  ;;  %s12082_s17 = sshll.u32 %s12158_s13, 4  ;;  %s12083_s17 = int_to_ptr.vmem [resolvable:$false] %s12082_s17 }
  0xad   : > { %v656_v35 = vrot.slane %v654_v4, 4  ;;  %s12084_s7 = scalar_lea.vmem %s12083_s17, 8192  ;;  %p12085_p7 = scmp.lt.s32.totalorder %s14339_s30, %s12083_s17 }
  0xae   : > { %10608 = vmatmul.mubr.msk.bf16.gmra.mrb[24].mxu0 %vm273_vm0, %v927_v16  ;;  %v328_v16 = vsel %vm12488_vm6, 0, %v327_v56  ;;  %v607_v56 = vsel %vm337_vm7, %v598_v37, %v606_v33  ;;  %v645_v33 = vrot.slane %v643_v5, 3  ;;  %v360_v5 = vld [vmem:[#allocation2 + $0x78] sm:$0x10]  ;;  %p12081_p3 = pneg %p12080_p1  ;;  %p12086_p9 = scmp.lt.s32.totalorder %s12084_s7, %s12078_s12 }
  0xaf   : > { %10611 = vmatprep.mubr.msk.bf16.mxu0 %vm273_vm0, %v930_v20  ;;  %329 = vst [vmem:[#allocation2 + $0xf0] sm:$0x8] %v328_v16  ;;  %v634_v20 = vshrl.u32 %v12457_v12, 16  ;;  %v343_v12 = vsel %vm12610_vm9, 0, %v342_v31  ;;  %v615_v16 = vor.u32 %v614_v54, %v611_v52  ;;  %v671_v31 = vshll.u32 %v12478_v25, 16 }
  0xb0   : > { %344 = vst [vmem:[#allocation2 + $0x18] sm:$0x10] %v343_v12  ;;  %v539_v12 = vld [vmem:[#allocation2 + $0x70] sm:$0xf8]  ;;  %v685_v52 = vshrl.u32 %v12497_v39, 16  ;;  %v688_v54 = vshll.u32 %v12497_v39, 16  ;;  %p12087_p12 = por %p12086_p9, %p12085_p7 }
  0xb1   : > { %v636_v47 = vrot.slane %v634_v20, 3  ;;  %v632_v20 = vor.u32 %v631_v60, %v628_v59  ;;  %v624_v37 = vsel %vm337_vm7, %v615_v16, %v623_v63  ;;  %v673_v25 = vrot.slane %v671_v31, 4  ;;  %v363_v16 = vld [vmem:[#allocation2 + $0x88] sm:$0x10] }
  0xb2   : > { %v677_v55 = vshrl.u32 %v539_v12, 16  ;;  %v702_v59 = vshrl.u32 %v12509_v49, 16  ;;  %v705_v60 = vshll.u32 %v12509_v49, 16  ;;  %v690_v4 = vrot.slane %v688_v54, 4  ;;  %p12088_p2 = pnand %p12087_p12, %p12081_p3 }
  0xb3   : > { %v640_v28 = vor.u32 %v639_v2, %v636_v47  ;;  %v541_v47 = vld [vmem:[#allocation2 + $0x80] sm:$0xf8]  ;;  %v357_v2 = vld [vmem:[#allocation2 + $0x68] sm:$0x10]  ;;  %v361_v22 = vsel %vm12610_vm9, 0, %v360_v5  ;;  %v753_v5 = vshrl.u32 %v12551_v21, 16 }
  0xb4   : > { %v694_v63 = vshrl.u32 %v541_v47, 16  ;;  %v697_v0 = vshll.u32 %v541_v47, 16  ;;  %v358_v7 = vsel %vm12610_vm9, 0, %v357_v2  ;;  %v707_v19 = vrot.slane %v705_v60, 4  ;;  %362 = vst [vmem:[#allocation2 + $0x78] sm:$0x10] %v361_v22 }
  0xb5   : > { %v641_v43 = vsel %vm337_vm7, %v632_v20, %v640_v28  ;;  %359 = vst [vmem:[#allocation2 + $0x68] sm:$0x10] %v358_v7  ;;  %v770_v7 = vshrl.u32 %v12556_v29, 16  ;;  %v755_v22 = vrot.slane %v753_v5, 3  ;;  %v2922_v30 = vld [vmem:[#allocation2 + $0x38] sm:$0x1f] }
  0xb6   : > { %10612 = vmatmul.mubr.msk.bf16.gmra.mrb[28].mxu0 %vm273_vm0, %v933_v62  ;;  %v537_v62 = vld [vmem:[#allocation2 + $0x60] sm:$0xf8]  ;;  %v696_v28 = vrot.slane %v694_v63, 3  ;;  %v699_v31 = vrot.slane %v697_v0, 4  ;;  %v547_v63 = vld [vmem:[#allocation2 + $0xb0] sm:$0xf8] }
  0xb7   : > { %10623 = vmatprep.mubr.msk.bf16.mxu0 %vm273_vm0, %v573_v6  ;;  %v646_v6 = vshll.u32 %v535_v57, 16  ;;  %v660_v17 = vshrl.u32 %v537_v62, 16  ;;  %v663_v18 = vshll.u32 %v537_v62, 16  ;;  %v355_v57 = vsel %vm12610_vm9, 0, %v354_v36  ;;  %v372_v0 = vld [vmem:[#allocation2 + $0xb8] sm:$0x10] }
  0xb8   : > { %356 = vst [vmem:[#allocation2 + $0x58] sm:$0x10] %v355_v57  ;;  %v674_v62 = vor.u32 %v673_v25, %v670_v45  ;;  %v700_v47 = vor.u32 %v699_v31, %v696_v28 }
  0xb9   : > { %v662_v38 = vrot.slane %v660_v17, 3  ;;  %v665_v40 = vrot.slane %v663_v18, 4  ;;  %v679_v17 = vrot.slane %v677_v55, 3  ;;  %v704_v18 = vrot.slane %v702_v59, 3 }
  0xbe   : > { %10624 = vmatmul.mubr.msk.bf16.vlgmr.msra.gmra.mrb[0].mxu0 %vm273_vm0, %v590_v50  ;;  %v657_v50 = vor.u32 %v656_v35, %v653_v34  ;;  %v364_v34 = vsel %vm12610_vm9, 0, %v363_v16  ;;  %v366_v35 = vld [vmem:[#allocation2 + $0x98] sm:$0x10]  ;;  %v773_v16 = vshll.u32 %v12556_v29, 16 }
  0xbf   : > { %10656 = vmatpush3.bf16.msra.mxu0 %v12506_v46  ;;  %10627 = vmatprep.mubr.msk.bf16.mxu0 %vm273_vm0, %v607_v56  ;;  %v648_v46 = vrot.slane %v646_v6, 4  ;;  %v680_v56 = vshll.u32 %v539_v12, 16  ;;  %v687_v6 = vrot.slane %v685_v52, 3  ;;  %365 = vst [vmem:[#allocation2 + $0x88] sm:$0x10] %v364_v34 }
  0xc0   : > { %10657 = vmatprep.subr.bf16.mxu0 %v11890_v61  ;;  %v369_v12 = vld [vmem:[#allocation2 + $0xa8] sm:$0x10]  ;;  %v775_v34 = vrot.slane %v773_v16, 4 }
  0xc1   : > { %v649_v48 = vor.u32 %v648_v46, %v645_v33  ;;  %v682_v49 = vrot.slane %v680_v56, 4  ;;  %v719_v33 = vshrl.u32 %v12536_v8, 16  ;;  %v545_v46 = vld [vmem:[#allocation2 + $0xa0] sm:$0xf8]  ;;  %v691_v36 = vor.u32 %v690_v4, %v687_v6 }
  0xc2   : > { %v728_v57 = vshrl.u32 %v545_v46, 16  ;;  %v549_v6 = vld [vmem:[#allocation2 + $0xc0] sm:$0xf8] }
  0xc3   : > { %10658 = vmatpush3.bf16.msra.mxu0 %v11890_v61  ;;  %v666_v61 = vor.u32 %v665_v40, %v662_v38  ;;  %v658_v39 = vsel %vm337_vm7, %v649_v48, %v657_v50  ;;  %v736_v38 = vshrl.u32 %v12540_v14, 16  ;;  %v739_v40 = vshll.u32 %v12540_v14, 16 }
  0xc4   : > { %10659 = vmatprep.subr.bf16.mxu0 %v11891_v32  ;;  %v731_v48 = vshll.u32 %v545_v46, 16  ;;  %v367_v50 = vsel %vm12610_vm9, 0, %v366_v35  ;;  %v370_v14 = vsel %vm12610_vm9, 0, %v369_v12  ;;  %v772_v46 = vrot.slane %v770_v7, 3  ;;  %v378_v35 = vld [vmem:[#allocation2 + $0xd8] sm:$0x10] }
  0xc5   : > { %v675_v20 = vsel %vm337_vm7, %v666_v61, %v674_v62  ;;  %368 = vst [vmem:[#allocation2 + $0x98] sm:$0x10] %v367_v50  ;;  %v738_v54 = vrot.slane %v736_v38, 3  ;;  %v741_v60 = vrot.slane %v739_v40, 4  ;;  %371 = vst [vmem:[#allocation2 + $0xa8] sm:$0x10] %v370_v14 }
  0xc6   : > { %10628 = vmatmul.mubr.msk.bf16.gmra.mrb[4].mxu0 %vm273_vm0, %v624_v37  ;;  %v722_v37 = vshll.u32 %v12536_v8, 16  ;;  %v721_v8 = vrot.slane %v719_v33, 3  ;;  %v730_v61 = vrot.slane %v728_v57, 3  ;;  %v733_v62 = vrot.slane %v731_v48, 4 }
  0xc7   : > { %10631 = vmatprep.mubr.msk.bf16.mxu0 %vm273_vm0, %v641_v43  ;;  %10660 = vmatpush3.bf16.msra.mxu0 %v11891_v32  ;;  %v543_v32 = vld [vmem:[#allocation2 + $0x90] sm:$0xf8]  ;;  %v708_v43 = vor.u32 %v707_v19, %v704_v18  ;;  %v748_v18 = vshll.u32 %v547_v63, 16  ;;  %v373_v19 = vsel %vm12610_vm9, 0, %v372_v0  ;;  %v742_v31 = vor.u32 %v741_v60, %v738_v54 }
  0xc8   : > { %10661 = vmatprep.subr.bf16.mxu0 %v11892_v42  ;;  %v711_v45 = vshrl.u32 %v543_v32, 16  ;;  %v714_v25 = vshll.u32 %v543_v32, 16  ;;  %v724_v52 = vrot.slane %v722_v37, 4  ;;  %v734_v28 = vor.u32 %v733_v62, %v730_v61  ;;  %374 = vst [vmem:[#allocation2 + $0xb8] sm:$0x10] %v373_v19 }
  0xc9   : > { %v709_v2 = vsel %vm337_vm7, %v700_v47, %v708_v43  ;;  %v765_v32 = vshll.u32 %v549_v6, 16  ;;  %v750_v38 = vrot.slane %v748_v18, 4  ;;  %v553_v47 = vld [vmem:[#allocation2 + $0xe0] sm:$0xf8]  ;;  %v379_v57 = vsel %vm12610_vm9, 0, %v378_v35 }
  0xca   : > { %v713_v56 = vrot.slane %v711_v45, 3  ;;  %v716_v59 = vrot.slane %v714_v25, 4  ;;  %v725_v4 = vor.u32 %v724_v52, %v721_v8  ;;  %v743_v40 = vsel %vm337_vm7, %v734_v28, %v742_v31  ;;  %v551_v45 = vld [vmem:[#allocation2 + $0xd0] sm:$0xf8]  ;;  %v381_v25 = vld [vmem:[#allocation2 + $0xe8] sm:$0x10] }
  0xcb   : > { %10662 = vmatpush3.bf16.msra.mxu0 %v11892_v42  ;;  %v683_v42 = vor.u32 %v682_v49, %v679_v17  ;;  %v745_v49 = vshrl.u32 %v547_v63, 16  ;;  %v767_v43 = vrot.slane %v765_v32, 4  ;;  %v776_v48 = vor.u32 %v775_v34, %v772_v46  ;;  %380 = vst [vmem:[#allocation2 + $0xd8] sm:$0x10] %v379_v57  ;;  %v555_v18 = vld [vmem:[#allocation2 + $0xf0] sm:$0xf8] }
  0xcc   : > { %10695 = vmatprep.subr.bf16.mxu0 %v12647_v1  ;;  %v717_v17 = vor.u32 %v716_v59, %v713_v56  ;;  %v787_v50 = vshrl.u32 %v12567_v41, 16  ;;  %v790_v8 = vshll.u32 %v12567_v41, 16  ;;  %v804_v52 = vshrl.u32 %v12573_v51, 16  ;;  %v384_v59 = vld [vmem:[#allocation2 + $0xf8] sm:$0x10] }
  0xcd   : > { %v692_v55 = vsel %vm337_vm7, %v683_v42, %v691_v36  ;;  %v747_v37 = vrot.slane %v745_v49, 3  ;;  %v779_v14 = vshrl.u32 %v551_v45, 16  ;;  %v382_v56 = vsel %vm12610_vm9, 0, %v381_v25  ;;  %v11953_v19 = vld [vmem:[#allocation2] sm:$0xf0] }
  0xce   : > { %10632 = vmatmul.mubr.msk.bf16.gmra.mrb[8].mxu0 %vm273_vm0, %v658_v39  ;;  %v756_v39 = vshll.u32 %v12551_v21, 16  ;;  %v762_v21 = vshrl.u32 %v549_v6, 16  ;;  %v726_v36 = vsel %vm337_vm7, %v717_v17, %v725_v4  ;;  %v799_v61 = vshll.u32 %v553_v47, 16  ;;  %383 = vst [vmem:[#allocation2 + $0xe8] sm:$0x10] %v382_v56 }
  0xcf   : > { %10635 = vmatprep.mubr.msk.bf16.mxu0 %vm273_vm0, %v675_v20  ;;  %v375_v20 = vld [vmem:[#allocation2 + $0xc8] sm:$0x10]  ;;  %v751_v54 = vor.u32 %v750_v38, %v747_v37  ;;  %v807_v62 = vshll.u32 %v12573_v51, 16  ;;  %v789_v63 = vrot.slane %v787_v50, 3  ;;  %v792_v41 = vrot.slane %v790_v8, 4 }
  0xd0   : > { %v758_v33 = vrot.slane %v756_v39, 4  ;;  %v376_v29 = vsel %vm12610_vm9, 0, %v375_v20  ;;  %v764_v42 = vrot.slane %v762_v21, 3  ;;  %v385_v0 = vsel %vm12610_vm9, 0, %v384_v59  ;;  %v1409_v28 = vld [vmem:[#allocation2 + $0x8] sm:$0x1f] }
  0xd1   : > { %377 = vst [vmem:[#allocation2 + $0xc8] sm:$0x10] %v376_v29  ;;  %v781_v39 = vrot.slane %v779_v14, 3  ;;  %v806_v4 = vrot.slane %v804_v52, 3  ;;  %386 = vst [vmem:[#allocation2 + $0xf8] sm:$0x10] %v385_v0 }
  0xd2   : > { %v759_v12 = vor.u32 %v758_v33, %v755_v22  ;;  %v768_v60 = vor.u32 %v767_v43, %v764_v42  ;;  %v801_v17 = vrot.slane %v799_v61, 4  ;;  %v809_v49 = vrot.slane %v807_v62, 4  ;;  %v1411_v8 = vld [vmem:[#allocation2 + $0x28] sm:$0x1f] }
  0xd3   : > { %v1427_v51 = vshrl.u32 %v11953_v19, 16  ;;  %v1430_v20 = vshll.u32 %v11953_v19, 16  ;;  %v821_v31 = vshrl.u32 %v12589_v24, 16  ;;  %v824_v21 = vshll.u32 %v12589_v24, 16 }
  0xd4   : > { %v760_v5 = vsel %vm337_vm7, %v751_v54, %v759_v12  ;;  %v777_v7 = vsel %vm337_vm7, %v768_v60, %v776_v48  ;;  %v793_v22 = vor.u32 %v792_v41, %v789_v63  ;;  %v813_v33 = vshrl.u32 %v555_v18, 16 }
  0xd5   : > { %v816_v46 = vshll.u32 %v555_v18, 16  ;;  %v810_v29 = vor.u32 %v809_v49, %v806_v4  ;;  %v1435_v35 = vshrl.u32 %v1409_v28, 16  ;;  %v1429_v37 = vrot.slane %v1427_v51, 4  ;;  %v1413_v18 = vld [vmem:[#allocation2 + $0x48] sm:$0x1f] }
  0xd6   : > { %10636 = vmatmul.mubr.msk.bf16.gmra.mrb[12].mxu0 %vm273_vm0, %v692_v55  ;;  %v782_v55 = vshll.u32 %v551_v45, 16  ;;  %v1432_v38 = vrot.slane %v1430_v20, 5  ;;  %v826_v42 = vrot.slane %v824_v21, 4  ;;  %v1444_v43 = vshrl.u32 %v12433_v58, 16 }
  0xd7   : > { %10639 = vmatprep.mubr.msk.bf16.mxu0 %vm273_vm0, %v709_v2  ;;  %v796_v2 = vshrl.u32 %v553_v47, 16  ;;  %v1447_v45 = vshll.u32 %v12433_v58, 16  ;;  %v815_v25 = vrot.slane %v813_v33, 3  ;;  %v818_v12 = vrot.slane %v816_v46, 4  ;;  %v1410_v47 = vld [vmem:[#allocation2 + $0x18] sm:$0x1f] }
  0xd8   : > { %v784_v6 = vrot.slane %v782_v55, 4  ;;  %v1437_v48 = vrot.slane %v1435_v35, 4  ;;  %v1461_v52 = vshrl.u32 %v12443_v3, 16  ;;  %v1464_v54 = vshll.u32 %v12443_v3, 16 }
  0xd9   : > { %v798_v16 = vrot.slane %v796_v2, 3  ;;  %v1452_v14 = vshrl.u32 %v1410_v47, 16  ;;  %v1455_v55 = vshll.u32 %v1410_v47, 16  ;;  %v819_v58 = vor.u32 %v818_v12, %v815_v25  ;;  %v1414_v12 = vld [vmem:[#allocation2 + $0x58] sm:$0x1f] }
  0xda   : > { %v785_v32 = vor.u32 %v784_v6, %v781_v39  ;;  %v1469_v59 = vshrl.u32 %v1411_v8, 16  ;;  %v1472_v60 = vshll.u32 %v1411_v8, 16  ;;  %v1433_v2 = vor.u32 %v1432_v38, %v1429_v37 }
  0xdb   : > { %v802_v34 = vor.u32 %v801_v17, %v798_v16  ;;  %v1446_v62 = vrot.slane %v1444_v43, 4  ;;  %v1449_v63 = vrot.slane %v1447_v45, 5  ;;  %v1463_v41 = vrot.slane %v1461_v52, 4  ;;  %v1412_v17 = vld [vmem:[#allocation2 + $0x38] sm:$0x1f]  ;;  %v11894_v45 = vld [vmem:[#allocation6 + $0x68] sm:$0xff]  }
  0xdc   : > { %v794_v24 = vsel %vm337_vm7, %v785_v32, %v793_v22  ;;  %v1466_v0 = vrot.slane %v1464_v54, 5  ;;  %v1457_v39 = vrot.slane %v1455_v55, 5  ;;  %v1478_v3 = vshrl.u32 %v12452_v11, 16  ;;  %v11954_v52 = vld [vmem:[#allocation2 + $0x60] sm:$0xf0] }
  0xdd   : > { %v811_v57 = vsel %vm337_vm7, %v802_v34, %v810_v29  ;;  %v1481_v6 = vshll.u32 %v12452_v11, 16  ;;  %v1474_v16 = vrot.slane %v1472_v60, 5  ;;  %v1495_v19 = vshrl.u32 %v12459_v13, 16 }
  0xde   : > { %10640 = vmatmul.mubr.msk.bf16.gmra.mrb[16].mxu0 %vm273_vm0, %v726_v36  ;;  %v1438_v36 = vshll.u32 %v1409_v28, 16  ;;  %v1498_v51 = vshll.u32 %v12459_v13, 16  ;;  %v1486_v20 = vshrl.u32 %v1412_v17, 16  ;;  %v1489_v28 = vshll.u32 %v1412_v17, 16 }
  0xdf   : > { %10643 = vmatprep.mubr.msk.bf16.mxu0 %vm273_vm0, %v743_v40  ;;  %v823_v40 = vrot.slane %v821_v31, 3  ;;  %v1450_v31 = vor.u32 %v1449_v63, %v1446_v62  ;;  %v1503_v21 = vshrl.u32 %v1413_v18, 16  ;;  %v1506_v32 = vshll.u32 %v1413_v18, 16  ;;  %v1416_v62 = vld [vmem:[#allocation2 + $0x78] sm:$0x1f] }
  0xe0   : > { %v1440_v50 = vrot.slane %v1438_v36, 5  ;;  %v1467_v22 = vor.u32 %v1466_v0, %v1463_v41  ;;  %v1480_v46 = vrot.slane %v1478_v3, 4  ;;  %v1483_v34 = vrot.slane %v1481_v6, 5  ;;  %v1417_v0 = vld [vmem:[#allocation2 + $0x88] sm:$0x1f] }
  0xe1   : > { %v827_v56 = vor.u32 %v826_v42, %v823_v40  ;;  %v1497_v29 = vrot.slane %v1495_v19, 4  ;;  %v1500_v35 = vrot.slane %v1498_v51, 5  ;;  %v1512_v36 = vshrl.u32 %v12476_v23, 16 }
  0xe2   : > { %v1441_v61 = vor.u32 %v1440_v50, %v1437_v48  ;;  %v1515_v13 = vshll.u32 %v12476_v23, 16  ;;  %v1488_v37 = vrot.slane %v1486_v20, 4  ;;  %v1491_v38 = vrot.slane %v1489_v28, 5  ;;  %v1415_v48 = vld [vmem:[#allocation2 + $0x68] sm:$0x1f] }
  0xe3   : > { %v828_v4 = vsel %vm337_vm7, %v819_v58, %v827_v56  ;;  %v1505_v42 = vrot.slane %v1503_v21, 4  ;;  %v1508_v43 = vrot.slane %v1506_v32, 5  ;;  %v1484_v47 = vor.u32 %v1483_v34, %v1480_v46  ;;  %v11895_v56 = vld [vmem:[#allocation6 + $0x70] sm:$0xff]  }
  0xe4   : > { %v1442_v49 = vsel %vm1425_vm10, %v1433_v2, %v1441_v61  ;;  %v1492_v50 = vor.u32 %v1491_v38, %v1488_v37  ;;  %v1501_v23 = vor.u32 %v1500_v35, %v1497_v29  ;;  %v1517_v8 = vrot.slane %v1515_v13, 5  ;;  %v1418_v29 = vld [vmem:[#allocation2 + $0x98] sm:$0x1f] }
  0xe5   : > { %v1532_v54 = vshll.u32 %v11954_v52, 16  ;;  %v1523_v55 = vshll.u32 %v1414_v12, 16  ;;  %v1546_v58 = vshrl.u32 %v12504_v44, 16  ;;  %v1537_v60 = vshrl.u32 %v1415_v48, 16 }
  0xe6   : > { %10644 = vmatmul.mubr.msk.bf16.gmra.mrb[20].mxu0 %vm273_vm0, %v760_v5  ;;  %v1454_v5 = vrot.slane %v1452_v14, 4  ;;  %v1509_v14 = vor.u32 %v1508_v43, %v1505_v42  ;;  %v1540_v2 = vshll.u32 %v1415_v48, 16  ;;  %v1549_v61 = vshll.u32 %v12504_v44, 16 }
  0xe7   : > { %10647 = vmatprep.mubr.msk.bf16.mxu0 %vm273_vm0, %v777_v7  ;;  %v1471_v7 = vrot.slane %v1469_v59, 4  ;;  %v1563_v63 = vshrl.u32 %v12513_v53, 16  ;;  %v1566_v41 = vshll.u32 %v12513_v53, 16  ;;  %v1525_v3 = vrot.slane %v1523_v55, 5  ;;  %v1420_v55 = vld [vmem:[#allocation2 + $0xb8] sm:$0x1f] }
  0xe8   : > { %v1458_v11 = vor.u32 %v1457_v39, %v1454_v5  ;;  %v1510_v5 = vsel %vm1425_vm10, %v1501_v23, %v1509_v14  ;;  %v1534_v6 = vrot.slane %v1532_v54, 5  ;;  %v1554_v17 = vshrl.u32 %v1416_v62, 16  ;;  %v11955_v14 = vld [vmem:[#allocation2 + $0xb0] sm:$0xf0] }
  0xe9   : > { %v1475_v33 = vor.u32 %v1474_v16, %v1471_v7  ;;  %v1539_v7 = vrot.slane %v1537_v60, 4  ;;  %v1542_v16 = vrot.slane %v1540_v2, 5  ;;  %v1571_v18 = vshrl.u32 %v1417_v0, 16  ;;  %v423_v2 = vld [vmem:[%s12369_s6 + $0xf0] sm:$0xff] }
  0xea   : > { %v1459_v40 = vsel %vm1425_vm10, %v1450_v31, %v1458_v11  ;;  %v1574_v19 = vshll.u32 %v1417_v0, 16  ;;  %v1548_v53 = vrot.slane %v1546_v58, 4  ;;  %v1551_v51 = vrot.slane %v1549_v61, 5  ;;  %v330_v58 = vld [vmem:[#allocation2 + $0x100] sm:$0x8]  ;;  %v424_v61 = vld [vmem:[%s12369_s6 + $0xf8] sm:$0xff] }
  0xeb   : > { %v1476_v25 = vsel %vm1425_vm10, %v1467_v22, %v1475_v33  ;;  %v1565_v20 = vrot.slane %v1563_v63, 4  ;;  %v1568_v28 = vrot.slane %v1566_v41, 5  ;;  %v1580_v11 = vshrl.u32 %v12538_v9, 16  ;;  %v12738_v22 = vld [vmem:[#allocation6 + $0x80] sm:$0xff]   ;;  %v11957_v63 = vld [vmem:[#allocation2 + $0xd0] sm:$0xf0] }
  0xec   : > { %v1583_v21 = vshll.u32 %v12538_v9, 16  ;;  %v1597_v32 = vshrl.u32 %v12542_v15, 16  ;;  %v1543_v46 = vor.u32 %v1542_v16, %v1539_v7  ;;  %v1556_v34 = vrot.slane %v1554_v17, 4 }
  0xed   : > { %v1600_v35 = vshll.u32 %v12542_v15, 16  ;;  %v1573_v13 = vrot.slane %v1571_v18, 4  ;;  %v1576_v37 = vrot.slane %v1574_v19, 5  ;;  %v1614_v38 = vshrl.u32 %v12554_v27, 16 }
  0xee   : > { %10648 = vmatmul.mubr.msk.bf16.gmra.mrb[24].mxu0 %vm273_vm0, %v794_v24  ;;  %v1529_v24 = vshrl.u32 %v12480_v26, 16  ;;  %v1520_v26 = vshrl.u32 %v1414_v12, 16  ;;  %v1588_v42 = vshrl.u32 %v1418_v29, 16  ;;  %v1591_v43 = vshll.u32 %v1418_v29, 16 }
  0xef   : > { %10651 = vmatprep.mubr.msk.bf16.mxu0 %vm273_vm0, %v811_v57  ;;  %v12721_v57 = vrot.slane %v1512_v36, 4  ;;  %v1552_v15 = vor.u32 %v1551_v51, %v1548_v53  ;;  %v1569_v12 = vor.u32 %v1568_v28, %v1565_v20  ;;  %v1577_v48 = vor.u32 %v1576_v37, %v1573_v13  ;;  %v1423_v37 = vld [vmem:[#allocation2 + $0xe8] sm:$0x1f] }
  0xf0   : > { %v1531_v59 = vrot.slane %v1529_v24, 4  ;;  %v1522_v39 = vrot.slane %v1520_v26, 4  ;;  %v12744_v24 = vrot.slane %v1580_v11, 4  ;;  %v12752_v23 = vrot.slane %v1614_v38, 4  ;;  %v11958_v11 = vld [vmem:[#allocation2 + $0xe0] sm:$0xf0] }
  0xf1   : > { %v1518_v44 = vor.u32 %v1517_v8, %v12721_v57  ;;  %v1590_v8 = vrot.slane %v1588_v42, 4  ;;  %v1593_v52 = vrot.slane %v1591_v43, 5  ;;  %v1617_v26 = vshll.u32 %v11955_v14, 16  ;;  %v12779_v38 = vld [vmem:[#allocation2 + $0x18] sm:$0xf] }
  0xf2   : > { %v1526_v31 = vor.u32 %v1525_v3, %v1522_v39  ;;  %v1535_v33 = vor.u32 %v1534_v6, %v1531_v59  ;;  %v11956_v59 = vld [vmem:[#allocation2 + $0xc0] sm:$0xf0]  ;;  %v1648_v41 = vshrl.u32 %v11957_v63, 16  ;;  %v1578_v0 = vsel %vm1425_vm10, %v1569_v12, %v1577_v48  ;;  %v11959_v42 = vld [vmem:[#allocation2 + $0xf0] sm:$0xf0] }
  0xf3   : > { %v1631_v60 = vshrl.u32 %v11956_v59, 16  ;;  %v1651_v39 = vshll.u32 %v11957_v63, 16  ;;  %v331_v3 = vsel %vm12488_vm6, 0, %v330_v58  ;;  %v1625_v7 = vshll.u32 %v1420_v55, 16  ;;  %v1424_v58 = vld [vmem:[#allocation2 + $0xf8] sm:$0x1f] }
  0xf4   : > { %v1527_v9 = vsel %vm1425_vm10, %v1518_v44, %v1526_v31  ;;  %332 = vst [vmem:[#allocation2 + $0x100] sm:$0x8] %v331_v3  ;;  %v440_v16 = vpack.c.bf16 %v424_v61, %v423_v2  ;;  %v12762_v44 = vrot.slane %v1617_v26, 5  ;;  %v12770_v28 = vrot.slane %v1648_v41, 4  ;;  %v1974_v41 = vld [vmem:[#allocation2 + $0x20] sm:$0xf8] }
  0xf5   : > { %v12764_v18 = vrot.slane %v1631_v60, 4  ;;  %v12772_v31 = vrot.slane %v1651_v39, 5  ;;  %v1682_v43 = vshrl.u32 %v11959_v42, 16  ;;  %v2016_v14 = vshll.u32 %v12779_v38, 16  ;;  %v12790_v3 = vld [vmem:[#allocation2 + $0x28] sm:$0xf] }
  0xf6   : > { %10652 = vmatmul.mubr.msk.bf16.gmra.mrb[28].mxu0 %vm273_vm0, %v828_v4  ;;  %v11896_v4 = vld [vmem:[#allocation6 + $0x78] sm:$0xff]   ;;  %v472_v20 = vrot.slane %v440_v16, 4  ;;  %v1620_v48 = vor.u32 %v12762_v44, %v12752_v23 }
  0xf7   : > { %10663 = vmatprep.mubr.msk.bf16.mxu0 %vm273_vm0, %v1442_v49  ;;  %v1557_v49 = vshll.u32 %v1416_v62, 16  ;;  %v1634_v62 = vshll.u32 %v11956_v59, 16  ;;  %v2018_v39 = vrot.slane %v2016_v14, 4 }
  0xf8   : > { %522 = vst.msk [vmem:[#allocation2 + $0x100] sm:$0xf0] %vm490_vm2, %v472_v20 }
  0xf9   : > { %v1559_v36 = vrot.slane %v1557_v49, 5  ;;  %v1594_v49 = vor.u32 %v1593_v52, %v1590_v8  ;;  %v12767_v19 = vrot.slane %v1634_v62, 5  ;;  %523 = vst.msk [vmem:[#allocation2 + $0x108] sm:$0xf] %vm492_vm3, %v472_v20  ;;  %v2033_v20 = vshll.u32 %v12790_v3, 16 }
  0xfb   : > { %v1560_v27 = vor.u32 %v1559_v36, %v1556_v34  ;;  %v1422_v36 = vld [vmem:[#allocation2 + $0xd8] sm:$0x1f] }
  0xfe   : > { %10664 = vmatmul.mubr.msk.bf16.vlgmr.msra.gmra.mrb[0].mxu0 %vm273_vm0, %v1459_v40  ;;  %v1419_v40 = vld [vmem:[#allocation2 + $0xa8] sm:$0x1f] }
  0xff   : > { %10696 = vmatpush3.bf16.msra.mxu0 %v12647_v1  ;;  %10667 = vmatprep.mubr.msk.bf16.mxu0 %vm273_vm0, %v1476_v25  ;;  %v1493_v1 = vsel %vm1425_vm10, %v1484_v47, %v1492_v50  ;;  %v1585_v25 = vrot.slane %v1583_v21, 5  ;;  %v12747_v47 = vrot.slane %v1597_v32, 4  ;;  %v1605_v57 = vshrl.u32 %v1419_v40, 16 }
 0x100   : > { %10697 = vmatprep.subr.bf16.mxu0 %v11894_v45  ;;  %v12750_v50 = vrot.slane %v1600_v35, 5  ;;  %v1608_v54 = vshll.u32 %v1419_v40, 16  ;;  %v1665_v21 = vshrl.u32 %v11958_v11, 16  ;;  %v1668_v32 = vshll.u32 %v11958_v11, 16 }
 0x101   : > { %v1586_v17 = vor.u32 %v1585_v25, %v12744_v24  ;;  %v1627_v35 = vrot.slane %v1625_v7, 5  ;;  %v1656_v24 = vshrl.u32 %v1422_v36, 16  ;;  %v1659_v25 = vshll.u32 %v1422_v36, 16  ;;  %v12793_v7 = vld [vmem:[#allocation2 + $0x38] sm:$0xf] }
 0x102   : > { %v1610_v6 = vrot.slane %v1608_v54, 5  ;;  %v1667_v52 = vrot.slane %v1665_v21, 4  ;;  %v2013_v54 = vshrl.u32 %v12779_v38, 16 }
 0x103   : > { %10698 = vmatpush3.bf16.msra.mxu0 %v11894_v45  ;;  %v1544_v45 = vsel %vm1425_vm10, %v1535_v33, %v1543_v46  ;;  %v1972_v33 = vld [vmem:[#allocation2 + $0x10] sm:$0xf8]  ;;  %v1603_v46 = vor.u32 %v12750_v50, %v12747_v47  ;;  %v1595_v13 = vsel %vm1425_vm10, %v1586_v17, %v1594_v49  ;;  %v1637_v50 = vor.u32 %v12767_v19, %v12764_v18 }
 0x104   : > { %10699 = vmatprep.subr.bf16.mxu0 %v11895_v56  ;;  %v2008_v12 = vshll.u32 %v1972_v33, 16  ;;  %v1658_v60 = vrot.slane %v1656_v24, 4  ;;  %v1661_v23 = vrot.slane %v1659_v25, 5  ;;  %v1654_v17 = vor.u32 %v12772_v31, %v12770_v28 }
 0x105   : > { %v2022_v19 = vshrl.u32 %v1974_v41, 16  ;;  %v2050_v28 = vshll.u32 %v12793_v7, 16 }
 0x106   : > { %10668 = vmatmul.mubr.msk.bf16.gmra.mrb[4].mxu0 %vm273_vm0, %v1493_v1  ;;  %v1561_v1 = vsel %vm1425_vm10, %v1552_v15, %v1560_v27  ;;  %v2005_v15 = vshrl.u32 %v1972_v33, 16  ;;  %v1676_v27 = vshll.u32 %v1423_v37, 16  ;;  %v2010_v61 = vrot.slane %v2008_v12, 4  ;;  %v12808_v12 = vld [vmem:[#allocation2 + $0x48] sm:$0xf] }
 0x107   : > { %10671 = vmatprep.mubr.msk.bf16.mxu0 %vm273_vm0, %v1510_v5  ;;  %10700 = vmatpush3.bf16.msra.mxu0 %v11895_v56  ;;  %v1607_v56 = vrot.slane %v1605_v57, 4  ;;  %v1421_v5 = vld [vmem:[#allocation2 + $0xc8] sm:$0x1f]  ;;  %v1673_v57 = vshrl.u32 %v1423_v37, 16  ;;  %v1662_v49 = vor.u32 %v1661_v23, %v1658_v60  ;;  %v2024_v36 = vrot.slane %v2022_v19, 3 }
 0x108   : > { %10701 = vmatprep.subr.bf16.mxu0 %v11896_v4  ;;  %v1639_v53 = vshrl.u32 %v1421_v5, 16  ;;  %v1642_v51 = vshll.u32 %v1421_v5, 16  ;;  %v2007_v2 = vrot.slane %v2005_v15, 3  ;;  %v1678_v63 = vrot.slane %v1676_v27, 5  ;;  %v1978_v15 = vld [vmem:[#allocation2 + $0x40] sm:$0xf8] }
 0x109   : > { %v1611_v34 = vor.u32 %v1610_v6, %v1607_v56  ;;  %v1684_v56 = vrot.slane %v1682_v43, 4  ;;  %v1675_v62 = vrot.slane %v1673_v57, 4  ;;  %v2015_v5 = vrot.slane %v2013_v54, 3  ;;  %v1976_v6 = vld [vmem:[#allocation2 + $0x30] sm:$0xf8] }
 0x10a   : > { %v1641_v40 = vrot.slane %v1639_v53, 4  ;;  %v2025_v53 = vshll.u32 %v1974_v41, 16  ;;  %v2039_v11 = vshrl.u32 %v1976_v6, 16  ;;  %v2042_v21 = vshll.u32 %v1976_v6, 16 }
 0x10b   : > { %10702 = vmatpush3.bf16.msra.mxu0 %v11896_v4  ;;  %v1622_v4 = vshrl.u32 %v1420_v55, 16  ;;  %v1612_v47 = vsel %vm1425_vm10, %v1603_v46, %v1611_v34  ;;  %v1670_v55 = vrot.slane %v1668_v32, 5  ;;  %v1679_v33 = vor.u32 %v1678_v63, %v1675_v62  ;;  %v1982_v62 = vld [vmem:[#allocation2 + $0x60] sm:$0xf8] }
 0x10c   : > { %10735 = vmatprep.subr.bf16.mxu0 %v12738_v22  ;;  %v2047_v46 = vshrl.u32 %v12793_v7, 16  ;;  %v1663_v31 = vsel %vm1425_vm10, %v1654_v17, %v1662_v49  ;;  %v2011_v43 = vor.u32 %v2010_v61, %v2007_v2  ;;  %v2052_v25 = vrot.slane %v2050_v28, 4  ;;  %v11898_v17 = vld [vmem:[#allocation6 + $0x88] sm:$0xff]   ;;  %v1984_v49 = vld [vmem:[#allocation2 + $0x70] sm:$0xf8] }
 0x10d   : > { %v1624_v29 = vrot.slane %v1622_v4, 4  ;;  %v1671_v32 = vor.u32 %v1670_v55, %v1667_v52  ;;  %v2056_v52 = vshrl.u32 %v1978_v15, 16  ;;  %v2059_v54 = vshll.u32 %v1978_v15, 16  ;;  %v11900_v15 = vld [vmem:[#allocation6 + $0x98] sm:$0xff]  }
 0x10e   : > { %10672 = vmatmul.mubr.msk.bf16.gmra.mrb[8].mxu0 %vm273_vm0, %v1527_v9  ;;  %v1644_v9 = vrot.slane %v1642_v51, 5  ;;  %v2030_v51 = vshrl.u32 %v12790_v3, 16  ;;  %v2049_v24 = vrot.slane %v2047_v46, 3  ;;  %v2067_v55 = vshll.u32 %v12808_v12, 16 }
 0x10f   : > { %10675 = vmatprep.mubr.msk.bf16.mxu0 %vm273_vm0, %v1544_v45  ;;  %v1685_v45 = vshll.u32 %v11959_v42, 16  ;;  %v1628_v8 = vor.u32 %v1627_v35, %v1624_v29  ;;  %v1680_v34 = vsel %vm1425_vm10, %v1671_v32, %v1679_v33  ;;  %v2044_v42 = vrot.slane %v2042_v21, 4 }
 0x110   : > { %v1645_v26 = vor.u32 %v1644_v9, %v1641_v40  ;;  %v2032_v37 = vrot.slane %v2030_v51, 3  ;;  %v2035_v40 = vrot.slane %v2033_v20, 4  ;;  %v2041_v9 = vrot.slane %v2039_v11, 3 }
 0x111   : > { %v1687_v59 = vrot.slane %v1685_v45, 5  ;;  %v1629_v4 = vsel %vm1425_vm10, %v1620_v48, %v1628_v8  ;;  %v2019_v45 = vor.u32 %v2018_v39, %v2015_v5  ;;  %v12812_v48 = vld [vmem:[#allocation2 + $0x58] sm:$0xf]  ;;  %v2058_v61 = vrot.slane %v2056_v52, 3  ;;  %v12821_v5 = vld [vmem:[#allocation2 + $0x68] sm:$0xf] }
 0x112   : > { %v1646_v16 = vsel %vm1425_vm10, %v1637_v50, %v1645_v26  ;;  %v2036_v8 = vor.u32 %v2035_v40, %v2032_v37  ;;  %v2045_v14 = vor.u32 %v2044_v42, %v2041_v9  ;;  %v2064_v26 = vshrl.u32 %v12808_v12, 16  ;;  %v1986_v9 = vld [vmem:[#allocation2 + $0x80] sm:$0xf8]  ;;  %v12834_v42 = vld [vmem:[#allocation2 + $0x88] sm:$0xf] }
 0x113   : > { %v1688_v29 = vor.u32 %v1687_v59, %v1684_v56  ;;  %v2020_v27 = vsel %vm337_vm7, %v2011_v43, %v2019_v45  ;;  %v2053_v56 = vor.u32 %v2052_v25, %v2049_v24  ;;  %v2081_v60 = vshrl.u32 %v12812_v48, 16  ;;  %v1988_v25 = vld [vmem:[#allocation2 + $0x90] sm:$0xf8] }
 0x114   : > { %v2084_v23 = vshll.u32 %v12812_v48, 16  ;;  %v2061_v63 = vrot.slane %v2059_v54, 4  ;;  %v2066_v41 = vrot.slane %v2064_v26, 3  ;;  %v2093_v19 = vshll.u32 %v1982_v62, 16 }
 0x115   : > { %v2054_v39 = vsel %vm337_vm7, %v2045_v14, %v2053_v56  ;;  %v2101_v51 = vshll.u32 %v12821_v5, 16  ;;  %v2107_v21 = vshrl.u32 %v1984_v49, 16  ;;  %v2110_v32 = vshll.u32 %v1984_v49, 16  ;;  %v12852_v49 = vld [vmem:[#allocation2 + $0xb8] sm:$0xf] }
 0x116   : > { %10676 = vmatmul.mubr.msk.bf16.gmra.mrb[12].mxu0 %vm273_vm0, %v1561_v1  ;;  %v1690_v1 = vshrl.u32 %v1424_v58, 16  ;;  %v2062_v20 = vor.u32 %v2061_v63, %v2058_v61  ;;  %v2132_v54 = vshrl.u32 %v12834_v42, 16  ;;  %v2135_v14 = vshll.u32 %v12834_v42, 16  ;;  %v1990_v61 = vld [vmem:[#allocation2 + $0xa0] sm:$0xf8] }
 0x117   : > { %10679 = vmatprep.mubr.msk.bf16.mxu0 %vm273_vm0, %v1578_v0  ;;  %v1693_v0 = vshll.u32 %v1424_v58, 16  ;;  %v2109_v37 = vrot.slane %v2107_v21, 3  ;;  %v2112_v40 = vrot.slane %v2110_v32, 4  ;;  %v2141_v26 = vshrl.u32 %v1988_v25, 16 }
 0x118   : > { %v1692_v44 = vrot.slane %v1690_v1, 4  ;;  %v2069_v1 = vrot.slane %v2067_v55, 4  ;;  %v2134_v63 = vrot.slane %v2132_v54, 3 }
 0x119   : > { %v1695_v18 = vrot.slane %v1693_v0, 5  ;;  %v2113_v52 = vor.u32 %v2112_v40, %v2109_v37  ;;  %v1994_v40 = vld [vmem:[#allocation2 + $0xc0] sm:$0xf8] }
 0x11a   : > { %v2070_v11 = vor.u32 %v2069_v1, %v2066_v41  ;;  %v2137_v41 = vrot.slane %v2135_v14, 4  ;;  %v2143_v1 = vrot.slane %v2141_v26, 3 }
 0x11b   : > { %v1696_v35 = vor.u32 %v1695_v18, %v1692_v44  ;;  %v12824_v44 = vld [vmem:[#allocation2 + $0x78] sm:$0xf]  ;;  %v2090_v18 = vshrl.u32 %v1982_v62, 16 }
 0x11c   : > { %v2115_v28 = vshrl.u32 %v12824_v44, 16 }
 0x11d   : > { %v1697_v57 = vsel %vm1425_vm10, %v1688_v29, %v1696_v35  ;;  %v2092_v29 = vrot.slane %v2090_v18, 3  ;;  %v2095_v35 = vrot.slane %v2093_v19, 4  ;;  %v2158_v18 = vshrl.u32 %v1990_v61, 16 }
 0x11e   : > { %10680 = vmatmul.mubr.msk.bf16.gmra.mrb[16].mxu0 %vm273_vm0, %v1595_v13  ;;  %v2027_v13 = vrot.slane %v2025_v53, 4  ;;  %v2098_v53 = vshrl.u32 %v12821_v5, 16  ;;  %v2117_v45 = vrot.slane %v2115_v28, 3  ;;  %v2161_v19 = vshll.u32 %v1990_v61, 16  ;;  %v1998_v61 = vld [vmem:[#allocation2 + $0xe0] sm:$0xf8] }
 0x11f   : > { %10683 = vmatprep.mubr.msk.bf16.mxu0 %vm273_vm0, %v1612_v47  ;;  %v1980_v47 = vld [vmem:[#allocation2 + $0x50] sm:$0xf8]  ;;  %v2183_v28 = vshrl.u32 %v12852_v49, 16 }
 0x120   : > { %v2028_v50 = vor.u32 %v2027_v13, %v2024_v36  ;;  %v2073_v58 = vshrl.u32 %v1980_v47, 16  ;;  %v2076_v59 = vshll.u32 %v1980_v47, 16  ;;  %v2100_v36 = vrot.slane %v2098_v53, 3  ;;  %v12837_v47 = vld [vmem:[#allocation2 + $0x98] sm:$0xf] }
 0x121   : > { %v2103_v13 = vrot.slane %v2101_v51, 4  ;;  %v2149_v56 = vshrl.u32 %v12837_v47, 16 }
 0x122   : > { %v2037_v2 = vsel %vm337_vm7, %v2028_v50, %v2036_v8  ;;  %v2075_v0 = vrot.slane %v2073_v58, 3  ;;  %v2078_v6 = vrot.slane %v2076_v59, 4  ;;  %v2124_v50 = vshrl.u32 %v1986_v9, 16 }
 0x123   : > { %v2127_v8 = vshll.u32 %v1986_v9, 16  ;;  %v2144_v58 = vshll.u32 %v1988_v25, 16  ;;  %v2152_v59 = vshll.u32 %v12837_v47, 16  ;;  %v1996_v25 = vld [vmem:[#allocation2 + $0xd0] sm:$0xf8] }
 0x124   : > { %v2079_v33 = vor.u32 %v2078_v6, %v2075_v0  ;;  %v12848_v0 = vld [vmem:[#allocation2 + $0xa8] sm:$0xf]  ;;  %v2209_v26 = vshrl.u32 %v1996_v25, 16 }
 0x125   : > { %v2129_v62 = vrot.slane %v2127_v8, 4  ;;  %v2146_v6 = vrot.slane %v2144_v58, 4  ;;  %v2166_v53 = vshrl.u32 %v12848_v0, 16  ;;  %v2169_v51 = vshll.u32 %v12848_v0, 16 }
 0x126   : > { %10684 = vmatmul.mubr.msk.bf16.gmra.mrb[20].mxu0 %vm273_vm0, %v1629_v4  ;;  %v2083_v4 = vrot.slane %v2081_v60, 3  ;;  %v12845_v60 = vld [vmem:[#allocation6 + $0xa0] sm:$0xff]   ;;  %v2195_v8 = vshll.u32 %v1994_v40, 16  ;;  %v2212_v58 = vshll.u32 %v1996_v25, 16 }
 0x127   : > { %10687 = vmatprep.mubr.msk.bf16.mxu0 %vm273_vm0, %v1646_v16  ;;  %v2086_v16 = vrot.slane %v2084_v23, 4 }
 0x129   : > { %v2087_v46 = vor.u32 %v2086_v16, %v2083_v4  ;;  %v2151_v4 = vrot.slane %v2149_v56, 3  ;;  %v2154_v16 = vrot.slane %v2152_v59, 4 }
 0x12b   : > { %v2088_v43 = vsel %vm337_vm7, %v2079_v33, %v2087_v46  ;;  %v2147_v33 = vor.u32 %v2146_v6, %v2143_v1  ;;  %v2155_v46 = vor.u32 %v2154_v16, %v2151_v4  ;;  %v2211_v1 = vrot.slane %v2209_v26, 3 }
 0x12c   : > { %v2214_v4 = vrot.slane %v2212_v58, 4 }
 0x12d   : > { %v2156_v9 = vsel %vm337_vm7, %v2147_v33, %v2155_v46 }
 0x12e   : > { %10688 = vmatmul.mubr.msk.bf16.gmra.mrb[24].mxu0 %vm273_vm0, %v1663_v31  ;;  %v2118_v31 = vshll.u32 %v12824_v44, 16 }
 0x12f   : > { %10691 = vmatprep.mubr.msk.bf16.mxu0 %vm273_vm0, %v1680_v34  ;;  %v11899_v34 = vld [vmem:[#allocation6 + $0x90] sm:$0xff]  }
 0x130   : > { %v2120_v24 = vrot.slane %v2118_v31, 4  ;;  %v2186_v31 = vshll.u32 %v12852_v49, 16 }
 0x132   : > { %v2121_v55 = vor.u32 %v2120_v24, %v2117_v45  ;;  %v2188_v45 = vrot.slane %v2186_v31, 4  ;;  %v12862_v24 = vld [vmem:[#allocation2 + $0xc8] sm:$0xf] }
 0x133   : > { %v2200_v54 = vshrl.u32 %v12862_v24, 16  ;;  %v2203_v14 = vshll.u32 %v12862_v24, 16 }
 0x136   : > { %10692 = vmatmul.mubr.msk.bf16.gmra.mrb[28].mxu0 %vm273_vm0, %v1697_v57  ;;  %v2096_v57 = vor.u32 %v2095_v35, %v2092_v29  ;;  %v2163_v29 = vrot.slane %v2161_v19, 4  ;;  %v2168_v35 = vrot.slane %v2166_v53, 3  ;;  %v12876_v19 = vld [vmem:[#allocation2 + $0xf8] sm:$0xf]  ;;  %v2226_v53 = vshrl.u32 %v1998_v61, 16 }
 0x137   : > { %10703 = vmatprep.mubr.msk.bf16.mxu0 %vm273_vm0, %v2020_v27  ;;  %v2104_v27 = vor.u32 %v2103_v13, %v2100_v36  ;;  %v2171_v36 = vrot.slane %v2169_v51, 4  ;;  %v2229_v51 = vshll.u32 %v1998_v61, 16 }
 0x139   : > { %v2105_v23 = vsel %vm337_vm7, %v2096_v57, %v2104_v27  ;;  %v2172_v27 = vor.u32 %v2171_v36, %v2168_v35  ;;  %v2228_v35 = vrot.slane %v2226_v53, 3  ;;  %v2231_v36 = vrot.slane %v2229_v51, 4  ;;  %v12904_v51 = vld [vmem:[#allocation2 + $0x20] sm:$0xf0] }
 0x13e   : > { %10704 = vmatmul.mubr.msk.bf16.vlgmr.msra.gmra.mrb[0].mxu0 %vm273_vm0, %v2037_v2  ;;  %v2126_v2 = vrot.slane %v2124_v50, 3  ;;  %v2192_v50 = vshrl.u32 %v1994_v40, 16 }
 0x13f   : > { %10736 = vmatpush3.bf16.msra.mxu0 %v12738_v22  ;;  %10707 = vmatprep.mubr.msk.bf16.mxu0 %vm273_vm0, %v2054_v39  ;;  %v2071_v22 = vsel %vm337_vm7, %v2062_v20, %v2070_v11  ;;  %v2122_v39 = vsel %vm337_vm7, %v2113_v52, %v2121_v55  ;;  %v2138_v11 = vor.u32 %v2137_v41, %v2134_v63  ;;  %v2202_v63 = vrot.slane %v2200_v54, 3 }
 0x140   : > { %10737 = vmatprep.subr.bf16.mxu0 %v11898_v17  ;;  %v2130_v20 = vor.u32 %v2129_v62, %v2126_v2  ;;  %v2194_v2 = vrot.slane %v2192_v50, 3  ;;  %v2197_v62 = vrot.slane %v2195_v8, 4  ;;  %v2205_v41 = vrot.slane %v2203_v14, 4 }
 0x141   : > { %v2232_v50 = vor.u32 %v2231_v36, %v2228_v35  ;;  %v2611_v35 = vrot.slane %v12812_v48, 4  ;;  %v11903_v36 = vld [vmem:[#allocation6 + $0xb0] sm:$0xff]   ;;  %v2614_v48 = vrot.slane %v12821_v5, 4 }
 0x142   : > { %v2139_v13 = vsel %vm337_vm7, %v2130_v20, %v2138_v11 }
 0x143   : > { %10738 = vmatpush3.bf16.msra.mxu0 %v11898_v17  ;;  %v1992_v17 = vld [vmem:[#allocation2 + $0xb0] sm:$0xf8] }
 0x144   : > { %10739 = vmatprep.subr.bf16.mxu0 %v11899_v34  ;;  %v2175_v21 = vshrl.u32 %v1992_v17, 16  ;;  %v2178_v32 = vshll.u32 %v1992_v17, 16 }
 0x146   : > { %10708 = vmatmul.mubr.msk.bf16.gmra.mrb[4].mxu0 %vm273_vm0, %v2071_v22  ;;  %v2177_v22 = vrot.slane %v2175_v21, 3  ;;  %v2180_v37 = vrot.slane %v2178_v32, 4  ;;  %v2198_v21 = vor.u32 %v2197_v62, %v2194_v2  ;;  %v2206_v32 = vor.u32 %v2205_v41, %v2202_v63 }
 0x147   : > { %10711 = vmatprep.mubr.msk.bf16.mxu0 %vm273_vm0, %v2088_v43  ;;  %10740 = vmatpush3.bf16.msra.mxu0 %v11899_v34  ;;  %v2160_v34 = vrot.slane %v2158_v18, 3  ;;  %v2185_v43 = vrot.slane %v2183_v28, 3  ;;  %v2000_v18 = vld [vmem:[#allocation2 + $0xf0] sm:$0xf8]  ;;  %v2215_v28 = vor.u32 %v2214_v4, %v2211_v1 }
 0x148   : > { %10741 = vmatprep.subr.bf16.mxu0 %v11900_v15  ;;  %v2181_v52 = vor.u32 %v2180_v37, %v2177_v22  ;;  %v2243_v33 = vshrl.u32 %v2000_v18, 16  ;;  %v2246_v46 = vshll.u32 %v2000_v18, 16  ;;  %v2207_v37 = vsel %vm337_vm7, %v2198_v21, %v2206_v32  ;;  %v12896_v1 = vld [vmem:[#allocation2 + $0x10] sm:$0xf0] }
 0x149   : > { %v2164_v57 = vor.u32 %v2163_v29, %v2160_v34  ;;  %v2189_v55 = vor.u32 %v2188_v45, %v2185_v43  ;;  %v2251_v34 = vshrl.u32 %v12876_v19, 16  ;;  %v2254_v29 = vshll.u32 %v12876_v19, 16 }
 0x14a   : > { %v2245_v40 = vrot.slane %v2243_v33, 3  ;;  %v2602_v21 = vrot.slane %v12790_v3, 4 }
 0x14b   : > { %10742 = vmatpush3.bf16.msra.mxu0 %v11900_v15  ;;  %v12864_v15 = vld [vmem:[#allocation2 + $0xd8] sm:$0xf]  ;;  %v2190_v6 = vsel %vm337_vm7, %v2181_v52, %v2189_v55  ;;  %v2253_v45 = vrot.slane %v2251_v34, 3  ;;  %v2256_v25 = vrot.slane %v2254_v29, 4  ;;  %v387_v55 = vld [vmem:[#allocation2 + $0x108] sm:$0x10] }
 0x14c   : > { %10775 = vmatprep.subr.bf16.mxu0 %v12845_v60  ;;  %v2217_v56 = vshrl.u32 %v12864_v15, 16  ;;  %v2220_v59 = vshll.u32 %v12864_v15, 16  ;;  %v12918_v34 = vld [vmem:[#allocation2 + $0x50] sm:$0xf0]  ;;  %v2608_v29 = vrot.slane %v12808_v12, 4 }
 0x14e   : > { %10712 = vmatmul.mubr.msk.bf16.gmra.mrb[8].mxu0 %vm273_vm0, %v2105_v23  ;;  %v2173_v23 = vsel %vm337_vm7, %v2164_v57, %v2172_v27  ;;  %v2219_v16 = vrot.slane %v2217_v56, 3  ;;  %v2222_v17 = vrot.slane %v2220_v59, 4  ;;  %v2002_v57 = vld [vmem:[#allocation2 + $0x100] sm:$0xf8]  ;;  %v12886_v27 = vld [vmem:[#allocation2 + $0x108] sm:$0xf]  ;;  %v2257_v56 = vor.u32 %v2256_v25, %v2253_v45 }
 0x14f   : > { %10715 = vmatprep.mubr.msk.bf16.mxu0 %vm273_vm0, %v2122_v39  ;;  %v12873_v39 = vld [vmem:[#allocation2 + $0xe8] sm:$0xf]  ;;  %v2260_v52 = vshrl.u32 %v2002_v57, 16  ;;  %v2263_v54 = vshll.u32 %v2002_v57, 16  ;;  %v2268_v14 = vshrl.u32 %v12886_v27, 16  ;;  %v2271_v26 = vshll.u32 %v12886_v27, 16 }
 0x150   : > { %v2234_v20 = vshrl.u32 %v12873_v39, 16  ;;  %v2237_v11 = vshll.u32 %v12873_v39, 16  ;;  %v2223_v31 = vor.u32 %v2222_v17, %v2219_v16  ;;  %v2598_v16 = vrot.slane %v12896_v1, 4  ;;  %v12939_v45 = vld [vmem:[#allocation6 + $0xc0] sm:$0xff]  }
 0x151   : > { %v2262_v2 = vrot.slane %v2260_v52, 3  ;;  %v2265_v61 = vrot.slane %v2263_v54, 4  ;;  %v2270_v62 = vrot.slane %v2268_v14, 3  ;;  %v2273_v63 = vrot.slane %v2271_v26, 4 }
 0x152   : > { %v2239_v22 = vrot.slane %v2237_v11, 4  ;;  %v2224_v43 = vsel %vm337_vm7, %v2215_v28, %v2223_v31  ;;  %v2599_v17 = vrot.slane %v12779_v38, 4  ;;  %v2601_v11 = vrot.slane %v12904_v51, 4  ;;  %v12916_v28 = vld [vmem:[#allocation2 + $0x40] sm:$0xf0]  ;;  %v11902_v31 = vld [vmem:[#allocation6 + $0xa8] sm:$0xff]  }
 0x153   : > { %v2274_v4 = vor.u32 %v2273_v63, %v2270_v62  ;;  %v2605_v38 = vrot.slane %v12793_v7, 4  ;;  %v2607_v3 = vrot.slane %v12916_v28, 4  ;;  %v2610_v7 = vrot.slane %v12918_v34, 4  ;;  %v12970_v62 = vld [vmem:[#allocation2 + $0xd0] sm:$0xf0] }
 0x154   : > { %v2600_v53 = vsel %vm885_vm1, %v2598_v16, %v2599_v17  ;;  %v2603_v33 = vsel %vm885_vm1, %v2601_v11, %v2602_v21  ;;  %v2623_v54 = vrot.slane %v12837_v47, 4  ;;  %v2629_v47 = vrot.slane %v12852_v49, 4  ;;  %v12980_v16 = vld [vmem:[#allocation2 + $0xe0] sm:$0xf0]  ;;  %v12982_v17 = vld [vmem:[#allocation2 + $0xf0] sm:$0xf0] }
 0x155   : > { %v2635_v49 = vrot.slane %v12864_v15, 4  ;;  %v2638_v11 = vrot.slane %v12873_v39, 4  ;;  %v2640_v15 = vrot.slane %v12982_v17, 4  ;;  %v2641_v21 = vrot.slane %v12876_v19, 4 }
 0x156   : > { %10716 = vmatmul.mubr.msk.bf16.gmra.mrb[12].mxu0 %vm273_vm0, %v2139_v13  ;;  %v2236_v13 = vrot.slane %v2234_v20, 3  ;;  %v12906_v20 = vld [vmem:[#allocation2 + $0x30] sm:$0xf0] }
 0x157   : > { %10719 = vmatprep.mubr.msk.bf16.mxu0 %vm273_vm0, %v2156_v9  ;;  %v2248_v9 = vrot.slane %v2246_v46, 4  ;;  %v2604_v32 = vrot.slane %v12906_v20, 4 }
 0x158   : > { %v2240_v8 = vor.u32 %v2239_v22, %v2236_v13  ;;  %v2609_v13 = vsel %vm885_vm1, %v2607_v3, %v2608_v29  ;;  %v2612_v22 = vsel %vm885_vm1, %v2610_v7, %v2611_v35  ;;  %v2642_v3 = vsel %vm885_vm1, %v2640_v15, %v2641_v21  ;;  %v12996_v29 = vld [vmem:[#allocation2 + $0x100] sm:$0xf0] }
 0x159   : > { %v2249_v58 = vor.u32 %v2248_v9, %v2245_v40  ;;  %v2606_v46 = vsel %vm885_vm1, %v2604_v32, %v2605_v38  ;;  %v12931_v40 = vld [vmem:[#allocation2 + $0x70] sm:$0xf0]  ;;  %v2937_v38 = vshrl.u32 %v12896_v1, 16 }
 0x15a   : > { %v2241_v59 = vsel %vm337_vm7, %v2232_v50, %v2240_v8  ;;  %v2616_v9 = vrot.slane %v12931_v40, 4  ;;  %v12943_v50 = vld [vmem:[#allocation2 + $0x80] sm:$0xf0]  ;;  %v12946_v8 = vld [vmem:[#allocation2 + $0x90] sm:$0xf0] }
 0x15b   : > { %v2258_v41 = vsel %vm337_vm7, %v2249_v58, %v2257_v56  ;;  %v2619_v5 = vrot.slane %v12943_v50, 4  ;;  %v2622_v52 = vrot.slane %v12946_v8, 4  ;;  %v12958_v58 = vld [vmem:[#allocation2 + $0xb0] sm:$0xf0]  ;;  %v2939_v7 = vrot.slane %v2937_v38, 4 }
 0x15d   : > { %v2624_v26 = vsel %vm885_vm1, %v2622_v52, %v2623_v54  ;;  %v2982_v52 = vshll.u32 %v2922_v30, 16 }
 0x15e   : > { %10720 = vmatmul.mubr.msk.bf16.gmra.mrb[16].mxu0 %vm273_vm0, %v2173_v23  ;;  %v388_v23 = vsel %vm12610_vm9, 0, %v387_v55  ;;  %v12956_v55 = vld [vmem:[#allocation2 + $0xa0] sm:$0xf0] }
 0x15f   : > { %10723 = vmatprep.mubr.msk.bf16.mxu0 %vm273_vm0, %v2190_v6  ;;  %389 = vst [vmem:[#allocation2 + $0x108] sm:$0x10] %v388_v23  ;;  %v2266_v6 = vor.u32 %v2265_v61, %v2262_v2  ;;  %v2625_v56 = vrot.slane %v12956_v55, 4  ;;  %v12968_v61 = vld [vmem:[#allocation2 + $0xc0] sm:$0xf0] }
 0x160   : > { %v2631_v63 = vrot.slane %v12968_v61, 4 }
 0x161   : > { %v2275_v18 = vsel %vm337_vm7, %v2266_v6, %v2274_v4 }
 0x166   : > { %10724 = vmatmul.mubr.msk.bf16.gmra.mrb[20].mxu0 %vm273_vm0, %v2207_v37  ;;  %v12929_v37 = vld [vmem:[#allocation2 + $0x60] sm:$0xf0] }
 0x167   : > { %10727 = vmatprep.mubr.msk.bf16.mxu0 %vm273_vm0, %v2224_v43  ;;  %v2613_v12 = vrot.slane %v12929_v37, 4  ;;  %v2617_v43 = vrot.slane %v12824_v44, 4  ;;  %v2620_v44 = vrot.slane %v12834_v42, 4  ;;  %v2626_v42 = vrot.slane %v12848_v0, 4 }
 0x168   : > { %v2632_v0 = vrot.slane %v12862_v24, 4  ;;  %v2637_v24 = vrot.slane %v12980_v16, 4 }
 0x169   : > { %v2615_v25 = vsel %vm885_vm1, %v2613_v12, %v2614_v48  ;;  %v2618_v57 = vsel %vm885_vm1, %v2616_v9, %v2617_v43  ;;  %v2621_v14 = vsel %vm885_vm1, %v2619_v5, %v2620_v44  ;;  %v2627_v23 = vsel %vm885_vm1, %v2625_v56, %v2626_v42 }
 0x16a   : > { %v2633_v6 = vsel %vm885_vm1, %v2631_v63, %v2632_v0  ;;  %v2639_v39 = vsel %vm885_vm1, %v2637_v24, %v2638_v11  ;;  %v2957_v12 = vshll.u32 %v12904_v51, 16  ;;  %v2971_v43 = vshrl.u32 %v12906_v20, 16 }
 0x16b   : > { %v2979_v44 = vshrl.u32 %v2922_v30, 16  ;;  %v2988_v63 = vshrl.u32 %v12916_v28, 16  ;;  %v3008_v24 = vshll.u32 %v12918_v34, 16 }
 0x16e   : > { %10728 = vmatmul.mubr.msk.bf16.gmra.mrb[24].mxu0 %vm273_vm0, %v2241_v59  ;;  %v2628_v59 = vrot.slane %v12958_v58, 4 }
 0x16f   : > { %10731 = vmatprep.mubr.msk.bf16.mxu0 %vm273_vm0, %v2258_v41  ;;  %v2634_v41 = vrot.slane %v12970_v62, 4 }
 0x170   : > { %v2630_v2 = vsel %vm885_vm1, %v2628_v59, %v2629_v47 }
 0x171   : > { %v2636_v4 = vsel %vm885_vm1, %v2634_v41, %v2635_v49  ;;  %v2924_v49 = vld [vmem:[#allocation2 + $0x58] sm:$0x1f] }
 0x172   : > { %v3013_v15 = vshrl.u32 %v2924_v49, 16  ;;  %v3016_v21 = vshll.u32 %v2924_v49, 16 }
 0x176   : > { %10732 = vmatmul.mubr.msk.bf16.gmra.mrb[28].mxu0 %vm273_vm0, %v2275_v18  ;;  %v2920_v18 = vld [vmem:[#allocation2 + $0x18] sm:$0x1f] }
 0x177   : > { %10743 = vmatprep.mubr.msk.bf16.mxu0 %vm273_vm0, %v2600_v53  ;;  %v333_v53 = vld [vmem:[#allocation2 + $0x110] sm:$0x8] }
 0x178   : > { %v334_v32 = vsel %vm12488_vm6, 0, %v333_v53  ;;  %v3005_v53 = vshrl.u32 %v12918_v34, 16  ;;  %v3022_v34 = vshrl.u32 %v12929_v37, 16 }
 0x179   : > { %335 = vst [vmem:[#allocation2 + $0x110] sm:$0x8] %v334_v32  ;;  %v2990_v32 = vrot.slane %v2988_v63, 4 }
 0x17e   : > { %10744 = vmatmul.mubr.msk.bf16.vlgmr.msra.gmra.mrb[0].mxu0 %vm273_vm0, %v2603_v33  ;;  %v2940_v33 = vshll.u32 %v12896_v1, 16  ;;  %v2644_v1 = vrot.slane %v12886_v27, 4  ;;  %v2959_v27 = vrot.slane %v2957_v12, 5 }
 0x17f   : > { %10776 = vmatpush3.bf16.msra.mxu0 %v12845_v60  ;;  %10747 = vmatprep.mubr.msk.bf16.mxu0 %vm273_vm0, %v2606_v46  ;;  %v11904_v60 = vld [vmem:[#allocation6 + $0xb8] sm:$0xff]   ;;  %v2945_v46 = vshrl.u32 %v2920_v18, 16 }
 0x180   : > { %10777 = vmatprep.subr.bf16.mxu0 %v11902_v31  ;;  %v2942_v35 = vrot.slane %v2940_v33, 5 }
 0x183   : > { %10778 = vmatpush3.bf16.msra.mxu0 %v11902_v31  ;;  %v2948_v31 = vshll.u32 %v2920_v18, 16 }
 0x184   : > { %10779 = vmatprep.subr.bf16.mxu0 %v11903_v36 }
 0x185   : > { %v2950_v19 = vrot.slane %v2948_v31, 5  ;;  %v3007_v31 = vrot.slane %v3005_v53, 4 }
 0x186   : > { %10748 = vmatmul.mubr.msk.bf16.gmra.mrb[4].mxu0 %vm273_vm0, %v2609_v13  ;;  %v2921_v13 = vld [vmem:[#allocation2 + $0x28] sm:$0x1f] }
 0x187   : > { %10751 = vmatprep.mubr.msk.bf16.mxu0 %vm273_vm0, %v2612_v22  ;;  %10780 = vmatpush3.bf16.msra.mxu0 %v11903_v36  ;;  %v2947_v36 = vrot.slane %v2945_v46, 4  ;;  %v2643_v22 = vrot.slane %v12996_v29, 4  ;;  %v2962_v48 = vshrl.u32 %v2921_v13, 16  ;;  %v2965_v9 = vshll.u32 %v2921_v13, 16  ;;  %v2926_v13 = vld [vmem:[#allocation2 + $0x78] sm:$0x1f] }
 0x188   : > { %10781 = vmatprep.subr.bf16.mxu0 %v11904_v60 }
 0x189   : > { %v2951_v5 = vor.u32 %v2950_v19, %v2947_v36  ;;  %v2645_v54 = vsel %vm885_vm1, %v2643_v22, %v2644_v1  ;;  %v2964_v56 = vrot.slane %v2962_v48, 4  ;;  %v2967_v42 = vrot.slane %v2965_v9, 5  ;;  %v11906_v19 = vld [vmem:[#allocation6 + $0xc8] sm:$0xff]  }
 0x18a   : > { %v3018_v36 = vrot.slane %v3016_v21, 5  ;;  %v3025_v1 = vshll.u32 %v12929_v37, 16  ;;  %v3039_v48 = vshrl.u32 %v12931_v40, 16  ;;  %v3042_v9 = vshll.u32 %v12931_v40, 16 }
 0x18b   : > { %10782 = vmatpush3.bf16.msra.mxu0 %v11904_v60  ;;  %v2954_v60 = vshrl.u32 %v12904_v51, 16  ;;  %v2973_v51 = vrot.slane %v2971_v43, 4  ;;  %v3047_v43 = vshrl.u32 %v2926_v13, 16 }
 0x18c   : > { %10815 = vmatprep.subr.bf16.mxu0 %v12939_v45  ;;  %v3027_v37 = vrot.slane %v3025_v1, 5 }
 0x18e   : > { %10752 = vmatmul.mubr.msk.bf16.gmra.mrb[8].mxu0 %vm273_vm0, %v2615_v25  ;;  %v2974_v25 = vshll.u32 %v12906_v20, 16  ;;  %v2991_v20 = vshll.u32 %v12916_v28, 16 }
 0x18f   : > { %10755 = vmatprep.mubr.msk.bf16.mxu0 %vm273_vm0, %v2618_v57  ;;  %v2943_v57 = vor.u32 %v2942_v35, %v2939_v7  ;;  %v3010_v7 = vrot.slane %v3008_v24, 5  ;;  %v3015_v35 = vrot.slane %v3013_v15, 4 }
 0x190   : > { %v2976_v59 = vrot.slane %v2974_v25, 5  ;;  %v2993_v38 = vrot.slane %v2991_v20, 5  ;;  %v3050_v25 = vshll.u32 %v2926_v13, 16  ;;  %v2928_v20 = vld [vmem:[#allocation2 + $0x98] sm:$0x1f] }
 0x191   : > { %v2952_v47 = vsel %vm1425_vm10, %v2943_v57, %v2951_v5  ;;  %v3011_v57 = vor.u32 %v3010_v7, %v3007_v31  ;;  %v3019_v5 = vor.u32 %v3018_v36, %v3015_v35  ;;  %v3081_v53 = vshrl.u32 %v2928_v20, 16 }
 0x192   : > { %v2977_v18 = vor.u32 %v2976_v59, %v2973_v51  ;;  %v2994_v30 = vor.u32 %v2993_v38, %v2990_v32  ;;  %v3052_v51 = vrot.slane %v3050_v25, 5  ;;  %v11908_v59 = vld [vmem:[#allocation6 + $0xd8] sm:$0xff]   ;;  %v3090_v36 = vshrl.u32 %v12956_v55, 16 }
 0x193   : > { %v3020_v40 = vsel %vm1425_vm10, %v3011_v57, %v3019_v5 }
 0x196   : > { %10756 = vmatmul.mubr.msk.bf16.gmra.mrb[12].mxu0 %vm273_vm0, %v2621_v14  ;;  %v2956_v14 = vrot.slane %v2954_v60, 4 }
 0x197   : > { %10759 = vmatprep.mubr.msk.bf16.mxu0 %vm273_vm0, %v2624_v26  ;;  %v2923_v26 = vld [vmem:[#allocation2 + $0x48] sm:$0x1f] }
 0x198   : > { %v2996_v0 = vshrl.u32 %v2923_v26, 16  ;;  %v2999_v41 = vshll.u32 %v2923_v26, 16  ;;  %v2927_v26 = vld [vmem:[#allocation2 + $0x88] sm:$0x1f] }
 0x199   : > { %v3067_v63 = vshll.u32 %v2927_v26, 16 }
 0x19a   : > { %v2998_v28 = vrot.slane %v2996_v0, 4  ;;  %v3001_v33 = vrot.slane %v2999_v41, 5 }
 0x19b   : > { %v3069_v32 = vrot.slane %v3067_v63, 5 }
 0x19c   : > { %v3002_v22 = vor.u32 %v3001_v33, %v2998_v28  ;;  %v2929_v33 = vld [vmem:[#allocation2 + $0xa8] sm:$0x1f] }
 0x19d   : > { %v3098_v13 = vshrl.u32 %v2929_v33, 16 }
 0x19e   : > { %10760 = vmatmul.mubr.msk.bf16.gmra.mrb[16].mxu0 %vm273_vm0, %v2627_v23  ;;  %v2981_v23 = vrot.slane %v2979_v44, 4  ;;  %v11907_v44 = vld [vmem:[#allocation6 + $0xd0] sm:$0xff]  }
 0x19f   : > { %10763 = vmatprep.mubr.msk.bf16.mxu0 %vm273_vm0, %v2630_v2  ;;  %v2984_v2 = vrot.slane %v2982_v52, 5  ;;  %v3003_v52 = vsel %vm1425_vm10, %v2994_v30, %v3002_v22  ;;  %v3101_v30 = vshll.u32 %v2929_v33, 16  ;;  %v3107_v22 = vshrl.u32 %v12958_v58, 16 }
 0x1a0   : > { %v3100_v57 = vrot.slane %v3098_v13, 4 }
 0x1a1   : > { %v2985_v11 = vor.u32 %v2984_v2, %v2981_v23  ;;  %v3059_v23 = vshll.u32 %v12943_v50, 16  ;;  %v3064_v2 = vshrl.u32 %v2927_v26, 16  ;;  %v3103_v5 = vrot.slane %v3101_v30, 5 }
 0x1a3   : > { %v3061_v15 = vrot.slane %v3059_v23, 5  ;;  %v3066_v21 = vrot.slane %v3064_v2, 4  ;;  %v3144_v23 = vshll.u32 %v12970_v62, 16 }
 0x1a5   : > { %v3070_v35 = vor.u32 %v3069_v32, %v3066_v21 }
 0x1a6   : > { %10764 = vmatmul.mubr.msk.bf16.gmra.mrb[20].mxu0 %vm273_vm0, %v2633_v6  ;;  %v2960_v6 = vor.u32 %v2959_v27, %v2956_v14 }
 0x1a7   : > { %10767 = vmatprep.mubr.msk.bf16.mxu0 %vm273_vm0, %v2636_v4  ;;  %v2968_v4 = vor.u32 %v2967_v42, %v2964_v56  ;;  %v3044_v56 = vrot.slane %v3042_v9, 5  ;;  %v3049_v42 = vrot.slane %v3047_v43, 4  ;;  %v3092_v43 = vrot.slane %v3090_v36, 4 }
 0x1a9   : > { %v2969_v46 = vsel %vm1425_vm10, %v2960_v6, %v2968_v4  ;;  %v3053_v6 = vor.u32 %v3052_v51, %v3049_v42  ;;  %v3073_v4 = vshrl.u32 %v12946_v8, 16  ;;  %v3104_v51 = vor.u32 %v3103_v5, %v3100_v57 }
 0x1ae   : > { %10768 = vmatmul.mubr.msk.bf16.gmra.mrb[24].mxu0 %vm273_vm0, %v2639_v39  ;;  %v2925_v39 = vld [vmem:[#allocation2 + $0x68] sm:$0x1f] }
 0x1af   : > { %10771 = vmatprep.mubr.msk.bf16.mxu0 %vm273_vm0, %v2642_v3  ;;  %v2986_v3 = vsel %vm1425_vm10, %v2977_v18, %v2985_v11  ;;  %v3030_v60 = vshrl.u32 %v2925_v39, 16  ;;  %v3033_v12 = vshll.u32 %v2925_v39, 16  ;;  %v3076_v18 = vshll.u32 %v12946_v8, 16  ;;  %v2930_v8 = vld [vmem:[#allocation2 + $0xb8] sm:$0x1f] }
 0x1b0   : > { %v3084_v11 = vshll.u32 %v2928_v20, 16  ;;  %v3083_v39 = vrot.slane %v3081_v53, 4  ;;  %v3115_v1 = vshrl.u32 %v2930_v8, 16  ;;  %v3146_v53 = vrot.slane %v3144_v23, 5 }
 0x1b1   : > { %v3032_v14 = vrot.slane %v3030_v60, 4  ;;  %v3035_v27 = vrot.slane %v3033_v12, 5  ;;  %v3078_v31 = vrot.slane %v3076_v18, 5  ;;  %v3118_v60 = vshll.u32 %v2930_v8, 16 }
 0x1b3   : > { %v3036_v41 = vor.u32 %v3035_v27, %v3032_v14  ;;  %v3124_v27 = vshrl.u32 %v12968_v61, 16 }
 0x1b5   : > { %v3126_v20 = vrot.slane %v3124_v27, 4 }
 0x1b6   : > { %10772 = vmatmul.mubr.msk.bf16.gmra.mrb[28].mxu0 %vm273_vm0, %v2645_v54  ;;  %v3024_v54 = vrot.slane %v3022_v34, 4  ;;  %v3110_v34 = vshll.u32 %v12958_v58, 16  ;;  %v3127_v58 = vshll.u32 %v12968_v61, 16 }
 0x1b7   : > { %10783 = vmatprep.mubr.msk.bf16.mxu0 %vm273_vm0, %v2952_v47  ;;  %v3056_v47 = vshrl.u32 %v12943_v50, 16  ;;  %v13031_v50 = vld [vmem:[#allocation6 + $0xe0] sm:$0xff]  }
 0x1b8   : > { %v3028_v0 = vor.u32 %v3027_v37, %v3024_v54  ;;  %v3117_v54 = vrot.slane %v3115_v1, 4  ;;  %v3120_v37 = vrot.slane %v3118_v60, 5  ;;  %v2935_v60 = vld [vmem:[#allocation2 + $0x108] sm:$0x1f] }
 0x1b9   : > { %v3058_v24 = vrot.slane %v3056_v47, 4  ;;  %v3141_v47 = vshrl.u32 %v12970_v62, 16  ;;  %v3158_v62 = vshrl.u32 %v12980_v16, 16  ;;  %v3203_v57 = vshll.u32 %v2935_v60, 16 }
 0x1ba   : > { %v3037_v38 = vsel %vm1425_vm10, %v3028_v0, %v3036_v41  ;;  %v3129_v0 = vrot.slane %v3127_v58, 5 }
 0x1bb   : > { %v3062_v7 = vor.u32 %v3061_v15, %v3058_v24  ;;  %v3143_v18 = vrot.slane %v3141_v47, 4  ;;  %v2934_v15 = vld [vmem:[#allocation2 + $0xf8] sm:$0x1f]  ;;  %v3160_v36 = vrot.slane %v3158_v62, 4 }
 0x1bc   : > { %v3130_v21 = vor.u32 %v3129_v0, %v3126_v20  ;;  %v13072_v20 = vld [vmem:[#allocation2 + $0x48] sm:$0xf] }
 0x1bd   : > { %v3071_v9 = vsel %vm1425_vm10, %v3062_v7, %v3070_v35  ;;  %v3147_v8 = vor.u32 %v3146_v53, %v3143_v18 }
 0x1be   : > { %10784 = vmatmul.mubr.msk.bf16.vlgmr.msra.gmra.mrb[0].mxu0 %vm273_vm0, %v2969_v46  ;;  %v3075_v46 = vrot.slane %v3073_v4, 4  ;;  %v2933_v4 = vld [vmem:[#allocation2 + $0xe8] sm:$0x1f] }
 0x1bf   : > { %10816 = vmatpush3.bf16.msra.mxu0 %v12939_v45  ;;  %10787 = vmatprep.mubr.msk.bf16.mxu0 %vm273_vm0, %v2986_v3  ;;  %v3041_v45 = vrot.slane %v3039_v48, 4  ;;  %v3086_v3 = vrot.slane %v3084_v11, 5  ;;  %v3169_v33 = vshll.u32 %v2933_v4, 16 }
 0x1c0   : > { %10817 = vmatprep.subr.bf16.mxu0 %v11906_v19  ;;  %v3079_v12 = vor.u32 %v3078_v31, %v3075_v46  ;;  %v3175_v46 = vshrl.u32 %v12982_v17, 16  ;;  %v3178_v31 = vshll.u32 %v12982_v17, 16  ;;  %v3192_v17 = vshrl.u32 %v12996_v29, 16 }
 0x1c1   : > { %v3045_v49 = vor.u32 %v3044_v56, %v3041_v45  ;;  %v3087_v48 = vor.u32 %v3086_v3, %v3083_v39  ;;  %v2932_v56 = vld [vmem:[#allocation2 + $0xd8] sm:$0x1f]  ;;  %v3183_v39 = vshrl.u32 %v2934_v15, 16  ;;  %v3186_v3 = vshll.u32 %v2934_v15, 16 }
 0x1c2   : > { %v3149_v2 = vshrl.u32 %v2932_v56, 16  ;;  %v3152_v63 = vshll.u32 %v2932_v56, 16  ;;  %v3171_v30 = vrot.slane %v3169_v33, 5  ;;  %v3194_v58 = vrot.slane %v3192_v17, 4  ;;  %v13081_v33 = vld [vmem:[#allocation2 + $0x58] sm:$0xf] }
 0x1c3   : > { %10818 = vmatpush3.bf16.msra.mxu0 %v11906_v19  ;;  %v3054_v28 = vsel %vm1425_vm10, %v3045_v49, %v3053_v6  ;;  %v3093_v19 = vshll.u32 %v12956_v55, 16  ;;  %v3109_v55 = vrot.slane %v3107_v22, 4  ;;  %v3088_v14 = vsel %vm1425_vm10, %v3079_v12, %v3087_v48  ;;  %v3483_v48 = vld [vmem:[#allocation2 + $0x20] sm:$0xf8] }
 0x1c4   : > { %10819 = vmatprep.subr.bf16.mxu0 %v11907_v44  ;;  %v3151_v11 = vrot.slane %v3149_v2, 4  ;;  %v3154_v24 = vrot.slane %v3152_v63, 5  ;;  %v3177_v22 = vrot.slane %v3175_v46, 4  ;;  %v3188_v1 = vrot.slane %v3186_v3, 5  ;;  %v3487_v63 = vld [vmem:[#allocation2 + $0x40] sm:$0xf8] }
 0x1c5   : > { %v3095_v25 = vrot.slane %v3093_v19, 5  ;;  %v3205_v56 = vrot.slane %v3203_v57, 5  ;;  %v3550_v18 = vshrl.u32 %v3487_v63, 16  ;;  %v3553_v53 = vshll.u32 %v3487_v63, 16 }
 0x1c6   : > { %10788 = vmatmul.mubr.msk.bf16.gmra.mrb[4].mxu0 %vm273_vm0, %v3003_v52  ;;  %v3112_v52 = vrot.slane %v3110_v34, 5  ;;  %v3155_v7 = vor.u32 %v3154_v24, %v3151_v11  ;;  %v3185_v34 = vrot.slane %v3183_v39, 4  ;;  %v3558_v15 = vshrl.u32 %v13072_v20, 16 }
 0x1c7   : > { %10791 = vmatprep.mubr.msk.bf16.mxu0 %vm273_vm0, %v3020_v40  ;;  %10820 = vmatpush3.bf16.msra.mxu0 %v11907_v44  ;;  %v2931_v44 = vld [vmem:[#allocation2 + $0xc8] sm:$0x1f]  ;;  %v3096_v42 = vor.u32 %v3095_v25, %v3092_v43  ;;  %v3195_v43 = vshll.u32 %v12996_v29, 16  ;;  %v3200_v25 = vshrl.u32 %v2935_v60, 16  ;;  %v3552_v39 = vrot.slane %v3550_v18, 3  ;;  %v11911_v18 = vld [vmem:[#allocation6 + $0xf0] sm:$0xff]  }
 0x1c8   : > { %10821 = vmatprep.subr.bf16.mxu0 %v11908_v59  ;;  %v3132_v26 = vshrl.u32 %v2931_v44, 16  ;;  %v3135_v45 = vshll.u32 %v2931_v44, 16  ;;  %v3113_v40 = vor.u32 %v3112_v52, %v3109_v55  ;;  %v3156_v12 = vsel %vm1425_vm10, %v3147_v8, %v3155_v7 }
 0x1c9   : > { %v3105_v49 = vsel %vm1425_vm10, %v3096_v42, %v3104_v51  ;;  %v3189_v52 = vor.u32 %v3188_v1, %v3185_v34  ;;  %v3485_v51 = vld [vmem:[#allocation2 + $0x30] sm:$0xf8]  ;;  %v3555_v3 = vrot.slane %v3553_v53, 4  ;;  %v3560_v7 = vrot.slane %v3558_v15, 3 }
 0x1ca   : > { %v3134_v61 = vrot.slane %v3132_v26, 4  ;;  %v3137_v41 = vrot.slane %v3135_v45, 5  ;;  %v3197_v26 = vrot.slane %v3195_v43, 5  ;;  %v3202_v45 = vrot.slane %v3200_v25, 4 }
 0x1cb   : > { %10822 = vmatpush3.bf16.msra.mxu0 %v11908_v59  ;;  %v3121_v59 = vor.u32 %v3120_v37, %v3117_v54  ;;  %v3516_v54 = vshrl.u32 %v3483_v48, 16  ;;  %v3519_v37 = vshll.u32 %v3483_v48, 16  ;;  %v3556_v17 = vor.u32 %v3555_v3, %v3552_v39  ;;  %v11912_v39 = vld [vmem:[#allocation6 + $0xf8] sm:$0xff]   ;;  %v3499_v3 = vld [vmem:[#allocation2 + $0xa0] sm:$0xf8] }
 0x1cc   : > { %10855 = vmatprep.subr.bf16.mxu0 %v13031_v50  ;;  %v3138_v32 = vor.u32 %v3137_v41, %v3134_v61  ;;  %v3198_v0 = vor.u32 %v3197_v26, %v3194_v58  ;;  %v3206_v61 = vor.u32 %v3205_v56, %v3202_v45  ;;  %v3533_v41 = vshrl.u32 %v3485_v51, 16  ;;  %v13093_v58 = vld [vmem:[#allocation2 + $0x78] sm:$0xf]  ;;  %v11910_v56 = vld [vmem:[#allocation6 + $0xe8] sm:$0xff]  }
 0x1cd   : > { %v3122_v6 = vsel %vm1425_vm10, %v3113_v40, %v3121_v59  ;;  %v13070_v40 = vld [vmem:[#allocation2 + $0x38] sm:$0xf]  ;;  %v3518_v59 = vrot.slane %v3516_v54, 3  ;;  %v3521_v47 = vrot.slane %v3519_v37, 4  ;;  %v3612_v63 = vshll.u32 %v13093_v58, 16 }
 0x1ce   : > { %10792 = vmatmul.mubr.msk.bf16.gmra.mrb[8].mxu0 %vm273_vm0, %v3037_v38  ;;  %v3161_v38 = vshll.u32 %v12980_v16, 16  ;;  %v3139_v35 = vsel %vm1425_vm10, %v3130_v21, %v3138_v32  ;;  %v3180_v16 = vrot.slane %v3178_v31, 5  ;;  %v3561_v21 = vshll.u32 %v13072_v20, 16 }
 0x1cf   : > { %10795 = vmatprep.mubr.msk.bf16.mxu0 %vm273_vm0, %v3054_v28  ;;  %v3166_v28 = vshrl.u32 %v2933_v4, 16  ;;  %v3544_v4 = vshll.u32 %v13070_v40, 16  ;;  %v3522_v11 = vor.u32 %v3521_v47, %v3518_v59  ;;  %v3207_v32 = vsel %vm1425_vm10, %v3198_v0, %v3206_v61 }
 0x1d0   : > { %v3163_v19 = vrot.slane %v3161_v38, 5  ;;  %v3181_v55 = vor.u32 %v3180_v16, %v3177_v22  ;;  %v3535_v62 = vrot.slane %v3533_v41, 3  ;;  %v3575_v22 = vshrl.u32 %v13081_v33, 16 }
 0x1d1   : > { %v3168_v13 = vrot.slane %v3166_v28, 4  ;;  %v3489_v28 = vld [vmem:[#allocation2 + $0x50] sm:$0xf8]  ;;  %v3546_v31 = vrot.slane %v3544_v4, 4  ;;  %v3578_v16 = vshll.u32 %v13081_v33, 16 }
 0x1d2   : > { %v3164_v5 = vor.u32 %v3163_v19, %v3160_v36  ;;  %v3190_v42 = vsel %vm1425_vm10, %v3181_v55, %v3189_v52  ;;  %v3491_v36 = vld [vmem:[#allocation2 + $0x60] sm:$0xf8]  ;;  %v13084_v19 = vld [vmem:[#allocation2 + $0x68] sm:$0xf]  ;;  %v3493_v52 = vld [vmem:[#allocation2 + $0x70] sm:$0xf8] }
 0x1d3   : > { %v3172_v44 = vor.u32 %v3171_v30, %v3168_v13  ;;  %v3567_v13 = vshrl.u32 %v3489_v28, 16  ;;  %v3570_v30 = vshll.u32 %v3489_v28, 16  ;;  %v3584_v60 = vshrl.u32 %v3491_v36, 16  ;;  %v3497_v28 = vld [vmem:[#allocation2 + $0x90] sm:$0xf8] }
 0x1d4   : > { %v3592_v48 = vshrl.u32 %v13084_v19, 16  ;;  %v3595_v25 = vshll.u32 %v13084_v19, 16  ;;  %v3580_v55 = vrot.slane %v3578_v16, 4  ;;  %v3601_v47 = vshrl.u32 %v3493_v52, 16 }
 0x1d5   : > { %v3173_v29 = vsel %vm1425_vm10, %v3164_v5, %v3172_v44  ;;  %v3569_v57 = vrot.slane %v3567_v13, 3  ;;  %v3572_v5 = vrot.slane %v3570_v30, 4  ;;  %v3577_v44 = vrot.slane %v3575_v22, 3 }
 0x1d6   : > { %10796 = vmatmul.mubr.msk.bf16.gmra.mrb[12].mxu0 %vm273_vm0, %v3071_v9  ;;  %v13060_v9 = vld [vmem:[#allocation2 + $0x28] sm:$0xf]  ;;  %v3586_v37 = vrot.slane %v3584_v60, 3  ;;  %v3597_v45 = vrot.slane %v3595_v25, 4  ;;  %v3638_v13 = vshll.u32 %v3497_v28, 16  ;;  %v3655_v60 = vshll.u32 %v3499_v3, 16 }
 0x1d7   : > { %10799 = vmatprep.mubr.msk.bf16.mxu0 %vm273_vm0, %v3088_v14  ;;  %v3524_v14 = vshrl.u32 %v13060_v9, 16  ;;  %v3527_v27 = vshll.u32 %v13060_v9, 16  ;;  %v3581_v59 = vor.u32 %v3580_v55, %v3577_v44  ;;  %v4110_v10 = vrot.slane %v13060_v9, 4 }
 0x1d8   : > { %v3640_v55 = vrot.slane %v3638_v13, 4  ;;  %v4116_v9 = vrot.slane %v13072_v20, 4 }
 0x1d9   : > { %v3526_v23 = vrot.slane %v3524_v14, 3  ;;  %v3529_v2 = vrot.slane %v3527_v27, 4  ;;  %v3594_v27 = vrot.slane %v3592_v48, 3 }
 0x1db   : > { %v3530_v24 = vor.u32 %v3529_v2, %v3526_v23  ;;  %v3604_v23 = vshll.u32 %v3493_v52, 16  ;;  %v3609_v2 = vshrl.u32 %v13093_v58, 16  ;;  %v3598_v4 = vor.u32 %v3597_v45, %v3594_v27  ;;  %v3503_v45 = vld [vmem:[#allocation2 + $0xc0] sm:$0xf8] }
 0x1dd   : > { %v3531_v8 = vsel %vm337_vm7, %v3522_v11, %v3530_v24  ;;  %v3603_v11 = vrot.slane %v3601_v47, 3  ;;  %v3606_v24 = vrot.slane %v3604_v23, 4  ;;  %v3611_v15 = vrot.slane %v3609_v2, 3  ;;  %v13126_v47 = vld [vmem:[#allocation2 + $0xc8] sm:$0xf] }
 0x1de   : > { %10800 = vmatmul.mubr.msk.bf16.gmra.mrb[16].mxu0 %vm273_vm0, %v3105_v49  ;;  %v3536_v49 = vshll.u32 %v3485_v51, 16  ;;  %v3573_v51 = vor.u32 %v3572_v5, %v3569_v57  ;;  %v3501_v57 = vld [vmem:[#allocation2 + $0xb0] sm:$0xf8]  ;;  %v13120_v5 = vld [vmem:[#allocation2 + $0xb8] sm:$0xf] }
 0x1df   : > { %10803 = vmatprep.mubr.msk.bf16.mxu0 %vm273_vm0, %v3122_v6  ;;  %v3541_v6 = vshrl.u32 %v13070_v40, 16 }
 0x1e0   : > { %v3538_v38 = vrot.slane %v3536_v49, 4  ;;  %v3582_v53 = vsel %vm337_vm7, %v3573_v51, %v3581_v59  ;;  %v3677_v51 = vshrl.u32 %v13120_v5, 16  ;;  %v3680_v59 = vshll.u32 %v13120_v5, 16 }
 0x1e1   : > { %v3543_v46 = vrot.slane %v3541_v6, 3 }
 0x1e2   : > { %v3539_v34 = vor.u32 %v3538_v38, %v3535_v62 }
 0x1e3   : > { %v3547_v1 = vor.u32 %v3546_v31, %v3543_v46  ;;  %v13107_v31 = vld [vmem:[#allocation2 + $0x98] sm:$0xf] }
 0x1e4   : > { %v3643_v16 = vshrl.u32 %v13107_v31, 16 }
 0x1e5   : > { %v3548_v54 = vsel %vm337_vm7, %v3539_v34, %v3547_v1  ;;  %v3646_v34 = vshll.u32 %v13107_v31, 16  ;;  %v3652_v1 = vshrl.u32 %v3499_v3, 16 }
 0x1e6   : > { %10804 = vmatmul.mubr.msk.bf16.gmra.mrb[20].mxu0 %vm273_vm0, %v3139_v35  ;;  %v3563_v35 = vrot.slane %v3561_v21, 4  ;;  %v3614_v21 = vrot.slane %v3612_v63, 4  ;;  %v3645_v52 = vrot.slane %v3643_v16, 3  ;;  %v3686_v63 = vshrl.u32 %v3503_v45, 16 }
 0x1e7   : > { %10807 = vmatprep.mubr.msk.bf16.mxu0 %vm273_vm0, %v3156_v12  ;;  %v3587_v12 = vshll.u32 %v3491_v36, 16  ;;  %v3635_v36 = vshrl.u32 %v3497_v28, 16 }
 0x1e8   : > { %v3564_v43 = vor.u32 %v3563_v35, %v3560_v7  ;;  %v3607_v7 = vor.u32 %v3606_v24, %v3603_v11  ;;  %v3615_v35 = vor.u32 %v3614_v21, %v3611_v15  ;;  %v3682_v11 = vrot.slane %v3680_v59, 4 }
 0x1e9   : > { %v3589_v14 = vrot.slane %v3587_v12, 4  ;;  %v3637_v25 = vrot.slane %v3635_v36, 3  ;;  %v3688_v15 = vrot.slane %v3686_v63, 3 }
 0x1ea   : > { %v3565_v26 = vsel %vm337_vm7, %v3556_v17, %v3564_v43  ;;  %v13117_v17 = vld [vmem:[#allocation6 + $0x100] sm:$0xff]   ;;  %v3616_v43 = vsel %vm337_vm7, %v3607_v7, %v3615_v35 }
 0x1eb   : > { %v3590_v6 = vor.u32 %v3589_v14, %v3586_v37  ;;  %v3654_v37 = vrot.slane %v3652_v1, 3  ;;  %v3657_v14 = vrot.slane %v3655_v60, 4  ;;  %v3641_v23 = vor.u32 %v3640_v55, %v3637_v25  ;;  %v3509_v55 = vld [vmem:[#allocation2 + $0xf0] sm:$0xf8] }
 0x1ed   : > { %v3599_v46 = vsel %vm337_vm7, %v3590_v6, %v3598_v4  ;;  %v3697_v6 = vshll.u32 %v13126_v47, 16 }
 0x1ee   : > { %10808 = vmatmul.mubr.msk.bf16.gmra.mrb[24].mxu0 %vm273_vm0, %v3173_v29  ;;  %v3495_v29 = vld [vmem:[#allocation2 + $0x80] sm:$0xf8] }
 0x1ef   : > { %10811 = vmatprep.mubr.msk.bf16.mxu0 %vm273_vm0, %v3190_v42  ;;  %v13096_v42 = vld [vmem:[#allocation2 + $0x88] sm:$0xf]  ;;  %v3618_v0 = vshrl.u32 %v3495_v29, 16  ;;  %v3621_v61 = vshll.u32 %v3495_v29, 16  ;;  %v3672_v29 = vshll.u32 %v3501_v57, 16  ;;  %v3699_v28 = vrot.slane %v3697_v6, 4 }
 0x1f0   : > { %v3626_v41 = vshrl.u32 %v13096_v42, 16  ;;  %v3629_v49 = vshll.u32 %v13096_v42, 16 }
 0x1f2   : > { %v3628_v62 = vrot.slane %v3626_v41, 3  ;;  %v3631_v38 = vrot.slane %v3629_v49, 4  ;;  %v3694_v49 = vshrl.u32 %v13126_v47, 16 }
 0x1f4   : > { %v3632_v22 = vor.u32 %v3631_v38, %v3628_v62  ;;  %v3696_v38 = vrot.slane %v3694_v49, 3 }
 0x1f6   : > { %10812 = vmatmul.mubr.msk.bf16.gmra.mrb[28].mxu0 %vm273_vm0, %v3207_v32  ;;  %v3623_v32 = vrot.slane %v3621_v61, 4  ;;  %v3658_v61 = vor.u32 %v3657_v14, %v3654_v37 }
 0x1f7   : > { %10823 = vmatprep.mubr.msk.bf16.mxu0 %vm273_vm0, %v3531_v8  ;;  %v13109_v8 = vld [vmem:[#allocation2 + $0xa8] sm:$0xf] }
 0x1f8   : > { %v3660_v12 = vshrl.u32 %v13109_v8, 16  ;;  %v3663_v48 = vshll.u32 %v13109_v8, 16 }
 0x1fa   : > { %v3662_v27 = vrot.slane %v3660_v12, 3  ;;  %v3700_v12 = vor.u32 %v3699_v28, %v3696_v38 }
 0x1fe   : > { %10824 = vmatmul.mubr.msk.bf16.vlgmr.msra.gmra.mrb[0].mxu0 %vm273_vm0, %v3548_v54  ;;  %v3648_v54 = vrot.slane %v3646_v34, 4 }
 0x1ff   : > { %10856 = vmatpush3.bf16.msra.mxu0 %v13031_v50  ;;  %10827 = vmatprep.mubr.msk.bf16.mxu0 %vm273_vm0, %v3565_v26  ;;  %v3620_v50 = vrot.slane %v3618_v0, 3  ;;  %v3665_v26 = vrot.slane %v3663_v48, 4  ;;  %v3689_v0 = vshll.u32 %v3503_v45, 16  ;;  %v3511_v45 = vld [vmem:[#allocation2 + $0x100] sm:$0xf8] }
 0x200   : > { %10857 = vmatprep.subr.bf16.mxu0 %v11910_v56  ;;  %v3649_v2 = vor.u32 %v3648_v54, %v3645_v52  ;;  %v3757_v49 = vshll.u32 %v3511_v45, 16 }
 0x201   : > { %v3624_v30 = vor.u32 %v3623_v32, %v3620_v50  ;;  %v3666_v41 = vor.u32 %v3665_v26, %v3662_v27  ;;  %v3691_v21 = vrot.slane %v3689_v0, 4  ;;  %v3505_v50 = vld [vmem:[#allocation2 + $0xd0] sm:$0xf8]  ;;  %v13133_v32 = vld [vmem:[#allocation2 + $0xd8] sm:$0xf] }
 0x202   : > { %v3650_v24 = vsel %vm337_vm7, %v3641_v23, %v3649_v2  ;;  %v3703_v35 = vshrl.u32 %v3505_v50, 16  ;;  %v3706_v36 = vshll.u32 %v3505_v50, 16  ;;  %v3711_v13 = vshrl.u32 %v13133_v32, 16  ;;  %v13145_v27 = vld [vmem:[#allocation2 + $0xf8] sm:$0xf] }
 0x203   : > { %10858 = vmatpush3.bf16.msra.mxu0 %v11910_v56  ;;  %v3633_v44 = vsel %vm337_vm7, %v3624_v30, %v3632_v22  ;;  %v3669_v56 = vshrl.u32 %v3501_v57, 16  ;;  %v3667_v62 = vsel %vm337_vm7, %v3658_v61, %v3666_v41  ;;  %v3714_v30 = vshll.u32 %v13133_v32, 16  ;;  %v13158_v50 = vld [vmem:[#allocation2 + $0x118] sm:$0xf] }
 0x204   : > { %10859 = vmatprep.subr.bf16.mxu0 %v11911_v18  ;;  %v3692_v60 = vor.u32 %v3691_v21, %v3688_v15  ;;  %v3708_v25 = vrot.slane %v3706_v36, 4  ;;  %v3713_v57 = vrot.slane %v3711_v13, 3  ;;  %v3745_v59 = vshrl.u32 %v13145_v27, 16 }
 0x205   : > { %v3671_v4 = vrot.slane %v3669_v56, 3  ;;  %v13148_v56 = vld [vmem:[#allocation2 + $0x108] sm:$0xf]  ;;  %v3748_v23 = vshll.u32 %v13145_v27, 16  ;;  %v3754_v41 = vshrl.u32 %v3511_v45, 16  ;;  %v3759_v38 = vrot.slane %v3757_v49, 4 }
 0x206   : > { %10828 = vmatmul.mubr.msk.bf16.gmra.mrb[4].mxu0 %vm273_vm0, %v3582_v53  ;;  %v3679_v53 = vrot.slane %v3677_v51, 3  ;;  %v3701_v26 = vsel %vm337_vm7, %v3692_v60, %v3700_v12  ;;  %v3740_v51 = vshll.u32 %v3509_v55, 16  ;;  %v3762_v6 = vshrl.u32 %v13148_v56, 16  ;;  %v13176_v45 = vld [vmem:[#allocation2 + $0x30] sm:$0xf0] }
 0x207   : > { %10831 = vmatprep.mubr.msk.bf16.mxu0 %vm273_vm0, %v3599_v46  ;;  %10860 = vmatpush3.bf16.msra.mxu0 %v11911_v18  ;;  %v3674_v18 = vrot.slane %v3672_v29, 4  ;;  %v3507_v46 = vld [vmem:[#allocation2 + $0xe0] sm:$0xf8]  ;;  %v3737_v29 = vshrl.u32 %v3509_v55, 16  ;;  %v4119_v49 = vrot.slane %v13081_v33, 4 }
 0x208   : > { %10861 = vmatprep.subr.bf16.mxu0 %v11912_v39  ;;  %v3683_v7 = vor.u32 %v3682_v11, %v3679_v53  ;;  %v3720_v22 = vshrl.u32 %v3507_v46, 16  ;;  %v3723_v16 = vshll.u32 %v3507_v46, 16  ;;  %v3742_v53 = vrot.slane %v3740_v51, 4  ;;  %v13168_v55 = vld [vmem:[#allocation2 + $0x20] sm:$0xf0] }
 0x209   : > { %v3675_v3 = vor.u32 %v3674_v18, %v3671_v4  ;;  %v3765_v4 = vshll.u32 %v13148_v56, 16  ;;  %v3739_v18 = vrot.slane %v3737_v29, 3  ;;  %v3747_v11 = vrot.slane %v3745_v59, 3  ;;  %v13178_v29 = vld [vmem:[#allocation2 + $0x40] sm:$0xf0] }
 0x20a   : > { %v3722_v52 = vrot.slane %v3720_v22, 3  ;;  %v3725_v54 = vrot.slane %v3723_v16, 4  ;;  %v3764_v28 = vrot.slane %v3762_v6, 3  ;;  %v3782_v22 = vshll.u32 %v13158_v50, 16  ;;  %v390_v16 = vld [vmem:[#allocation2 + $0x118] sm:$0x10] }
 0x20b   : > { %10862 = vmatpush3.bf16.msra.mxu0 %v11912_v39  ;;  %v13136_v39 = vld [vmem:[#allocation2 + $0xe8] sm:$0xf]  ;;  %v3684_v48 = vsel %vm337_vm7, %v3675_v3, %v3683_v7  ;;  %v3767_v46 = vrot.slane %v3765_v4, 4  ;;  %v3513_v3 = vld [vmem:[#allocation2 + $0x110] sm:$0xf8]  ;;  %v3743_v7 = vor.u32 %v3742_v53, %v3739_v18  ;;  %v391_v12 = vsel %vm12610_vm9, 0, %v390_v16 }
 0x20c   : > { %10895 = vmatprep.subr.bf16.mxu0 %v13117_v17  ;;  %v3728_v34 = vshrl.u32 %v13136_v39, 16  ;;  %v3731_v1 = vshll.u32 %v13136_v39, 16  ;;  %v3726_v0 = vor.u32 %v3725_v54, %v3722_v52  ;;  %v3771_v36 = vshrl.u32 %v3513_v3, 16  ;;  %392 = vst [vmem:[#allocation2 + $0x118] sm:$0x10] %v391_v12  ;;  %v11915_v4 = vld [vmem:[#allocation6 + $0x110] sm:$0xff]  }
 0x20d   : > { %v3774_v13 = vshll.u32 %v3513_v3, 16  ;;  %v4112_v51 = vrot.slane %v13176_v45, 4  ;;  %v4113_v59 = vrot.slane %v13070_v40, 4  ;;  %v4122_v6 = vrot.slane %v13084_v19, 4  ;;  %v13239_v12 = vld [vmem:[#allocation2 + $0xe0] sm:$0xf0] }
 0x20e   : > { %10832 = vmatmul.mubr.msk.bf16.gmra.mrb[8].mxu0 %vm273_vm0, %v3616_v43  ;;  %v3705_v43 = vrot.slane %v3703_v35, 3  ;;  %v3730_v37 = vrot.slane %v3728_v34, 3  ;;  %v3733_v14 = vrot.slane %v3731_v1, 4  ;;  %v3768_v1 = vor.u32 %v3767_v46, %v3764_v28  ;;  %v13213_v28 = vld [vmem:[#allocation2 + $0x90] sm:$0xf0] }
 0x20f   : > { %10835 = vmatprep.mubr.msk.bf16.mxu0 %vm273_vm0, %v3633_v44  ;;  %v3716_v44 = vrot.slane %v3714_v30, 4  ;;  %v3779_v30 = vshrl.u32 %v13158_v50, 16  ;;  %v4125_v19 = vrot.slane %v13093_v58, 4  ;;  %v13215_v46 = vld [vmem:[#allocation2 + $0xa0] sm:$0xf0]  ;;  %v4130_v58 = vrot.slane %v13213_v28, 4 }
 0x210   : > { %v3709_v2 = vor.u32 %v3708_v25, %v3705_v43  ;;  %v3734_v61 = vor.u32 %v3733_v14, %v3730_v37  ;;  %v3776_v43 = vrot.slane %v3774_v13, 4  ;;  %v4109_v37 = vrot.slane %v13168_v55, 4  ;;  %v13225_v13 = vld [vmem:[#allocation2 + $0xb0] sm:$0xf0] }
 0x211   : > { %v3717_v63 = vor.u32 %v3716_v44, %v3713_v57  ;;  %v3781_v25 = vrot.slane %v3779_v30, 3  ;;  %v3784_v57 = vrot.slane %v3782_v22, 4  ;;  %v4131_v3 = vrot.slane %v13107_v31, 4  ;;  %v13227_v30 = vld [vmem:[#allocation2 + $0xc0] sm:$0xf0] }
 0x212   : > { %v3735_v21 = vsel %vm337_vm7, %v3726_v0, %v3734_v61  ;;  %v13188_v0 = vld [vmem:[#allocation2 + $0x50] sm:$0xf0]  ;;  %v11914_v61 = vld [vmem:[#allocation6 + $0x108] sm:$0xff]   ;;  %v4136_v22 = vrot.slane %v13225_v13, 4  ;;  %v4137_v31 = vrot.slane %v13120_v5, 4  ;;  %v4139_v16 = vrot.slane %v13227_v30, 4 }
 0x213   : > { %v3718_v15 = vsel %vm337_vm7, %v3709_v2, %v3717_v63  ;;  %v3785_v54 = vor.u32 %v3784_v57, %v3781_v25  ;;  %v4114_v2 = vsel %vm885_vm1, %v4112_v51, %v4113_v59  ;;  %v4118_v40 = vrot.slane %v13188_v0, 4  ;;  %v13248_v57 = vld [vmem:[#allocation2 + $0xf0] sm:$0xf0] }
 0x214   : > { %v4143_v5 = vrot.slane %v13133_v32, 4  ;;  %v4448_v32 = vshrl.u32 %v13168_v55, 16  ;;  %v4152_v59 = vrot.slane %v13148_v56, 4 }
 0x215   : > { %v4120_v18 = vsel %vm885_vm1, %v4118_v40, %v4119_v49  ;;  %v13263_v49 = vld [vmem:[#allocation2 + $0x110] sm:$0xf0] }
 0x216   : > { %10836 = vmatmul.mubr.msk.bf16.gmra.mrb[12].mxu0 %vm273_vm0, %v3650_v24  ;;  %v3750_v24 = vrot.slane %v3748_v23, 4  ;;  %v4115_v23 = vrot.slane %v13178_v29, 4  ;;  %v4154_v56 = vrot.slane %v13263_v49, 4 }
 0x217   : > { %10839 = vmatprep.mubr.msk.bf16.mxu0 %vm273_vm0, %v3667_v62  ;;  %v3756_v62 = vrot.slane %v3754_v41, 3  ;;  %v13190_v41 = vld [vmem:[#allocation2 + $0x60] sm:$0xf0] }
 0x218   : > { %v3751_v35 = vor.u32 %v3750_v24, %v3747_v11  ;;  %v4117_v63 = vsel %vm885_vm1, %v4115_v23, %v4116_v9  ;;  %v4121_v20 = vrot.slane %v13190_v41, 4  ;;  %v13201_v11 = vld [vmem:[#allocation2 + $0x70] sm:$0xf0]  ;;  %v13203_v24 = vld [vmem:[#allocation2 + $0x80] sm:$0xf0] }
 0x219   : > { %v3760_v34 = vor.u32 %v3759_v38, %v3756_v62  ;;  %v4124_v33 = vrot.slane %v13201_v11, 4  ;;  %v4432_v9 = vld [vmem:[#allocation2 + $0x38] sm:$0x1f] }
 0x21a   : > { %v3752_v60 = vsel %vm337_vm7, %v3743_v7, %v3751_v35  ;;  %v4123_v53 = vsel %vm885_vm1, %v4121_v20, %v4122_v6  ;;  %v4134_v7 = vrot.slane %v13109_v8, 4  ;;  %v4132_v35 = vsel %vm885_vm1, %v4130_v58, %v4131_v3 }
 0x21b   : > { %v3769_v44 = vsel %vm337_vm7, %v3760_v34, %v3768_v1  ;;  %v4126_v62 = vsel %vm885_vm1, %v4124_v33, %v4125_v19  ;;  %v4140_v8 = vrot.slane %v13126_v47, 4  ;;  %v4138_v34 = vsel %vm885_vm1, %v4136_v22, %v4137_v31 }
 0x21c   : > { %v4146_v47 = vrot.slane %v13136_v39, 4  ;;  %v4451_v39 = vshll.u32 %v13168_v55, 16  ;;  %v4465_v20 = vshrl.u32 %v13176_v45, 16  ;;  %v4468_v55 = vshll.u32 %v13176_v45, 16 }
 0x21d   : > { %v4141_v1 = vsel %vm885_vm1, %v4139_v16, %v4140_v8  ;;  %v4473_v6 = vshrl.u32 %v4432_v9, 16  ;;  %v4482_v19 = vshrl.u32 %v13178_v29, 16  ;;  %v4435_v16 = vld [vmem:[#allocation2 + $0x68] sm:$0x1f] }
 0x21e   : > { %10840 = vmatmul.mubr.msk.bf16.gmra.mrb[16].mxu0 %vm273_vm0, %v3684_v48  ;;  %v3773_v48 = vrot.slane %v3771_v36, 3  ;;  %v4467_v45 = vrot.slane %v4465_v20, 4 }
 0x21f   : > { %10843 = vmatprep.mubr.msk.bf16.mxu0 %vm273_vm0, %v3701_v26  ;;  %v4111_v26 = vsel %vm885_vm1, %v4109_v37, %v4110_v10  ;;  %v4148_v37 = vrot.slane %v13248_v57, 4  ;;  %v4149_v10 = vrot.slane %v13145_v27, 4  ;;  %v4475_v58 = vrot.slane %v4473_v6, 4 }
 0x220   : > { %v3777_v52 = vor.u32 %v3776_v43, %v3773_v48  ;;  %v4145_v43 = vrot.slane %v13239_v12, 4 }
 0x221   : > { %v4150_v23 = vsel %vm885_vm1, %v4148_v37, %v4149_v10 }
 0x222   : > { %v3786_v14 = vsel %vm337_vm7, %v3777_v52, %v3785_v54  ;;  %v4431_v52 = vld [vmem:[#allocation2 + $0x28] sm:$0x1f]  ;;  %v13251_v54 = vld [vmem:[#allocation2 + $0x100] sm:$0xf0] }
 0x223   : > { %v4151_v51 = vrot.slane %v13251_v54, 4 }
 0x225   : > { %v4153_v27 = vsel %vm885_vm1, %v4151_v51, %v4152_v59  ;;  %v4436_v51 = vld [vmem:[#allocation2 + $0x78] sm:$0x1f] }
 0x226   : > { %10844 = vmatmul.mubr.msk.bf16.gmra.mrb[20].mxu0 %vm273_vm0, %v3718_v15  ;;  %v4127_v15 = vrot.slane %v13203_v24, 4 }
 0x227   : > { %10847 = vmatprep.mubr.msk.bf16.mxu0 %vm273_vm0, %v3735_v21  ;;  %v4128_v21 = vrot.slane %v13096_v42, 4  ;;  %v4133_v42 = vrot.slane %v13215_v46, 4 }
 0x229   : > { %v4129_v38 = vsel %vm885_vm1, %v4127_v15, %v4128_v21  ;;  %v4135_v36 = vsel %vm885_vm1, %v4133_v42, %v4134_v7  ;;  %v4485_v15 = vshll.u32 %v13178_v29, 16  ;;  %v4499_v29 = vshrl.u32 %v13188_v0, 16 }
 0x22b   : > { %v4487_v22 = vrot.slane %v4485_v15, 5 }
 0x22e   : > { %10848 = vmatmul.mubr.msk.bf16.gmra.mrb[24].mxu0 %vm273_vm0, %v3752_v60  ;;  %v13237_v60 = vld [vmem:[#allocation2 + $0xd0] sm:$0xf0] }
 0x22f   : > { %10851 = vmatprep.mubr.msk.bf16.mxu0 %vm273_vm0, %v3769_v44  ;;  %v4142_v48 = vrot.slane %v13237_v60, 4  ;;  %v4147_v44 = vsel %vm885_vm1, %v4145_v43, %v4146_v47  ;;  %v4516_v43 = vshrl.u32 %v13190_v41, 16  ;;  %v4519_v47 = vshll.u32 %v13190_v41, 16 }
 0x230   : > { %v4536_v41 = vshll.u32 %v13201_v11, 16 }
 0x231   : > { %v4144_v25 = vsel %vm885_vm1, %v4142_v48, %v4143_v5  ;;  %v4521_v59 = vrot.slane %v4519_v47, 5 }
 0x236   : > { %10852 = vmatmul.mubr.msk.bf16.gmra.mrb[28].mxu0 %vm273_vm0, %v3786_v14  ;;  %v4456_v14 = vshrl.u32 %v4431_v52, 16 }
 0x237   : > { %10863 = vmatprep.mubr.msk.bf16.mxu0 %vm273_vm0, %v4111_v26  ;;  %v4459_v26 = vshll.u32 %v4431_v52, 16 }
 0x239   : > { %v4461_v40 = vrot.slane %v4459_v26, 5 }
 0x23e   : > { %10864 = vmatmul.mubr.msk.bf16.vlgmr.msra.gmra.mrb[0].mxu0 %vm273_vm0, %v4114_v2  ;;  %v4450_v2 = vrot.slane %v4448_v32, 4  ;;  %v4501_v32 = vrot.slane %v4499_v29, 4 }
 0x23f   : > { %10896 = vmatpush3.bf16.msra.mxu0 %v13117_v17  ;;  %10867 = vmatprep.mubr.msk.bf16.mxu0 %vm273_vm0, %v4117_v63  ;;  %v11916_v17 = vld [vmem:[#allocation6 + $0x118] sm:$0xff]   ;;  %v4453_v63 = vrot.slane %v4451_v39, 5 }
 0x240   : > { %10897 = vmatprep.subr.bf16.mxu0 %v11914_v61 }
 0x243   : > { %10898 = vmatpush3.bf16.msra.mxu0 %v11914_v61  ;;  %v4458_v61 = vrot.slane %v4456_v14, 4 }
 0x244   : > { %10899 = vmatprep.subr.bf16.mxu0 %v11915_v4 }
 0x245   : > { %v4462_v33 = vor.u32 %v4461_v40, %v4458_v61  ;;  %v4541_v61 = vshrl.u32 %v4436_v51, 16  ;;  %v4544_v40 = vshll.u32 %v4436_v51, 16 }
 0x246   : > { %10868 = vmatmul.mubr.msk.bf16.gmra.mrb[4].mxu0 %vm273_vm0, %v4120_v18  ;;  %v4433_v18 = vld [vmem:[#allocation2 + $0x48] sm:$0x1f] }
 0x247   : > { %10871 = vmatprep.mubr.msk.bf16.mxu0 %vm273_vm0, %v4123_v53  ;;  %10900 = vmatpush3.bf16.msra.mxu0 %v11915_v4  ;;  %v4476_v4 = vshll.u32 %v4432_v9, 16  ;;  %v4155_v53 = vrot.slane %v13158_v50, 4  ;;  %v4490_v21 = vshrl.u32 %v4433_v18, 16  ;;  %v4546_v15 = vrot.slane %v4544_v40, 5 }
 0x248   : > { %10901 = vmatprep.subr.bf16.mxu0 %v11916_v17 }
 0x249   : > { %v4478_v3 = vrot.slane %v4476_v4, 5  ;;  %v4156_v42 = vsel %vm885_vm1, %v4154_v56, %v4155_v53  ;;  %v4492_v50 = vrot.slane %v4490_v21, 4  ;;  %v4553_v56 = vshll.u32 %v13203_v24, 16 }
 0x24b   : > { %10902 = vmatpush3.bf16.msra.mxu0 %v11916_v17  ;;  %v4454_v17 = vor.u32 %v4453_v63, %v4450_v2  ;;  %v4533_v63 = vshrl.u32 %v13201_v11, 16  ;;  %v4543_v11 = vrot.slane %v4541_v61, 4 }
 0x24d   : > { %v4463_v7 = vsel %vm1425_vm10, %v4454_v17, %v4462_v33  ;;  %v4535_v33 = vrot.slane %v4533_v63, 4  ;;  %v4618_v63 = vshrl.u32 %v13227_v30, 16 }
 0x24e   : > { %10872 = vmatmul.mubr.msk.bf16.gmra.mrb[8].mxu0 %vm273_vm0, %v4126_v62  ;;  %v4493_v62 = vshll.u32 %v4433_v18, 16  ;;  %v4550_v18 = vshrl.u32 %v13203_v24, 16  ;;  %v4567_v24 = vshrl.u32 %v13213_v28, 16 }
 0x24f   : > { %10875 = vmatprep.mubr.msk.bf16.mxu0 %vm273_vm0, %v4129_v38  ;;  %v4470_v38 = vrot.slane %v4468_v55, 5 }
 0x250   : > { %v4495_v31 = vrot.slane %v4493_v62, 5 }
 0x251   : > { %v4471_v8 = vor.u32 %v4470_v38, %v4467_v45  ;;  %v4438_v45 = vld [vmem:[#allocation2 + $0x98] sm:$0x1f]  ;;  %v4552_v38 = vrot.slane %v4550_v18, 4 }
 0x252   : > { %v4496_v37 = vor.u32 %v4495_v31, %v4492_v50  ;;  %v4575_v50 = vshrl.u32 %v4438_v45, 16  ;;  %v4578_v31 = vshll.u32 %v4438_v45, 16  ;;  %v4442_v18 = vld [vmem:[#allocation2 + $0xd8] sm:$0x1f] }
 0x253   : > { %v4646_v45 = vshll.u32 %v4442_v18, 16 }
 0x256   : > { %10876 = vmatmul.mubr.msk.bf16.gmra.mrb[12].mxu0 %vm273_vm0, %v4132_v35  ;;  %v4434_v35 = vld [vmem:[#allocation2 + $0x58] sm:$0x1f] }
 0x257   : > { %10879 = vmatprep.mubr.msk.bf16.mxu0 %vm273_vm0, %v4135_v36  ;;  %v4484_v36 = vrot.slane %v4482_v19, 4  ;;  %v4507_v48 = vshrl.u32 %v4434_v35, 16  ;;  %v4510_v5 = vshll.u32 %v4434_v35, 16  ;;  %v4538_v19 = vrot.slane %v4536_v41, 5 }
 0x258   : > { %v4621_v41 = vshll.u32 %v13227_v30, 16  ;;  %v4635_v30 = vshrl.u32 %v13237_v60, 16 }
 0x259   : > { %v4488_v52 = vor.u32 %v4487_v22, %v4484_v36  ;;  %v4509_v14 = vrot.slane %v4507_v48, 4  ;;  %v4512_v26 = vrot.slane %v4510_v5, 5  ;;  %v4539_v35 = vor.u32 %v4538_v19, %v4535_v33  ;;  %v4443_v19 = vld [vmem:[#allocation2 + $0xe8] sm:$0x1f] }
 0x25a   : > { %v4547_v36 = vor.u32 %v4546_v15, %v4543_v11  ;;  %v4570_v22 = vshll.u32 %v13213_v28, 16 }
 0x25b   : > { %v4497_v2 = vsel %vm1425_vm10, %v4488_v52, %v4496_v37  ;;  %v4513_v55 = vor.u32 %v4512_v26, %v4509_v14  ;;  %v4440_v52 = vld [vmem:[#allocation2 + $0xb8] sm:$0x1f]  ;;  %v4601_v14 = vshrl.u32 %v13225_v13, 16 }
 0x25c   : > { %v4548_v5 = vsel %vm1425_vm10, %v4539_v35, %v4547_v36  ;;  %v4572_v47 = vrot.slane %v4570_v22, 5  ;;  %v4609_v26 = vshrl.u32 %v4440_v52, 16  ;;  %v4612_v51 = vshll.u32 %v4440_v52, 16 }
 0x25e   : > { %10880 = vmatmul.mubr.msk.bf16.gmra.mrb[16].mxu0 %vm273_vm0, %v4138_v34  ;;  %v4479_v34 = vor.u32 %v4478_v3, %v4475_v58  ;;  %v4555_v58 = vrot.slane %v4553_v56, 5  ;;  %v4620_v56 = vrot.slane %v4618_v63, 4  ;;  %v4446_v63 = vld [vmem:[#allocation2 + $0x118] sm:$0x1f] }
 0x25f   : > { %10883 = vmatprep.mubr.msk.bf16.mxu0 %vm273_vm0, %v4141_v1  ;;  %v4502_v1 = vshll.u32 %v13188_v0, 16  ;;  %v4518_v0 = vrot.slane %v4516_v43, 4  ;;  %v4569_v43 = vrot.slane %v4567_v24, 4  ;;  %v4637_v24 = vrot.slane %v4635_v30, 4  ;;  %v11919_v30 = vld [vmem:[#allocation8 + $0x30] sm:$0xff]  }
 0x260   : > { %v4480_v10 = vsel %vm1425_vm10, %v4471_v8, %v4479_v34  ;;  %v4587_v8 = vshll.u32 %v13215_v46, 16 }
 0x261   : > { %v4504_v39 = vrot.slane %v4502_v1, 5  ;;  %v4522_v6 = vor.u32 %v4521_v59, %v4518_v0  ;;  %v4556_v1 = vor.u32 %v4555_v58, %v4552_v38  ;;  %v4441_v0 = vld [vmem:[#allocation2 + $0xc8] sm:$0x1f]  ;;  %v4573_v59 = vor.u32 %v4572_v47, %v4569_v43 }
 0x262   : > { %v4589_v37 = vrot.slane %v4587_v8, 5  ;;  %v4626_v61 = vshrl.u32 %v4441_v0, 16  ;;  %v4629_v40 = vshll.u32 %v4441_v0, 16  ;;  %v4652_v38 = vshrl.u32 %v13239_v12, 16 }
 0x263   : > { %v4505_v20 = vor.u32 %v4504_v39, %v4501_v32  ;;  %v4655_v58 = vshll.u32 %v13239_v12, 16  ;;  %v4669_v12 = vshrl.u32 %v13248_v57, 16 }
 0x264   : > { %v4631_v33 = vrot.slane %v4629_v40, 5  ;;  %v4706_v40 = vshll.u32 %v13263_v49, 16 }
 0x265   : > { %v4514_v21 = vsel %vm1425_vm10, %v4505_v20, %v4513_v55  ;;  %v4614_v55 = vrot.slane %v4612_v51, 5 }
 0x266   : > { %10884 = vmatmul.mubr.msk.bf16.gmra.mrb[20].mxu0 %vm273_vm0, %v4144_v25  ;;  %v4524_v25 = vshrl.u32 %v4435_v16, 16 }
 0x267   : > { %10887 = vmatprep.mubr.msk.bf16.mxu0 %vm273_vm0, %v4147_v44  ;;  %v4527_v44 = vshll.u32 %v4435_v16, 16  ;;  %v4584_v16 = vshrl.u32 %v13215_v46, 16  ;;  %v4604_v46 = vshll.u32 %v13225_v13, 16  ;;  %v4611_v13 = vrot.slane %v4609_v26, 4 }
 0x269   : > { %v4529_v9 = vrot.slane %v4527_v44, 5  ;;  %v4580_v44 = vrot.slane %v4578_v31, 5  ;;  %v4586_v28 = vrot.slane %v4584_v16, 4  ;;  %v4606_v20 = vrot.slane %v4604_v46, 5 }
 0x26a   : > { %v4615_v15 = vor.u32 %v4614_v55, %v4611_v13  ;;  %v4648_v31 = vrot.slane %v4646_v45, 5  ;;  %v4654_v16 = vrot.slane %v4652_v38, 4  ;;  %v13335_v45 = vld [vmem:[#allocation2] sm:$0xf0] }
 0x26b   : > { %v5520_v38 = vrot.slane %v13335_v45, 4 }
 0x26e   : > { %10888 = vmatmul.mubr.msk.bf16.gmra.mrb[24].mxu0 %vm273_vm0, %v4150_v23  ;;  %v4526_v23 = vrot.slane %v4524_v25, 4  ;;  %v4577_v25 = vrot.slane %v4575_v50, 4 }
 0x26f   : > { %10891 = vmatprep.mubr.msk.bf16.mxu0 %vm273_vm0, %v4153_v27  ;;  %v4437_v27 = vld [vmem:[#allocation2 + $0x88] sm:$0x1f] }
 0x270   : > { %v4530_v4 = vor.u32 %v4529_v9, %v4526_v23  ;;  %v4558_v53 = vshrl.u32 %v4437_v27, 16  ;;  %v4561_v17 = vshll.u32 %v4437_v27, 16  ;;  %v4581_v23 = vor.u32 %v4580_v44, %v4577_v25 }
 0x271   : > { %v4590_v9 = vor.u32 %v4589_v37, %v4586_v28  ;;  %v4603_v27 = vrot.slane %v4601_v14, 4  ;;  %v4686_v37 = vshrl.u32 %v13251_v54, 16  ;;  %v4671_v14 = vrot.slane %v4669_v12, 4 }
 0x272   : > { %v4531_v62 = vsel %vm1425_vm10, %v4522_v6, %v4530_v4  ;;  %v4560_v3 = vrot.slane %v4558_v53, 4  ;;  %v4582_v6 = vsel %vm1425_vm10, %v4573_v59, %v4581_v23  ;;  %v4623_v53 = vrot.slane %v4621_v41, 5 }
 0x273   : > { %v4607_v11 = vor.u32 %v4606_v20, %v4603_v27  ;;  %v4688_v59 = vrot.slane %v4686_v37, 4  ;;  %v4711_v27 = vshrl.u32 %v4446_v63, 16  ;;  %v4714_v20 = vshll.u32 %v4446_v63, 16 }
 0x275   : > { %v4616_v36 = vsel %vm1425_vm10, %v4607_v11, %v4615_v15  ;;  %v11917_v11 = vld [vmem:[#allocation8 + $0x20] sm:$0xff]   ;;  %v11918_v15 = vld [vmem:[#allocation8 + $0x28] sm:$0xff]  }
 0x276   : > { %10892 = vmatmul.mubr.msk.bf16.gmra.mrb[28].mxu0 %vm273_vm0, %v4156_v42  ;;  %v4563_v42 = vrot.slane %v4561_v17, 5  ;;  %v4628_v17 = vrot.slane %v4626_v61, 4  ;;  %10935 = vmatprep.subr.bf16.mxu1 %v11917_v11 }
 0x277   : > { %10903 = vmatprep.mubr.msk.bf16.mxu0 %vm273_vm0, %v4463_v7  ;;  %v4439_v7 = vld [vmem:[#allocation2 + $0xa8] sm:$0x1f]  ;;  %10936 = vmatpush3.bf16.msra.mxu1 %v11917_v11 }
 0x278   : > { %v4592_v34 = vshrl.u32 %v4439_v7, 16  ;;  %v4595_v29 = vshll.u32 %v4439_v7, 16  ;;  %v4564_v48 = vor.u32 %v4563_v42, %v4560_v3  ;;  %v4660_v3 = vshrl.u32 %v4443_v19, 16  ;;  %10937 = vmatprep.subr.bf16.mxu1 %v11918_v15 }
 0x279   : > { %v4663_v42 = vshll.u32 %v4443_v19, 16  ;;  %v4624_v7 = vor.u32 %v4623_v53, %v4620_v56  ;;  %v4632_v35 = vor.u32 %v4631_v33, %v4628_v17  ;;  %v4713_v56 = vrot.slane %v4711_v27, 4 }
 0x27a   : > { %v4597_v32 = vrot.slane %v4595_v29, 5  ;;  %v4565_v39 = vsel %vm1425_vm10, %v4556_v1, %v4564_v48  ;;  %v4662_v8 = vrot.slane %v4660_v3, 4  ;;  %v4444_v29 = vld [vmem:[#allocation2 + $0xf8] sm:$0x1f]  ;;  %v4445_v48 = vld [vmem:[#allocation2 + $0x108] sm:$0x1f] }
 0x27b   : > { %v4633_v1 = vsel %vm1425_vm10, %v4624_v7, %v4632_v35  ;;  %v4677_v43 = vshrl.u32 %v4444_v29, 16  ;;  %v4680_v47 = vshll.u32 %v4444_v29, 16  ;;  %v4716_v53 = vrot.slane %v4714_v20, 5  ;;  %10938 = vmatpush3.bf16.msra.mxu1 %v11918_v15  ;;  %v13347_v7 = vld [vmem:[%s14392_s2] ss:$0 sm:$0xff] }
 0x27c   : > { %10939 = vmatprep.subr.bf16.mxu1 %v11919_v30 }
 0x27d   : > { %v4679_v26 = vrot.slane %v4677_v43, 4  ;;  %v4682_v51 = vrot.slane %v4680_v47, 5  ;;  %v4717_v19 = vor.u32 %v4716_v53, %v4713_v56 }
 0x27e   : > { %10904 = vmatmul.mubr.msk.bf16.vlgmr.msra.gmra.mrb[0].mxu0 %vm273_vm0, %v4480_v10  ;;  %v4594_v10 = vrot.slane %v4592_v34, 4  ;;  %v4665_v34 = vrot.slane %v4663_v42, 5  ;;  %v13341_v42 = vld [vmem:[#allocation8] sm:$0xff]  }
 0x27f   : > { %10907 = vmatprep.mubr.msk.bf16.mxu0 %vm273_vm0, %v4497_v2  ;;  %v4683_v61 = vor.u32 %v4682_v51, %v4679_v26  ;;  %10940 = vmatpush3.bf16.msra.mxu1 %v11919_v30 }
 0x280   : > { %v4598_v2 = vor.u32 %v4597_v32, %v4594_v10  ;;  %v4666_v28 = vor.u32 %v4665_v34, %v4662_v8  ;;  %v4689_v10 = vshll.u32 %v13251_v54, 16  ;;  %v4694_v32 = vshrl.u32 %v4445_v48, 16 }
 0x281   : > { %v4703_v54 = vshrl.u32 %v13263_v49, 16 }
 0x282   : > { %v4599_v4 = vsel %vm1425_vm10, %v4590_v9, %v4598_v2  ;;  %v4691_v23 = vrot.slane %v4689_v10, 5  ;;  %v4696_v9 = vrot.slane %v4694_v32, 4 }
 0x284   : > { %v4692_v13 = vor.u32 %v4691_v23, %v4688_v59 }
 0x286   : > { %10908 = vmatmul.mubr.msk.bf16.gmra.mrb[4].mxu0 %vm273_vm0, %v4514_v21  ;;  %v4638_v21 = vshll.u32 %v13237_v60, 16  ;;  %v4657_v60 = vrot.slane %v4655_v58, 5 }
 0x287   : > { %10911 = vmatprep.mubr.msk.bf16.mxu0 %vm273_vm0, %v4531_v62  ;;  %v4643_v62 = vshrl.u32 %v4442_v18, 16  ;;  %v4708_v18 = vrot.slane %v4706_v40, 5 }
 0x288   : > { %v4640_v22 = vrot.slane %v4638_v21, 5  ;;  %v4658_v52 = vor.u32 %v4657_v60, %v4654_v16  ;;  %v11920_v21 = vld [vmem:[#allocation8 + $0x38] sm:$0xff]  }
 0x289   : > { %v4645_v50 = vrot.slane %v4643_v62, 4  ;;  %v13333_v62 = vld [vmem:[#allocation2 + $0x8] sm:$0xf]  ;;  %10941 = vmatprep.subr.bf16.mxu1 %v11920_v21 }
 0x28a   : > { %v4641_v25 = vor.u32 %v4640_v22, %v4637_v24  ;;  %v4667_v0 = vsel %vm1425_vm10, %v4658_v52, %v4666_v28  ;;  %v5521_v58 = vrot.slane %v13333_v62, 4  ;;  %10942 = vmatpush3.bf16.msra.mxu1 %v11920_v21 }
 0x28b   : > { %v4649_v44 = vor.u32 %v4648_v31, %v4645_v50  ;;  %10975 = vmatprep.subr.bf16.mxu1 %v13341_v42 }
 0x28c   : > { %v5522_v3 = vsel %vm885_vm1, %v5520_v38, %v5521_v58 }
 0x28d   : > { %10943 = vmatprep.mubr.msk.bf16.mxu1 %vm273_vm0, %v5522_v3 }
 0x28e   : > { %10912 = vmatmul.mubr.msk.bf16.gmra.mrb[8].mxu0 %vm273_vm0, %v4548_v5  ;;  %v4672_v5 = vshll.u32 %v13248_v57, 16  ;;  %v4650_v57 = vsel %vm1425_vm10, %v4641_v25, %v4649_v44 }
 0x28f   : > { %10915 = vmatprep.mubr.msk.bf16.mxu0 %vm273_vm0, %v4565_v39  ;;  %v4697_v39 = vshll.u32 %v4445_v48, 16 }
 0x290   : > { %v4674_v46 = vrot.slane %v4672_v5, 5 }
 0x291   : > { %v4699_v2 = vrot.slane %v4697_v39, 5 }
 0x292   : > { %v4675_v41 = vor.u32 %v4674_v46, %v4671_v14 }
 0x293   : > { %v4700_v55 = vor.u32 %v4699_v2, %v4696_v9 }
 0x295   : > { %v4701_v17 = vsel %vm1425_vm10, %v4692_v13, %v4700_v55 }
 0x296   : > { %10916 = vmatmul.mubr.msk.bf16.gmra.mrb[12].mxu0 %vm273_vm0, %v4582_v6  ;;  %v4684_v6 = vsel %vm1425_vm10, %v4675_v41, %v4683_v61 }
 0x297   : > { %10919 = vmatprep.mubr.msk.bf16.mxu0 %vm273_vm0, %v4599_v4  ;;  %v4705_v4 = vrot.slane %v4703_v54, 4 }
 0x299   : > { %v4709_v33 = vor.u32 %v4708_v18, %v4705_v4 }
 0x29b   : > { %v4718_v49 = vsel %vm1425_vm10, %v4709_v33, %v4717_v19  ;;  %v11922_v33 = vld [vmem:[#allocation8 + $0x8] sm:$0xff]  }
 0x29e   : > { %10920 = vmatmul.mubr.msk.bf16.gmra.mrb[16].mxu0 %vm273_vm0, %v4616_v36 }
 0x29f   : > { %10923 = vmatprep.mubr.msk.bf16.mxu0 %vm273_vm0, %v4633_v1 }
 0x2a6   : > { %10924 = vmatmul.mubr.msk.bf16.gmra.mrb[20].mxu0 %vm273_vm0, %v4650_v57 }
 0x2a7   : > { %10927 = vmatprep.mubr.msk.bf16.mxu0 %vm273_vm0, %v4667_v0 }
 0x2ae   : > { %10928 = vmatmul.mubr.msk.bf16.gmra.mrb[24].mxu0 %vm273_vm0, %v4684_v6 }
 0x2af   : > { %10931 = vmatprep.mubr.msk.bf16.mxu0 %vm273_vm0, %v4701_v17 }
 0x2b6   : > { %10932 = vmatmul.mubr.msk.bf16.gmra.mrb[28].mxu0 %vm273_vm0, %v4718_v49 }
 0x351   : > { %v10905_v35 = vpop.f32.mrb[0].mxu0 }
 0x352   : > { %v5001_v36 = vadd.f32 %v10905_v35, %v13347_v7  ;;  %v4834_v24 = vpop.f32.mrb[1].mxu0  ;;  %v11923_v35 = vld [vmem:[#allocation8 + $0x10] sm:$0xff]  }
 0x353   : > { %v4999_v22 = vadd.f32 %v13347_v7, %v4834_v24  ;;  %v10906_v50 = vpop.f32.mrb[2].mxu0 }
 0x354   : > { %v5002_v31 = vadd.f32 %v10906_v50, %v13347_v7  ;;  %v4837_v16 = vpop.f32.mrb[3].mxu0  ;;  %v5033_v8 = vmax.f32 %v5001_v36, 0.0 }
 0x355   : > { %v5000_v60 = vadd.f32 %v13347_v7, %v4837_v16  ;;  %v5031_v29 = vmax.f32 %v4999_v22, 0.0 }
 0x356   : > { %v5034_v34 = vmax.f32 %v5002_v31, 0.0 }
 0x357   : > { %v5032_v1 = vmax.f32 %v5000_v60, 0.0 }
 0x358   : > { %v5064_v48 = vpack.c.bf16 %v5034_v34, %v5033_v8 }
 0x359   : > { %v5063_v12 = vpack.c.bf16 %v5032_v1, %v5031_v29  ;;  %v10909_v5 = vpop.f32.mrb[4].mxu0 }
 0x35a   : > { %v5096_v43 = vrot.slane %v5064_v48, 4  ;;  %v5005_v47 = vadd.f32 %v10909_v5, %v13347_v7  ;;  %v4850_v25 = vpop.f32.mrb[5].mxu0 }
 0x35b   : > { %v5095_v44 = vrot.slane %v5063_v12, 4  ;;  %v5003_v52 = vadd.f32 %v13347_v7, %v4850_v25  ;;  %v10910_v28 = vpop.f32.mrb[6].mxu0 }
 0x35c   : > { %5129 = vst.msk [vmem:[#allocation2 + $0x20] sm:$0xf0] %vm490_vm2, %v5096_v43  ;;  %v5006_v37 = vadd.f32 %v10910_v28, %v13347_v7  ;;  %v4853_v10 = vpop.f32.mrb[7].mxu0  ;;  %v5037_v39 = vmax.f32 %v5005_v47, 0.0  ;;  %v11924_v28 = vld [vmem:[#allocation8 + $0x18] sm:$0xff]  }
 0x35d   : > { %5130 = vst.msk [vmem:[#allocation2 + $0x28] sm:$0xf] %vm492_vm3, %v5096_v43  ;;  %5128 = vst.msk [vmem:[#allocation2 + $0x18] sm:$0xf] %vm492_vm3, %v5095_v44  ;;  %v5004_v32 = vadd.f32 %v13347_v7, %v4853_v10  ;;  %v5035_v46 = vmax.f32 %v5003_v52, 0.0 }
 0x35e   : > { %5127 = vst.msk [vmem:[#allocation2 + $0x10] sm:$0xf0] %vm490_vm2, %v5095_v44  ;;  %v5038_v14 = vmax.f32 %v5006_v37, 0.0 }
 0x35f   : > { %v5036_v26 = vmax.f32 %v5004_v32, 0.0 }
 0x360   : > { %v5066_v51 = vpack.c.bf16 %v5038_v14, %v5037_v39 }
 0x361   : > { %v5065_v57 = vpack.c.bf16 %v5036_v26, %v5035_v46  ;;  %v10913_v0 = vpop.f32.mrb[8].mxu0 }
 0x362   : > { %v5098_v59 = vrot.slane %v5066_v51, 4  ;;  %v5009_v23 = vadd.f32 %v10913_v0, %v13347_v7  ;;  %v4866_v9 = vpop.f32.mrb[9].mxu0  ;;  %v13411_v51 = vld [vmem:[#allocation8 + $0x40] sm:$0xff]  }
 0x363   : > { %v5097_v2 = vrot.slane %v5065_v57, 4  ;;  %v5007_v63 = vadd.f32 %v13347_v7, %v4866_v9  ;;  %v10914_v41 = vpop.f32.mrb[10].mxu0  ;;  %v13373_v13 = vld [vmem:[#allocation2 + $0x20] sm:$0xf0] }
 0x364   : > { %5133 = vst.msk [vmem:[#allocation2 + $0x40] sm:$0xf0] %vm490_vm2, %v5098_v59  ;;  %v5010_v61 = vadd.f32 %v10914_v41, %v13347_v7  ;;  %v4869_v54 = vpop.f32.mrb[11].mxu0  ;;  %v13366_v40 = vld [vmem:[#allocation2 + $0x18] sm:$0xf]  ;;  %v5041_v55 = vmax.f32 %v5009_v23, 0.0 }
 0x365   : > { %5134 = vst.msk [vmem:[#allocation2 + $0x48] sm:$0xf] %vm492_vm3, %v5098_v59  ;;  %v13368_v27 = vld [vmem:[#allocation2 + $0x10] sm:$0xf0]  ;;  %5132 = vst.msk [vmem:[#allocation2 + $0x38] sm:$0xf] %vm492_vm3, %v5097_v2  ;;  %v5008_v20 = vadd.f32 %v13347_v7, %v4869_v54 }
 0x366   : > { %5131 = vst.msk [vmem:[#allocation2 + $0x30] sm:$0xf0] %vm490_vm2, %v5097_v2  ;;  %v5042_v6 = vmax.f32 %v5010_v61, 0.0  ;;  %v5523_v4 = vrot.slane %v13368_v27, 4  ;;  %v5524_v18 = vrot.slane %v13366_v40, 4  ;;  %v5039_v53 = vmax.f32 %v5007_v63, 0.0 }
 0x367   : > { %v13377_v56 = vld [vmem:[#allocation2 + $0x28] sm:$0xf]  ;;  %v5040_v17 = vmax.f32 %v5008_v20, 0.0  ;;  %v5526_v11 = vrot.slane %v13373_v13, 4 }
 0x368   : > { %v5068_v19 = vpack.c.bf16 %v5042_v6, %v5041_v55  ;;  %v5525_v49 = vsel %vm885_vm1, %v5523_v4, %v5524_v18  ;;  %v5527_v21 = vrot.slane %v13377_v56, 4 }
 0x369   : > { %v5067_v15 = vpack.c.bf16 %v5040_v17, %v5039_v53  ;;  %10944 = vmatmul.mubr.msk.bf16.vlgmr.msra.gmra.mrb[0].mxu1 %vm273_vm0, %v5525_v49  ;;  %v10917_v30 = vpop.f32.mrb[12].mxu0 }
 0x36a   : > { %v5100_v38 = vrot.slane %v5068_v19, 4  ;;  %v5013_v58 = vadd.f32 %v10917_v30, %v13347_v7  ;;  %10976 = vmatpush3.bf16.msra.mxu1 %v13341_v42  ;;  %v4882_v3 = vpop.f32.mrb[13].mxu0  ;;  %v5528_v24 = vsel %vm885_vm1, %v5526_v11, %v5527_v21 }
 0x36b   : > { %v5099_v36 = vrot.slane %v5067_v15, 4  ;;  %v5011_v22 = vadd.f32 %v13347_v7, %v4882_v3  ;;  %v10918_v50 = vpop.f32.mrb[14].mxu0  ;;  %v13389_v16 = vld [vmem:[#allocation2 + $0x40] sm:$0xf0]  ;;  %10977 = vmatprep.subr.bf16.mxu1 %v11922_v33  ;;  %10947 = vmatprep.mubr.msk.bf16.mxu1 %vm273_vm0, %v5528_v24 }
 0x36c   : > { %v13387_v31 = vld [vmem:[#allocation2 + $0x48] sm:$0xf]  ;;  %5137 = vst.msk [vmem:[#allocation2 + $0x60] sm:$0xf0] %vm490_vm2, %v5100_v38  ;;  %v5014_v42 = vadd.f32 %v10918_v50, %v13347_v7  ;;  %v4885_v60 = vpop.f32.mrb[15].mxu0  ;;  %v5045_v12 = vmax.f32 %v5013_v58, 0.0 }
 0x36d   : > { %5138 = vst.msk [vmem:[#allocation2 + $0x68] sm:$0xf] %vm492_vm3, %v5100_v38  ;;  %v13395_v8 = vld [vmem:[#allocation2 + $0x38] sm:$0xf]  ;;  %v13397_v34 = vld [vmem:[#allocation2 + $0x30] sm:$0xf0]  ;;  %v5012_v29 = vadd.f32 %v13347_v7, %v4885_v60 }
 0x36e   : > { %5135 = vst.msk [vmem:[#allocation2 + $0x50] sm:$0xf0] %vm490_vm2, %v5099_v36  ;;  %v5529_v1 = vrot.slane %v13397_v34, 4  ;;  %v5530_v48 = vrot.slane %v13395_v8, 4  ;;  %v5046_v5 = vmax.f32 %v5014_v42, 0.0  ;;  %v5532_v43 = vrot.slane %v13389_v16, 4  ;;  %10978 = vmatpush3.bf16.msra.mxu1 %v11922_v33 }
 0x36f   : > { %5136 = vst.msk [vmem:[#allocation2 + $0x58] sm:$0xf] %vm492_vm3, %v5099_v36  ;;  %v5533_v47 = vrot.slane %v13387_v31, 4  ;;  %v5043_v25 = vmax.f32 %v5011_v22, 0.0  ;;  %v5044_v44 = vmax.f32 %v5012_v29, 0.0  ;;  %10979 = vmatprep.subr.bf16.mxu1 %v11923_v35 }
 0x370   : > { %v5531_v52 = vsel %vm885_vm1, %v5529_v1, %v5530_v48  ;;  %v5070_v37 = vpack.c.bf16 %v5046_v5, %v5045_v12 }
 0x371   : > { %v5069_v10 = vpack.c.bf16 %v5044_v44, %v5043_v25  ;;  %10948 = vmatmul.mubr.msk.bf16.gmra.mrb[4].mxu1 %vm273_vm0, %v5531_v52  ;;  %v10921_v32 = vpop.f32.mrb[16].mxu0  ;;  %v5534_v39 = vsel %vm885_vm1, %v5532_v43, %v5533_v47 }
 0x372   : > { %v5102_v14 = vrot.slane %v5070_v37, 4  ;;  %v5017_v46 = vadd.f32 %v10921_v32, %v13347_v7  ;;  %10951 = vmatprep.mubr.msk.bf16.mxu1 %vm273_vm0, %v5534_v39  ;;  %v4898_v26 = vpop.f32.mrb[17].mxu0  ;;  %10980 = vmatpush3.bf16.msra.mxu1 %v11923_v35 }
 0x373   : > { %v5101_v57 = vrot.slane %v5069_v10, 4  ;;  %v5015_v0 = vadd.f32 %v13347_v7, %v4898_v26  ;;  %v10922_v59 = vpop.f32.mrb[18].mxu0  ;;  %v13416_v9 = vld [vmem:[#allocation2 + $0x60] sm:$0xf0]  ;;  %10981 = vmatprep.subr.bf16.mxu1 %v11924_v28 }
 0x374   : > { %v13414_v23 = vld [vmem:[#allocation2 + $0x68] sm:$0xf]  ;;  %5141 = vst.msk [vmem:[#allocation2 + $0x80] sm:$0xf0] %vm490_vm2, %v5102_v14  ;;  %v5018_v2 = vadd.f32 %v10922_v59, %v13347_v7  ;;  %v4901_v63 = vpop.f32.mrb[19].mxu0  ;;  %v5049_v6 = vmax.f32 %v5017_v46, 0.0 }
 0x375   : > { %5142 = vst.msk [vmem:[#allocation2 + $0x88] sm:$0xf] %vm492_vm3, %v5102_v14  ;;  %v13423_v61 = vld [vmem:[#allocation2 + $0x50] sm:$0xf0]  ;;  %5140 = vst.msk [vmem:[#allocation2 + $0x78] sm:$0xf] %vm492_vm3, %v5101_v57  ;;  %v5016_v54 = vadd.f32 %v13347_v7, %v4901_v63 }
 0x376   : > { %v13421_v41 = vld [vmem:[#allocation2 + $0x58] sm:$0xf]  ;;  %5139 = vst.msk [vmem:[#allocation2 + $0x70] sm:$0xf0] %vm490_vm2, %v5101_v57  ;;  %v5535_v20 = vrot.slane %v13423_v61, 4  ;;  %v5050_v4 = vmax.f32 %v5018_v2, 0.0  ;;  %10982 = vmatpush3.bf16.msra.mxu1 %v11924_v28 }
 0x377   : > { %v5536_v55 = vrot.slane %v13421_v41, 4  ;;  %v5538_v18 = vrot.slane %v13416_v9, 4  ;;  %v5539_v53 = vrot.slane %v13414_v23, 4  ;;  %v5047_v17 = vmax.f32 %v5015_v0, 0.0  ;;  %11015 = vmatprep.subr.bf16.mxu1 %v13411_v51 }
 0x378   : > { %v5048_v33 = vmax.f32 %v5016_v54, 0.0  ;;  %v5072_v49 = vpack.c.bf16 %v5050_v4, %v5049_v6 }
 0x379   : > { %v5537_v19 = vsel %vm885_vm1, %v5535_v20, %v5536_v55  ;;  %v10925_v15 = vpop.f32.mrb[20].mxu0  ;;  %v5540_v30 = vsel %vm885_vm1, %v5538_v18, %v5539_v53 }
 0x37a   : > { %v5071_v11 = vpack.c.bf16 %v5048_v33, %v5047_v17  ;;  %10952 = vmatmul.mubr.msk.bf16.gmra.mrb[8].mxu1 %vm273_vm0, %v5537_v19  ;;  %v5104_v21 = vrot.slane %v5072_v49, 4  ;;  %v5021_v38 = vadd.f32 %v10925_v15, %v13347_v7  ;;  %v4914_v58 = vpop.f32.mrb[21].mxu0 }
 0x37b   : > { %10955 = vmatprep.mubr.msk.bf16.mxu1 %vm273_vm0, %v5540_v30  ;;  %v5019_v35 = vadd.f32 %v13347_v7, %v4914_v58  ;;  %v10926_v36 = vpop.f32.mrb[22].mxu0  ;;  %v13441_v22 = vld [vmem:[#allocation2 + $0x80] sm:$0xf0] }
 0x37c   : > { %v5103_v3 = vrot.slane %v5071_v11, 4  ;;  %v13439_v24 = vld [vmem:[#allocation2 + $0x88] sm:$0xf]  ;;  %5145 = vst.msk [vmem:[#allocation2 + $0xa0] sm:$0xf0] %vm490_vm2, %v5104_v21  ;;  %v5022_v50 = vadd.f32 %v10926_v36, %v13347_v7  ;;  %v4917_v42 = vpop.f32.mrb[23].mxu0 }
 0x37d   : > { %5146 = vst.msk [vmem:[#allocation2 + $0xa8] sm:$0xf] %vm492_vm3, %v5104_v21  ;;  %v13446_v60 = vld [vmem:[#allocation2 + $0x78] sm:$0xf]  ;;  %v13448_v29 = vld [vmem:[#allocation2 + $0x70] sm:$0xf0]  ;;  %v5020_v1 = vadd.f32 %v13347_v7, %v4917_v42 }
 0x37e   : > { %5143 = vst.msk [vmem:[#allocation2 + $0x90] sm:$0xf0] %vm490_vm2, %v5103_v3  ;;  %v5541_v48 = vrot.slane %v13448_v29, 4  ;;  %v5542_v12 = vrot.slane %v13446_v60, 4  ;;  %v5053_v5 = vmax.f32 %v5021_v38, 0.0  ;;  %v5054_v43 = vmax.f32 %v5022_v50, 0.0 }
 0x37f   : > { %5144 = vst.msk [vmem:[#allocation2 + $0x98] sm:$0xf] %vm492_vm3, %v5103_v3  ;;  %v5544_v47 = vrot.slane %v13441_v22, 4  ;;  %v5545_v25 = vrot.slane %v13439_v24, 4  ;;  %v5051_v44 = vmax.f32 %v5019_v35, 0.0  ;;  %v5052_v52 = vmax.f32 %v5020_v1, 0.0 }
 0x380   : > { %v5543_v28 = vsel %vm885_vm1, %v5541_v48, %v5542_v12  ;;  %v5074_v37 = vpack.c.bf16 %v5054_v43, %v5053_v5 }
 0x381   : > { %v5073_v10 = vpack.c.bf16 %v5052_v52, %v5051_v44  ;;  %v10929_v32 = vpop.f32.mrb[24].mxu0  ;;  %v5546_v39 = vsel %vm885_vm1, %v5544_v47, %v5545_v25 }
 0x382   : > { %10956 = vmatmul.mubr.msk.bf16.gmra.mrb[12].mxu1 %vm273_vm0, %v5543_v28  ;;  %v5106_v14 = vrot.slane %v5074_v37, 4  ;;  %v5025_v46 = vadd.f32 %v10929_v32, %v13347_v7  ;;  %v4930_v26 = vpop.f32.mrb[25].mxu0 }
 0x383   : > { %10959 = vmatprep.mubr.msk.bf16.mxu1 %vm273_vm0, %v5546_v39  ;;  %v5105_v57 = vrot.slane %v5073_v10, 4  ;;  %v5023_v0 = vadd.f32 %v13347_v7, %v4930_v26  ;;  %v10930_v59 = vpop.f32.mrb[26].mxu0  ;;  %v13465_v63 = vld [vmem:[#allocation2 + $0xa0] sm:$0xf0] }
 0x384   : > { %v13463_v2 = vld [vmem:[#allocation2 + $0xa8] sm:$0xf]  ;;  %5149 = vst.msk [vmem:[#allocation2 + $0xc0] sm:$0xf0] %vm490_vm2, %v5106_v14  ;;  %v5026_v54 = vadd.f32 %v10930_v59, %v13347_v7  ;;  %v4933_v20 = vpop.f32.mrb[27].mxu0  ;;  %v5057_v17 = vmax.f32 %v5025_v46, 0.0 }
 0x385   : > { %5150 = vst.msk [vmem:[#allocation2 + $0xc8] sm:$0xf] %vm492_vm3, %v5106_v14  ;;  %v13472_v6 = vld [vmem:[#allocation2 + $0x90] sm:$0xf0]  ;;  %5148 = vst.msk [vmem:[#allocation2 + $0xb8] sm:$0xf] %vm492_vm3, %v5105_v57  ;;  %v5024_v4 = vadd.f32 %v13347_v7, %v4933_v20 }
 0x386   : > { %v13470_v55 = vld [vmem:[#allocation2 + $0x98] sm:$0xf]  ;;  %5147 = vst.msk [vmem:[#allocation2 + $0xb0] sm:$0xf0] %vm490_vm2, %v5105_v57  ;;  %v5547_v18 = vrot.slane %v13472_v6, 4  ;;  %v5058_v33 = vmax.f32 %v5026_v54, 0.0 }
 0x387   : > { %v5548_v53 = vrot.slane %v13470_v55, 4  ;;  %v5550_v19 = vrot.slane %v13465_v63, 4  ;;  %v5551_v49 = vrot.slane %v13463_v2, 4  ;;  %v5055_v11 = vmax.f32 %v5023_v0, 0.0  ;;  %v5160_v0 = vld [vmem:[#allocation2] sm:$0xf8] }
 0x388   : > { %v5056_v15 = vmax.f32 %v5024_v4, 0.0  ;;  %v5076_v21 = vpack.c.bf16 %v5058_v33, %v5057_v17  ;;  %v5201_v20 = vshrl.u32 %v13333_v62, 16  ;;  %v5204_v4 = vshll.u32 %v13333_v62, 16 }
 0x389   : > { %v5549_v30 = vsel %vm885_vm1, %v5547_v18, %v5548_v53  ;;  %v10933_v58 = vpop.f32.mrb[28].mxu0  ;;  %v5552_v3 = vsel %vm885_vm1, %v5550_v19, %v5551_v49  ;;  %v5193_v53 = vshrl.u32 %v5160_v0, 16  ;;  %v5196_v49 = vshll.u32 %v5160_v0, 16 }
 0x38a   : > { %v5075_v38 = vpack.c.bf16 %v5056_v15, %v5055_v11  ;;  %10960 = vmatmul.mubr.msk.bf16.gmra.mrb[16].mxu1 %vm273_vm0, %v5549_v30  ;;  %v5108_v35 = vrot.slane %v5076_v21, 4  ;;  %v5029_v36 = vadd.f32 %v10933_v58, %v13347_v7  ;;  %v4946_v50 = vpop.f32.mrb[29].mxu0  ;;  %v5203_v58 = vrot.slane %v5201_v20, 3 }
 0x38b   : > { %10963 = vmatprep.mubr.msk.bf16.mxu1 %vm273_vm0, %v5552_v3  ;;  %v5027_v1 = vadd.f32 %v13347_v7, %v4946_v50  ;;  %v10934_v48 = vpop.f32.mrb[30].mxu0  ;;  %v13489_v5 = vld [vmem:[#allocation2 + $0xc0] sm:$0xf0]  ;;  %v5206_v50 = vrot.slane %v5204_v4, 4  ;;  %v5235_v0 = vshrl.u32 %v13377_v56, 16 }
 0x38c   : > { %v5107_v42 = vrot.slane %v5075_v38, 4  ;;  %v13487_v12 = vld [vmem:[#allocation2 + $0xc8] sm:$0xf]  ;;  %5153 = vst.msk [vmem:[#allocation2 + $0xe0] sm:$0xf0] %vm490_vm2, %v5108_v35  ;;  %v5030_v43 = vadd.f32 %v10934_v48, %v13347_v7  ;;  %v4949_v47 = vpop.f32.mrb[31].mxu0 }
 0x38d   : > { %5154 = vst.msk [vmem:[#allocation2 + $0xe8] sm:$0xf] %vm492_vm3, %v5108_v35  ;;  %v13494_v25 = vld [vmem:[#allocation2 + $0xb8] sm:$0xf]  ;;  %v13496_v44 = vld [vmem:[#allocation2 + $0xb0] sm:$0xf0]  ;;  %v5028_v52 = vadd.f32 %v13347_v7, %v4949_v47 }
 0x38e   : > { %5151 = vst.msk [vmem:[#allocation2 + $0xd0] sm:$0xf0] %vm490_vm2, %v5107_v42  ;;  %v5553_v28 = vrot.slane %v13496_v44, 4  ;;  %v5554_v37 = vrot.slane %v13494_v25, 4  ;;  %v5061_v10 = vmax.f32 %v5029_v36, 0.0  ;;  %v5062_v32 = vmax.f32 %v5030_v43, 0.0 }
 0x38f   : > { %5152 = vst.msk [vmem:[#allocation2 + $0xd8] sm:$0xf] %vm492_vm3, %v5107_v42  ;;  %v5556_v39 = vrot.slane %v13489_v5, 4  ;;  %v5557_v14 = vrot.slane %v13487_v12, 4  ;;  %v5059_v46 = vmax.f32 %v5027_v1, 0.0  ;;  %v5060_v26 = vmax.f32 %v5028_v52, 0.0 }
 0x390   : > { %v5555_v57 = vsel %vm885_vm1, %v5553_v28, %v5554_v37  ;;  %v5078_v59 = vpack.c.bf16 %v5062_v32, %v5061_v10  ;;  %v5195_v35 = vrot.slane %v5193_v53, 3  ;;  %v5198_v36 = vrot.slane %v5196_v49, 4  ;;  %v5162_v42 = vld [vmem:[#allocation2 + $0x10] sm:$0xf8]  ;;  %v5164_v48 = vld [vmem:[#allocation2 + $0x20] sm:$0xf8] }
 0x391   : > { %v5077_v54 = vpack.c.bf16 %v5060_v26, %v5059_v46  ;;  %v5558_v7 = vsel %vm885_vm1, %v5556_v39, %v5557_v14  ;;  %v5218_v43 = vshrl.u32 %v13366_v40, 16  ;;  %v5221_v47 = vshll.u32 %v13366_v40, 16  ;;  %v5166_v53 = vld [vmem:[#allocation2 + $0x30] sm:$0xf8] }
 0x392   : > { %10964 = vmatmul.mubr.msk.bf16.gmra.mrb[20].mxu1 %vm273_vm0, %v5555_v57  ;;  %v5110_v18 = vrot.slane %v5078_v59, 4  ;;  %v5210_v52 = vshrl.u32 %v5162_v42, 16  ;;  %v5213_v28 = vshll.u32 %v5162_v42, 16  ;;  %v5199_v37 = vor.u32 %v5198_v36, %v5195_v35 }
 0x393   : > { %10967 = vmatprep.mubr.msk.bf16.mxu1 %vm273_vm0, %v5558_v7  ;;  %v5109_v17 = vrot.slane %v5077_v54, 4  ;;  %v13513_v19 = vld [vmem:[#allocation2 + $0xe0] sm:$0xf0]  ;;  %v5207_v10 = vor.u32 %v5206_v50, %v5203_v58  ;;  %v5227_v14 = vshrl.u32 %v5164_v48, 16  ;;  %v5230_v46 = vshll.u32 %v5164_v48, 16 }
 0x394   : > { %v13511_v33 = vld [vmem:[#allocation2 + $0xe8] sm:$0xf]  ;;  %5157 = vst.msk [vmem:[#allocation2 + $0x100] sm:$0xf0] %vm490_vm2, %v5110_v18  ;;  %v5562_v21 = vrot.slane %v13513_v19, 4  ;;  %v5238_v40 = vshll.u32 %v13377_v56, 16 }
 0x395   : > { %5158 = vst.msk [vmem:[#allocation2 + $0x108] sm:$0xf] %vm492_vm3, %v5110_v18  ;;  %v13519_v15 = vld [vmem:[#allocation2 + $0xd0] sm:$0xf0]  ;;  %5156 = vst.msk [vmem:[#allocation2 + $0xf8] sm:$0xf] %vm492_vm3, %v5109_v17  ;;  %v5208_v18 = vsel %vm337_vm7, %v5199_v37, %v5207_v10 }
 0x396   : > { %v13517_v11 = vld [vmem:[#allocation2 + $0xd8] sm:$0xf]  ;;  %5155 = vst.msk [vmem:[#allocation2 + $0xf0] sm:$0xf0] %vm490_vm2, %v5109_v17  ;;  %v5559_v62 = vrot.slane %v13519_v15, 4  ;;  %v5563_v38 = vrot.slane %v13511_v33, 4 }
 0x397   : > { %v5560_v30 = vrot.slane %v13517_v11, 4  ;;  %v5220_v59 = vrot.slane %v5218_v43, 3  ;;  %v5223_v54 = vrot.slane %v5221_v47, 4  ;;  %v5212_v7 = vrot.slane %v5210_v52, 3 }
 0x398   : > { %v5564_v1 = vsel %vm885_vm1, %v5562_v21, %v5563_v38  ;;  %v5215_v20 = vrot.slane %v5213_v28, 4  ;;  %v5229_v17 = vrot.slane %v5227_v14, 3  ;;  %v5232_v49 = vrot.slane %v5230_v46, 4  ;;  %v5168_v21 = vld [vmem:[#allocation2 + $0x40] sm:$0xf8]  ;;  %v11926_v28 = vld [vmem:[#allocation8 + $0x48] sm:$0xff]  }
 0x399   : > { %v5561_v3 = vsel %vm885_vm1, %v5559_v62, %v5560_v30  ;;  %v5237_v62 = vrot.slane %v5235_v0, 3  ;;  %v5240_v30 = vrot.slane %v5238_v40, 4  ;;  %v5224_v56 = vor.u32 %v5223_v54, %v5220_v59 }
 0x39a   : > { %10968 = vmatmul.mubr.msk.bf16.gmra.mrb[24].mxu1 %vm273_vm0, %v5561_v3  ;;  %v5216_v38 = vor.u32 %v5215_v20, %v5212_v7  ;;  %v5244_v58 = vshrl.u32 %v5166_v53, 16  ;;  %v5247_v3 = vshll.u32 %v5166_v53, 16  ;;  %v5252_v35 = vshrl.u32 %v13395_v8, 16 }
 0x39b   : > { %10971 = vmatprep.mubr.msk.bf16.mxu1 %vm273_vm0, %v5564_v1  ;;  %v5255_v36 = vshll.u32 %v13395_v8, 16  ;;  %v5261_v50 = vshrl.u32 %v5168_v21, 16  ;;  %v5264_v42 = vshll.u32 %v5168_v21, 16  ;;  %v5269_v1 = vshrl.u32 %v13387_v31, 16 }
 0x39c   : > { %v13533_v32 = vld [vmem:[#allocation2 + $0xf8] sm:$0xf]  ;;  %v5272_v48 = vshll.u32 %v13387_v31, 16  ;;  %v5233_v43 = vor.u32 %v5232_v49, %v5229_v17  ;;  %v5241_v47 = vor.u32 %v5240_v30, %v5237_v62  ;;  %v5225_v52 = vsel %vm337_vm7, %v5216_v38, %v5224_v56 }
 0x39d   : > { %v13535_v39 = vld [vmem:[#allocation2 + $0xf0] sm:$0xf0]  ;;  %v5566_v57 = vrot.slane %v13533_v32, 4  ;;  %v5246_v37 = vrot.slane %v5244_v58, 3  ;;  %v5249_v10 = vrot.slane %v5247_v3, 4  ;;  %v5254_v14 = vrot.slane %v5252_v35, 3 }
 0x39e   : > { %v5565_v26 = vrot.slane %v13535_v39, 4  ;;  %v5257_v46 = vrot.slane %v5255_v36, 4  ;;  %v5266_v0 = vrot.slane %v5264_v42, 4  ;;  %v5271_v40 = vrot.slane %v5269_v1, 3  ;;  %v5174_v42 = vld [vmem:[#allocation2 + $0x70] sm:$0xf8] }
 0x39f   : > { %v5274_v8 = vrot.slane %v5272_v48, 4  ;;  %v5242_v59 = vsel %vm337_vm7, %v5233_v43, %v5241_v47  ;;  %v5286_v7 = vshrl.u32 %v13421_v41, 16  ;;  %v5289_v20 = vshll.u32 %v13421_v41, 16  ;;  %v11928_v41 = vld [vmem:[#allocation8 + $0x58] sm:$0xff]  }
 0x3a0   : > { %v5567_v4 = vsel %vm885_vm1, %v5565_v26, %v5566_v57  ;;  %v5170_v26 = vld [vmem:[#allocation2 + $0x50] sm:$0xf8]  ;;  %v5263_v57 = vrot.slane %v5261_v50, 3  ;;  %v5250_v53 = vor.u32 %v5249_v10, %v5246_v37  ;;  %v5258_v17 = vor.u32 %v5257_v46, %v5254_v14 }
 0x3a1   : > { %v5278_v31 = vshrl.u32 %v5170_v26, 16  ;;  %v5281_v54 = vshll.u32 %v5170_v26, 16  ;;  %v5275_v62 = vor.u32 %v5274_v8, %v5271_v40  ;;  %v5303_v38 = vshrl.u32 %v13414_v23, 16  ;;  %v13564_v26 = vld [vmem:[#allocation8 + $0x60] sm:$0xff]  }
 0x3a2   : > { %10972 = vmatmul.mubr.msk.bf16.gmra.mrb[28].mxu1 %vm273_vm0, %v5567_v4  ;;  %v5172_v4 = vld [vmem:[#allocation2 + $0x60] sm:$0xf8]  ;;  %v5267_v49 = vor.u32 %v5266_v0, %v5263_v57  ;;  %v5306_v56 = vshll.u32 %v13414_v23, 16  ;;  %v5288_v3 = vrot.slane %v5286_v7, 3  ;;  %v5291_v35 = vrot.slane %v5289_v20, 4 }
 0x3a3   : > { %10983 = vmatprep.mubr.msk.bf16.mxu1 %vm273_vm0, %v5208_v18  ;;  %v11927_v18 = vld [vmem:[#allocation8 + $0x50] sm:$0xff]   ;;  %v5295_v30 = vshrl.u32 %v5172_v4, 16  ;;  %v5298_v21 = vshll.u32 %v5172_v4, 16  ;;  %v5283_v58 = vrot.slane %v5281_v54, 4  ;;  %v5259_v36 = vsel %vm337_vm7, %v5250_v53, %v5258_v17 }
 0x3a4   : > { %v5276_v50 = vsel %vm337_vm7, %v5267_v49, %v5275_v62  ;;  %v5305_v43 = vrot.slane %v5303_v38, 3  ;;  %v5308_v47 = vrot.slane %v5306_v56, 4  ;;  %v5292_v37 = vor.u32 %v5291_v35, %v5288_v3  ;;  %v5178_v53 = vld [vmem:[#allocation2 + $0x90] sm:$0xf8] }
 0x3a5   : > { %v5297_v1 = vrot.slane %v5295_v30, 3  ;;  %v5300_v48 = vrot.slane %v5298_v21, 4  ;;  %v5315_v10 = vshll.u32 %v5174_v42, 16  ;;  %v5320_v14 = vshrl.u32 %v13446_v60, 16 }
 0x3a6   : > { %v5323_v46 = vshll.u32 %v13446_v60, 16  ;;  %v5337_v40 = vshrl.u32 %v13439_v24, 16  ;;  %v5340_v8 = vshll.u32 %v13439_v24, 16  ;;  %v5346_v30 = vshrl.u32 %v5178_v53, 16 }
 0x3a7   : > { %v5317_v20 = vrot.slane %v5315_v10, 4  ;;  %v5322_v4 = vrot.slane %v5320_v14, 3  ;;  %v5349_v21 = vshll.u32 %v5178_v53, 16  ;;  %v5354_v38 = vshrl.u32 %v13470_v55, 16 }
 0x3a8   : > { %v5339_v49 = vrot.slane %v5337_v40, 3  ;;  %v5342_v62 = vrot.slane %v5340_v8, 4  ;;  %v5357_v56 = vshll.u32 %v13470_v55, 16  ;;  %v5182_v55 = vld [vmem:[#allocation2 + $0xb0] sm:$0xf8] }
 0x3a9   : > { %v5380_v40 = vshrl.u32 %v5182_v55, 16  ;;  %v5383_v8 = vshll.u32 %v5182_v55, 16 }
 0x3aa   : > { %10984 = vmatmul.mubr.msk.bf16.vlgmr.msra.gmra.mrb[0].mxu1 %vm273_vm0, %v5225_v52  ;;  %v5176_v52 = vld [vmem:[#allocation2 + $0x80] sm:$0xf8] }
 0x3ab   : > { %10987 = vmatprep.mubr.msk.bf16.mxu1 %vm273_vm0, %v5242_v59  ;;  %11016 = vmatpush3.bf16.msra.mxu1 %v13411_v51  ;;  %v5280_v51 = vrot.slane %v5278_v31, 3  ;;  %v5329_v57 = vshrl.u32 %v5176_v52, 16  ;;  %v5332_v0 = vshll.u32 %v5176_v52, 16  ;;  %v5301_v59 = vor.u32 %v5300_v48, %v5297_v1 }
 0x3ac   : > { %11017 = vmatprep.subr.bf16.mxu1 %v11926_v28  ;;  %v5309_v31 = vor.u32 %v5308_v47, %v5305_v43  ;;  %v5374_v1 = vshll.u32 %v13463_v2, 16  ;;  %v5348_v48 = vrot.slane %v5346_v30, 3  ;;  %v5351_v43 = vrot.slane %v5349_v21, 4 }
 0x3ad   : > { %v5284_v23 = vor.u32 %v5283_v58, %v5280_v51  ;;  %v5331_v60 = vrot.slane %v5329_v57, 3  ;;  %v5334_v17 = vrot.slane %v5332_v0, 4  ;;  %v5180_v51 = vld [vmem:[#allocation2 + $0xa0] sm:$0xf8]  ;;  %v5356_v47 = vrot.slane %v5354_v38, 3 }
 0x3ae   : > { %v5310_v24 = vsel %vm337_vm7, %v5301_v59, %v5309_v31  ;;  %v5359_v52 = vrot.slane %v5357_v56, 4  ;;  %v5184_v57 = vld [vmem:[#allocation2 + $0xc0] sm:$0xf8]  ;;  %v5352_v0 = vor.u32 %v5351_v43, %v5348_v48  ;;  %v5388_v59 = vshrl.u32 %v13494_v25, 16 }
 0x3af   : > { %11018 = vmatpush3.bf16.msra.mxu1 %v11926_v28  ;;  %v5312_v28 = vshrl.u32 %v5174_v42, 16  ;;  %v5293_v54 = vsel %vm337_vm7, %v5284_v23, %v5292_v37  ;;  %v5335_v35 = vor.u32 %v5334_v17, %v5331_v60  ;;  %v5371_v42 = vshrl.u32 %v13463_v2, 16 }
 0x3b0   : > { %11019 = vmatprep.subr.bf16.mxu1 %v11927_v18  ;;  %v5360_v2 = vor.u32 %v5359_v52, %v5356_v47  ;;  %v5391_v31 = vshll.u32 %v13494_v25, 16  ;;  %v5382_v17 = vrot.slane %v5380_v40, 3  ;;  %v5439_v47 = vshrl.u32 %v13511_v33, 16  ;;  %v5190_v40 = vld [vmem:[#allocation2 + $0xf0] sm:$0xf8] }
 0x3b1   : > { %v5314_v7 = vrot.slane %v5312_v28, 3  ;;  %v5373_v14 = vrot.slane %v5371_v42, 3  ;;  %v5442_v52 = vshll.u32 %v13511_v33, 16  ;;  %v6063_v33 = vshll.u32 %v13335_v45, 16 }
 0x3b2   : > { %10988 = vmatmul.mubr.msk.bf16.gmra.mrb[4].mxu1 %vm273_vm0, %v5259_v36  ;;  %v5363_v36 = vshrl.u32 %v5180_v51, 16  ;;  %v5361_v60 = vsel %vm337_vm7, %v5352_v0, %v5360_v2  ;;  %v5441_v0 = vrot.slane %v5439_v47, 3 }
 0x3b3   : > { %10991 = vmatprep.mubr.msk.bf16.mxu1 %vm273_vm0, %v5276_v50  ;;  %11020 = vmatpush3.bf16.msra.mxu1 %v11927_v18  ;;  %v5325_v18 = vrot.slane %v5323_v46, 4  ;;  %v5318_v58 = vor.u32 %v5317_v20, %v5314_v7  ;;  %v5366_v50 = vshll.u32 %v5180_v51, 16  ;;  %v5376_v46 = vrot.slane %v5374_v1, 4  ;;  %v5186_v51 = vld [vmem:[#allocation2 + $0xd0] sm:$0xf8] }
 0x3b4   : > { %11021 = vmatprep.subr.bf16.mxu1 %v11928_v41  ;;  %v5365_v28 = vrot.slane %v5363_v36, 3  ;;  %v5400_v7 = vshll.u32 %v5184_v57, 16  ;;  %v5405_v20 = vshrl.u32 %v13487_v12, 16  ;;  %v5444_v2 = vrot.slane %v5442_v52, 4 }
 0x3b5   : > { %v5326_v3 = vor.u32 %v5325_v18, %v5322_v4  ;;  %v5368_v10 = vrot.slane %v5366_v50, 4  ;;  %v5408_v4 = vshll.u32 %v13487_v12, 16  ;;  %v5377_v53 = vor.u32 %v5376_v46, %v5373_v14  ;;  %v5188_v12 = vld [vmem:[#allocation2 + $0xe0] sm:$0xf8]  ;;  %v6043_v46 = vld [vmem:[#allocation2 + $0x8] sm:$0x1f] }
 0x3b6   : > { %v5402_v21 = vrot.slane %v5400_v7, 4  ;;  %v5407_v38 = vrot.slane %v5405_v20, 3  ;;  %v5431_v48 = vshrl.u32 %v5188_v12, 16  ;;  %v5434_v43 = vshll.u32 %v5188_v12, 16 }
 0x3b7   : > { %11022 = vmatpush3.bf16.msra.mxu1 %v11928_v41  ;;  %v5343_v41 = vor.u32 %v5342_v62, %v5339_v49  ;;  %v5327_v23 = vsel %vm337_vm7, %v5318_v58, %v5326_v3  ;;  %v5369_v18 = vor.u32 %v5368_v10, %v5365_v28  ;;  %v5385_v49 = vrot.slane %v5383_v8, 4 }
 0x3b8   : > { %11055 = vmatprep.subr.bf16.mxu1 %v13564_v26  ;;  %v5390_v62 = vrot.slane %v5388_v59, 3  ;;  %v5410_v56 = vrot.slane %v5408_v4, 4  ;;  %v5414_v58 = vshrl.u32 %v5186_v51, 16  ;;  %v5417_v3 = vshll.u32 %v5186_v51, 16 }
 0x3b9   : > { %v5344_v37 = vsel %vm337_vm7, %v5335_v35, %v5343_v41  ;;  %v5378_v25 = vsel %vm337_vm7, %v5369_v18, %v5377_v53  ;;  %v5422_v35 = vshrl.u32 %v13517_v11, 16  ;;  %v5425_v41 = vshll.u32 %v13517_v11, 16 }
 0x3ba   : > { %10992 = vmatmul.mubr.msk.bf16.gmra.mrb[8].mxu1 %vm273_vm0, %v5293_v54  ;;  %v5397_v54 = vshrl.u32 %v5184_v57, 16  ;;  %v5386_v36 = vor.u32 %v5385_v49, %v5382_v17  ;;  %v5411_v1 = vor.u32 %v5410_v56, %v5407_v38  ;;  %v5433_v11 = vrot.slane %v5431_v48, 3 }
 0x3bb   : > { %10995 = vmatprep.mubr.msk.bf16.mxu1 %vm273_vm0, %v5310_v24  ;;  %v5393_v24 = vrot.slane %v5391_v31, 4  ;;  %v5424_v55 = vrot.slane %v5422_v35, 3  ;;  %v5427_v28 = vrot.slane %v5425_v41, 4  ;;  %v5436_v57 = vrot.slane %v5434_v43, 4  ;;  %v6045_v41 = vld [vmem:[#allocation2 + $0x28] sm:$0x1f] }
 0x3bc   : > { %v5399_v30 = vrot.slane %v5397_v54, 3  ;;  %v6060_v8 = vshrl.u32 %v13335_v45, 16  ;;  %v6068_v54 = vshrl.u32 %v6043_v46, 16  ;;  %v6071_v7 = vshll.u32 %v6043_v46, 16 }
 0x3bd   : > { %v5394_v50 = vor.u32 %v5393_v24, %v5390_v62  ;;  %v5428_v31 = vor.u32 %v5427_v28, %v5424_v55  ;;  %v5448_v20 = vshrl.u32 %v5190_v40, 16  ;;  %v5451_v4 = vshll.u32 %v5190_v40, 16 }
 0x3be   : > { %v5403_v42 = vor.u32 %v5402_v21, %v5399_v30  ;;  %v5456_v18 = vshrl.u32 %v13533_v32, 16  ;;  %v5459_v53 = vshll.u32 %v13533_v32, 16  ;;  %v5445_v17 = vor.u32 %v5444_v2, %v5441_v0  ;;  %v6044_v21 = vld [vmem:[#allocation2 + $0x18] sm:$0x1f]  ;;  %v6047_v2 = vld [vmem:[#allocation2 + $0x48] sm:$0x1f] }
 0x3bf   : > { %v5395_v10 = vsel %vm337_vm7, %v5386_v36, %v5394_v50  ;;  %v6062_v49 = vrot.slane %v6060_v8, 4  ;;  %v6065_v24 = vrot.slane %v6063_v33, 5  ;;  %v6070_v30 = vrot.slane %v6068_v54, 4 }
 0x3c0   : > { %v5412_v14 = vsel %vm337_vm7, %v5403_v42, %v5411_v1  ;;  %v6073_v45 = vrot.slane %v6071_v7, 5  ;;  %v5450_v38 = vrot.slane %v5448_v20, 3  ;;  %v5453_v56 = vrot.slane %v5451_v4, 4 }
 0x3c1   : > { %v5458_v51 = vrot.slane %v5456_v18, 3  ;;  %v6080_v32 = vshll.u32 %v13368_v27, 16  ;;  %v6088_v35 = vshll.u32 %v6044_v21, 16  ;;  %v6066_v36 = vor.u32 %v6065_v24, %v6062_v49 }
 0x3c2   : > { %10996 = vmatmul.mubr.msk.bf16.gmra.mrb[12].mxu1 %vm273_vm0, %v5327_v23  ;;  %v5416_v23 = vrot.slane %v5414_v58, 3  ;;  %v6077_v58 = vshrl.u32 %v13368_v27, 16  ;;  %v6074_v50 = vor.u32 %v6073_v45, %v6070_v30  ;;  %v5454_v42 = vor.u32 %v5453_v56, %v5450_v38  ;;  %v11930_v45 = vld [vmem:[#allocation8 + $0x68] sm:$0xff]  }
 0x3c3   : > { %10999 = vmatprep.mubr.msk.bf16.mxu1 %vm273_vm0, %v5344_v37  ;;  %v5419_v37 = vrot.slane %v5417_v3, 4  ;;  %v6085_v3 = vshrl.u32 %v6044_v21, 16  ;;  %v6094_v48 = vshrl.u32 %v13373_v13, 16  ;;  %v6097_v43 = vshll.u32 %v13373_v13, 16 }
 0x3c4   : > { %v6102_v47 = vshrl.u32 %v6045_v41, 16  ;;  %v6105_v52 = vshll.u32 %v6045_v41, 16  ;;  %v6090_v28 = vrot.slane %v6088_v35, 5  ;;  %v6075_v27 = vsel %vm1425_vm10, %v6066_v36, %v6074_v50 }
 0x3c5   : > { %v5420_v59 = vor.u32 %v5419_v37, %v5416_v23  ;;  %v6079_v23 = vrot.slane %v6077_v58, 4  ;;  %v6082_v37 = vrot.slane %v6080_v32, 5  ;;  %v6087_v55 = vrot.slane %v6085_v3, 4  ;;  %v6049_v32 = vld [vmem:[#allocation2 + $0x68] sm:$0x1f]  ;;  %v11931_v3 = vld [vmem:[#allocation8 + $0x70] sm:$0xff]  }
 0x3c6   : > { %v6096_v46 = vrot.slane %v6094_v48, 4  ;;  %v6107_v0 = vrot.slane %v6105_v52, 5  ;;  %v6111_v8 = vshrl.u32 %v13397_v34, 16  ;;  %v6114_v33 = vshll.u32 %v13397_v34, 16 }
 0x3c7   : > { %v5429_v62 = vsel %vm337_vm7, %v5420_v59, %v5428_v31  ;;  %v6083_v13 = vor.u32 %v6082_v37, %v6079_v23  ;;  %v6091_v40 = vor.u32 %v6090_v28, %v6087_v55  ;;  %v6128_v54 = vshrl.u32 %v13389_v16, 16  ;;  %v6050_v28 = vld [vmem:[#allocation2 + $0x78] sm:$0x1f] }
 0x3c8   : > { %v6131_v7 = vshll.u32 %v13389_v16, 16  ;;  %v6136_v20 = vshrl.u32 %v6047_v2, 16  ;;  %v6139_v4 = vshll.u32 %v6047_v2, 16  ;;  %v6113_v49 = vrot.slane %v6111_v8, 4  ;;  %v13632_v8 = vld [vmem:[#allocation8 + $0x80] sm:$0xff]  }
 0x3c9   : > { %v6130_v21 = vrot.slane %v6128_v54, 4  ;;  %v6170_v48 = vshrl.u32 %v6049_v32, 16  ;;  %v6182_v2 = vshll.u32 %v13448_v29, 16 }
 0x3ca   : > { %11000 = vmatmul.mubr.msk.bf16.gmra.mrb[16].mxu1 %vm273_vm0, %v5361_v60  ;;  %v5437_v60 = vor.u32 %v5436_v57, %v5433_v11  ;;  %v6099_v11 = vrot.slane %v6097_v43, 5  ;;  %v6104_v57 = vrot.slane %v6102_v47, 4  ;;  %v6133_v34 = vrot.slane %v6131_v7, 5 }
 0x3cb   : > { %11003 = vmatprep.mubr.msk.bf16.mxu1 %vm273_vm0, %v5378_v25  ;;  %v5461_v25 = vrot.slane %v5459_v53, 4  ;;  %v6138_v38 = vrot.slane %v6136_v20, 4  ;;  %v6141_v56 = vrot.slane %v6139_v4, 5  ;;  %v6173_v43 = vshll.u32 %v6049_v32, 16 }
 0x3cc   : > { %v5446_v12 = vsel %vm337_vm7, %v5437_v60, %v5445_v17  ;;  %v6100_v18 = vor.u32 %v6099_v11, %v6096_v46  ;;  %v6108_v53 = vor.u32 %v6107_v0, %v6104_v57  ;;  %v6092_v60 = vsel %vm1425_vm10, %v6083_v13, %v6091_v40  ;;  %v6048_v17 = vld [vmem:[#allocation2 + $0x58] sm:$0x1f]  ;;  %v6051_v46 = vld [vmem:[#allocation2 + $0x88] sm:$0x1f] }
 0x3cd   : > { %v5462_v1 = vor.u32 %v5461_v25, %v5458_v51  ;;  %v6145_v51 = vshrl.u32 %v13423_v61, 16  ;;  %v6148_v25 = vshll.u32 %v13423_v61, 16  ;;  %v6156_v58 = vshll.u32 %v6048_v17, 16  ;;  %v11932_v61 = vld [vmem:[#allocation8 + $0x78] sm:$0xff]  }
 0x3ce   : > { %v6109_v16 = vsel %vm1425_vm10, %v6100_v18, %v6108_v53  ;;  %v6134_v36 = vor.u32 %v6133_v34, %v6130_v21  ;;  %v6142_v50 = vor.u32 %v6141_v56, %v6138_v38  ;;  %v6179_v0 = vshrl.u32 %v13448_v29, 16  ;;  %v6053_v56 = vld [vmem:[#allocation2 + $0xa8] sm:$0x1f] }
 0x3cf   : > { %v6150_v47 = vrot.slane %v6148_v25, 5  ;;  %v6158_v23 = vrot.slane %v6156_v58, 5  ;;  %v6187_v13 = vshrl.u32 %v6050_v28, 16  ;;  %v6190_v40 = vshll.u32 %v6050_v28, 16 }
 0x3d0   : > { %v6143_v55 = vsel %vm1425_vm10, %v6134_v36, %v6142_v50  ;;  %v6207_v54 = vshll.u32 %v6051_v46, 16  ;;  %v6181_v18 = vrot.slane %v6179_v0, 4  ;;  %v6184_v53 = vrot.slane %v6182_v2, 5 }
 0x3d1   : > { %v6192_v29 = vrot.slane %v6190_v40, 5  ;;  %v6216_v21 = vshll.u32 %v13472_v6, 16  ;;  %v6230_v58 = vshrl.u32 %v13465_v63, 16  ;;  %v6233_v32 = vshll.u32 %v13465_v63, 16 }
 0x3d2   : > { %11004 = vmatmul.mubr.msk.bf16.gmra.mrb[20].mxu1 %vm273_vm0, %v5395_v10  ;;  %v5463_v10 = vsel %vm337_vm7, %v5454_v42, %v5462_v1  ;;  %v6162_v42 = vshrl.u32 %v13416_v9, 16  ;;  %v6165_v1 = vshll.u32 %v13416_v9, 16  ;;  %v6175_v9 = vrot.slane %v6173_v43, 5 }
 0x3d3   : > { %11007 = vmatprep.mubr.msk.bf16.mxu1 %vm273_vm0, %v5412_v14  ;;  %v6046_v14 = vld [vmem:[#allocation2 + $0x38] sm:$0x1f]  ;;  %v6218_v36 = vrot.slane %v6216_v21, 5  ;;  %v6232_v43 = vrot.slane %v6230_v58, 4 }
 0x3d4   : > { %v6119_v59 = vshrl.u32 %v6046_v14, 16  ;;  %v6122_v31 = vshll.u32 %v6046_v14, 16  ;;  %v6172_v14 = vrot.slane %v6170_v48, 4  ;;  %v6054_v48 = vld [vmem:[#allocation2 + $0xb8] sm:$0x1f] }
 0x3d5   : > { %v6255_v28 = vshrl.u32 %v6054_v48, 16 }
 0x3d6   : > { %v6121_v24 = vrot.slane %v6119_v59, 4  ;;  %v6124_v30 = vrot.slane %v6122_v31, 5  ;;  %v6199_v59 = vshll.u32 %v13441_v22, 16  ;;  %v6204_v31 = vshrl.u32 %v6051_v46, 16 }
 0x3d7   : > { %v6176_v20 = vor.u32 %v6175_v9, %v6172_v14  ;;  %v6267_v14 = vshll.u32 %v13489_v5, 16  ;;  %v6257_v40 = vrot.slane %v6255_v28, 4 }
 0x3d8   : > { %v6125_v41 = vor.u32 %v6124_v30, %v6121_v24  ;;  %v6206_v24 = vrot.slane %v6204_v31, 4  ;;  %v6209_v30 = vrot.slane %v6207_v54, 5 }
 0x3d9   : > { %v6269_v54 = vrot.slane %v6267_v14, 5 }
 0x3da   : > { %11008 = vmatmul.mubr.msk.bf16.gmra.mrb[24].mxu1 %vm273_vm0, %v5429_v62  ;;  %v6116_v62 = vrot.slane %v6114_v33, 5  ;;  %v6196_v33 = vshrl.u32 %v13441_v22, 16 }
 0x3db   : > { %11011 = vmatprep.mubr.msk.bf16.mxu1 %vm273_vm0, %v5446_v12  ;;  %v6153_v12 = vshrl.u32 %v6048_v17, 16  ;;  %v6052_v17 = vld [vmem:[#allocation2 + $0x98] sm:$0x1f] }
 0x3dc   : > { %v6117_v35 = vor.u32 %v6116_v62, %v6113_v49  ;;  %v6198_v49 = vrot.slane %v6196_v33, 4  ;;  %v6201_v62 = vrot.slane %v6199_v59, 5  ;;  %v6221_v34 = vshrl.u32 %v6052_v17, 16  ;;  %v6056_v59 = vld [vmem:[#allocation2 + $0xd8] sm:$0x1f] }
 0x3dd   : > { %v6155_v52 = vrot.slane %v6153_v12, 4  ;;  %v6224_v38 = vshll.u32 %v6052_v17, 16  ;;  %v6210_v12 = vor.u32 %v6209_v30, %v6206_v24  ;;  %v6298_v24 = vshrl.u32 %v13513_v19, 16 }
 0x3de   : > { %v6126_v37 = vsel %vm1425_vm10, %v6117_v35, %v6125_v41  ;;  %v6202_v25 = vor.u32 %v6201_v62, %v6198_v49  ;;  %v6241_v35 = vshll.u32 %v6053_v56, 16  ;;  %v6223_v50 = vrot.slane %v6221_v34, 4 }
 0x3df   : > { %v6159_v57 = vor.u32 %v6158_v23, %v6155_v52  ;;  %v6055_v23 = vld [vmem:[#allocation2 + $0xc8] sm:$0x1f]  ;;  %v6301_v30 = vshll.u32 %v13513_v19, 16 }
 0x3e0   : > { %v6243_v52 = vrot.slane %v6241_v35, 5  ;;  %v6272_v9 = vshrl.u32 %v6055_v23, 16  ;;  %v6275_v46 = vshll.u32 %v6055_v23, 16  ;;  %v13664_v35 = vld [vmem:[#allocation2 + $0x18] sm:$0xf] }
 0x3e1   : > { %v6303_v58 = vrot.slane %v6301_v30, 5 }
 0x3e2   : > { %11012 = vmatmul.mubr.msk.bf16.gmra.mrb[28].mxu1 %vm273_vm0, %v5463_v10  ;;  %v6167_v10 = vrot.slane %v6165_v1, 5 }
 0x3e3   : > { %11023 = vmatprep.mubr.msk.bf16.mxu1 %vm273_vm0, %v6075_v27  ;;  %v6164_v27 = vrot.slane %v6162_v42, 4  ;;  %v6226_v42 = vrot.slane %v6224_v38, 5 }
 0x3e5   : > { %v6168_v7 = vor.u32 %v6167_v10, %v6164_v27  ;;  %v6258_v27 = vshll.u32 %v6054_v48, 16  ;;  %v6264_v10 = vshrl.u32 %v13489_v5, 16  ;;  %v6281_v5 = vshrl.u32 %v13519_v15, 16 }
 0x3e7   : > { %v6177_v22 = vsel %vm1425_vm10, %v6168_v7, %v6176_v20  ;;  %v6260_v33 = vrot.slane %v6258_v27, 5  ;;  %v6266_v31 = vrot.slane %v6264_v10, 4  ;;  %v6277_v7 = vrot.slane %v6275_v46, 5  ;;  %v13672_v27 = vld [vmem:[#allocation2 + $0x28] sm:$0xf] }
 0x3e8   : > { %v6283_v21 = vrot.slane %v6281_v5, 4 }
 0x3e9   : > { %v6261_v17 = vor.u32 %v6260_v33, %v6257_v40  ;;  %v6270_v49 = vor.u32 %v6269_v54, %v6266_v31  ;;  %v13679_v40 = vld [vmem:[#allocation2 + $0x38] sm:$0xf] }
 0x3ea   : > { %11024 = vmatmul.mubr.msk.bf16.vlgmr.msra.gmra.mrb[0].mxu1 %vm273_vm0, %v6092_v60  ;;  %v6189_v60 = vrot.slane %v6187_v13, 4  ;;  %v6683_v5 = vshll.u32 %v13679_v40, 16 }
 0x3eb   : > { %11027 = vmatprep.mubr.msk.bf16.mxu1 %vm273_vm0, %v6109_v16  ;;  %11056 = vmatpush3.bf16.msra.mxu1 %v13564_v26  ;;  %v6147_v26 = vrot.slane %v6145_v51, 4  ;;  %v6185_v16 = vor.u32 %v6184_v53, %v6181_v18  ;;  %v6289_v18 = vshrl.u32 %v6056_v59, 16  ;;  %v6292_v53 = vshll.u32 %v6056_v59, 16 }
 0x3ec   : > { %11057 = vmatprep.subr.bf16.mxu1 %v11930_v45  ;;  %v6193_v51 = vor.u32 %v6192_v29, %v6189_v60  ;;  %v6057_v60 = vld [vmem:[#allocation2 + $0xe8] sm:$0x1f] }
 0x3ed   : > { %v6151_v11 = vor.u32 %v6150_v47, %v6147_v26  ;;  %v6235_v26 = vrot.slane %v6233_v32, 5  ;;  %v6291_v38 = vrot.slane %v6289_v18, 4 }
 0x3ee   : > { %v6194_v1 = vsel %vm1425_vm10, %v6185_v16, %v6193_v51  ;;  %v6058_v51 = vld [vmem:[#allocation2 + $0xf8] sm:$0x1f] }
 0x3ef   : > { %11058 = vmatpush3.bf16.msra.mxu1 %v11930_v45  ;;  %v6160_v4 = vsel %vm1425_vm10, %v6151_v11, %v6159_v57  ;;  %v6213_v45 = vshrl.u32 %v13472_v6, 16  ;;  %v6211_v6 = vsel %vm1425_vm10, %v6202_v25, %v6210_v12  ;;  %v6236_v11 = vor.u32 %v6235_v26, %v6232_v43  ;;  %v6605_v25 = vld [vmem:[#allocation2 + $0x10] sm:$0xf8] }
 0x3f0   : > { %11059 = vmatprep.subr.bf16.mxu1 %v11931_v3  ;;  %v6300_v12 = vrot.slane %v6298_v24, 4  ;;  %v6641_v48 = vshll.u32 %v6605_v25, 16  ;;  %v6646_v43 = vshrl.u32 %v13664_v35, 16  ;;  %v6649_v26 = vshll.u32 %v13664_v35, 16  ;;  %v6613_v24 = vld [vmem:[#allocation2 + $0x50] sm:$0xf8] }
 0x3f1   : > { %v6215_v41 = vrot.slane %v6213_v45, 4  ;;  %v6309_v45 = vshll.u32 %v6057_v60, 16 }
 0x3f2   : > { %11028 = vmatmul.mubr.msk.bf16.gmra.mrb[4].mxu1 %vm273_vm0, %v6126_v37  ;;  %v6247_v37 = vshrl.u32 %v13496_v44, 16  ;;  %v6643_v10 = vrot.slane %v6641_v48, 4  ;;  %v6648_v14 = vrot.slane %v6646_v43, 3 }
 0x3f3   : > { %11031 = vmatprep.mubr.msk.bf16.mxu1 %vm273_vm0, %v6143_v55  ;;  %11060 = vmatpush3.bf16.msra.mxu1 %v11931_v3  ;;  %v6238_v3 = vshrl.u32 %v6053_v56, 16  ;;  %v6219_v63 = vor.u32 %v6218_v36, %v6215_v41  ;;  %v6250_v55 = vshll.u32 %v13496_v44, 16  ;;  %v6274_v44 = vrot.slane %v6272_v9, 4 }
 0x3f4   : > { %11061 = vmatprep.subr.bf16.mxu1 %v11932_v61  ;;  %v6249_v2 = vrot.slane %v6247_v37, 4  ;;  %v6294_v56 = vrot.slane %v6292_v53, 5  ;;  %v6315_v36 = vshrl.u32 %v13535_v39, 16  ;;  %v6651_v9 = vrot.slane %v6649_v26, 4  ;;  %v11934_v26 = vld [vmem:[#allocation8 + $0x88] sm:$0xff]  }
 0x3f5   : > { %v6240_v47 = vrot.slane %v6238_v3, 4  ;;  %v6252_v13 = vrot.slane %v6250_v55, 5  ;;  %v6278_v62 = vor.u32 %v6277_v7, %v6274_v44  ;;  %v6311_v3 = vrot.slane %v6309_v45, 5 }
 0x3f6   : > { %v6295_v41 = vor.u32 %v6294_v56, %v6291_v38  ;;  %v6652_v54 = vor.u32 %v6651_v9, %v6648_v14  ;;  %v13704_v14 = vld [vmem:[#allocation2 + $0x78] sm:$0xf]  ;;  %v11935_v9 = vld [vmem:[#allocation8 + $0x90] sm:$0xff]  }
 0x3f7   : > { %11062 = vmatpush3.bf16.msra.mxu1 %v11932_v61  ;;  %v6227_v61 = vor.u32 %v6226_v42, %v6223_v50  ;;  %v6244_v57 = vor.u32 %v6243_v52, %v6240_v47  ;;  %v6253_v29 = vor.u32 %v6252_v13, %v6249_v2  ;;  %v6318_v50 = vshll.u32 %v13535_v39, 16 }
 0x3f8   : > { %11095 = vmatprep.subr.bf16.mxu1 %v13632_v8  ;;  %v6323_v42 = vshrl.u32 %v6058_v51, 16  ;;  %v6304_v47 = vor.u32 %v6303_v58, %v6300_v12  ;;  %v6663_v2 = vshrl.u32 %v13672_v27, 16  ;;  %v6666_v13 = vshll.u32 %v13672_v27, 16 }
 0x3f9   : > { %v6228_v0 = vsel %vm1425_vm10, %v6219_v63, %v6227_v61  ;;  %v6245_v20 = vsel %vm1425_vm10, %v6236_v11, %v6244_v57  ;;  %v6262_v16 = vsel %vm1425_vm10, %v6253_v29, %v6261_v17  ;;  %v6607_v63 = vld [vmem:[#allocation2 + $0x20] sm:$0xf8]  ;;  %v6317_v61 = vrot.slane %v6315_v36, 4  ;;  %v6609_v11 = vld [vmem:[#allocation2 + $0x30] sm:$0xf8] }
 0x3fa   : > { %11032 = vmatmul.mubr.msk.bf16.gmra.mrb[8].mxu1 %vm273_vm0, %v6160_v4  ;;  %v6284_v4 = vshll.u32 %v13519_v15, 16  ;;  %v6279_v15 = vsel %vm1425_vm10, %v6270_v49, %v6278_v62  ;;  %v6320_v37 = vrot.slane %v6318_v50, 5  ;;  %v6325_v55 = vrot.slane %v6323_v42, 4  ;;  %v6611_v49 = vld [vmem:[#allocation2 + $0x40] sm:$0xf8] }
 0x3fb   : > { %11035 = vmatprep.mubr.msk.bf16.mxu1 %vm273_vm0, %v6177_v22  ;;  %v6306_v22 = vshrl.u32 %v6057_v60, 16  ;;  %v6655_v57 = vshrl.u32 %v6607_v63, 16  ;;  %v6672_v44 = vshrl.u32 %v6609_v11, 16  ;;  %v6675_v7 = vshll.u32 %v6609_v11, 16  ;;  %v13685_v62 = vld [vmem:[#allocation2 + $0x48] sm:$0xf] }
 0x3fc   : > { %v6286_v34 = vrot.slane %v6284_v4, 5  ;;  %v6321_v33 = vor.u32 %v6320_v37, %v6317_v61  ;;  %v6665_v53 = vrot.slane %v6663_v2, 3  ;;  %v6668_v60 = vrot.slane %v6666_v13, 4  ;;  %v6615_v50 = vld [vmem:[#allocation2 + $0x60] sm:$0xf8] }
 0x3fd   : > { %v6308_v32 = vrot.slane %v6306_v22, 4  ;;  %v6657_v4 = vrot.slane %v6655_v57, 3  ;;  %v6674_v30 = vrot.slane %v6672_v44, 3  ;;  %v6677_v22 = vrot.slane %v6675_v7, 4  ;;  %v13696_v42 = vld [vmem:[#allocation2 + $0x68] sm:$0xf] }
 0x3fe   : > { %v6287_v19 = vor.u32 %v6286_v34, %v6283_v21  ;;  %v6685_v21 = vrot.slane %v6683_v5, 4  ;;  %v13688_v34 = vld [vmem:[#allocation2 + $0x58] sm:$0xf]  ;;  %v6669_v56 = vor.u32 %v6668_v60, %v6665_v53  ;;  %v6706_v12 = vshrl.u32 %v6613_v24, 16  ;;  %v6617_v37 = vld [vmem:[#allocation2 + $0x70] sm:$0xf8] }
 0x3ff   : > { %v6312_v52 = vor.u32 %v6311_v3, %v6308_v32  ;;  %v6709_v58 = vshll.u32 %v6613_v24, 16  ;;  %v6714_v32 = vshrl.u32 %v13688_v34, 16  ;;  %v6717_v3 = vshll.u32 %v13688_v34, 16  ;;  %v11936_v7 = vld [vmem:[#allocation8 + $0x98] sm:$0xff]   ;;  %v6621_v53 = vld [vmem:[#allocation2 + $0x90] sm:$0xf8] }
 0x400   : > { %v6296_v23 = vsel %vm1425_vm10, %v6287_v19, %v6295_v41  ;;  %v6678_v19 = vor.u32 %v6677_v22, %v6674_v30  ;;  %v6740_v2 = vshrl.u32 %v6617_v37, 16  ;;  %v6743_v13 = vshll.u32 %v6617_v37, 16  ;;  %v13713_v24 = vld [vmem:[#allocation2 + $0x98] sm:$0xf] }
 0x401   : > { %v6313_v46 = vsel %vm1425_vm10, %v6304_v47, %v6312_v52  ;;  %v6708_v47 = vrot.slane %v6706_v12, 3  ;;  %v6711_v52 = vrot.slane %v6709_v58, 4  ;;  %v6785_v12 = vshll.u32 %v13713_v24, 16 }
 0x402   : > { %11036 = vmatmul.mubr.msk.bf16.gmra.mrb[12].mxu1 %vm273_vm0, %v6194_v1  ;;  %v6326_v1 = vshll.u32 %v6058_v51, 16  ;;  %v6697_v51 = vshrl.u32 %v13685_v62, 16  ;;  %v6742_v60 = vrot.slane %v6740_v2, 3 }
 0x403   : > { %11039 = vmatprep.mubr.msk.bf16.mxu1 %vm273_vm0, %v6211_v6  ;;  %v6638_v6 = vshrl.u32 %v6605_v25, 16  ;;  %v6700_v25 = vshll.u32 %v13685_v62, 16  ;;  %v6712_v57 = vor.u32 %v6711_v52, %v6708_v47  ;;  %v6787_v47 = vrot.slane %v6785_v12, 4 }
 0x404   : > { %v6328_v28 = vrot.slane %v6326_v1, 5  ;;  %v6699_v48 = vrot.slane %v6697_v51, 3  ;;  %v6777_v51 = vshll.u32 %v6621_v53, 16 }
 0x405   : > { %v6640_v39 = vrot.slane %v6638_v6, 3  ;;  %v6702_v43 = vrot.slane %v6700_v25, 4  ;;  %v6782_v25 = vshrl.u32 %v13713_v24, 16 }
 0x406   : > { %v6329_v59 = vor.u32 %v6328_v28, %v6325_v55  ;;  %v6723_v55 = vshrl.u32 %v6615_v50, 16  ;;  %v6726_v28 = vshll.u32 %v6615_v50, 16 }
 0x407   : > { %v6644_v31 = vor.u32 %v6643_v10, %v6640_v39  ;;  %v6731_v39 = vshrl.u32 %v13696_v42, 16  ;;  %v6734_v10 = vshll.u32 %v13696_v42, 16  ;;  %v6703_v11 = vor.u32 %v6702_v43, %v6699_v48 }
 0x408   : > { %v6330_v29 = vsel %vm1425_vm10, %v6321_v33, %v6329_v59  ;;  %v6748_v33 = vshrl.u32 %v13704_v14, 16  ;;  %v6725_v59 = vrot.slane %v6723_v55, 3  ;;  %v6779_v43 = vrot.slane %v6777_v51, 4 }
 0x409   : > { %v6653_v17 = vsel %vm337_vm7, %v6644_v31, %v6652_v54  ;;  %v6728_v31 = vrot.slane %v6726_v28, 4  ;;  %v6733_v54 = vrot.slane %v6731_v39, 3  ;;  %v6736_v44 = vrot.slane %v6734_v10, 4  ;;  %v13731_v28 = vld [vmem:[#allocation2 + $0xb8] sm:$0xf] }
 0x40a   : > { %11040 = vmatmul.mubr.msk.bf16.gmra.mrb[16].mxu1 %vm273_vm0, %v6228_v0  ;;  %v6658_v0 = vshll.u32 %v6607_v63, 16  ;;  %v6719_v63 = vrot.slane %v6717_v3, 4  ;;  %v6819_v2 = vshll.u32 %v13731_v28, 16 }
 0x40b   : > { %11043 = vmatprep.mubr.msk.bf16.mxu1 %vm273_vm0, %v6245_v20  ;;  %v6680_v20 = vshrl.u32 %v13679_v40, 16  ;;  %v6729_v30 = vor.u32 %v6728_v31, %v6725_v59  ;;  %v6737_v22 = vor.u32 %v6736_v44, %v6733_v54  ;;  %v6627_v44 = vld [vmem:[#allocation2 + $0xc0] sm:$0xf8] }
 0x40c   : > { %v6660_v18 = vrot.slane %v6658_v0, 4 }
 0x40d   : > { %v6682_v45 = vrot.slane %v6680_v20, 3  ;;  %v6738_v3 = vsel %vm337_vm7, %v6729_v30, %v6737_v22  ;;  %v6825_v30 = vshrl.u32 %v6627_v44, 16  ;;  %v6828_v22 = vshll.u32 %v6627_v44, 16  ;;  %v6635_v44 = vld [vmem:[#allocation2 + $0x100] sm:$0xf8] }
 0x40e   : > { %v6661_v38 = vor.u32 %v6660_v18, %v6657_v4  ;;  %v6619_v4 = vld [vmem:[#allocation2 + $0x80] sm:$0xf8]  ;;  %v13710_v18 = vld [vmem:[#allocation2 + $0x88] sm:$0xf] }
 0x40f   : > { %v6686_v41 = vor.u32 %v6685_v21, %v6682_v45  ;;  %v6757_v45 = vshrl.u32 %v6619_v4, 16  ;;  %v6760_v21 = vshll.u32 %v6619_v4, 16 }
 0x410   : > { %v6670_v36 = vsel %vm337_vm7, %v6661_v38, %v6669_v56  ;;  %v6765_v38 = vshrl.u32 %v13710_v18, 16  ;;  %v6768_v56 = vshll.u32 %v13710_v18, 16 }
 0x411   : > { %v6687_v61 = vsel %vm337_vm7, %v6678_v19, %v6686_v41  ;;  %v6623_v19 = vld [vmem:[#allocation2 + $0xa0] sm:$0xf8]  ;;  %v6759_v41 = vrot.slane %v6757_v45, 3 }
 0x412   : > { %11044 = vmatmul.mubr.msk.bf16.gmra.mrb[20].mxu1 %vm273_vm0, %v6262_v16  ;;  %v6689_v16 = vshrl.u32 %v6611_v49, 16  ;;  %v6767_v50 = vrot.slane %v6765_v38, 3 }
 0x413   : > { %11047 = vmatprep.mubr.msk.bf16.mxu1 %vm273_vm0, %v6279_v15  ;;  %v6692_v15 = vshll.u32 %v6611_v49, 16 }
 0x414   : > { %v6691_v1 = vrot.slane %v6689_v16, 3  ;;  %v13718_v16 = vld [vmem:[#allocation8 + $0xa0] sm:$0xff]  }
 0x415   : > { %v6694_v6 = vrot.slane %v6692_v15, 4  ;;  %v6774_v15 = vshrl.u32 %v6621_v53, 16 }
 0x417   : > { %v6776_v48 = vrot.slane %v6774_v15, 3 }
 0x41a   : > { %11048 = vmatmul.mubr.msk.bf16.gmra.mrb[24].mxu1 %vm273_vm0, %v6296_v23  ;;  %v6716_v23 = vrot.slane %v6714_v32, 3 }
 0x41b   : > { %11051 = vmatprep.mubr.msk.bf16.mxu1 %vm273_vm0, %v6313_v46  ;;  %v6695_v46 = vor.u32 %v6694_v6, %v6691_v1  ;;  %v6770_v1 = vrot.slane %v6768_v56, 4  ;;  %v13723_v6 = vld [vmem:[#allocation2 + $0xa8] sm:$0xf] }
 0x41c   : > { %v6720_v0 = vor.u32 %v6719_v63, %v6716_v23  ;;  %v6625_v23 = vld [vmem:[#allocation2 + $0xb0] sm:$0xf8]  ;;  %v6791_v63 = vshrl.u32 %v6623_v19, 16  ;;  %v6799_v37 = vshrl.u32 %v13723_v6, 16  ;;  %v6802_v55 = vshll.u32 %v13723_v6, 16 }
 0x41d   : > { %v6704_v20 = vsel %vm337_vm7, %v6695_v46, %v6703_v11  ;;  %v6771_v10 = vor.u32 %v6770_v1, %v6767_v50  ;;  %v6808_v11 = vshrl.u32 %v6625_v23, 16 }
 0x41e   : > { %v6721_v5 = vsel %vm337_vm7, %v6712_v57, %v6720_v0  ;;  %v6811_v57 = vshll.u32 %v6625_v23, 16  ;;  %v6816_v0 = vshrl.u32 %v13731_v28, 16  ;;  %v6804_v59 = vrot.slane %v6802_v55, 4  ;;  %v13753_v23 = vld [vmem:[#allocation2 + $0xf8] sm:$0xf] }
 0x420   : > { %v6813_v4 = vrot.slane %v6811_v57, 4  ;;  %v6818_v53 = vrot.slane %v6816_v0, 3  ;;  %v6884_v0 = vshrl.u32 %v13753_v23, 16 }
 0x422   : > { %11052 = vmatmul.mubr.msk.bf16.gmra.mrb[28].mxu1 %vm273_vm0, %v6330_v29  ;;  %v6745_v29 = vrot.slane %v6743_v13, 4  ;;  %v6793_v13 = vrot.slane %v6791_v63, 3 }
 0x423   : > { %11063 = vmatprep.mubr.msk.bf16.mxu1 %vm273_vm0, %v6653_v17  ;;  %v6750_v17 = vrot.slane %v6748_v33, 3 }
 0x424   : > { %v6746_v58 = vor.u32 %v6745_v29, %v6742_v60  ;;  %v6821_v60 = vrot.slane %v6819_v2, 4  ;;  %v13740_v29 = vld [vmem:[#allocation2 + $0xd8] sm:$0xf]  ;;  %v6887_v2 = vshll.u32 %v13753_v23, 16 }
 0x425   : > { %v6850_v15 = vshrl.u32 %v13740_v29, 16  ;;  %v6853_v51 = vshll.u32 %v13740_v29, 16 }
 0x426   : > { %v6822_v12 = vor.u32 %v6821_v60, %v6818_v53  ;;  %v6889_v53 = vrot.slane %v6887_v2, 4  ;;  %v13762_v60 = vld [vmem:[#allocation2 + $0x108] sm:$0xf] }
 0x42a   : > { %11064 = vmatmul.mubr.msk.bf16.vlgmr.msra.gmra.mrb[0].mxu1 %vm273_vm0, %v6670_v36  ;;  %v6762_v36 = vrot.slane %v6760_v21, 4 }
 0x42b   : > { %11067 = vmatprep.mubr.msk.bf16.mxu1 %vm273_vm0, %v6687_v61  ;;  %11096 = vmatpush3.bf16.msra.mxu1 %v13632_v8  ;;  %v6751_v8 = vshll.u32 %v13704_v14, 16  ;;  %v6794_v61 = vshll.u32 %v6623_v19, 16 }
 0x42c   : > { %11097 = vmatprep.subr.bf16.mxu1 %v11934_v26  ;;  %v6763_v39 = vor.u32 %v6762_v36, %v6759_v41  ;;  %v6631_v36 = vld [vmem:[#allocation2 + $0xe0] sm:$0xf8] }
 0x42d   : > { %v6753_v49 = vrot.slane %v6751_v8, 4  ;;  %v6796_v33 = vrot.slane %v6794_v61, 4  ;;  %v6801_v8 = vrot.slane %v6799_v37, 3  ;;  %v6859_v63 = vshrl.u32 %v6631_v36, 16 }
 0x42e   : > { %v6772_v31 = vsel %vm337_vm7, %v6763_v39, %v6771_v10  ;;  %v6862_v61 = vshll.u32 %v6631_v36, 16 }
 0x42f   : > { %11098 = vmatpush3.bf16.msra.mxu1 %v11934_v26  ;;  %v6754_v32 = vor.u32 %v6753_v49, %v6750_v17  ;;  %v6784_v26 = vrot.slane %v6782_v25, 3  ;;  %v6797_v17 = vor.u32 %v6796_v33, %v6793_v13  ;;  %v6805_v49 = vor.u32 %v6804_v59, %v6801_v8 }
 0x430   : > { %11099 = vmatprep.subr.bf16.mxu1 %v11935_v9  ;;  %v6861_v13 = vrot.slane %v6859_v63, 3  ;;  %v6864_v33 = vrot.slane %v6862_v61, 4  ;;  %v7235_v63 = vrot.slane %v13672_v27, 4  ;;  %v11939_v27 = vld [vmem:[#allocation8 + $0xb0] sm:$0xff]  }
 0x431   : > { %v6755_v52 = vsel %vm337_vm7, %v6746_v58, %v6754_v32  ;;  %v6788_v46 = vor.u32 %v6787_v47, %v6784_v26  ;;  %v6806_v58 = vsel %vm337_vm7, %v6797_v17, %v6805_v49  ;;  %v6827_v32 = vrot.slane %v6825_v30, 3  ;;  %v13748_v26 = vld [vmem:[#allocation2 + $0xe8] sm:$0xf] }
 0x432   : > { %11068 = vmatmul.mubr.msk.bf16.gmra.mrb[4].mxu1 %vm273_vm0, %v6704_v20  ;;  %v6629_v20 = vld [vmem:[#allocation2 + $0xd0] sm:$0xf8]  ;;  %v6867_v37 = vshrl.u32 %v13748_v26, 16  ;;  %v6870_v55 = vshll.u32 %v13748_v26, 16  ;;  %v6865_v17 = vor.u32 %v6864_v33, %v6861_v13  ;;  %v6893_v30 = vshrl.u32 %v6635_v44, 16 }
 0x433   : > { %11071 = vmatprep.mubr.msk.bf16.mxu1 %vm273_vm0, %v6721_v5  ;;  %11100 = vmatpush3.bf16.msra.mxu1 %v11935_v9  ;;  %v6780_v9 = vor.u32 %v6779_v43, %v6776_v48  ;;  %v6810_v5 = vrot.slane %v6808_v11, 3  ;;  %v6842_v38 = vshrl.u32 %v6629_v20, 16  ;;  %v6845_v56 = vshll.u32 %v6629_v20, 16  ;;  %v13803_v13 = vld [vmem:[#allocation2 + $0x60] sm:$0xf0] }
 0x434   : > { %11101 = vmatprep.subr.bf16.mxu1 %v11936_v7  ;;  %v6852_v48 = vrot.slane %v6850_v15, 3  ;;  %v6855_v43 = vrot.slane %v6853_v51, 4  ;;  %v6869_v8 = vrot.slane %v6867_v37, 3  ;;  %v6872_v59 = vrot.slane %v6870_v55, 4  ;;  %v11938_v37 = vld [vmem:[#allocation8 + $0xa8] sm:$0xff]  }
 0x435   : > { %v6789_v54 = vsel %vm337_vm7, %v6780_v9, %v6788_v46  ;;  %v6814_v25 = vor.u32 %v6813_v4, %v6810_v5  ;;  %v6844_v50 = vrot.slane %v6842_v38, 3  ;;  %v6847_v1 = vrot.slane %v6845_v56, 4  ;;  %v13806_v33 = vld [vmem:[#allocation2 + $0x70] sm:$0xf0] }
 0x436   : > { %v6856_v46 = vor.u32 %v6855_v43, %v6852_v48  ;;  %v6886_v4 = vrot.slane %v6884_v0, 3  ;;  %v6873_v49 = vor.u32 %v6872_v59, %v6869_v8  ;;  %v6895_v51 = vrot.slane %v6893_v30, 3  ;;  %v13778_v43 = vld [vmem:[#allocation2 + $0x20] sm:$0xf0]  ;;  %v11940_v0 = vld [vmem:[#allocation8 + $0xb8] sm:$0xff]  }
 0x437   : > { %11102 = vmatpush3.bf16.msra.mxu1 %v11936_v7  ;;  %v13737_v7 = vld [vmem:[#allocation2 + $0xc8] sm:$0xf]  ;;  %v6823_v47 = vsel %vm337_vm7, %v6814_v25, %v6822_v12  ;;  %v6848_v9 = vor.u32 %v6847_v1, %v6844_v50  ;;  %v7232_v50 = vrot.slane %v13664_v35, 4  ;;  %v7238_v35 = vrot.slane %v13679_v40, 4  ;;  %v13830_v30 = vld [vmem:[#allocation2 + $0xa0] sm:$0xf0] }
 0x438   : > { %11135 = vmatprep.subr.bf16.mxu1 %v13718_v16  ;;  %v6833_v45 = vshrl.u32 %v13737_v7, 16  ;;  %v6836_v21 = vshll.u32 %v13737_v7, 16  ;;  %v6890_v56 = vor.u32 %v6889_v53, %v6886_v4  ;;  %v6874_v15 = vsel %vm337_vm7, %v6865_v17, %v6873_v49 }
 0x439   : > { %v7241_v40 = vrot.slane %v13685_v62, 4  ;;  %v13808_v62 = vld [vmem:[#allocation8 + $0xc0] sm:$0xff]   ;;  %v7247_v8 = vrot.slane %v13696_v42, 4  ;;  %v7249_v59 = vrot.slane %v13806_v33, 4  ;;  %v7253_v4 = vrot.slane %v13710_v18, 4 }
 0x43a   : > { %11072 = vmatmul.mubr.msk.bf16.gmra.mrb[8].mxu1 %vm273_vm0, %v6738_v3  ;;  %v6830_v3 = vrot.slane %v6828_v22, 4  ;;  %v6835_v19 = vrot.slane %v6833_v45, 3  ;;  %v6838_v41 = vrot.slane %v6836_v21, 4  ;;  %v6896_v22 = vshll.u32 %v6635_v44, 16 }
 0x43b   : > { %11075 = vmatprep.mubr.msk.bf16.mxu1 %vm273_vm0, %v6755_v52  ;;  %v6633_v52 = vld [vmem:[#allocation2 + $0xf0] sm:$0xf8]  ;;  %v6901_v45 = vshrl.u32 %v13762_v60, 16  ;;  %v6904_v21 = vshll.u32 %v13762_v60, 16  ;;  %v7256_v53 = vrot.slane %v13713_v24, 4  ;;  %v7259_v18 = vrot.slane %v13723_v6, 4 }
 0x43c   : > { %v6831_v39 = vor.u32 %v6830_v3, %v6827_v32  ;;  %v6839_v10 = vor.u32 %v6838_v41, %v6835_v19  ;;  %v6876_v11 = vshrl.u32 %v6633_v52, 16  ;;  %v6879_v57 = vshll.u32 %v6633_v52, 16  ;;  %v13771_v3 = vld [vmem:[#allocation2 + $0x10] sm:$0xf0] }
 0x43d   : > { %v6898_v25 = vrot.slane %v6896_v22, 4  ;;  %v6903_v12 = vrot.slane %v6901_v45, 3  ;;  %v7231_v36 = vrot.slane %v13771_v3, 4  ;;  %v7234_v52 = vrot.slane %v13778_v43, 4  ;;  %v13833_v22 = vld [vmem:[#allocation2 + $0xb0] sm:$0xf0] }
 0x43e   : > { %v6878_v20 = vrot.slane %v6876_v11, 3  ;;  %v6881_v5 = vrot.slane %v6879_v57, 4  ;;  %v7244_v57 = vrot.slane %v13688_v34, 4  ;;  %v7246_v34 = vrot.slane %v13803_v13, 4 }
 0x43f   : > { %v6899_v19 = vor.u32 %v6898_v25, %v6895_v51  ;;  %v7233_v48 = vsel %vm885_vm1, %v7231_v36, %v7232_v50  ;;  %v7236_v55 = vsel %vm885_vm1, %v7234_v52, %v7235_v63  ;;  %v7258_v45 = vrot.slane %v13830_v30, 4  ;;  %v13845_v51 = vld [vmem:[#allocation2 + $0xd0] sm:$0xf0]  ;;  %v7553_v36 = vld [vmem:[#allocation2 + $0x18] sm:$0x1f] }
 0x440   : > { %v6882_v38 = vor.u32 %v6881_v5, %v6878_v20  ;;  %v13818_v20 = vld [vmem:[#allocation2 + $0x80] sm:$0xf0]  ;;  %v13821_v5 = vld [vmem:[#allocation2 + $0x90] sm:$0xf0]  ;;  %v7262_v24 = vrot.slane %v13731_v28, 4  ;;  %v7265_v6 = vrot.slane %v13737_v7, 4 }
 0x441   : > { %v7252_v42 = vrot.slane %v13818_v20, 4  ;;  %v7268_v28 = vrot.slane %v13740_v29, 4  ;;  %v7271_v7 = vrot.slane %v13748_v26, 4  ;;  %v7573_v29 = vshll.u32 %v13771_v3, 16  ;;  %v13868_v26 = vld [vmem:[#allocation2 + $0x100] sm:$0xf0] }
 0x442   : > { %11076 = vmatmul.mubr.msk.bf16.gmra.mrb[12].mxu1 %vm273_vm0, %v6772_v31  ;;  %v6840_v31 = vsel %vm337_vm7, %v6831_v39, %v6839_v10  ;;  %v6891_v32 = vsel %vm337_vm7, %v6882_v38, %v6890_v56  ;;  %v13790_v10 = vld [vmem:[#allocation2 + $0x40] sm:$0xf0]  ;;  %v7260_v38 = vsel %vm885_vm1, %v7258_v45, %v7259_v18  ;;  %v7274_v52 = vrot.slane %v13753_v23, 4 }
 0x443   : > { %11079 = vmatprep.mubr.msk.bf16.mxu1 %vm273_vm0, %v6789_v54  ;;  %v6857_v54 = vsel %vm337_vm7, %v6848_v9, %v6856_v46  ;;  %v13794_v9 = vld [vmem:[#allocation2 + $0x50] sm:$0xf0]  ;;  %v7240_v46 = vrot.slane %v13790_v10, 4  ;;  %v7254_v17 = vsel %vm885_vm1, %v7252_v42, %v7253_v4  ;;  %v7578_v63 = vshrl.u32 %v7553_v36, 16 }
 0x444   : > { %v7243_v11 = vrot.slane %v13794_v9, 4  ;;  %v7587_v23 = vshrl.u32 %v13778_v43, 16 }
 0x445   : > { %v7242_v2 = vsel %vm885_vm1, %v7240_v46, %v7241_v40  ;;  %v7580_v46 = vrot.slane %v7578_v63, 4  ;;  %v11942_v63 = vld [vmem:[#allocation8 + $0xc8] sm:$0xff]  }
 0x446   : > { %v7589_v42 = vrot.slane %v7587_v23, 4  ;;  %v7559_v23 = vld [vmem:[#allocation2 + $0x78] sm:$0x1f] }
 0x44a   : > { %11080 = vmatmul.mubr.msk.bf16.gmra.mrb[16].mxu1 %vm273_vm0, %v6806_v58  ;;  %v6906_v58 = vrot.slane %v6904_v21, 4  ;;  %v7261_v21 = vrot.slane %v13833_v22, 4 }
 0x44b   : > { %11083 = vmatprep.mubr.msk.bf16.mxu1 %vm273_vm0, %v6823_v47  ;;  %v13781_v47 = vld [vmem:[#allocation2 + $0x30] sm:$0xf0] }
 0x44c   : > { %v6907_v41 = vor.u32 %v6906_v58, %v6903_v12  ;;  %v7237_v61 = vrot.slane %v13781_v47, 4  ;;  %v7263_v56 = vsel %vm885_vm1, %v7261_v21, %v7262_v24  ;;  %v7267_v12 = vrot.slane %v13845_v51, 4  ;;  %v7556_v21 = vld [vmem:[#allocation2 + $0x48] sm:$0x1f] }
 0x44e   : > { %v6908_v1 = vsel %vm337_vm7, %v6899_v19, %v6907_v41  ;;  %v7239_v39 = vsel %vm885_vm1, %v7237_v61, %v7238_v35  ;;  %v13854_v19 = vld [vmem:[#allocation2 + $0xe0] sm:$0xf0]  ;;  %v13857_v41 = vld [vmem:[#allocation2 + $0xf0] sm:$0xf0]  ;;  %v7581_v61 = vshll.u32 %v7553_v36, 16 }
 0x44f   : > { %v7270_v50 = vrot.slane %v13854_v19, 4 }
 0x450   : > { %v7583_v40 = vrot.slane %v7581_v61, 5 }
 0x451   : > { %v7272_v35 = vsel %vm885_vm1, %v7270_v50, %v7271_v7 }
 0x452   : > { %11084 = vmatmul.mubr.msk.bf16.gmra.mrb[20].mxu1 %vm273_vm0, %v6840_v31  ;;  %v7250_v31 = vrot.slane %v13704_v14, 4  ;;  %v7255_v14 = vrot.slane %v13821_v5, 4 }
 0x453   : > { %11087 = vmatprep.mubr.msk.bf16.mxu1 %vm273_vm0, %v6857_v54  ;;  %v7248_v54 = vsel %vm885_vm1, %v7246_v34, %v7247_v8  ;;  %v7604_v8 = vshrl.u32 %v13781_v47, 16 }
 0x454   : > { %v7251_v44 = vsel %vm885_vm1, %v7249_v59, %v7250_v31  ;;  %v7257_v49 = vsel %vm885_vm1, %v7255_v14, %v7256_v53  ;;  %v7584_v59 = vor.u32 %v7583_v40, %v7580_v46  ;;  %v7607_v31 = vshll.u32 %v13781_v47, 16  ;;  %v7557_v47 = vld [vmem:[#allocation2 + $0x58] sm:$0x1f] }
 0x455   : > { %v7646_v50 = vshrl.u32 %v7557_v47, 16  ;;  %v7649_v7 = vshll.u32 %v7557_v47, 16  ;;  %v7658_v46 = vshll.u32 %v13803_v13, 16  ;;  %v7692_v47 = vshll.u32 %v13818_v20, 16 }
 0x45a   : > { %11088 = vmatmul.mubr.msk.bf16.gmra.mrb[24].mxu1 %vm273_vm0, %v6874_v15  ;;  %v13842_v15 = vld [vmem:[#allocation2 + $0xc0] sm:$0xf0] }
 0x45b   : > { %11091 = vmatprep.mubr.msk.bf16.mxu1 %vm273_vm0, %v6891_v32  ;;  %v7264_v25 = vrot.slane %v13842_v15, 4  ;;  %v7269_v32 = vsel %vm885_vm1, %v7267_v12, %v7268_v28  ;;  %v7632_v12 = vshll.u32 %v7556_v21, 16  ;;  %v7638_v28 = vshrl.u32 %v13794_v9, 16 }
 0x45d   : > { %v7266_v58 = vsel %vm885_vm1, %v7264_v25, %v7265_v6  ;;  %v7624_v25 = vshll.u32 %v13790_v10, 16  ;;  %v7629_v6 = vshrl.u32 %v7556_v21, 16  ;;  %v7689_v21 = vshrl.u32 %v13818_v20, 16 }
 0x45f   : > { %v7631_v61 = vrot.slane %v7629_v6, 4  ;;  %v7709_v6 = vshll.u32 %v13821_v5, 16 }
 0x462   : > { %11092 = vmatmul.mubr.msk.bf16.gmra.mrb[28].mxu1 %vm273_vm0, %v6908_v1  ;;  %v7570_v1 = vshrl.u32 %v13771_v3, 16  ;;  %v7555_v3 = vld [vmem:[#allocation2 + $0x38] sm:$0x1f] }
 0x463   : > { %11103 = vmatprep.mubr.msk.bf16.mxu1 %vm273_vm0, %v7233_v48  ;;  %v7273_v48 = vrot.slane %v13857_v41, 4 }
 0x46a   : > { %11104 = vmatmul.mubr.msk.bf16.vlgmr.msra.gmra.mrb[0].mxu1 %vm273_vm0, %v7236_v55  ;;  %v7575_v55 = vrot.slane %v7573_v29, 5 }
 0x46b   : > { %11107 = vmatprep.mubr.msk.bf16.mxu1 %vm273_vm0, %v7239_v39  ;;  %11136 = vmatpush3.bf16.msra.mxu1 %v13718_v16  ;;  %v7245_v16 = vsel %vm885_vm1, %v7243_v11, %v7244_v57  ;;  %v7554_v39 = vld [vmem:[#allocation2 + $0x28] sm:$0x1f]  ;;  %v7590_v11 = vshll.u32 %v13778_v43, 16 }
 0x46c   : > { %11137 = vmatprep.subr.bf16.mxu1 %v11938_v37  ;;  %v7595_v57 = vshrl.u32 %v7554_v39, 16 }
 0x46d   : > { %v7592_v4 = vrot.slane %v7590_v11, 5  ;;  %v11943_v11 = vld [vmem:[#allocation8 + $0xd0] sm:$0xff]  }
 0x46e   : > { %v7597_v14 = vrot.slane %v7595_v57, 4 }
 0x46f   : > { %11138 = vmatpush3.bf16.msra.mxu1 %v11938_v37  ;;  %v7572_v37 = vrot.slane %v7570_v1, 4  ;;  %v7593_v24 = vor.u32 %v7592_v4, %v7589_v42 }
 0x470   : > { %11139 = vmatprep.subr.bf16.mxu1 %v11939_v27 }
 0x471   : > { %v7576_v34 = vor.u32 %v7575_v55, %v7572_v37  ;;  %v7640_v37 = vrot.slane %v7638_v28, 4 }
 0x472   : > { %11108 = vmatmul.mubr.msk.bf16.gmra.mrb[4].mxu1 %vm273_vm0, %v7242_v2  ;;  %v7276_v2 = vrot.slane %v13868_v26, 4 }
 0x473   : > { %11111 = vmatprep.mubr.msk.bf16.mxu1 %vm273_vm0, %v7245_v16  ;;  %11140 = vmatpush3.bf16.msra.mxu1 %v11939_v27  ;;  %v7275_v27 = vsel %vm885_vm1, %v7273_v48, %v7274_v52  ;;  %v7277_v16 = vrot.slane %v13762_v60, 4  ;;  %v7609_v60 = vrot.slane %v7607_v31, 5  ;;  %v7626_v48 = vrot.slane %v7624_v25, 5  ;;  %v7558_v52 = vld [vmem:[#allocation2 + $0x68] sm:$0x1f] }
 0x474   : > { %11141 = vmatprep.subr.bf16.mxu1 %v11940_v0  ;;  %v7663_v40 = vshrl.u32 %v7558_v52, 16  ;;  %v7683_v31 = vshll.u32 %v7559_v23, 16  ;;  %v7706_v25 = vshrl.u32 %v13821_v5, 16 }
 0x475   : > { %v7278_v43 = vsel %vm885_vm1, %v7276_v2, %v7277_v16  ;;  %v7672_v16 = vshrl.u32 %v13806_v33, 16 }
 0x477   : > { %11142 = vmatpush3.bf16.msra.mxu1 %v11940_v0  ;;  %v7598_v0 = vshll.u32 %v7554_v39, 16  ;;  %v7648_v39 = vrot.slane %v7646_v50, 4  ;;  %v7691_v50 = vrot.slane %v7689_v21, 4 }
 0x478   : > { %11175 = vmatprep.subr.bf16.mxu1 %v13808_v62 }
 0x479   : > { %v7600_v53 = vrot.slane %v7598_v0, 5 }
 0x47a   : > { %11112 = vmatmul.mubr.msk.bf16.gmra.mrb[8].mxu1 %vm273_vm0, %v7248_v54  ;;  %v7612_v54 = vshrl.u32 %v7555_v3, 16 }
 0x47b   : > { %11115 = vmatprep.mubr.msk.bf16.mxu1 %vm273_vm0, %v7251_v44  ;;  %v7615_v44 = vshll.u32 %v7555_v3, 16  ;;  %v7666_v3 = vshll.u32 %v7558_v52, 16  ;;  %v7711_v52 = vrot.slane %v7709_v6, 5  ;;  %v7566_v6 = vld [vmem:[#allocation2 + $0xe8] sm:$0x1f] }
 0x47c   : > { %v7614_v45 = vrot.slane %v7612_v54, 4  ;;  %v7660_v54 = vrot.slane %v7658_v46, 5 }
 0x47d   : > { %v7617_v18 = vrot.slane %v7615_v44, 5  ;;  %v7665_v44 = vrot.slane %v7663_v40, 4  ;;  %v7668_v42 = vrot.slane %v7666_v3, 5  ;;  %v7740_v3 = vshrl.u32 %v13833_v22, 16 }
 0x47f   : > { %v7618_v36 = vor.u32 %v7617_v18, %v7614_v45  ;;  %v7669_v18 = vor.u32 %v7668_v42, %v7665_v44  ;;  %v7565_v42 = vld [vmem:[#allocation2 + $0xd8] sm:$0x1f] }
 0x482   : > { %11116 = vmatmul.mubr.msk.bf16.gmra.mrb[12].mxu1 %vm273_vm0, %v7254_v17  ;;  %v7606_v17 = vrot.slane %v7604_v8, 4  ;;  %v7675_v8 = vshll.u32 %v13806_v33, 16  ;;  %v7685_v33 = vrot.slane %v7683_v31, 5  ;;  %v7742_v31 = vrot.slane %v7740_v3, 4 }
 0x483   : > { %11119 = vmatprep.mubr.msk.bf16.mxu1 %vm273_vm0, %v7257_v49  ;;  %v7585_v49 = vsel %vm1425_vm10, %v7576_v34, %v7584_v59  ;;  %v7680_v59 = vshrl.u32 %v7559_v23, 16  ;;  %v7743_v23 = vshll.u32 %v13833_v22, 16 }
 0x48a   : > { %11120 = vmatmul.mubr.msk.bf16.gmra.mrb[16].mxu1 %vm273_vm0, %v7260_v38  ;;  %v7601_v38 = vor.u32 %v7600_v53, %v7597_v14  ;;  %v7674_v14 = vrot.slane %v7672_v16, 4  ;;  %v7560_v53 = vld [vmem:[#allocation2 + $0x88] sm:$0x1f] }
 0x48b   : > { %11123 = vmatprep.mubr.msk.bf16.mxu1 %vm273_vm0, %v7263_v56  ;;  %v7621_v56 = vshrl.u32 %v13790_v10, 16 }
 0x48c   : > { %v7602_v1 = vsel %vm1425_vm10, %v7593_v24, %v7601_v38  ;;  %v7697_v24 = vshrl.u32 %v7560_v53, 16  ;;  %v7700_v38 = vshll.u32 %v7560_v53, 16 }
 0x48d   : > { %v7623_v29 = vrot.slane %v7621_v56, 4  ;;  %v13900_v56 = vld [vmem:[#allocation8 + $0xe0] sm:$0xff]  }
 0x48e   : > { %v7702_v20 = vrot.slane %v7700_v38, 5 }
 0x48f   : > { %v7627_v57 = vor.u32 %v7626_v48, %v7623_v29  ;;  %v7562_v29 = vld [vmem:[#allocation2 + $0xa8] sm:$0x1f]  ;;  %v7708_v48 = vrot.slane %v7706_v25, 4 }
 0x491   : > { %v7712_v46 = vor.u32 %v7711_v52, %v7708_v48 }
 0x492   : > { %11124 = vmatmul.mubr.msk.bf16.gmra.mrb[20].mxu1 %vm273_vm0, %v7266_v58  ;;  %v7641_v58 = vshll.u32 %v13794_v9, 16  ;;  %v7651_v9 = vrot.slane %v7649_v7, 5  ;;  %v7694_v7 = vrot.slane %v7692_v47, 5 }
 0x493   : > { %11127 = vmatprep.mubr.msk.bf16.mxu1 %vm273_vm0, %v7269_v32  ;;  %v7610_v32 = vor.u32 %v7609_v60, %v7606_v17  ;;  %v7677_v17 = vrot.slane %v7675_v8, 5  ;;  %v7561_v60 = vld [vmem:[#allocation2 + $0x98] sm:$0x1f] }
 0x494   : > { %v7643_v10 = vrot.slane %v7641_v58, 5  ;;  %v7652_v34 = vor.u32 %v7651_v9, %v7648_v39  ;;  %v7717_v28 = vshll.u32 %v7561_v60, 16  ;;  %v7563_v39 = vld [vmem:[#allocation2 + $0xb8] sm:$0x1f]  ;;  %v7695_v9 = vor.u32 %v7694_v7, %v7691_v50 }
 0x495   : > { %v7619_v55 = vsel %vm1425_vm10, %v7610_v32, %v7618_v36  ;;  %v7678_v58 = vor.u32 %v7677_v17, %v7674_v14  ;;  %v7760_v14 = vshll.u32 %v13842_v15, 16  ;;  %v7774_v17 = vshrl.u32 %v13845_v51, 16 }
 0x496   : > { %v7644_v2 = vor.u32 %v7643_v10, %v7640_v37  ;;  %v7726_v37 = vshll.u32 %v13830_v30, 16  ;;  %v7731_v10 = vshrl.u32 %v7562_v29, 16  ;;  %v7799_v50 = vshrl.u32 %v7566_v6, 16 }
 0x497   : > { %v7802_v7 = vshll.u32 %v7566_v6, 16 }
 0x498   : > { %v7733_v16 = vrot.slane %v7731_v10, 4 }
 0x49a   : > { %11128 = vmatmul.mubr.msk.bf16.gmra.mrb[24].mxu1 %vm273_vm0, %v7272_v35  ;;  %v7634_v35 = vrot.slane %v7632_v12, 5  ;;  %v7714_v12 = vshrl.u32 %v7561_v60, 16  ;;  %v7785_v60 = vshll.u32 %v7565_v42, 16 }
 0x49b   : > { %11131 = vmatprep.mubr.msk.bf16.mxu1 %vm273_vm0, %v7275_v27  ;;  %v7655_v27 = vshrl.u32 %v13803_v13, 16  ;;  %v11944_v13 = vld [vmem:[#allocation8 + $0xd8] sm:$0xff]  }
 0x49c   : > { %v7635_v0 = vor.u32 %v7634_v35, %v7631_v61  ;;  %v7719_v61 = vrot.slane %v7717_v28, 5  ;;  %v7723_v35 = vshrl.u32 %v13830_v30, 16 }
 0x49e   : > { %v7636_v4 = vsel %vm1425_vm10, %v7627_v57, %v7635_v0  ;;  %v7751_v57 = vshll.u32 %v7563_v39, 16  ;;  %v7725_v0 = vrot.slane %v7723_v35, 4 }
 0x4a0   : > { %v7753_v44 = vrot.slane %v7751_v57, 5  ;;  %v13932_v57 = vld [vmem:[#allocation2 + $0x28] sm:$0xf] }
 0x4a2   : > { %11132 = vmatmul.mubr.msk.bf16.gmra.mrb[28].mxu1 %vm273_vm0, %v7278_v43  ;;  %v7653_v43 = vsel %vm1425_vm10, %v7644_v2, %v7652_v34  ;;  %v7728_v2 = vrot.slane %v7726_v37, 5 }
 0x4a3   : > { %11143 = vmatprep.mubr.msk.bf16.mxu1 %vm273_vm0, %v7585_v49  ;;  %v7682_v49 = vrot.slane %v7680_v59, 4  ;;  %v7564_v59 = vld [vmem:[#allocation2 + $0xc8] sm:$0x1f] }
 0x4a4   : > { %v7729_v22 = vor.u32 %v7728_v2, %v7725_v0  ;;  %v7765_v53 = vshrl.u32 %v7564_v59, 16  ;;  %v7825_v2 = vshrl.u32 %v13868_v26, 16 }
 0x4a5   : > { %v7686_v32 = vor.u32 %v7685_v33, %v7682_v49  ;;  %v7777_v49 = vshll.u32 %v13845_v51, 16  ;;  %v7782_v33 = vshrl.u32 %v7565_v42, 16  ;;  %v7791_v51 = vshrl.u32 %v13854_v19, 16 }
 0x4a6   : > { %v7767_v38 = vrot.slane %v7765_v53, 4 }
 0x4a7   : > { %v7687_v5 = vsel %vm1425_vm10, %v7678_v58, %v7686_v32  ;;  %v7779_v28 = vrot.slane %v7777_v49, 5  ;;  %v7787_v58 = vrot.slane %v7785_v60, 5  ;;  %v7793_v37 = vrot.slane %v7791_v51, 4 }
 0x4aa   : > { %11144 = vmatmul.mubr.msk.bf16.vlgmr.msra.gmra.mrb[0].mxu1 %vm273_vm0, %v7602_v1  ;;  %v7699_v1 = vrot.slane %v7697_v24, 4  ;;  %v7762_v24 = vrot.slane %v7760_v14, 5 }
 0x4ab   : > { %11147 = vmatprep.mubr.msk.bf16.mxu1 %vm273_vm0, %v7619_v55  ;;  %11176 = vmatpush3.bf16.msra.mxu1 %v13808_v62  ;;  %v7657_v62 = vrot.slane %v7655_v27, 4  ;;  %v7734_v55 = vshll.u32 %v7562_v29, 16 }
 0x4ac   : > { %11177 = vmatprep.subr.bf16.mxu1 %v11942_v63  ;;  %v7703_v27 = vor.u32 %v7702_v20, %v7699_v1  ;;  %v7567_v1 = vld [vmem:[#allocation2 + $0xf8] sm:$0x1f] }
 0x4ad   : > { %v7661_v45 = vor.u32 %v7660_v54, %v7657_v62  ;;  %v7736_v34 = vrot.slane %v7734_v55, 5  ;;  %v7745_v62 = vrot.slane %v7743_v23, 5  ;;  %v7819_v35 = vshll.u32 %v7567_v1, 16 }
 0x4ae   : > { %v7704_v8 = vsel %vm1425_vm10, %v7695_v9, %v7703_v27  ;;  %v7801_v55 = vrot.slane %v7799_v50, 4  ;;  %v7568_v27 = vld [vmem:[#allocation2 + $0x108] sm:$0x1f] }
 0x4af   : > { %11178 = vmatpush3.bf16.msra.mxu1 %v11942_v63  ;;  %v7670_v36 = vsel %vm1425_vm10, %v7661_v45, %v7669_v18  ;;  %v7716_v63 = vrot.slane %v7714_v12, 4  ;;  %v7746_v45 = vor.u32 %v7745_v62, %v7742_v31  ;;  %v7776_v12 = vrot.slane %v7774_v17, 4 }
 0x4b0   : > { %11179 = vmatprep.subr.bf16.mxu1 %v11943_v11  ;;  %v8156_v31 = vshrl.u32 %v13932_v57, 16  ;;  %v8159_v62 = vshll.u32 %v13932_v57, 16 }
 0x4b1   : > { %v7720_v40 = vor.u32 %v7719_v61, %v7716_v63  ;;  %v7780_v48 = vor.u32 %v7779_v28, %v7776_v12  ;;  %v7808_v63 = vshrl.u32 %v13857_v41, 16  ;;  %v7811_v61 = vshll.u32 %v13857_v41, 16 }
 0x4b2   : > { %11148 = vmatmul.mubr.msk.bf16.gmra.mrb[4].mxu1 %vm273_vm0, %v7636_v4  ;;  %v7757_v4 = vshrl.u32 %v13842_v15, 16  ;;  %v7784_v15 = vrot.slane %v7782_v33, 4  ;;  %v8158_v49 = vrot.slane %v8156_v31, 3  ;;  %v8161_v33 = vrot.slane %v8159_v62, 4  ;;  %v11946_v62 = vld [vmem:[#allocation8 + $0xe8] sm:$0xff]  }
 0x4b3   : > { %11151 = vmatprep.mubr.msk.bf16.mxu1 %vm273_vm0, %v7653_v43  ;;  %11180 = vmatpush3.bf16.msra.mxu1 %v11943_v11  ;;  %v7748_v11 = vshrl.u32 %v7563_v39, 16  ;;  %v7721_v30 = vsel %vm1425_vm10, %v7712_v46, %v7720_v40  ;;  %v7768_v43 = vshll.u32 %v7564_v59, 16  ;;  %v7804_v39 = vrot.slane %v7802_v7, 5  ;;  %v8115_v46 = vld [vmem:[#allocation2 + $0x20] sm:$0xf8] }
 0x4b4   : > { %11181 = vmatprep.subr.bf16.mxu1 %v11944_v13  ;;  %v7759_v47 = vrot.slane %v7757_v4, 4  ;;  %v7788_v52 = vor.u32 %v7787_v58, %v7784_v15  ;;  %v7810_v40 = vrot.slane %v7808_v63, 4  ;;  %v7813_v3 = vrot.slane %v7811_v61, 5  ;;  %v8123_v63 = vld [vmem:[#allocation2 + $0x60] sm:$0xf8] }
 0x4b5   : > { %v7750_v54 = vrot.slane %v7748_v11, 4  ;;  %v7770_v25 = vrot.slane %v7768_v43, 5  ;;  %v7821_v11 = vrot.slane %v7819_v35, 5  ;;  %v7805_v0 = vor.u32 %v7804_v39, %v7801_v55  ;;  %v13940_v43 = vld [vmem:[#allocation2 + $0x38] sm:$0xf] }
 0x4b6   : > { %v7763_v20 = vor.u32 %v7762_v24, %v7759_v47  ;;  %v8151_v59 = vshll.u32 %v8115_v46, 16  ;;  %v8173_v47 = vshrl.u32 %v13940_v43, 16  ;;  %v8176_v24 = vshll.u32 %v13940_v43, 16 }
 0x4b7   : > { %11182 = vmatpush3.bf16.msra.mxu1 %v11944_v13  ;;  %v7737_v13 = vor.u32 %v7736_v34, %v7733_v16  ;;  %v7754_v18 = vor.u32 %v7753_v44, %v7750_v54  ;;  %v7771_v29 = vor.u32 %v7770_v25, %v7767_v38  ;;  %v7828_v16 = vshll.u32 %v13868_v26, 16  ;;  %v13947_v38 = vld [vmem:[#allocation2 + $0x48] sm:$0xf] }
 0x4b8   : > { %11215 = vmatprep.subr.bf16.mxu1 %v13900_v56  ;;  %v7833_v34 = vshrl.u32 %v7568_v27, 16  ;;  %v7814_v54 = vor.u32 %v7813_v3, %v7810_v40  ;;  %v8153_v17 = vrot.slane %v8151_v59, 4  ;;  %v8162_v28 = vor.u32 %v8161_v33, %v8158_v49  ;;  %v13972_v49 = vld [vmem:[#allocation2 + $0x88] sm:$0xf]  ;;  %v11947_v33 = vld [vmem:[#allocation8 + $0xf0] sm:$0xff]  }
 0x4b9   : > { %v7738_v21 = vsel %vm1425_vm10, %v7729_v22, %v7737_v13  ;;  %v7755_v32 = vsel %vm1425_vm10, %v7746_v45, %v7754_v18  ;;  %v7772_v9 = vsel %vm1425_vm10, %v7763_v20, %v7771_v29  ;;  %v8117_v22 = vld [vmem:[#allocation2 + $0x30] sm:$0xf8]  ;;  %v7827_v13 = vrot.slane %v7825_v2, 4  ;;  %v8119_v45 = vld [vmem:[#allocation2 + $0x40] sm:$0xf8] }
 0x4ba   : > { %11152 = vmatmul.mubr.msk.bf16.gmra.mrb[8].mxu1 %vm273_vm0, %v7670_v36  ;;  %v7794_v36 = vshll.u32 %v13854_v19, 16  ;;  %v7789_v19 = vsel %vm1425_vm10, %v7780_v48, %v7788_v52  ;;  %v7830_v4 = vrot.slane %v7828_v16, 5  ;;  %v7835_v14 = vrot.slane %v7833_v34, 4  ;;  %v8121_v48 = vld [vmem:[#allocation2 + $0x50] sm:$0xf8] }
 0x4bb   : > { %11155 = vmatprep.mubr.msk.bf16.mxu1 %vm273_vm0, %v7687_v5  ;;  %v7816_v5 = vshrl.u32 %v7567_v1, 16  ;;  %v8165_v18 = vshrl.u32 %v8117_v22, 16  ;;  %v8182_v15 = vshrl.u32 %v8119_v45, 16  ;;  %v8185_v58 = vshll.u32 %v8119_v45, 16  ;;  %v13953_v52 = vld [vmem:[#allocation2 + $0x58] sm:$0xf] }
 0x4bc   : > { %v7796_v10 = vrot.slane %v7794_v36, 5  ;;  %v7831_v25 = vor.u32 %v7830_v4, %v7827_v13  ;;  %v8193_v51 = vshll.u32 %v13947_v38, 16  ;;  %v8175_v7 = vrot.slane %v8173_v47, 3  ;;  %v8125_v16 = vld [vmem:[#allocation2 + $0x70] sm:$0xf8] }
 0x4bd   : > { %v7818_v23 = vrot.slane %v7816_v5, 4  ;;  %v8167_v36 = vrot.slane %v8165_v18, 3  ;;  %v8178_v1 = vrot.slane %v8176_v24, 4  ;;  %v8184_v61 = vrot.slane %v8182_v15, 3  ;;  %v13964_v34 = vld [vmem:[#allocation2 + $0x78] sm:$0xf] }
 0x4be   : > { %v7797_v41 = vor.u32 %v7796_v10, %v7793_v37  ;;  %v8187_v5 = vrot.slane %v8185_v58, 4  ;;  %v8195_v37 = vrot.slane %v8193_v51, 4  ;;  %v13956_v10 = vld [vmem:[#allocation2 + $0x68] sm:$0xf]  ;;  %v8216_v40 = vshrl.u32 %v8123_v63, 16  ;;  %v11948_v58 = vld [vmem:[#allocation8 + $0xf8] sm:$0xff]  }
 0x4bf   : > { %v7822_v44 = vor.u32 %v7821_v11, %v7818_v23  ;;  %v8179_v39 = vor.u32 %v8178_v1, %v8175_v7  ;;  %v8219_v3 = vshll.u32 %v8123_v63, 16  ;;  %v8224_v23 = vshrl.u32 %v13956_v10, 16  ;;  %v8127_v4 = vld [vmem:[#allocation2 + $0x80] sm:$0xf8]  ;;  %v13981_v63 = vld [vmem:[#allocation2 + $0xa8] sm:$0xf] }
 0x4c0   : > { %v7806_v42 = vsel %vm1425_vm10, %v7797_v41, %v7805_v0  ;;  %v8227_v11 = vshll.u32 %v13956_v10, 16  ;;  %v8188_v41 = vor.u32 %v8187_v5, %v8184_v61  ;;  %v8250_v47 = vshrl.u32 %v8127_v4, 16  ;;  %v8131_v7 = vld [vmem:[#allocation2 + $0xa0] sm:$0xf8] }
 0x4c1   : > { %v7823_v60 = vsel %vm1425_vm10, %v7814_v54, %v7822_v44  ;;  %v8218_v54 = vrot.slane %v8216_v40, 3  ;;  %v8221_v44 = vrot.slane %v8219_v3, 4  ;;  %v8253_v24 = vshll.u32 %v8127_v4, 16 }
 0x4c2   : > { %11156 = vmatmul.mubr.msk.bf16.gmra.mrb[12].mxu1 %vm273_vm0, %v7704_v8  ;;  %v7836_v8 = vshll.u32 %v7568_v27, 16  ;;  %v8207_v27 = vshrl.u32 %v13953_v52, 16  ;;  %v8252_v1 = vrot.slane %v8250_v47, 3  ;;  %v8295_v40 = vshll.u32 %v13981_v63, 16 }
 0x4c3   : > { %11159 = vmatprep.mubr.msk.bf16.mxu1 %vm273_vm0, %v7721_v30  ;;  %v8148_v30 = vshrl.u32 %v8115_v46, 16  ;;  %v8210_v46 = vshll.u32 %v13953_v52, 16  ;;  %v8222_v18 = vor.u32 %v8221_v44, %v8218_v54 }
 0x4c4   : > { %v7838_v53 = vrot.slane %v7836_v8, 5  ;;  %v8209_v59 = vrot.slane %v8207_v27, 3  ;;  %v8287_v27 = vshll.u32 %v8131_v7, 16  ;;  %v8297_v54 = vrot.slane %v8295_v40, 4 }
 0x4c5   : > { %v8150_v26 = vrot.slane %v8148_v30, 3  ;;  %v8212_v31 = vrot.slane %v8210_v46, 4  ;;  %v8292_v46 = vshrl.u32 %v13981_v63, 16 }
 0x4c6   : > { %v7839_v6 = vor.u32 %v7838_v53, %v7835_v14  ;;  %v8233_v14 = vshrl.u32 %v8125_v16, 16  ;;  %v8236_v53 = vshll.u32 %v8125_v16, 16 }
 0x4c7   : > { %v8154_v12 = vor.u32 %v8153_v17, %v8150_v26  ;;  %v8241_v26 = vshrl.u32 %v13964_v34, 16  ;;  %v8244_v17 = vshll.u32 %v13964_v34, 16  ;;  %v8213_v45 = vor.u32 %v8212_v31, %v8209_v59 }
 0x4c8   : > { %v7840_v20 = vsel %vm1425_vm10, %v7831_v25, %v7839_v6  ;;  %v8258_v25 = vshrl.u32 %v13972_v49, 16  ;;  %v8235_v6 = vrot.slane %v8233_v14, 3  ;;  %v8289_v31 = vrot.slane %v8287_v27, 4 }
 0x4c9   : > { %v8163_v29 = vsel %vm337_vm7, %v8154_v12, %v8162_v28  ;;  %v8238_v12 = vrot.slane %v8236_v53, 4  ;;  %v8243_v28 = vrot.slane %v8241_v26, 3  ;;  %v8246_v15 = vrot.slane %v8244_v17, 4  ;;  %v13999_v53 = vld [vmem:[#allocation2 + $0xc8] sm:$0xf] }
 0x4ca   : > { %11160 = vmatmul.mubr.msk.bf16.gmra.mrb[16].mxu1 %vm273_vm0, %v7738_v21  ;;  %v8168_v21 = vshll.u32 %v8117_v22, 16  ;;  %v8229_v22 = vrot.slane %v8227_v11, 4  ;;  %v8329_v47 = vshll.u32 %v13999_v53, 16 }
 0x4cb   : > { %11163 = vmatprep.mubr.msk.bf16.mxu1 %vm273_vm0, %v7755_v32  ;;  %v8190_v32 = vshrl.u32 %v13947_v38, 16  ;;  %v8239_v61 = vor.u32 %v8238_v12, %v8235_v6  ;;  %v8247_v5 = vor.u32 %v8246_v15, %v8243_v28  ;;  %v8137_v15 = vld [vmem:[#allocation2 + $0xd0] sm:$0xf8] }
 0x4cc   : > { %v8170_v50 = vrot.slane %v8168_v21, 4 }
 0x4cd   : > { %v8192_v35 = vrot.slane %v8190_v32, 3  ;;  %v8248_v11 = vsel %vm337_vm7, %v8239_v61, %v8247_v5  ;;  %v8335_v61 = vshrl.u32 %v8137_v15, 16  ;;  %v8338_v5 = vshll.u32 %v8137_v15, 16 }
 0x4ce   : > { %v8171_v55 = vor.u32 %v8170_v50, %v8167_v36  ;;  %v8129_v36 = vld [vmem:[#allocation2 + $0x90] sm:$0xf8]  ;;  %v13978_v50 = vld [vmem:[#allocation2 + $0x98] sm:$0xf] }
 0x4cf   : > { %v8196_v0 = vor.u32 %v8195_v37, %v8192_v35  ;;  %v8267_v35 = vshrl.u32 %v8129_v36, 16  ;;  %v8270_v37 = vshll.u32 %v8129_v36, 16 }
 0x4d0   : > { %v8180_v2 = vsel %vm337_vm7, %v8171_v55, %v8179_v39  ;;  %v8275_v55 = vshrl.u32 %v13978_v50, 16  ;;  %v8278_v39 = vshll.u32 %v13978_v50, 16 }
 0x4d1   : > { %v8197_v13 = vsel %vm337_vm7, %v8188_v41, %v8196_v0  ;;  %v8133_v41 = vld [vmem:[#allocation2 + $0xb0] sm:$0xf8]  ;;  %v8269_v0 = vrot.slane %v8267_v35, 3 }
 0x4d2   : > { %11164 = vmatmul.mubr.msk.bf16.gmra.mrb[20].mxu1 %vm273_vm0, %v7772_v9  ;;  %v8199_v9 = vshrl.u32 %v8121_v48, 16  ;;  %v8277_v16 = vrot.slane %v8275_v55, 3 }
 0x4d3   : > { %11167 = vmatprep.mubr.msk.bf16.mxu1 %vm273_vm0, %v7789_v19  ;;  %v8202_v19 = vshll.u32 %v8121_v48, 16 }
 0x4d4   : > { %v8201_v8 = vrot.slane %v8199_v9, 3  ;;  %v13986_v9 = vld [vmem:[#allocation8 + $0x100] sm:$0xff]  }
 0x4d5   : > { %v8204_v30 = vrot.slane %v8202_v19, 4  ;;  %v8284_v19 = vshrl.u32 %v8131_v7, 16 }
 0x4d7   : > { %v8286_v59 = vrot.slane %v8284_v19, 3 }
 0x4da   : > { %11168 = vmatmul.mubr.msk.bf16.gmra.mrb[24].mxu1 %vm273_vm0, %v7806_v42  ;;  %v8226_v42 = vrot.slane %v8224_v23, 3 }
 0x4db   : > { %11171 = vmatprep.mubr.msk.bf16.mxu1 %vm273_vm0, %v7823_v60  ;;  %v8205_v60 = vor.u32 %v8204_v30, %v8201_v8  ;;  %v8280_v8 = vrot.slane %v8278_v39, 4  ;;  %v13991_v30 = vld [vmem:[#allocation2 + $0xb8] sm:$0xf] }
 0x4dc   : > { %v8230_v21 = vor.u32 %v8229_v22, %v8226_v42  ;;  %v8135_v42 = vld [vmem:[#allocation2 + $0xc0] sm:$0xf8]  ;;  %v8301_v22 = vshrl.u32 %v8133_v41, 16  ;;  %v8309_v4 = vshrl.u32 %v13991_v30, 16  ;;  %v8312_v14 = vshll.u32 %v13991_v30, 16 }
 0x4dd   : > { %v8214_v32 = vsel %vm337_vm7, %v8205_v60, %v8213_v45  ;;  %v8281_v17 = vor.u32 %v8280_v8, %v8277_v16  ;;  %v8318_v45 = vshrl.u32 %v8135_v42, 16 }
 0x4de   : > { %v8231_v51 = vsel %vm337_vm7, %v8222_v18, %v8230_v21  ;;  %v8321_v18 = vshll.u32 %v8135_v42, 16  ;;  %v8326_v21 = vshrl.u32 %v13999_v53, 16  ;;  %v8314_v6 = vrot.slane %v8312_v14, 4  ;;  %v14021_v42 = vld [vmem:[#allocation2 + $0x108] sm:$0xf] }
 0x4e0   : > { %v8323_v36 = vrot.slane %v8321_v18, 4  ;;  %v8328_v7 = vrot.slane %v8326_v21, 3  ;;  %v8394_v21 = vshrl.u32 %v14021_v42, 16 }
 0x4e2   : > { %11172 = vmatmul.mubr.msk.bf16.gmra.mrb[28].mxu1 %vm273_vm0, %v7840_v20  ;;  %v8255_v20 = vrot.slane %v8253_v24, 4  ;;  %v8303_v24 = vrot.slane %v8301_v22, 3 }
 0x4e3   : > { %11183 = vmatprep.mubr.msk.bf16.mxu1 %vm273_vm0, %v8163_v29  ;;  %v8260_v29 = vrot.slane %v8258_v25, 3 }
 0x4e4   : > { %v8256_v3 = vor.u32 %v8255_v20, %v8252_v1  ;;  %v8331_v1 = vrot.slane %v8329_v47, 4  ;;  %v14008_v20 = vld [vmem:[#allocation2 + $0xe8] sm:$0xf]  ;;  %v8397_v47 = vshll.u32 %v14021_v42, 16 }
 0x4e5   : > { %v8360_v19 = vshrl.u32 %v14008_v20, 16  ;;  %v8363_v27 = vshll.u32 %v14008_v20, 16 }
 0x4e6   : > { %v8332_v40 = vor.u32 %v8331_v1, %v8328_v7  ;;  %v8396_v7 = vrot.slane %v8394_v21, 3  ;;  %v8399_v1 = vrot.slane %v8397_v47, 4  ;;  %v11952_v21 = vld [vmem:[#allocation8 + $0x118] sm:$0xff]  }
 0x4e7   : > { %v8362_v8 = vrot.slane %v8360_v19, 3 }
 0x4ea   : > { %11184 = vmatmul.mubr.msk.bf16.vlgmr.msra.gmra.mrb[0].mxu1 %vm273_vm0, %v8180_v2  ;;  %v8272_v2 = vrot.slane %v8270_v37, 4 }
 0x4eb   : > { %11187 = vmatprep.mubr.msk.bf16.mxu1 %vm273_vm0, %v8197_v13  ;;  %11216 = vmatpush3.bf16.msra.mxu1 %v13900_v56  ;;  %v8261_v56 = vshll.u32 %v13972_v49, 16  ;;  %v8304_v13 = vshll.u32 %v8133_v41, 16 }
 0x4ec   : > { %11217 = vmatprep.subr.bf16.mxu1 %v11946_v62  ;;  %v8273_v26 = vor.u32 %v8272_v2, %v8269_v0 }
 0x4ed   : > { %v8263_v48 = vrot.slane %v8261_v56, 4  ;;  %v8306_v25 = vrot.slane %v8304_v13, 4  ;;  %v8311_v56 = vrot.slane %v8309_v4, 3 }
 0x4ee   : > { %v8282_v12 = vsel %vm337_vm7, %v8273_v26, %v8281_v17 }
 0x4ef   : > { %11218 = vmatpush3.bf16.msra.mxu1 %v11946_v62  ;;  %v8264_v23 = vor.u32 %v8263_v48, %v8260_v29  ;;  %v8294_v62 = vrot.slane %v8292_v46, 3  ;;  %v8307_v29 = vor.u32 %v8306_v25, %v8303_v24  ;;  %v8315_v48 = vor.u32 %v8314_v6, %v8311_v56  ;;  %v8145_v56 = vld [vmem:[#allocation2 + $0x110] sm:$0xf8]  ;;  %v14028_v6 = vld [vmem:[#allocation2 + $0x118] sm:$0xf] }
 0x4f0   : > { %11219 = vmatprep.subr.bf16.mxu1 %v11947_v33 }
 0x4f1   : > { %v8265_v44 = vsel %vm337_vm7, %v8256_v3, %v8264_v23  ;;  %v8298_v60 = vor.u32 %v8297_v54, %v8294_v62  ;;  %v8316_v3 = vsel %vm337_vm7, %v8307_v29, %v8315_v48  ;;  %v8337_v23 = vrot.slane %v8335_v61, 3  ;;  %v14018_v54 = vld [vmem:[#allocation2 + $0xf8] sm:$0xf] }
 0x4f2   : > { %11188 = vmatmul.mubr.msk.bf16.gmra.mrb[4].mxu1 %vm273_vm0, %v8214_v32  ;;  %v8139_v32 = vld [vmem:[#allocation2 + $0xe0] sm:$0xf8]  ;;  %v8403_v29 = vshrl.u32 %v8145_v56, 16  ;;  %v8406_v48 = vshll.u32 %v8145_v56, 16  ;;  %v8411_v61 = vshrl.u32 %v14028_v6, 16 }
 0x4f3   : > { %11191 = vmatprep.mubr.msk.bf16.mxu1 %vm273_vm0, %v8231_v51  ;;  %11220 = vmatpush3.bf16.msra.mxu1 %v11947_v33  ;;  %v8290_v33 = vor.u32 %v8289_v31, %v8286_v59  ;;  %v8320_v51 = vrot.slane %v8318_v45, 3  ;;  %v8352_v55 = vshrl.u32 %v8139_v32, 16  ;;  %v8355_v39 = vshll.u32 %v8139_v32, 16  ;;  %v8141_v31 = vld [vmem:[#allocation2 + $0xf0] sm:$0xf8] }
 0x4f4   : > { %11221 = vmatprep.subr.bf16.mxu1 %v11948_v58  ;;  %v8365_v59 = vrot.slane %v8363_v27, 4  ;;  %v8369_v4 = vshrl.u32 %v8141_v31, 16  ;;  %v8372_v14 = vshll.u32 %v8141_v31, 16  ;;  %v8405_v19 = vrot.slane %v8403_v29, 3  ;;  %v14046_v31 = vld [vmem:[#allocation2 + $0x30] sm:$0xf0] }
 0x4f5   : > { %v8299_v28 = vsel %vm337_vm7, %v8290_v33, %v8298_v60  ;;  %v8324_v46 = vor.u32 %v8323_v36, %v8320_v51  ;;  %v8354_v2 = vrot.slane %v8352_v55, 3  ;;  %v8357_v16 = vrot.slane %v8355_v39, 4 }
 0x4f6   : > { %v8366_v17 = vor.u32 %v8365_v59, %v8362_v8  ;;  %v8377_v33 = vshrl.u32 %v14018_v54, 16  ;;  %v8380_v60 = vshll.u32 %v14018_v54, 16  ;;  %v8371_v25 = vrot.slane %v8369_v4, 3  ;;  %v11950_v4 = vld [vmem:[#allocation8 + $0x108] sm:$0xff]  }
 0x4f7   : > { %11222 = vmatpush3.bf16.msra.mxu1 %v11948_v58  ;;  %v14005_v58 = vld [vmem:[#allocation2 + $0xd8] sm:$0xf]  ;;  %v8333_v62 = vsel %vm337_vm7, %v8324_v46, %v8332_v40  ;;  %v8358_v26 = vor.u32 %v8357_v16, %v8354_v2  ;;  %v8400_v39 = vor.u32 %v8399_v1, %v8396_v7  ;;  %v8408_v27 = vrot.slane %v8406_v48, 4  ;;  %v14095_v48 = vld [vmem:[#allocation2 + $0xb0] sm:$0xf0] }
 0x4f8   : > { %11255 = vmatprep.subr.bf16.mxu1 %v13986_v9  ;;  %v8343_v35 = vshrl.u32 %v14005_v58, 16  ;;  %v8346_v37 = vshll.u32 %v14005_v58, 16  ;;  %v8379_v15 = vrot.slane %v8377_v33, 3  ;;  %v8382_v32 = vrot.slane %v8380_v60, 4  ;;  %v14062_v33 = vld [vmem:[#allocation2 + $0x60] sm:$0xf0] }
 0x4f9   : > { %v8413_v46 = vrot.slane %v8411_v61, 3  ;;  %v8742_v16 = vrot.slane %v13932_v57, 4  ;;  %v8748_v57 = vrot.slane %v13947_v38, 4  ;;  %v8751_v38 = vrot.slane %v13953_v52, 4  ;;  %v14098_v61 = vld [vmem:[#allocation2 + $0xc0] sm:$0xf0] }
 0x4fa   : > { %11192 = vmatmul.mubr.msk.bf16.gmra.mrb[8].mxu1 %vm273_vm0, %v8248_v11  ;;  %v8340_v11 = vrot.slane %v8338_v5, 4  ;;  %v8345_v41 = vrot.slane %v8343_v35, 3  ;;  %v8348_v0 = vrot.slane %v8346_v37, 4  ;;  %v8414_v5 = vshll.u32 %v14028_v6, 16 }
 0x4fb   : > { %11195 = vmatprep.mubr.msk.bf16.mxu1 %vm273_vm0, %v8265_v44  ;;  %v8143_v44 = vld [vmem:[#allocation2 + $0x100] sm:$0xf8]  ;;  %v8383_v37 = vor.u32 %v8382_v32, %v8379_v15  ;;  %v14083_v32 = vld [vmem:[#allocation2 + $0x90] sm:$0xf0] }
 0x4fc   : > { %v8341_v22 = vor.u32 %v8340_v11, %v8337_v23  ;;  %v8349_v13 = vor.u32 %v8348_v0, %v8345_v41  ;;  %v8386_v45 = vshrl.u32 %v8143_v44, 16  ;;  %v8389_v18 = vshll.u32 %v8143_v44, 16  ;;  %v14039_v0 = vld [vmem:[#allocation2 + $0x20] sm:$0xf0] }
 0x4fd   : > { %v8416_v40 = vrot.slane %v8414_v5, 4  ;;  %v8409_v11 = vor.u32 %v8408_v27, %v8405_v19  ;;  %v8741_v2 = vrot.slane %v14039_v0, 4  ;;  %v8744_v44 = vrot.slane %v14046_v31, 4  ;;  %v14110_v19 = vld [vmem:[#allocation2 + $0xe0] sm:$0xf0] }
 0x4fe   : > { %v8350_v24 = vsel %vm337_vm7, %v8341_v22, %v8349_v13  ;;  %v8388_v51 = vrot.slane %v8386_v45, 3  ;;  %v8391_v36 = vrot.slane %v8389_v18, 4  ;;  %v8745_v22 = vrot.slane %v13940_v43, 4  ;;  %v11951_v43 = vld [vmem:[#allocation8 + $0x110] sm:$0xff]  }
 0x4ff   : > { %v8417_v41 = vor.u32 %v8416_v40, %v8413_v46  ;;  %v8743_v59 = vsel %vm885_vm1, %v8741_v2, %v8742_v16  ;;  %v8753_v45 = vrot.slane %v14062_v33, 4  ;;  %v8754_v18 = vrot.slane %v13956_v10, 4 }
 0x500   : > { %v8392_v55 = vor.u32 %v8391_v36, %v8388_v51  ;;  %v8757_v10 = vrot.slane %v13964_v34, 4  ;;  %v14086_v51 = vld [vmem:[#allocation2 + $0xa0] sm:$0xf0]  ;;  %v8762_v36 = vrot.slane %v14083_v32, 4  ;;  %v8763_v34 = vrot.slane %v13978_v50, 4 }
 0x501   : > { %v8418_v8 = vsel %vm337_vm7, %v8409_v11, %v8417_v41  ;;  %v8765_v7 = vrot.slane %v14086_v51, 4  ;;  %v8768_v5 = vrot.slane %v14095_v48, 4  ;;  %v8769_v50 = vrot.slane %v13991_v30, 4  ;;  %v14122_v11 = vld [vmem:[#allocation2 + $0x100] sm:$0xf0] }
 0x502   : > { %11196 = vmatmul.mubr.msk.bf16.gmra.mrb[12].mxu1 %vm273_vm0, %v8282_v12  ;;  %v8367_v12 = vsel %vm337_vm7, %v8358_v26, %v8366_v17  ;;  %v8401_v23 = vsel %vm337_vm7, %v8392_v55, %v8400_v39  ;;  %v14058_v17 = vld [vmem:[#allocation2 + $0x50] sm:$0xf0]  ;;  %v8764_v1 = vsel %vm885_vm1, %v8762_v36, %v8763_v34  ;;  %v8775_v30 = vrot.slane %v14005_v58, 4  ;;  %v9063_v41 = vld [vmem:[#allocation2 + $0x28] sm:$0x1f] }
 0x503   : > { %11199 = vmatprep.mubr.msk.bf16.mxu1 %vm273_vm0, %v8299_v28  ;;  %v8374_v28 = vrot.slane %v8372_v14, 4  ;;  %v8746_v14 = vsel %vm885_vm1, %v8744_v44, %v8745_v22  ;;  %v8750_v60 = vrot.slane %v14058_v17, 4  ;;  %v14107_v39 = vld [vmem:[#allocation2 + $0xd0] sm:$0xf0]  ;;  %v8777_v46 = vrot.slane %v14110_v19, 4 }
 0x504   : > { %v8774_v27 = vrot.slane %v14107_v39, 4  ;;  %v8781_v58 = vrot.slane %v14018_v54, 4  ;;  %v9080_v16 = vshrl.u32 %v14039_v0, 16  ;;  %v9088_v44 = vshrl.u32 %v9063_v41, 16 }
 0x505   : > { %v8375_v35 = vor.u32 %v8374_v28, %v8371_v25  ;;  %v8752_v47 = vsel %vm885_vm1, %v8750_v60, %v8751_v38  ;;  %v14074_v25 = vld [vmem:[#allocation2 + $0x80] sm:$0xf0]  ;;  %v9091_v22 = vshll.u32 %v9063_v41, 16  ;;  %v9065_v38 = vld [vmem:[#allocation2 + $0x48] sm:$0x1f] }
 0x506   : > { %v8759_v56 = vrot.slane %v14074_v25, 4  ;;  %v8776_v40 = vsel %vm885_vm1, %v8774_v27, %v8775_v30 }
 0x507   : > { %v9093_v60 = vrot.slane %v9091_v22, 5 }
 0x50a   : > { %11200 = vmatmul.mubr.msk.bf16.gmra.mrb[16].mxu1 %vm273_vm0, %v8316_v3  ;;  %v8384_v3 = vsel %vm337_vm7, %v8375_v35, %v8383_v37  ;;  %v8771_v35 = vrot.slane %v14098_v61, 4  ;;  %v8770_v37 = vsel %vm885_vm1, %v8768_v5, %v8769_v50  ;;  %v9066_v50 = vld [vmem:[#allocation2 + $0x58] sm:$0x1f] }
 0x50b   : > { %11203 = vmatprep.mubr.msk.bf16.mxu1 %vm273_vm0, %v8333_v62  ;;  %v14049_v62 = vld [vmem:[#allocation2 + $0x40] sm:$0xf0]  ;;  %v9139_v27 = vshrl.u32 %v9066_v50, 16  ;;  %v9142_v30 = vshll.u32 %v9066_v50, 16 }
 0x50c   : > { %v8747_v13 = vrot.slane %v14049_v62, 4 }
 0x50e   : > { %v8749_v26 = vsel %vm885_vm1, %v8747_v13, %v8748_v57  ;;  %v14130_v13 = vld [vmem:[#allocation2 + $0x110] sm:$0xf0] }
 0x512   : > { %11204 = vmatmul.mubr.msk.bf16.gmra.mrb[20].mxu1 %vm273_vm0, %v8350_v24  ;;  %v14071_v24 = vld [vmem:[#allocation2 + $0x70] sm:$0xf0] }
 0x513   : > { %11207 = vmatprep.mubr.msk.bf16.mxu1 %vm273_vm0, %v8367_v12  ;;  %v8756_v52 = vrot.slane %v14071_v24, 4  ;;  %v8760_v12 = vrot.slane %v13972_v49, 4  ;;  %v8766_v49 = vrot.slane %v13981_v63, 4  ;;  %v8772_v63 = vrot.slane %v13999_v53, 4 }
 0x514   : > { %v8778_v53 = vrot.slane %v14008_v20, 4  ;;  %v9083_v20 = vshll.u32 %v14039_v0, 16  ;;  %v8786_v0 = vrot.slane %v14130_v13, 4 }
 0x515   : > { %v8758_v28 = vsel %vm885_vm1, %v8756_v52, %v8757_v10  ;;  %v8761_v15 = vsel %vm885_vm1, %v8759_v56, %v8760_v12  ;;  %v8767_v29 = vsel %vm885_vm1, %v8765_v7, %v8766_v49  ;;  %v8773_v55 = vsel %vm885_vm1, %v8771_v35, %v8772_v63 }
 0x516   : > { %v9114_v52 = vshrl.u32 %v14049_v62, 16  ;;  %v9117_v56 = vshll.u32 %v14049_v62, 16  ;;  %v9122_v12 = vshrl.u32 %v9065_v38, 16  ;;  %v9067_v62 = vld [vmem:[#allocation2 + $0x68] sm:$0x1f] }
 0x517   : > { %v9156_v41 = vshrl.u32 %v9067_v62, 16 }
 0x518   : > { %v9116_v49 = vrot.slane %v9114_v52, 4 }
 0x51a   : > { %11208 = vmatmul.mubr.msk.bf16.gmra.mrb[24].mxu1 %vm273_vm0, %v8384_v3  ;;  %v8779_v3 = vsel %vm885_vm1, %v8777_v46, %v8778_v53  ;;  %v9148_v46 = vshrl.u32 %v14062_v33, 16  ;;  %v9151_v53 = vshll.u32 %v14062_v33, 16  ;;  %v9165_v33 = vshrl.u32 %v14071_v24, 16 }
 0x51b   : > { %11211 = vmatprep.mubr.msk.bf16.mxu1 %vm273_vm0, %v8401_v23  ;;  %v14119_v23 = vld [vmem:[#allocation2 + $0xf0] sm:$0xf0] }
 0x51c   : > { %v8780_v2 = vrot.slane %v14119_v23, 4  ;;  %v9153_v22 = vrot.slane %v9151_v53, 5  ;;  %v9167_v52 = vrot.slane %v9165_v33, 4  ;;  %v9250_v33 = vshrl.u32 %v14098_v61, 16 }
 0x51e   : > { %v8782_v57 = vsel %vm885_vm1, %v8780_v2, %v8781_v58  ;;  %v9159_v2 = vshll.u32 %v9067_v62, 16  ;;  %v9216_v62 = vshrl.u32 %v14086_v51, 16 }
 0x522   : > { %11212 = vmatmul.mubr.msk.bf16.gmra.mrb[28].mxu1 %vm273_vm0, %v8418_v8  ;;  %v8783_v8 = vrot.slane %v14122_v11, 4 }
 0x523   : > { %11223 = vmatprep.mubr.msk.bf16.mxu1 %vm273_vm0, %v8743_v59  ;;  %v8784_v59 = vrot.slane %v14021_v42, 4  ;;  %v8787_v42 = vrot.slane %v14028_v6, 4 }
 0x525   : > { %v8785_v54 = vsel %vm885_vm1, %v8783_v8, %v8784_v59  ;;  %v9141_v8 = vrot.slane %v9139_v27, 4  ;;  %v9144_v59 = vrot.slane %v9142_v30, 5 }
 0x52a   : > { %11224 = vmatmul.mubr.msk.bf16.vlgmr.msra.gmra.mrb[0].mxu1 %vm273_vm0, %v8746_v14  ;;  %v9085_v14 = vrot.slane %v9083_v20, 5 }
 0x52b   : > { %11227 = vmatprep.mubr.msk.bf16.mxu1 %vm273_vm0, %v8749_v26  ;;  %11256 = vmatpush3.bf16.msra.mxu1 %v13986_v9  ;;  %v8755_v9 = vsel %vm885_vm1, %v8753_v45, %v8754_v18  ;;  %v9064_v26 = vld [vmem:[#allocation2 + $0x38] sm:$0x1f]  ;;  %v9097_v45 = vshrl.u32 %v14046_v31, 16  ;;  %v9100_v18 = vshll.u32 %v14046_v31, 16 }
 0x52c   : > { %11257 = vmatprep.subr.bf16.mxu1 %v11950_v4 }
 0x52d   : > { %v9099_v36 = vrot.slane %v9097_v45, 4  ;;  %v9102_v34 = vrot.slane %v9100_v18, 5  ;;  %v9182_v45 = vshrl.u32 %v14074_v25, 16 }
 0x52f   : > { %11258 = vmatpush3.bf16.msra.mxu1 %v11950_v4  ;;  %v9082_v4 = vrot.slane %v9080_v16, 4  ;;  %v9103_v35 = vor.u32 %v9102_v34, %v9099_v36 }
 0x530   : > { %11259 = vmatprep.subr.bf16.mxu1 %v11951_v43 }
 0x532   : > { %11228 = vmatmul.mubr.msk.bf16.gmra.mrb[4].mxu1 %vm273_vm0, %v8752_v47  ;;  %v9108_v47 = vshll.u32 %v9064_v26, 16 }
 0x533   : > { %11231 = vmatprep.mubr.msk.bf16.mxu1 %vm273_vm0, %v8755_v9  ;;  %11260 = vmatpush3.bf16.msra.mxu1 %v11951_v43  ;;  %v9090_v43 = vrot.slane %v9088_v44, 4  ;;  %v9086_v9 = vor.u32 %v9085_v14, %v9082_v4  ;;  %v9150_v44 = vrot.slane %v9148_v46, 4  ;;  %v9158_v4 = vrot.slane %v9156_v41, 4 }
 0x534   : > { %11261 = vmatprep.subr.bf16.mxu1 %v11952_v21  ;;  %v9110_v7 = vrot.slane %v9108_v47, 5  ;;  %v9161_v14 = vrot.slane %v9159_v2, 5  ;;  %v9218_v41 = vrot.slane %v9216_v62, 4 }
 0x535   : > { %v9094_v10 = vor.u32 %v9093_v60, %v9090_v43 }
 0x536   : > { %v9162_v18 = vor.u32 %v9161_v14, %v9158_v4 }
 0x537   : > { %11262 = vmatpush3.bf16.msra.mxu1 %v11952_v21  ;;  %v9105_v21 = vshrl.u32 %v9064_v26, 16  ;;  %v9095_v31 = vsel %vm1425_vm10, %v9086_v9, %v9094_v10  ;;  %v9168_v26 = vshll.u32 %v14071_v24, 16  ;;  %v9184_v24 = vrot.slane %v9182_v45, 4 }
 0x539   : > { %v9107_v6 = vrot.slane %v9105_v21, 4  ;;  %v9185_v21 = vshll.u32 %v14074_v25, 16  ;;  %v9170_v10 = vrot.slane %v9168_v26, 5  ;;  %v9253_v26 = vshll.u32 %v14098_v61, 16 }
 0x53a   : > { %11232 = vmatmul.mubr.msk.bf16.gmra.mrb[8].mxu1 %vm273_vm0, %v8758_v28  ;;  %v9125_v28 = vshll.u32 %v9065_v38, 16  ;;  %v9154_v38 = vor.u32 %v9153_v22, %v9150_v44 }
 0x53b   : > { %11235 = vmatprep.mubr.msk.bf16.mxu1 %vm273_vm0, %v8761_v15  ;;  %v8788_v15 = vsel %vm885_vm1, %v8786_v0, %v8787_v42  ;;  %v9111_v63 = vor.u32 %v9110_v7, %v9107_v6  ;;  %v9145_v42 = vor.u32 %v9144_v59, %v9141_v8  ;;  %v9187_v34 = vrot.slane %v9185_v21, 5  ;;  %v9073_v59 = vld [vmem:[#allocation2 + $0xc8] sm:$0x1f] }
 0x53c   : > { %v9127_v5 = vrot.slane %v9125_v28, 5  ;;  %v9163_v36 = vsel %vm1425_vm10, %v9154_v38, %v9162_v18  ;;  %v9171_v25 = vor.u32 %v9170_v10, %v9167_v52  ;;  %v9236_v8 = vshll.u32 %v14095_v48, 16  ;;  %v9074_v18 = vld [vmem:[#allocation2 + $0xd8] sm:$0x1f]  ;;  %v9075_v10 = vld [vmem:[#allocation2 + $0xe8] sm:$0x1f] }
 0x53d   : > { %v9112_v58 = vsel %vm1425_vm10, %v9103_v35, %v9111_v63  ;;  %v9219_v35 = vshll.u32 %v14086_v51, 16  ;;  %v9233_v51 = vshrl.u32 %v14095_v48, 16  ;;  %v9252_v21 = vrot.slane %v9250_v33, 4 }
 0x53f   : > { %v9221_v2 = vrot.slane %v9219_v35, 5 }
 0x541   : > { %v9222_v4 = vor.u32 %v9221_v2, %v9218_v41 }
 0x542   : > { %11236 = vmatmul.mubr.msk.bf16.gmra.mrb[12].mxu1 %vm273_vm0, %v8764_v1  ;;  %v9119_v1 = vrot.slane %v9117_v56, 5 }
 0x543   : > { %11239 = vmatprep.mubr.msk.bf16.mxu1 %vm273_vm0, %v8767_v29  ;;  %v9124_v29 = vrot.slane %v9122_v12, 4 }
 0x54a   : > { %11240 = vmatmul.mubr.msk.bf16.gmra.mrb[16].mxu1 %vm273_vm0, %v8770_v37  ;;  %v9131_v37 = vshrl.u32 %v14058_v17, 16 }
 0x54b   : > { %11243 = vmatprep.mubr.msk.bf16.mxu1 %vm273_vm0, %v8773_v55  ;;  %v9134_v55 = vshll.u32 %v14058_v17, 16 }
 0x54c   : > { %v9133_v16 = vrot.slane %v9131_v37, 4 }
 0x54d   : > { %v9136_v20 = vrot.slane %v9134_v55, 5  ;;  %v9188_v55 = vor.u32 %v9187_v34, %v9184_v24  ;;  %v9275_v24 = vshrl.u32 %v9074_v18, 16  ;;  %v9287_v34 = vshll.u32 %v14110_v19, 16 }
 0x54f   : > { %v9137_v0 = vor.u32 %v9136_v20, %v9133_v16  ;;  %v9072_v16 = vld [vmem:[#allocation2 + $0xb8] sm:$0x1f]  ;;  %v9289_v35 = vrot.slane %v9287_v34, 5 }
 0x550   : > { %v9241_v44 = vshrl.u32 %v9072_v16, 16  ;;  %v9244_v22 = vshll.u32 %v9072_v16, 16 }
 0x551   : > { %v9146_v28 = vsel %vm1425_vm10, %v9137_v0, %v9145_v42  ;;  %v9238_v0 = vrot.slane %v9236_v8, 5 }
 0x552   : > { %11244 = vmatmul.mubr.msk.bf16.gmra.mrb[20].mxu1 %vm273_vm0, %v8776_v40  ;;  %v9120_v40 = vor.u32 %v9119_v1, %v9116_v49  ;;  %v9071_v49 = vld [vmem:[#allocation2 + $0xa8] sm:$0x1f]  ;;  %v9243_v42 = vrot.slane %v9241_v44, 4  ;;  %v9246_v38 = vrot.slane %v9244_v22, 5 }
 0x553   : > { %11247 = vmatprep.mubr.msk.bf16.mxu1 %vm273_vm0, %v8779_v3  ;;  %v9128_v3 = vor.u32 %v9127_v5, %v9124_v29  ;;  %v9202_v29 = vshll.u32 %v14083_v32, 16  ;;  %v9224_v63 = vshrl.u32 %v9071_v49, 16  ;;  %v9227_v37 = vshll.u32 %v9071_v49, 16 }
 0x555   : > { %v9129_v17 = vsel %vm1425_vm10, %v9120_v40, %v9128_v3  ;;  %v9204_v53 = vrot.slane %v9202_v29, 5 }
 0x55a   : > { %11248 = vmatmul.mubr.msk.bf16.gmra.mrb[24].mxu1 %vm273_vm0, %v8782_v57  ;;  %v9068_v57 = vld [vmem:[#allocation2 + $0x78] sm:$0x1f] }
 0x55b   : > { %11251 = vmatprep.mubr.msk.bf16.mxu1 %vm273_vm0, %v8785_v54  ;;  %v9069_v54 = vld [vmem:[#allocation2 + $0x88] sm:$0x1f]  ;;  %v9173_v43 = vshrl.u32 %v9068_v57, 16  ;;  %v9176_v60 = vshll.u32 %v9068_v57, 16 }
 0x55c   : > { %v9190_v47 = vshrl.u32 %v9069_v54, 16  ;;  %v9193_v9 = vshll.u32 %v9069_v54, 16  ;;  %v9258_v54 = vshrl.u32 %v9073_v59, 16 }
 0x55d   : > { %v9175_v56 = vrot.slane %v9173_v43, 4  ;;  %v9178_v12 = vrot.slane %v9176_v60, 5  ;;  %v9261_v43 = vshll.u32 %v9073_v59, 16  ;;  %v9235_v60 = vrot.slane %v9233_v51, 4  ;;  %v9078_v59 = vld [vmem:[#allocation2 + $0x118] sm:$0x1f] }
 0x55e   : > { %v9192_v6 = vrot.slane %v9190_v47, 4  ;;  %v9195_v7 = vrot.slane %v9193_v9, 5  ;;  %v9255_v47 = vrot.slane %v9253_v26, 5  ;;  %v9260_v9 = vrot.slane %v9258_v54, 4 }
 0x55f   : > { %v9179_v1 = vor.u32 %v9178_v12, %v9175_v56  ;;  %v9263_v52 = vrot.slane %v9261_v43, 5  ;;  %v9239_v61 = vor.u32 %v9238_v0, %v9235_v60  ;;  %v9267_v56 = vshrl.u32 %v14107_v39, 16 }
 0x560   : > { %v9196_v27 = vor.u32 %v9195_v7, %v9192_v6  ;;  %v9247_v12 = vor.u32 %v9246_v38, %v9243_v42  ;;  %v9292_v6 = vshrl.u32 %v9075_v10, 16  ;;  %v9295_v7 = vshll.u32 %v9075_v10, 16 }
 0x561   : > { %v9180_v46 = vsel %vm1425_vm10, %v9171_v25, %v9179_v1  ;;  %v9256_v49 = vor.u32 %v9255_v47, %v9252_v21  ;;  %v9264_v25 = vor.u32 %v9263_v52, %v9260_v9  ;;  %v9338_v26 = vshll.u32 %v14130_v13, 16 }
 0x562   : > { %11252 = vmatmul.mubr.msk.bf16.gmra.mrb[28].mxu1 %vm273_vm0, %v8788_v15  ;;  %v9070_v15 = vld [vmem:[#allocation2 + $0x98] sm:$0x1f]  ;;  %v9197_v20 = vsel %vm1425_vm10, %v9188_v55, %v9196_v27  ;;  %v9248_v1 = vsel %vm1425_vm10, %v9239_v61, %v9247_v12  ;;  %v9343_v54 = vshrl.u32 %v9078_v59, 16  ;;  %v9346_v43 = vshll.u32 %v9078_v59, 16  ;;  %v14205_v61 = vld [vmem:[%s14394_s4] ss:$0 sm:$0xff] }
 0x563   : > { %11263 = vmatprep.mubr.msk.bf16.mxu1 %vm273_vm0, %v9095_v31  ;;  %v9199_v31 = vshrl.u32 %v14083_v32, 16  ;;  %v9207_v5 = vshrl.u32 %v9070_v15, 16  ;;  %v9210_v50 = vshll.u32 %v9070_v15, 16  ;;  %v9229_v32 = vrot.slane %v9227_v37, 5  ;;  %v9076_v55 = vld [vmem:[#allocation2 + $0xf8] sm:$0x1f] }
 0x564   : > { %v9278_v15 = vshll.u32 %v9074_v18, 16  ;;  %v9265_v37 = vsel %vm1425_vm10, %v9256_v49, %v9264_v25  ;;  %v9309_v41 = vshrl.u32 %v9076_v55, 16  ;;  %v9312_v2 = vshll.u32 %v9076_v55, 16  ;;  %v11961_v49 = vld [vmem:[%s12369_s6] sm:$0xff]  ;;  %v11964_v55 = vld [vmem:[%s12369_s6 + $0x30] sm:$0xff] }
 0x565   : > { %v9201_v30 = vrot.slane %v9199_v31, 4  ;;  %v9209_v40 = vrot.slane %v9207_v5, 4  ;;  %v9212_v3 = vrot.slane %v9210_v50, 5  ;;  %v9269_v31 = vrot.slane %v9267_v56, 4  ;;  %v11968_v59 = vld [vmem:[%s12369_s6 + $0x50] sm:$0xff] }
 0x566   : > { %v9277_v5 = vrot.slane %v9275_v24, 4  ;;  %v9280_v50 = vrot.slane %v9278_v15, 5  ;;  %v9345_v18 = vrot.slane %v9343_v54, 4  ;;  %v9348_v21 = vrot.slane %v9346_v43, 5 }
 0x567   : > { %v9205_v57 = vor.u32 %v9204_v53, %v9201_v30  ;;  %v9304_v53 = vshll.u32 %v14119_v23, 16 }
 0x568   : > { %v9281_v30 = vor.u32 %v9280_v50, %v9277_v5  ;;  %v9349_v52 = vor.u32 %v9348_v21, %v9345_v18  ;;  %v11963_v5 = vld [vmem:[%s12369_s6 + $0x8] sm:$0xff]  ;;  %v11973_v21 = vld [vmem:[%s12369_s6 + $0x60] sm:$0xff] }
 0x569   : > { %v9306_v22 = vrot.slane %v9304_v53, 5 }
 0x56a   : > { %11264 = vmatmul.mubr.msk.bf16.vlgmr.msra.gmra.mrb[0].mxu1 %vm273_vm0, %v9112_v58  ;;  %v9226_v58 = vrot.slane %v9224_v63, 4  ;;  %v9294_v63 = vrot.slane %v9292_v6, 4 }
 0x56b   : > { %11267 = vmatprep.mubr.msk.bf16.mxu1 %vm273_vm0, %v9129_v17  ;;  %v9213_v17 = vor.u32 %v9212_v3, %v9209_v40 }
 0x56c   : > { %v9230_v14 = vor.u32 %v9229_v32, %v9226_v58  ;;  %v9318_v58 = vshrl.u32 %v14122_v11, 16  ;;  %v9321_v32 = vshll.u32 %v14122_v11, 16  ;;  %v9335_v11 = vshrl.u32 %v14130_v13, 16 }
 0x56d   : > { %v9214_v45 = vsel %vm1425_vm10, %v9205_v57, %v9213_v17  ;;  %v9311_v57 = vrot.slane %v9309_v41, 4  ;;  %v9314_v17 = vrot.slane %v9312_v2, 5  ;;  %v11967_v2 = vld [vmem:[%s12369_s6 + $0x28] sm:$0xff] }
 0x56e   : > { %v9231_v48 = vsel %vm1425_vm10, %v9222_v4, %v9230_v14  ;;  %v9323_v4 = vrot.slane %v9321_v32, 5 }
 0x56f   : > { %v9315_v0 = vor.u32 %v9314_v17, %v9311_v57  ;;  %v11969_v17 = vld [vmem:[%s12369_s6 + $0x40] sm:$0xff] }
 0x572   : > { %11268 = vmatmul.mubr.msk.bf16.gmra.mrb[4].mxu1 %vm273_vm0, %v9146_v28  ;;  %v9270_v28 = vshll.u32 %v14107_v39, 16  ;;  %v9297_v39 = vrot.slane %v9295_v7, 5 }
 0x573   : > { %11271 = vmatprep.mubr.msk.bf16.mxu1 %vm273_vm0, %v9163_v36  ;;  %v9284_v36 = vshrl.u32 %v14110_v19, 16  ;;  %v9077_v19 = vld [vmem:[#allocation2 + $0x108] sm:$0x1f] }
 0x574   : > { %v9272_v29 = vrot.slane %v9270_v28, 5  ;;  %v9298_v3 = vor.u32 %v9297_v39, %v9294_v63  ;;  %v9326_v16 = vshrl.u32 %v9077_v19, 16 }
 0x575   : > { %v9286_v62 = vrot.slane %v9284_v36, 4  ;;  %v11960_v36 = vld [vmem:[%s12369_s6 + $0x10] sm:$0xff] }
 0x576   : > { %v9273_v27 = vor.u32 %v9272_v29, %v9269_v31  ;;  %v9328_v14 = vrot.slane %v9326_v16, 4 }
 0x577   : > { %v9290_v40 = vor.u32 %v9289_v35, %v9286_v62 }
 0x578   : > { %v9282_v51 = vsel %vm1425_vm10, %v9273_v27, %v9281_v30 }
 0x579   : > { %v9299_v44 = vsel %vm1425_vm10, %v9290_v40, %v9298_v3  ;;  %v11966_v3 = vld [vmem:[%s12369_s6 + $0x38] sm:$0xff] }
 0x57a   : > { %11272 = vmatmul.mubr.msk.bf16.gmra.mrb[8].mxu1 %vm273_vm0, %v9180_v46  ;;  %v9301_v46 = vshrl.u32 %v14119_v23, 16  ;;  %v9320_v23 = vrot.slane %v9318_v58, 4 }
 0x57b   : > { %11275 = vmatprep.mubr.msk.bf16.mxu1 %vm273_vm0, %v9197_v20  ;;  %v9329_v20 = vshll.u32 %v9077_v19, 16 }
 0x57c   : > { %v9303_v8 = vrot.slane %v9301_v46, 4  ;;  %v9324_v42 = vor.u32 %v9323_v4, %v9320_v23  ;;  %v11965_v46 = vld [vmem:[%s12369_s6 + $0x20] sm:$0xff] }
 0x57d   : > { %v9331_v33 = vrot.slane %v9329_v20, 5 }
 0x57e   : > { %v9307_v60 = vor.u32 %v9306_v22, %v9303_v8 }
 0x57f   : > { %v9332_v38 = vor.u32 %v9331_v33, %v9328_v14  ;;  %v11970_v14 = vld [vmem:[%s12369_s6 + $0x58] sm:$0xff] }
 0x580   : > { %v9316_v47 = vsel %vm1425_vm10, %v9307_v60, %v9315_v0 }
 0x581   : > { %v9333_v9 = vsel %vm1425_vm10, %v9324_v42, %v9332_v38  ;;  %v11972_v38 = vld [vmem:[%s12369_s6 + $0x70] sm:$0xff] }
 0x582   : > { %11276 = vmatmul.mubr.msk.bf16.gmra.mrb[12].mxu1 %vm273_vm0, %v9214_v45  ;;  %v9337_v45 = vrot.slane %v9335_v11, 4  ;;  %v11971_v11 = vld [vmem:[%s12369_s6 + $0x48] sm:$0xff] }
 0x583   : > { %11279 = vmatprep.mubr.msk.bf16.mxu1 %vm273_vm0, %v9231_v48  ;;  %v9340_v48 = vrot.slane %v9338_v26, 5 }
 0x585   : > { %v9341_v13 = vor.u32 %v9340_v48, %v9337_v45 }
 0x587   : > { %v9350_v10 = vsel %vm1425_vm10, %v9341_v13, %v9349_v52  ;;  %v11974_v13 = vld [vmem:[%s12369_s6 + $0x78] sm:$0xff] }
 0x58a   : > { %11280 = vmatmul.mubr.msk.bf16.gmra.mrb[16].mxu1 %vm273_vm0, %v9248_v1  ;;  %v11962_v1 = vld [vmem:[%s12369_s6 + $0x18] sm:$0xff] }
 0x58b   : > { %11283 = vmatprep.mubr.msk.bf16.mxu1 %vm273_vm0, %v9265_v37 }
 0x592   : > { %11284 = vmatmul.mubr.msk.bf16.gmra.mrb[20].mxu1 %vm273_vm0, %v9282_v51 }
 0x593   : > { %11287 = vmatprep.mubr.msk.bf16.mxu1 %vm273_vm0, %v9299_v44 }
 0x59a   : > { %11288 = vmatmul.mubr.msk.bf16.gmra.mrb[24].mxu1 %vm273_vm0, %v9316_v47 }
 0x59b   : > { %11291 = vmatprep.mubr.msk.bf16.mxu1 %vm273_vm0, %v9333_v9 }
 0x5a2   : > { %11292 = vmatmul.mubr.msk.bf16.gmra.mrb[28].mxu1 %vm273_vm0, %v9350_v10  ;;  %v11975_v10 = vld [vmem:[%s12369_s6 + $0x68] sm:$0xff] }
 0x63d   : > { %v11265_v56 = vpop.f32.mrb[0].mxu1 }
 0x63e   : > { %v9633_v12 = vadd.f32 %v11265_v56, %v14205_v61  ;;  %v9466_v28 = vpop.f32.mrb[1].mxu1 }
 0x63f   : > { %v9631_v24 = vadd.f32 %v14205_v61, %v9466_v28  ;;  %v11266_v15 = vpop.f32.mrb[2].mxu1 }
 0x640   : > { %v9665_v34 = vadd.f32 %v11960_v36, %v9633_v12  ;;  %v9634_v6 = vadd.f32 %v11266_v15, %v14205_v61  ;;  %v9469_v7 = vpop.f32.mrb[3].mxu1 }
 0x641   : > { %v9663_v25 = vadd.f32 %v11961_v49, %v9631_v24  ;;  %v9632_v31 = vadd.f32 %v14205_v61, %v9469_v7 }
 0x642   : > { %9697 = vst.msk [vmem:[%s14215_s11 + $0x10] sm:$0xff] %vm273_vm0, %v9665_v34  ;;  %v9666_v29 = vadd.f32 %v11962_v1, %v9634_v6  ;;  %v11976_v34 = vld [vmem:[%s12369_s6 + $0x90] sm:$0xff] }
 0x643   : > { %9695 = vst.msk [vmem:[%s14215_s11] sm:$0xff] %vm273_vm0, %v9663_v25  ;;  %v9664_v50 = vadd.f32 %v11963_v5, %v9632_v31  ;;  %v11977_v25 = vld [vmem:[%s12369_s6 + $0x80] sm:$0xff] }
 0x644   : > { %9698 = vst.msk [vmem:[%s14215_s11 + $0x18] sm:$0xff] %vm273_vm0, %v9666_v29  ;;  %v11978_v29 = vld [vmem:[%s12369_s6 + $0x98] sm:$0xff] }
 0x645   : > { %9696 = vst.msk [vmem:[%s14215_s11 + $0x8] sm:$0xff] %vm273_vm0, %v9664_v50  ;;  %v11269_v62 = vpop.f32.mrb[4].mxu1  ;;  %v11979_v50 = vld [vmem:[%s12369_s6 + $0x88] sm:$0xff] }
 0x646   : > { %v9637_v35 = vadd.f32 %v11269_v62, %v14205_v61  ;;  %v9482_v63 = vpop.f32.mrb[5].mxu1 }
 0x647   : > { %v9635_v39 = vadd.f32 %v14205_v61, %v9482_v63  ;;  %v11270_v37 = vpop.f32.mrb[6].mxu1 }
 0x648   : > { %v9669_v19 = vadd.f32 %v11964_v55, %v9637_v35  ;;  %v9638_v27 = vadd.f32 %v11270_v37, %v14205_v61  ;;  %v9485_v30 = vpop.f32.mrb[7].mxu1 }
 0x649   : > { %v9667_v53 = vadd.f32 %v11965_v46, %v9635_v39  ;;  %v9636_v40 = vadd.f32 %v14205_v61, %v9485_v30 }
 0x64a   : > { %9701 = vst.msk [vmem:[%s14215_s11 + $0x30] sm:$0xff] %vm273_vm0, %v9669_v19  ;;  %v9670_v41 = vadd.f32 %v11966_v3, %v9638_v27  ;;  %v11980_v19 = vld [vmem:[%s12369_s6 + $0xb0] sm:$0xff] }
 0x64b   : > { %9699 = vst.msk [vmem:[%s14215_s11 + $0x20] sm:$0xff] %vm273_vm0, %v9667_v53  ;;  %v9668_v58 = vadd.f32 %v11967_v2, %v9636_v40  ;;  %v11981_v53 = vld [vmem:[%s12369_s6 + $0xa0] sm:$0xff] }
 0x64c   : > { %9702 = vst.msk [vmem:[%s14215_s11 + $0x38] sm:$0xff] %vm273_vm0, %v9670_v41  ;;  %v11982_v41 = vld [vmem:[%s12369_s6 + $0xb8] sm:$0xff] }
 0x64d   : > { %9700 = vst.msk [vmem:[%s14215_s11 + $0x28] sm:$0xff] %vm273_vm0, %v9668_v58  ;;  %v11273_v32 = vpop.f32.mrb[8].mxu1  ;;  %v11983_v58 = vld [vmem:[%s12369_s6 + $0xa8] sm:$0xff] }
 0x64e   : > { %v9641_v16 = vadd.f32 %v11273_v32, %v14205_v61  ;;  %v9498_v20 = vpop.f32.mrb[9].mxu1 }
 0x64f   : > { %v9639_v51 = vadd.f32 %v14205_v61, %v9498_v20  ;;  %v11274_v8 = vpop.f32.mrb[10].mxu1 }
 0x650   : > { %v9673_v44 = vadd.f32 %v11968_v59, %v9641_v16  ;;  %v9642_v22 = vadd.f32 %v11274_v8, %v14205_v61  ;;  %v9501_v57 = vpop.f32.mrb[11].mxu1 }
 0x651   : > { %v9671_v23 = vadd.f32 %v11969_v17, %v9639_v51  ;;  %v9640_v4 = vadd.f32 %v14205_v61, %v9501_v57 }
 0x652   : > { %9705 = vst.msk [vmem:[%s14215_s11 + $0x50] sm:$0xff] %vm273_vm0, %v9673_v44  ;;  %v9674_v33 = vadd.f32 %v11970_v14, %v9642_v22  ;;  %v11984_v44 = vld [vmem:[%s12369_s6 + $0xd0] sm:$0xff] }
 0x653   : > { %9703 = vst.msk [vmem:[%s14215_s11 + $0x40] sm:$0xff] %vm273_vm0, %v9671_v23  ;;  %v9672_v26 = vadd.f32 %v11971_v11, %v9640_v4  ;;  %v11985_v23 = vld [vmem:[%s12369_s6 + $0xc0] sm:$0xff] }
 0x654   : > { %9706 = vst.msk [vmem:[%s14215_s11 + $0x58] sm:$0xff] %vm273_vm0, %v9674_v33  ;;  %v11986_v33 = vld [vmem:[%s12369_s6 + $0xd8] sm:$0xff] }
 0x655   : > { %9704 = vst.msk [vmem:[%s14215_s11 + $0x48] sm:$0xff] %vm273_vm0, %v9672_v26  ;;  %v11277_v54 = vpop.f32.mrb[12].mxu1  ;;  %v11987_v26 = vld [vmem:[%s12369_s6 + $0xc8] sm:$0xff] }
 0x656   : > { %v9645_v43 = vadd.f32 %v11277_v54, %v14205_v61  ;;  %v9514_v60 = vpop.f32.mrb[13].mxu1 }
 0x657   : > { %v9643_v0 = vadd.f32 %v14205_v61, %v9514_v60  ;;  %v11278_v42 = vpop.f32.mrb[14].mxu1 }
 0x658   : > { %v9677_v45 = vadd.f32 %v11972_v38, %v9645_v43  ;;  %v9646_v48 = vadd.f32 %v11278_v42, %v14205_v61  ;;  %v9517_v18 = vpop.f32.mrb[15].mxu1 }
 0x659   : > { %v9675_v47 = vadd.f32 %v11973_v21, %v9643_v0  ;;  %v9644_v9 = vadd.f32 %v14205_v61, %v9517_v18 }
 0x65a   : > { %9709 = vst.msk [vmem:[%s14215_s11 + $0x70] sm:$0xff] %vm273_vm0, %v9677_v45  ;;  %v9678_v52 = vadd.f32 %v11974_v13, %v9646_v48  ;;  %v11988_v45 = vld [vmem:[%s12369_s6 + $0xf0] sm:$0xff] }
 0x65b   : > { %9707 = vst.msk [vmem:[%s14215_s11 + $0x60] sm:$0xff] %vm273_vm0, %v9675_v47  ;;  %v9676_v56 = vadd.f32 %v11975_v10, %v9644_v9  ;;  %v11989_v47 = vld [vmem:[%s12369_s6 + $0xe0] sm:$0xff] }
 0x65c   : > { %9710 = vst.msk [vmem:[%s14215_s11 + $0x78] sm:$0xff] %vm273_vm0, %v9678_v52  ;;  %v11990_v52 = vld [vmem:[%s12369_s6 + $0xf8] sm:$0xff] }
 0x65d   : > { %9708 = vst.msk [vmem:[%s14215_s11 + $0x68] sm:$0xff] %vm273_vm0, %v9676_v56  ;;  %v11281_v12 = vpop.f32.mrb[16].mxu1  ;;  %v11991_v56 = vld [vmem:[%s12369_s6 + $0xe8] sm:$0xff] }
 0x65e   : > { %v9649_v28 = vadd.f32 %v11281_v12, %v14205_v61  ;;  %v9530_v24 = vpop.f32.mrb[17].mxu1 }
 0x65f   : > { %v9647_v15 = vadd.f32 %v14205_v61, %v9530_v24  ;;  %v11282_v36 = vpop.f32.mrb[18].mxu1 }
 0x660   : > { %v9681_v6 = vadd.f32 %v11976_v34, %v9649_v28  ;;  %v9650_v7 = vadd.f32 %v11282_v36, %v14205_v61  ;;  %v9533_v49 = vpop.f32.mrb[19].mxu1 }
 0x661   : > { %v9679_v31 = vadd.f32 %v11977_v25, %v9647_v15  ;;  %v9648_v1 = vadd.f32 %v14205_v61, %v9533_v49 }
 0x662   : > { %9713 = vst.msk [vmem:[%s14215_s11 + $0x90] sm:$0xff] %vm273_vm0, %v9681_v6  ;;  %v9682_v5 = vadd.f32 %v11978_v29, %v9650_v7 }
 0x663   : > { %9711 = vst.msk [vmem:[%s14215_s11 + $0x80] sm:$0xff] %vm273_vm0, %v9679_v31  ;;  %v9680_v62 = vadd.f32 %v11979_v50, %v9648_v1 }
 0x664   : > { %9714 = vst.msk [vmem:[%s14215_s11 + $0x98] sm:$0xff] %vm273_vm0, %v9682_v5 }
 0x665   : > { %9712 = vst.msk [vmem:[%s14215_s11 + $0x88] sm:$0xff] %vm273_vm0, %v9680_v62  ;;  %v11285_v35 = vpop.f32.mrb[20].mxu1 }
 0x666   : > { %v9653_v63 = vadd.f32 %v11285_v35, %v14205_v61  ;;  %v9546_v39 = vpop.f32.mrb[21].mxu1 }
 0x667   : > { %v9651_v37 = vadd.f32 %v14205_v61, %v9546_v39  ;;  %v11286_v55 = vpop.f32.mrb[22].mxu1 }
 0x668   : > { %v9685_v27 = vadd.f32 %v11980_v19, %v9653_v63  ;;  %v9654_v30 = vadd.f32 %v11286_v55, %v14205_v61  ;;  %v9549_v46 = vpop.f32.mrb[23].mxu1 }
 0x669   : > { %v9683_v40 = vadd.f32 %v11981_v53, %v9651_v37  ;;  %v9652_v3 = vadd.f32 %v14205_v61, %v9549_v46 }
 0x66a   : > { %9717 = vst.msk [vmem:[%s14215_s11 + $0xb0] sm:$0xff] %vm273_vm0, %v9685_v27  ;;  %v9686_v2 = vadd.f32 %v11982_v41, %v9654_v30 }
 0x66b   : > { %9715 = vst.msk [vmem:[%s14215_s11 + $0xa0] sm:$0xff] %vm273_vm0, %v9683_v40  ;;  %v9684_v32 = vadd.f32 %v11983_v58, %v9652_v3 }
 0x66c   : > { %9718 = vst.msk [vmem:[%s14215_s11 + $0xb8] sm:$0xff] %vm273_vm0, %v9686_v2 }
 0x66d   : > { %9716 = vst.msk [vmem:[%s14215_s11 + $0xa8] sm:$0xff] %vm273_vm0, %v9684_v32  ;;  %v11289_v16 = vpop.f32.mrb[24].mxu1 }
 0x66e   : > { %v9657_v20 = vadd.f32 %v11289_v16, %v14205_v61  ;;  %v9562_v51 = vpop.f32.mrb[25].mxu1 }
 0x66f   : > { %v9655_v8 = vadd.f32 %v14205_v61, %v9562_v51  ;;  %v11290_v59 = vpop.f32.mrb[26].mxu1 }
 0x670   : > { %v9689_v22 = vadd.f32 %v11984_v44, %v9657_v20  ;;  %v9658_v57 = vadd.f32 %v11290_v59, %v14205_v61  ;;  %v9565_v17 = vpop.f32.mrb[27].mxu1 }
 0x671   : > { %v9687_v4 = vadd.f32 %v11985_v23, %v9655_v8  ;;  %v9656_v14 = vadd.f32 %v14205_v61, %v9565_v17 }
 0x672   : > { %9721 = vst.msk [vmem:[%s14215_s11 + $0xd0] sm:$0xff] %vm273_vm0, %v9689_v22  ;;  %v9690_v11 = vadd.f32 %v11986_v33, %v9658_v57 }
 0x673   : > { %9719 = vst.msk [vmem:[%s14215_s11 + $0xc0] sm:$0xff] %vm273_vm0, %v9687_v4  ;;  %v9688_v54 = vadd.f32 %v11987_v26, %v9656_v14 }
 0x674   : > { %9722 = vst.msk [vmem:[%s14215_s11 + $0xd8] sm:$0xff] %vm273_vm0, %v9690_v11 }
 0x675   : > { %9720 = vst.msk [vmem:[%s14215_s11 + $0xc8] sm:$0xff] %vm273_vm0, %v9688_v54  ;;  %v11293_v43 = vpop.f32.mrb[28].mxu1 }
 0x676   : > { %v9661_v60 = vadd.f32 %v11293_v43, %v14205_v61  ;;  %v9578_v0 = vpop.f32.mrb[29].mxu1 }
 0x677   : > { %v9659_v42 = vadd.f32 %v14205_v61, %v9578_v0  ;;  %v11294_v38 = vpop.f32.mrb[30].mxu1 }
 0x678   : > { %v9693_v48 = vadd.f32 %v11988_v45, %v9661_v60  ;;  %v9662_v18 = vadd.f32 %v11294_v38, %v14205_v61  ;;  %v9581_v21 = vpop.f32.mrb[31].mxu1 }
 0x679   : > { %v9691_v9 = vadd.f32 %v11989_v47, %v9659_v42  ;;  %v9660_v13 = vadd.f32 %v14205_v61, %v9581_v21 }
 0x67a   : > { %9725 = vst.msk [vmem:[%s14215_s11 + $0xf0] sm:$0xff] %vm273_vm0, %v9693_v48  ;;  %v9694_v10 = vadd.f32 %v11990_v52, %v9662_v18 }
 0x67b   : > { %9723 = vst.msk [vmem:[%s14215_s11 + $0xe0] sm:$0xff] %vm273_vm0, %v9691_v9  ;;  %v9692_v12 = vadd.f32 %v11991_v56, %v9660_v13 }
 0x67c   : > { %9726 = vst.msk [vmem:[%s14215_s11 + $0xf8] sm:$0xff] %vm273_vm0, %v9694_v10 }
 0x67d   : > { %9724 = vst.msk [vmem:[%s14215_s11 + $0xe8] sm:$0xff] %vm273_vm0, %v9692_v12 }
 0x67e   : > { %12091 = shalt.err (!%p12088_p2)
}
 0x67f   : > { %s12092_s6 = scalar_lea.hbm %s14337_s16, 4096  ;;  %s12096_s8 = scalar_lea.hbm %s14395_s5, 8192 }
 0x680   : > { %p12093_p13 = scmp.ne.s32.totalorder %s14337_s16, %s12092_s6  ;;  %p12097_p4 = scmp.lt.u32.totalorder %s14337_s16, %s14395_s5 }
 0x681   : > { %p12098_p5 = scmp.lt.u32.totalorder %s12096_s8, %s12092_s6  ;;  %p12100_p11 = scmp.lt.u32.totalorder %s12092_s6, %s14337_s16 }
 0x682   : > { %p12094_p6 = pnand %p12093_p13, %p14413_p0 }
 0x683   : > { %p12099_p8 = por %p12098_p5, %p12097_p4 }
 0x684   : > { %p12095_p10 = pneg %p12094_p6 }
 0x685   : > { %p12101_p1 = por %p12100_p11, %p12099_p8 }
 0x687   : > { %p12102_p3 = pnand %p12101_p1, %p12095_p10 }
 0x689   : > { %12105 = shalt.err (!%p12102_p3)
}
 0x68a   : > { %s12159_s28 = smov 128   ;;  %s12160_s15 = smov 8  }
 0x68b   : > { %11817 = dma.vmem_to_hbm [thread:$0]  (%p14413_p0), %s14339_s30, 4096, %s14337_s16, %s9728_s9, %s12159_s28, %s12159_s28, %s12160_s15  }
 0x68c PF: > { %s9756_s22 = sand.u32 1, %s12136_s18   ;;  %p14414_p7 = scmp.ne.s32.totalorder %s14400_s25, 0 }
 0x68d   : > { %p14415_p9 = scmp.ge.s32.totalorder %s12148_s21, 2  ;;  %s9757_s12 = scalar_lea.sflag [#allocation5], %s9756_s22 }
 0x68f   : > { %p11831_p12 = pnand %p14415_p9, %p14414_p7 }
 0x691   : > { %12131 = dma.done.wait (!%p11831_p12), %s9757_s12, 4096  }
 0x692   : > { %12133 = vsyncadd (!%p11831_p12), %s9757_s12, 4294963200  ;;  %p19_p2 = scmp.ge.s32.totalorder %s12301_s14, 4   ;;  %s14416_s18 = smov %s12140_s19 }
 0x693   : > { %s14417_s19 = smov %s12144_s20  ;;  %s14418_s20 = smov %s12317_s27 }
 0x694   : > { %s14419_s21 = smov %s12301_s14  ;;  %21 = sbr.rel (!%p19_p2) target bundleno = 6 (0x6), region = 112 }
 0x69b   :  { %9762 = vsyncpa [#allocation4], 1 }
 0x69c   :  { %9764 = vsyncpa [#allocation4 + $0x1], 1 }
 0x69d   :  { %9765 = vsyncpa [#allocation7], 1 }
 0x69e   :  { %9766 = vsyncpa [#allocation5], 1 }
 0x69f   :  { %9768 = vsyncpa [#allocation5 + $0x1], 1 }

</bundles_post_ra>
